<compile_context>
chip_gen: v6e
topology: v6e:2x2x1
jax: 0.10.0
libtpu: 0.0.40
codegen_flags: <defaults>
</compile_context>

<pallas_src>
import functools
import math

import jax
import jax.numpy as jnp
from jax.experimental import pallas as pl
from jax.experimental.pallas import tpu as pltpu


def _round_up(x, m):
    return ((x + m - 1) // m) * m


def _cdiv(a, b):
    return -(-a // b)


# ---------------------------------------------------------------------------
# Per-generation knobs (v5e/v6e: 128 MiB VMEM, v7x: 64 MiB)
# ---------------------------------------------------------------------------
def _tpu_vmem_capacity_bytes():
    try:
        return int(pltpu.get_tpu_info().vmem_capacity_bytes)
    except Exception:
        return 64 * 1024 * 1024          # conservative (v7x-sized) fallback


_VMEM_CAP = _tpu_vmem_capacity_bytes()
_BIG_VMEM = _VMEM_CAP > 96 * 1024 * 1024          # True on v5e/v6e, False on v7x
_MM_TM_MAX = 512
_MM_TN_MAX = 1024 if _BIG_VMEM else 512
_MM_TK_MAX = 1024 if _BIG_VMEM else 512
_MM_VMEM_LIMIT = (64 if _BIG_VMEM else 32) * 1024 * 1024
_FUSED_VMEM_LIMIT = (96 if _BIG_VMEM else 48) * 1024 * 1024


def _pick_tile(dim, cap, align):
    """Largest tile <= cap such that padding waste is bounded by one tile."""
    cap = max(cap, align)
    tile = _round_up(_cdiv(dim, _cdiv(dim, cap)), align)
    return min(tile, _round_up(dim, align))


# ---------------------------------------------------------------------------
# Kernel 1: tiled, pipelined matmul + bias (+ optional ReLU), bf16 MXU / f32 acc
# ---------------------------------------------------------------------------
def _mm_bias_kernel(x_ref, w_ref, b_ref, o_ref, acc_ref, *, act):
    @pl.when(pl.program_id(2) == 0)
    def _():
        acc_ref[...] = jnp.zeros_like(acc_ref)

    acc_ref[...] += jnp.dot(x_ref[...].astype(jnp.bfloat16),
                            w_ref[...].astype(jnp.bfloat16),
                            preferred_element_type=jnp.float32)

    @pl.when(pl.program_id(2) == pl.num_programs(2) - 1)
    def _():
        y = acc_ref[...] + b_ref[...]
        if act == "relu":
            y = jnp.maximum(y, 0.0)
        o_ref[...] = y.astype(o_ref.dtype)


def pallas_matmul_bias(x, w, b, act=None, out_dtype=jnp.bfloat16,
                       *, tm_max=_MM_TM_MAX, tn_max=_MM_TN_MAX, tk_max=_MM_TK_MAX):
    """o = act(x @ w + b), tiled over (M, N, K) with a f32 VMEM accumulator."""
    M, K = x.shape
    Kw, N = w.shape
    assert Kw == K
    # bf16 sublane packing: keep M tiles multiples of 16; lanes multiples of 128.
    tm = _pick_tile(M, tm_max, 16)
    tn = _pick_tile(N, tn_max, 128)
    tk = _pick_tile(K, tk_max, 128)
    Mp, Np, Kp = _round_up(M, tm), _round_up(N, tn), _round_up(K, tk)

    xp = jnp.pad(x, ((0, Mp - M), (0, Kp - K))) if (Mp > M or Kp > K) else x
    wp = jnp.pad(w, ((0, Kp - K), (0, Np - N))) if (Kp > K or Np > N) else w
    bp = b.reshape(1, N).astype(jnp.float32)
    if Np > N:
        bp = jnp.pad(bp, ((0, 0), (0, Np - N)))

    out = pl.pallas_call(
        functools.partial(_mm_bias_kernel, act=act),
        out_shape=jax.ShapeDtypeStruct((Mp, Np), out_dtype),
        grid=(Mp // tm, Np // tn, Kp // tk),
        in_specs=[
            pl.BlockSpec((tm, tk), lambda i, j, k: (i, k)),
            pl.BlockSpec((tk, tn), lambda i, j, k: (k, j)),
            pl.BlockSpec((1, tn), lambda i, j, k: (0, j)),
        ],
        out_specs=pl.BlockSpec((tm, tn), lambda i, j, k: (i, j)),
        scratch_shapes=[pltpu.VMEM((tm, tn), jnp.float32)],
        compiler_params=pltpu.CompilerParams(
            dimension_semantics=("parallel", "parallel", "arbitrary"),
            vmem_limit_bytes=_MM_VMEM_LIMIT),
    )(xp, wp, bp)
    if Mp > M or Np > N:
        out = out[:M, :N]
    return out


# ---------------------------------------------------------------------------
# Kernel 2: fused feature fusion (grid over batch)
#   conv11(l4) -> bilinear upsample -> conv33(f_up + conv22(l3)) -> channel
#   concat (direct stores, no identity matmul) -> + positional embedding.
# ---------------------------------------------------------------------------
def _feature_fuse_kernel(l4_ref, l3_ref, up_ref, w11_ref, b11_ref,
                         w22_ref, b22_ref, w33_ref, b33_ref,
                         posa_ref, posb_ref, o_ref):
    d2 = w11_ref.shape[1]
    f4 = (jnp.dot(l4_ref[0], w11_ref[...], preferred_element_type=jnp.float32)
          + b11_ref[...])                                        # (S4, d2) f32
    f_up = jnp.dot(up_ref[...], f4.astype(jnp.bfloat16),
                   preferred_element_type=jnp.float32)           # (S3, d2) f32
    f3 = (jnp.dot(l3_ref[0], w22_ref[...], preferred_element_type=jnp.float32)
          + b22_ref[...])                                        # (S3, d2) f32
    g = (f_up + f3).astype(jnp.bfloat16)
    h2 = (jnp.dot(g, w33_ref[...], preferred_element_type=jnp.float32)
          + b33_ref[...] + posb_ref[...])                        # (S3, d2) f32
    # Channel concat: write the two halves directly (no identity matmul).
    o_ref[0, :, 0:d2] = (f_up + posa_ref[...]).astype(o_ref.dtype)
    o_ref[0, :, d2:2 * d2] = h2.astype(o_ref.dtype)


def pallas_feature_fuse(l4, l3, p):
    B, S4, C4 = l4.shape
    _, S3, C3 = l3.shape
    d2 = p["w11"].shape[1]
    D = 2 * d2

    def full(shape):
        return pl.BlockSpec(shape, lambda b: tuple(0 for _ in shape))

    # TODO(synk): for v7x with B<=2, add a sequence-tile grid axis so both
    # TensorCores get multiple pipelined steps.
    return pl.pallas_call(
        _feature_fuse_kernel,
        out_shape=jax.ShapeDtypeStruct((B, S3, D), jnp.bfloat16),
        grid=(B,),
        in_specs=[
            pl.BlockSpec((1, S4, C4), lambda b: (b, 0, 0)),
            pl.BlockSpec((1, S3, C3), lambda b: (b, 0, 0)),
            full((S3, S4)),
            full((C4, d2)), full((1, d2)),
            full((C3, d2)), full((1, d2)),
            full((d2, d2)), full((1, d2)),
            full((S3, d2)), full((S3, d2)),
        ],
        out_specs=pl.BlockSpec((1, S3, D), lambda b: (b, 0, 0)),
        compiler_params=pltpu.CompilerParams(
            dimension_semantics=("parallel",),
            vmem_limit_bytes=_FUSED_VMEM_LIMIT),
    )(l4, l3, p["up"], p["w11"], p["b11"], p["w22"], p["b22"],
      p["w33"], p["b33"], p["pos_a"], p["pos_b"])


# ---------------------------------------------------------------------------
# Kernel 3: fused pre-LN transformer encoder layer (one pallas_call per layer)
#   x = x + out_proj(MHA(LN1(x)));  x = x + W2 relu(W1 LN2(x) + b1) + b2
#   Per-head Q/K/V weights are indexed on a leading head axis (tile-aligned),
#   head outputs land in a (S, D) VMEM scratch, then ONE out-projection matmul.
# ---------------------------------------------------------------------------
def _encoder_layer_kernel(x_ref, ln1g_ref, ln1b_ref,
                          wq_ref, wk_ref, wv_ref, bq_ref, bk_ref, bv_ref,
                          wo_ref, bo_ref, ln2g_ref, ln2b_ref,
                          w1_ref, b1_ref, w2_ref, b2_ref,
                          o_ref, attn_scr, *, nhead, eps):
    x = x_ref[0].astype(jnp.float32)                       # (S, D)
    dh = wq_ref.shape[2]

    def layer_norm(t, g, b):
        mu = jnp.mean(t, axis=-1, keepdims=True)
        var = jnp.mean((t - mu) ** 2, axis=-1, keepdims=True)   # biased (torch)
        return (t - mu) * jax.lax.rsqrt(var + eps) * g + b

    # --- self-attention sub-block (pre-LN); softmax scale folded into wq/bq ---
    h = layer_norm(x, ln1g_ref[...], ln1b_ref[...]).astype(jnp.bfloat16)
    # TODO(synk): for S >~ 1024, switch to KV-tiled online softmax (flash-style).
    for hh in range(nhead):
        q = jnp.dot(h, wq_ref[hh], preferred_element_type=jnp.float32) + bq_ref[hh]
        k = jnp.dot(h, wk_ref[hh], preferred_element_type=jnp.float32) + bk_ref[hh]
        v = jnp.dot(h, wv_ref[hh], preferred_element_type=jnp.float32) + bv_ref[hh]
        s = jax.lax.dot_general(q.astype(jnp.bfloat16), k.astype(jnp.bfloat16),
                                (((1,), (1,)), ((), ())),
                                preferred_element_type=jnp.float32)   # (S, S)
        m = jnp.max(s, axis=-1, keepdims=True)
        p = jnp.exp(s - m)
        p = p * pl.reciprocal(jnp.sum(p, axis=-1, keepdims=True), approx=True)
        o_h = jnp.dot(p.astype(jnp.bfloat16), v.astype(jnp.bfloat16),
                      preferred_element_type=jnp.float32)             # (S, dh)
        attn_scr[:, hh * dh:(hh + 1) * dh] = o_h.astype(attn_scr.dtype)
    attn = (jnp.dot(attn_scr[...], wo_ref[...],
                    preferred_element_type=jnp.float32) + bo_ref[...])
    x = x + attn

    # --- feed-forward sub-block (pre-LN, ReLU; dropout == identity) ---
    h2 = layer_norm(x, ln2g_ref[...], ln2b_ref[...]).astype(jnp.bfloat16)
    ff = jnp.maximum(jnp.dot(h2, w1_ref[...], preferred_element_type=jnp.float32)
                     + b1_ref[...], 0.0).astype(jnp.bfloat16)
    ff = jnp.dot(ff, w2_ref[...], preferred_element_type=jnp.float32) + b2_ref[...]
    o_ref[0] = (x + ff).astype(o_ref.dtype)


def pallas_encoder_layer(x, p, nhead, eps=1e-5):
    B, S, D = x.shape
    dh = D // nhead
    dff = p["w1"].shape[1]

    def full(shape):
        return pl.BlockSpec(shape, lambda b: tuple(0 for _ in shape))

    return pl.pallas_call(
        functools.partial(_encoder_layer_kernel, nhead=nhead, eps=eps),
        out_shape=jax.ShapeDtypeStruct((B, S, D), jnp.bfloat16),
        grid=(B,),
        in_specs=[
            pl.BlockSpec((1, S, D), lambda b: (b, 0, 0)),
            full((1, D)), full((1, D)),
            full((nhead, D, dh)), full((nhead, D, dh)), full((nhead, D, dh)),
            full((nhead, 1, dh)), full((nhead, 1, dh)), full((nhead, 1, dh)),
            full((D, D)), full((1, D)),
            full((1, D)), full((1, D)),
            full((D, dff)), full((1, dff)),
            full((dff, D)), full((1, D)),
        ],
        out_specs=pl.BlockSpec((1, S, D), lambda b: (b, 0, 0)),
        scratch_shapes=[pltpu.VMEM((S, D), jnp.bfloat16)],
        compiler_params=pltpu.CompilerParams(
            dimension_semantics=("parallel",),
            vmem_limit_bytes=_FUSED_VMEM_LIMIT),
    )(x, p["ln1_g"], p["ln1_b"], p["wq_h"], p["wk_h"], p["wv_h"],
      p["bq_h"], p["bk_h"], p["bv_h"], p["wo"], p["bo"],
      p["ln2_g"], p["ln2_b"], p["w1"], p["b1"], p["w2"], p["b2"])


# ---------------------------------------------------------------------------
# Host-side precomputation (outside jit): bilinear matrix, pos-emb, weight folds
# ---------------------------------------------------------------------------
def _bilinear_matrix(n_in, n_out):
    """F.interpolate(mode='bilinear', align_corners=False) as (n_out, n_in)."""
    o = jnp.arange(n_out, dtype=jnp.float32)
    src = (o + 0.5) * (n_in / n_out) - 0.5
    src = jnp.maximum(src, 0.0)
    i0 = jnp.minimum(jnp.floor(src).astype(jnp.int32), n_in - 1)
    i1 = jnp.minimum(i0 + 1, n_in - 1)
    frac = src - i0.astype(jnp.float32)
    A = jnp.zeros((n_out, n_in), jnp.float32)
    A = A.at[jnp.arange(n_out), i0].add(1.0 - frac)
    A = A.at[jnp.arange(n_out), i1].add(frac)
    return A


def sine_pos_embed_2d(d_model, H, W):
    """DETR-style 2D sine positional encoding (normalize=True), (H*W, d_model)."""
    npf = d_model // 2
    temperature, scale, eps = 10000.0, 2.0 * math.pi, 1e-6
    ones = jnp.ones((H, W), jnp.float32)
    y_embed = jnp.cumsum(ones, axis=0)
    x_embed = jnp.cumsum(ones, axis=1)
    y_embed = y_embed / (y_embed[-1:, :] + eps) * scale
    x_embed = x_embed / (x_embed[:, -1:] + eps) * scale
    dim_t = jnp.arange(npf, dtype=jnp.float32)
    dim_t = temperature ** (2.0 * jnp.floor(dim_t / 2.0) / npf)
    pos_x = x_embed[..., None] / dim_t
    pos_y = y_embed[..., None] / dim_t
    pos_x = jnp.stack([jnp.sin(pos_x[..., 0::2]), jnp.cos(pos_x[..., 1::2])],
                      axis=3).reshape(H, W, npf)
    pos_y = jnp.stack([jnp.sin(pos_y[..., 0::2]), jnp.cos(pos_y[..., 1::2])],
                      axis=3).reshape(H, W, npf)
    return jnp.concatenate([pos_y, pos_x], axis=2).reshape(H * W, d_model)


def init_params(key, *, d_model, dff, num_layers, c3, c4, patch=16):
    """Raw synthetic parameters (shapes mirror the module)."""
    def nrm(k, shape, s=0.05):
        return s * jax.random.normal(k, shape, jnp.float32)

    keys = iter(jax.random.split(key, 64))
    d2 = d_model // 2
    params = {
        "w_l3": nrm(next(keys), (3 * patch * patch, c3)),
        "b_l3": jnp.zeros((c3,), jnp.float32),
        "w_l4": nrm(next(keys), (4 * c3, c4)),
        "b_l4": jnp.zeros((c4,), jnp.float32),
        "w11": nrm(next(keys), (c4, d2)), "b11": nrm(next(keys), (d2,)),
        "w22": nrm(next(keys), (c3, d2)), "b22": nrm(next(keys), (d2,)),
        "w33": nrm(next(keys), (d2, d2)), "b33": nrm(next(keys), (d2,)),
        "layers": [],
    }
    for _ in range(num_layers):
        lk = jax.random.split(next(keys), 8)
        params["layers"].append({
            "wq": nrm(lk[0], (d_model, d_model)), "bq": jnp.zeros((d_model,), jnp.float32),
            "wk": nrm(lk[1], (d_model, d_model)), "bk": jnp.zeros((d_model,), jnp.float32),
            "wv": nrm(lk[2], (d_model, d_model)), "bv": jnp.zeros((d_model,), jnp.float32),
            "wo": nrm(lk[3], (d_model, d_model)), "bo": jnp.zeros((d_model,), jnp.float32),
            "ln1_g": jnp.ones((d_model,), jnp.float32), "ln1_b": jnp.zeros((d_model,), jnp.float32),
            "ln2_g": jnp.ones((d_model,), jnp.float32), "ln2_b": jnp.zeros((d_model,), jnp.float32),
            "w1": nrm(lk[4], (d_model, dff)), "b1": jnp.zeros((dff,), jnp.float32),
            "w2": nrm(lk[5], (dff, d_model)), "b2": jnp.zeros((d_model,), jnp.float32),
        })
    return params


def prepare_params(raw, *, image_hw, d_model, nhead, patch=16):
    """One-time (outside jit) weight folding / precomputation; weights -> bf16."""
    H, W = image_hw
    Hp, Wp = H // patch, W // patch
    H4, W4 = Hp // 2, Wp // 2
    d2 = d_model // 2
    dh = d_model // nhead
    bf16 = jnp.bfloat16

    # Fold ImageNet normalization into the first patch-conv (rows are (c,py,px)).
    mean = jnp.array([0.485, 0.456, 0.406], jnp.float32)
    std = jnp.array([0.229, 0.224, 0.225], jnp.float32)
    inv_std_rows = jnp.repeat(1.0 / std, patch * patch)
    mean_rows = jnp.repeat(mean, patch * patch)
    w_l3 = (raw["w_l3"] * inv_std_rows[:, None]).astype(bf16)
    b_l3 = raw["b_l3"] - (mean_rows * inv_std_rows) @ raw["w_l3"]

    # Separable bilinear upsample as one combined spatial matrix.
    up = jnp.kron(_bilinear_matrix(H4, Hp), _bilinear_matrix(W4, Wp)).astype(bf16)

    pos = sine_pos_embed_2d(d_model, Hp, Wp)               # (Hp*Wp, d_model) f32

    params = {
        "w_l3": w_l3, "b_l3": b_l3,
        "w_l4": raw["w_l4"].astype(bf16), "b_l4": raw["b_l4"],
        "w11": raw["w11"].astype(bf16), "b11": raw["b11"].reshape(1, d2),
        "w22": raw["w22"].astype(bf16), "b22": raw["b22"].reshape(1, d2),
        "w33": raw["w33"].astype(bf16), "b33": raw["b33"].reshape(1, d2),
        "up": up, "pos_a": pos[:, :d2], "pos_b": pos[:, d2:],
        "layers": [],
    }
    scale = 1.0 / math.sqrt(dh)
    for lp in raw["layers"]:
        dm = lp["wq"].shape[0]
        dff = lp["w1"].shape[1]

        def heads(w):
            return w.reshape(dm, nhead, dh).transpose(1, 0, 2)   # (nhead, D, dh)

        params["layers"].append({
            "ln1_g": lp["ln1_g"].reshape(1, dm), "ln1_b": lp["ln1_b"].reshape(1, dm),
            # 1/sqrt(dh) folded into the query projection.
            "wq_h": heads(lp["wq"] * scale).astype(bf16),
            "wk_h": heads(lp["wk"]).astype(bf16),
            "wv_h": heads(lp["wv"]).astype(bf16),
            "bq_h": (lp["bq"] * scale).reshape(nhead, 1, dh),
            "bk_h": lp["bk"].reshape(nhead, 1, dh),
            "bv_h": lp["bv"].reshape(nhead, 1, dh),
            "wo": lp["wo"].astype(bf16), "bo": lp["bo"].reshape(1, dm),
            "ln2_g": lp["ln2_g"].reshape(1, dm), "ln2_b": lp["ln2_b"].reshape(1, dm),
            "w1": lp["w1"].astype(bf16), "b1": lp["b1"].reshape(1, dff),
            "w2": lp["w2"].astype(bf16), "b2": lp["b2"].reshape(1, dm),
        })
    return params


# ---------------------------------------------------------------------------
# Forward pass
# ---------------------------------------------------------------------------
def image_feature_sequence(image, params, *, patch=16):
    """Feature extractor; returns the (B, S, d_model) bf16 sequence with the
    positional embedding already added."""
    B, C, H, W = image.shape
    Hp, Wp = H // patch, W // patch
    H4, W4 = Hp // 2, Wp // 2

    # TODO(synk): pretrained torchvision ResNet50 body has no checkpoint-free
    # Pallas equivalent; replaced by deterministic strided patch-conv stand-ins.
    # TODO(synk): im2col is still an XLA reshape/transpose (bf16 to halve its
    # traffic); it could be folded into the kernel via BlockSpec index_map.
    img = image.astype(jnp.bfloat16)
    cols3 = (img.reshape(B, C, Hp, patch, Wp, patch)
                .transpose(0, 2, 4, 1, 3, 5)
                .reshape(B * Hp * Wp, C * patch * patch))
    # ImageNet normalization is folded into w_l3 / b_l3 (prepare_params).
    l3 = pallas_matmul_bias(cols3, params["w_l3"], params["b_l3"], act="relu")
    c3 = l3.shape[-1]

    cols4 = (l3.reshape(B, H4, 2, W4, 2, c3)
               .transpose(0, 1, 3, 2, 4, 5)
               .reshape(B * H4 * W4, 4 * c3))
    l4 = pallas_matmul_bias(cols4, params["w_l4"], params["b_l4"], act="relu")

    l3_seq = l3.reshape(B, Hp * Wp, c3)                 # channels-last sequences
    l4_seq = l4.reshape(B, H4 * W4, -1)
    return pallas_feature_fuse(l4_seq, l3_seq, params)


def image_encoder_forward(image, params, *, nhead):
    h = image_feature_sequence(image, params)           # (B, S, d_model) bf16
    for layer_p in params["layers"]:
        h = pallas_encoder_layer(h, layer_p, nhead)
    return h


# ---------------------------------------------------------------------------
# Main
# ---------------------------------------------------------------------------
if __name__ == "__main__":
    # Lane-dense demo config (d_model=256 -> d2=128 so every store is 128-wide).
    B, H, W = 2, 64, 64                    # NCHW image, 3 channels
    d_model, nhead, dff, num_layers = 256, 8, 512, 2
    c3, c4 = 128, 256                      # stand-in layer3 / layer4 channels

    key = jax.random.PRNGKey(0)
    k_img, k_par = jax.random.split(key)
    image = jax.random.uniform(k_img, (B, 3, H, W), jnp.float32)

    raw = init_params(k_par, d_model=d_model, dff=dff,
                      num_layers=num_layers, c3=c3, c4=c4)
    params = prepare_params(raw, image_hw=(H, W), d_model=d_model, nhead=nhead)

    fwd = jax.jit(functools.partial(image_encoder_forward, nhead=nhead))
    out = fwd(image, params)
    jax.block_until_ready(out)

    expected_seq = (H // 16) * (W // 16)
    assert out.shape == (B, expected_seq, d_model), out.shape
    assert bool(jnp.all(jnp.isfinite(out.astype(jnp.float32))))
    print("KERNEL_OK")
</pallas_src>

<mosaic_0001>
module attributes {stable_mosaic.version = 11 : i64} {
  func.func @_mm_bias_kernel(%arg0: i32, %arg1: i32, %arg2: i32, %arg3: memref<32x384xbf16, #tpu.memory_space<vmem>>, %arg4: memref<384x128xbf16, #tpu.memory_space<vmem>>, %arg5: memref<1x128xf32, #tpu.memory_space<vmem>>, %arg6: memref<32x128xbf16, #tpu.memory_space<vmem>>, %arg7: memref<32x128xf32, #tpu.memory_space<vmem>>) attributes {dimension_semantics = [#tpu.dimension_semantics<parallel>, #tpu.dimension_semantics<parallel>, #tpu.dimension_semantics<arbitrary>], iteration_bounds = array<i64: 1, 1, 2>, scalar_prefetch = 0 : i64, scratch_operands = 1 : i64, tpu.core_type = #tpu.core_type<tc>, window_params = [{transform_indices = @transform_0, window_bounds = array<i64: 32, 384>}, {transform_indices = @transform_1, window_bounds = array<i64: 384, 128>}, {transform_indices = @transform_2, window_bounds = array<i64: 1, 128>}, {transform_indices = @transform_3, window_bounds = array<i64: 32, 128>}]} {
    %c0_i32 = arith.constant 0 : i32
    %0 = arith.cmpi eq, %arg2, %c0_i32 : i32
    %1 = arith.extui %0 : i1 to i32
    %c0_i32_0 = arith.constant 0 : i32
    %2 = arith.cmpi ne, %1, %c0_i32_0 : i32
    scf.if %2 {
      %cst_9 = arith.constant 0.000000e+00 : f32
      %12 = vector.broadcast %cst_9 : f32 to vector<32x128xf32>
      %c0_10 = arith.constant 0 : index
      %c0_11 = arith.constant 0 : index
      %13 = vector.load %arg7[%c0_10, %c0_11] : memref<32x128xf32, #tpu.memory_space<vmem>>, vector<32x128xf32>
      tpu.vector_store %arg7[%c0_10, %c0_11], %12 {strides = array<i32>} : memref<32x128xf32, #tpu.memory_space<vmem>>, vector<32x128xf32>,
    } else {
    }
    %c0 = arith.constant 0 : index
    %c0_1 = arith.constant 0 : index
    %3 = vector.load %arg7[%c0, %c0_1] : memref<32x128xf32, #tpu.memory_space<vmem>>, vector<32x128xf32>
    %c0_2 = arith.constant 0 : index
    %c0_3 = arith.constant 0 : index
    %4 = vector.load %arg3[%c0_2, %c0_3] : memref<32x384xbf16, #tpu.memory_space<vmem>>, vector<32x384xbf16>
    %c0_4 = arith.constant 0 : index
    %c0_5 = arith.constant 0 : index
    %5 = vector.load %arg4[%c0_4, %c0_5] : memref<384x128xbf16, #tpu.memory_space<vmem>>, vector<384x128xbf16>
    %cst = arith.constant dense<0.000000e+00> : vector<32x128xf32>
    %6 = tpu.matmul %4, %5, %cst {dimension_numbers = #tpu.dot_dimension_numbers<[1], [0], [0], [1], [0, 0, 1, 1], [], []>} : vector<32x384xbf16>, vector<384x128xbf16>, vector<32x128xf32> -> vector<32x128xf32>
    %7 = arith.addf %3, %6 : vector<32x128xf32>
    %c0_6 = arith.constant 0 : index
    %c0_7 = arith.constant 0 : index
    %8 = vector.load %arg7[%c0_6, %c0_7] : memref<32x128xf32, #tpu.memory_space<vmem>>, vector<32x128xf32>
    tpu.vector_store %arg7[%c0_6, %c0_7], %7 {strides = array<i32>} : memref<32x128xf32, #tpu.memory_space<vmem>>, vector<32x128xf32>,
    %c1_i32 = arith.constant 1 : i32
    %9 = arith.cmpi eq, %arg2, %c1_i32 : i32
    %10 = arith.extui %9 : i1 to i32
    %c0_i32_8 = arith.constant 0 : i32
    %11 = arith.cmpi ne, %10, %c0_i32_8 : i32
    scf.if %11 {
      %c0_9 = arith.constant 0 : index
      %c0_10 = arith.constant 0 : index
      %12 = vector.load %arg7[%c0_9, %c0_10] : memref<32x128xf32, #tpu.memory_space<vmem>>, vector<32x128xf32>
      %c0_11 = arith.constant 0 : index
      %c0_12 = arith.constant 0 : index
      %13 = vector.load %arg5[%c0_11, %c0_12] : memref<1x128xf32, #tpu.memory_space<vmem>>, vector<1x128xf32>
      %14 = vector.broadcast %13 : vector<1x128xf32> to vector<32x128xf32>
      %15 = arith.addf %12, %14 : vector<32x128xf32>
      %cst_13 = arith.constant 0.000000e+00 : f32
      %16 = vector.broadcast %cst_13 : f32 to vector<32x128xf32>
      %17 = arith.maximumf %15, %16 : vector<32x128xf32>
      %18 = arith.truncf %17 : vector<32x128xf32> to vector<32x128xbf16>
      %c0_14 = arith.constant 0 : index
      %c0_15 = arith.constant 0 : index
      %19 = vector.load %arg6[%c0_14, %c0_15] : memref<32x128xbf16, #tpu.memory_space<vmem>>, vector<32x128xbf16>
      tpu.vector_store %arg6[%c0_14, %c0_15], %18 {strides = array<i32>} : memref<32x128xbf16, #tpu.memory_space<vmem>>, vector<32x128xbf16>,
    } else {
    }
    return
  }
  func.func @transform_0(%arg0: i32, %arg1: i32, %arg2: i32) -> (i32, i32) {
    %c0_i32 = arith.constant 0 : i32
    return %arg0, %arg2 : i32, i32
  }
  func.func @transform_1(%arg0: i32, %arg1: i32, %arg2: i32) -> (i32, i32) {
    %c0_i32 = arith.constant 0 : i32
    return %arg2, %arg1 : i32, i32
  }
  func.func @transform_2(%arg0: i32, %arg1: i32, %arg2: i32) -> (i32, i32) {
    %c0_i32 = arith.constant 0 : i32
    %c0_i32_0 = arith.constant 0 : i32
    return %c0_i32, %arg1 : i32, i32
  }
  func.func @transform_3(%arg0: i32, %arg1: i32, %arg2: i32) -> (i32, i32) {
    %c0_i32 = arith.constant 0 : i32
    return %arg0, %arg1 : i32, i32
  }
}

module attributes {stable_mosaic.version = 11 : i64} {
  func.func @_mm_bias_kernel(%arg0: i32, %arg1: i32, %arg2: i32, %arg3: memref<16x512xbf16, #tpu.memory_space<vmem>>, %arg4: memref<512x256xbf16, #tpu.memory_space<vmem>>, %arg5: memref<1x256xf32, #tpu.memory_space<vmem>>, %arg6: memref<16x256xbf16, #tpu.memory_space<vmem>>, %arg7: memref<16x256xf32, #tpu.memory_space<vmem>>) attributes {dimension_semantics = [#tpu.dimension_semantics<parallel>, #tpu.dimension_semantics<parallel>, #tpu.dimension_semantics<arbitrary>], iteration_bounds = array<i64: 1, 1, 1>, scalar_prefetch = 0 : i64, scratch_operands = 1 : i64, tpu.core_type = #tpu.core_type<tc>, window_params = [{transform_indices = @transform_0, window_bounds = array<i64: 16, 512>}, {transform_indices = @transform_1, window_bounds = array<i64: 512, 256>}, {transform_indices = @transform_2, window_bounds = array<i64: 1, 256>}, {transform_indices = @transform_3, window_bounds = array<i64: 16, 256>}]} {
    %c0_i32 = arith.constant 0 : i32
    %0 = arith.cmpi eq, %arg2, %c0_i32 : i32
    %1 = arith.extui %0 : i1 to i32
    %c0_i32_0 = arith.constant 0 : i32
    %2 = arith.cmpi ne, %1, %c0_i32_0 : i32
    scf.if %2 {
      %cst_10 = arith.constant 0.000000e+00 : f32
      %12 = vector.broadcast %cst_10 : f32 to vector<16x256xf32>
      %c0_11 = arith.constant 0 : index
      %c0_12 = arith.constant 0 : index
      %13 = vector.load %arg7[%c0_11, %c0_12] : memref<16x256xf32, #tpu.memory_space<vmem>>, vector<16x256xf32>
      tpu.vector_store %arg7[%c0_11, %c0_12], %12 {strides = array<i32>} : memref<16x256xf32, #tpu.memory_space<vmem>>, vector<16x256xf32>,
    } else {
    }
    %c0 = arith.constant 0 : index
    %c0_1 = arith.constant 0 : index
    %3 = vector.load %arg7[%c0, %c0_1] : memref<16x256xf32, #tpu.memory_space<vmem>>, vector<16x256xf32>
    %c0_2 = arith.constant 0 : index
    %c0_3 = arith.constant 0 : index
    %4 = vector.load %arg3[%c0_2, %c0_3] : memref<16x512xbf16, #tpu.memory_space<vmem>>, vector<16x512xbf16>
    %c0_4 = arith.constant 0 : index
    %c0_5 = arith.constant 0 : index
    %5 = vector.load %arg4[%c0_4, %c0_5] : memref<512x256xbf16, #tpu.memory_space<vmem>>, vector<512x256xbf16>
    %cst = arith.constant dense<0.000000e+00> : vector<16x256xf32>
    %6 = tpu.matmul %4, %5, %cst {dimension_numbers = #tpu.dot_dimension_numbers<[1], [0], [0], [1], [0, 0, 1, 1], [], []>} : vector<16x512xbf16>, vector<512x256xbf16>, vector<16x256xf32> -> vector<16x256xf32>
    %7 = arith.addf %3, %6 : vector<16x256xf32>
    %c0_6 = arith.constant 0 : index
    %c0_7 = arith.constant 0 : index
    %8 = vector.load %arg7[%c0_6, %c0_7] : memref<16x256xf32, #tpu.memory_space<vmem>>, vector<16x256xf32>
    tpu.vector_store %arg7[%c0_6, %c0_7], %7 {strides = array<i32>} : memref<16x256xf32, #tpu.memory_space<vmem>>, vector<16x256xf32>,
    %c0_i32_8 = arith.constant 0 : i32
    %9 = arith.cmpi eq, %arg2, %c0_i32_8 : i32
    %10 = arith.extui %9 : i1 to i32
    %c0_i32_9 = arith.constant 0 : i32
    %11 = arith.cmpi ne, %10, %c0_i32_9 : i32
    scf.if %11 {
      %c0_10 = arith.constant 0 : index
      %c0_11 = arith.constant 0 : index
      %12 = vector.load %arg7[%c0_10, %c0_11] : memref<16x256xf32, #tpu.memory_space<vmem>>, vector<16x256xf32>
      %c0_12 = arith.constant 0 : index
      %c0_13 = arith.constant 0 : index
      %13 = vector.load %arg5[%c0_12, %c0_13] : memref<1x256xf32, #tpu.memory_space<vmem>>, vector<1x256xf32>
      %14 = vector.broadcast %13 : vector<1x256xf32> to vector<16x256xf32>
      %15 = arith.addf %12, %14 : vector<16x256xf32>
      %cst_14 = arith.constant 0.000000e+00 : f32
      %16 = vector.broadcast %cst_14 : f32 to vector<16x256xf32>
      %17 = arith.maximumf %15, %16 : vector<16x256xf32>
      %18 = arith.truncf %17 : vector<16x256xf32> to vector<16x256xbf16>
      %c0_15 = arith.constant 0 : index
      %c0_16 = arith.constant 0 : index
      %19 = vector.load %arg6[%c0_15, %c0_16] : memref<16x256xbf16, #tpu.memory_space<vmem>>, vector<16x256xbf16>
      tpu.vector_store %arg6[%c0_15, %c0_16], %18 {strides = array<i32>} : memref<16x256xbf16, #tpu.memory_space<vmem>>, vector<16x256xbf16>,
    } else {
    }
    return
  }
  func.func @transform_0(%arg0: i32, %arg1: i32, %arg2: i32) -> (i32, i32) {
    %c0_i32 = arith.constant 0 : i32
    return %arg0, %arg2 : i32, i32
  }
  func.func @transform_1(%arg0: i32, %arg1: i32, %arg2: i32) -> (i32, i32) {
    %c0_i32 = arith.constant 0 : i32
    return %arg2, %arg1 : i32, i32
  }
  func.func @transform_2(%arg0: i32, %arg1: i32, %arg2: i32) -> (i32, i32) {
    %c0_i32 = arith.constant 0 : i32
    %c0_i32_0 = arith.constant 0 : i32
    return %c0_i32, %arg1 : i32, i32
  }
  func.func @transform_3(%arg0: i32, %arg1: i32, %arg2: i32) -> (i32, i32) {
    %c0_i32 = arith.constant 0 : i32
    return %arg0, %arg1 : i32, i32
  }
}

module attributes {stable_mosaic.version = 11 : i64} {
  func.func @_feature_fuse_kernel(%arg0: i32, %arg1: memref<1x4x256xbf16, #tpu.memory_space<vmem>>, %arg2: memref<1x16x128xbf16, #tpu.memory_space<vmem>>, %arg3: memref<16x4xbf16, #tpu.memory_space<vmem>>, %arg4: memref<256x128xbf16, #tpu.memory_space<vmem>>, %arg5: memref<1x128xf32, #tpu.memory_space<vmem>>, %arg6: memref<128x128xbf16, #tpu.memory_space<vmem>>, %arg7: memref<1x128xf32, #tpu.memory_space<vmem>>, %arg8: memref<128x128xbf16, #tpu.memory_space<vmem>>, %arg9: memref<1x128xf32, #tpu.memory_space<vmem>>, %arg10: memref<16x128xf32, #tpu.memory_space<vmem>>, %arg11: memref<16x128xf32, #tpu.memory_space<vmem>>, %arg12: memref<1x16x256xbf16, #tpu.memory_space<vmem>>) attributes {dimension_semantics = [#tpu.dimension_semantics<parallel>], iteration_bounds = array<i64: 2>, scalar_prefetch = 0 : i64, scratch_operands = 0 : i64, tpu.core_type = #tpu.core_type<tc>, window_params = [{transform_indices = @transform_0, window_bounds = array<i64: 1, 4, 256>}, {transform_indices = @transform_1, window_bounds = array<i64: 1, 16, 128>}, {pipeline_mode = #tpu.pipeline_mode<synchronous>, transform_indices = @transform_2, window_bounds = array<i64: 16, 4>}, {pipeline_mode = #tpu.pipeline_mode<synchronous>, transform_indices = @transform_3, window_bounds = array<i64: 256, 128>}, {pipeline_mode = #tpu.pipeline_mode<synchronous>, transform_indices = @transform_4, window_bounds = array<i64: 1, 128>}, {pipeline_mode = #tpu.pipeline_mode<synchronous>, transform_indices = @transform_5, window_bounds = array<i64: 128, 128>}, {pipeline_mode = #tpu.pipeline_mode<synchronous>, transform_indices = @transform_6, window_bounds = array<i64: 1, 128>}, {pipeline_mode = #tpu.pipeline_mode<synchronous>, transform_indices = @transform_7, window_bounds = array<i64: 128, 128>}, {pipeline_mode = #tpu.pipeline_mode<synchronous>, transform_indices = @transform_8, window_bounds = array<i64: 1, 128>}, {pipeline_mode = #tpu.pipeline_mode<synchronous>, transform_indices = @transform_9, window_bounds = array<i64: 16, 128>}, {pipeline_mode = #tpu.pipeline_mode<synchronous>, transform_indices = @transform_10, window_bounds = array<i64: 16, 128>}, {transform_indices = @transform_11, window_bounds = array<i64: 1, 16, 256>}]} {
    %c0 = arith.constant 0 : index
    %c0_0 = arith.constant 0 : index
    %c0_1 = arith.constant 0 : index
    %0 = vector.load %arg1[%c0, %c0_0, %c0_1] : memref<1x4x256xbf16, #tpu.memory_space<vmem>>, vector<1x4x256xbf16>
    %1 = vector.shape_cast %0 : vector<1x4x256xbf16> to vector<4x256xbf16>
    %c0_2 = arith.constant 0 : index
    %c0_3 = arith.constant 0 : index
    %2 = vector.load %arg4[%c0_2, %c0_3] : memref<256x128xbf16, #tpu.memory_space<vmem>>, vector<256x128xbf16>
    %cst = arith.constant dense<0.000000e+00> : vector<4x128xf32>
    %3 = tpu.matmul %1, %2, %cst {dimension_numbers = #tpu.dot_dimension_numbers<[1], [0], [0], [1], [0, 0, 1, 1], [], []>} : vector<4x256xbf16>, vector<256x128xbf16>, vector<4x128xf32> -> vector<4x128xf32>
    %c0_4 = arith.constant 0 : index
    %c0_5 = arith.constant 0 : index
    %4 = vector.load %arg5[%c0_4, %c0_5] : memref<1x128xf32, #tpu.memory_space<vmem>>, vector<1x128xf32>
    %5 = vector.broadcast %4 : vector<1x128xf32> to vector<4x128xf32>
    %6 = arith.addf %3, %5 : vector<4x128xf32>
    %c0_6 = arith.constant 0 : index
    %c0_7 = arith.constant 0 : index
    %7 = vector.load %arg3[%c0_6, %c0_7] : memref<16x4xbf16, #tpu.memory_space<vmem>>, vector<16x4xbf16>
    %8 = arith.truncf %6 : vector<4x128xf32> to vector<4x128xbf16>
    %cst_8 = arith.constant dense<0.000000e+00> : vector<16x128xf32>
    %9 = tpu.matmul %7, %8, %cst_8 {dimension_numbers = #tpu.dot_dimension_numbers<[1], [0], [0], [1], [0, 0, 1, 1], [], []>} : vector<16x4xbf16>, vector<4x128xbf16>, vector<16x128xf32> -> vector<16x128xf32>
    %c0_9 = arith.constant 0 : index
    %c0_10 = arith.constant 0 : index
    %c0_11 = arith.constant 0 : index
    %10 = vector.load %arg2[%c0_9, %c0_10, %c0_11] : memref<1x16x128xbf16, #tpu.memory_space<vmem>>, vector<1x16x128xbf16>
    %11 = vector.shape_cast %10 : vector<1x16x128xbf16> to vector<16x128xbf16>
    %c0_12 = arith.constant 0 : index
    %c0_13 = arith.constant 0 : index
    %12 = vector.load %arg6[%c0_12, %c0_13] : memref<128x128xbf16, #tpu.memory_space<vmem>>, vector<128x128xbf16>
    %cst_14 = arith.constant dense<0.000000e+00> : vector<16x128xf32>
    %13 = tpu.matmul %11, %12, %cst_14 {dimension_numbers = #tpu.dot_dimension_numbers<[1], [0], [0], [1], [0, 0, 1, 1], [], []>} : vector<16x128xbf16>, vector<128x128xbf16>, vector<16x128xf32> -> vector<16x128xf32>
    %c0_15 = arith.constant 0 : index
    %c0_16 = arith.constant 0 : index
    %14 = vector.load %arg7[%c0_15, %c0_16] : memref<1x128xf32, #tpu.memory_space<vmem>>, vector<1x128xf32>
    %15 = vector.broadcast %14 : vector<1x128xf32> to vector<16x128xf32>
    %16 = arith.addf %13, %15 : vector<16x128xf32>
    %17 = arith.addf %9, %16 : vector<16x128xf32>
    %18 = arith.truncf %17 : vector<16x128xf32> to vector<16x128xbf16>
    %c0_17 = arith.constant 0 : index
    %c0_18 = arith.constant 0 : index
    %19 = vector.load %arg8[%c0_17, %c0_18] : memref<128x128xbf16, #tpu.memory_space<vmem>>, vector<128x128xbf16>
    %cst_19 = arith.constant dense<0.000000e+00> : vector<16x128xf32>
    %20 = tpu.matmul %18, %19, %cst_19 {dimension_numbers = #tpu.dot_dimension_numbers<[1], [0], [0], [1], [0, 0, 1, 1], [], []>} : vector<16x128xbf16>, vector<128x128xbf16>, vector<16x128xf32> -> vector<16x128xf32>
    %c0_20 = arith.constant 0 : index
    %c0_21 = arith.constant 0 : index
    %21 = vector.load %arg9[%c0_20, %c0_21] : memref<1x128xf32, #tpu.memory_space<vmem>>, vector<1x128xf32>
    %22 = vector.broadcast %21 : vector<1x128xf32> to vector<16x128xf32>
    %23 = arith.addf %20, %22 : vector<16x128xf32>
    %c0_22 = arith.constant 0 : index
    %c0_23 = arith.constant 0 : index
    %24 = vector.load %arg11[%c0_22, %c0_23] : memref<16x128xf32, #tpu.memory_space<vmem>>, vector<16x128xf32>
    %25 = arith.addf %23, %24 : vector<16x128xf32>
    %c0_24 = arith.constant 0 : index
    %c0_25 = arith.constant 0 : index
    %26 = vector.load %arg10[%c0_24, %c0_25] : memref<16x128xf32, #tpu.memory_space<vmem>>, vector<16x128xf32>
    %27 = arith.addf %9, %26 : vector<16x128xf32>
    %28 = arith.truncf %27 : vector<16x128xf32> to vector<16x128xbf16>
    %c0_26 = arith.constant 0 : index
    %c0_27 = arith.constant 0 : index
    %c0_28 = arith.constant 0 : index
    %29 = vector.load %arg12[%c0_26, %c0_27, %c0_28] : memref<1x16x256xbf16, #tpu.memory_space<vmem>>, vector<1x16x128xbf16>
    %30 = vector.shape_cast %29 : vector<1x16x128xbf16> to vector<16x128xbf16>
    %31 = vector.shape_cast %28 : vector<16x128xbf16> to vector<1x16x128xbf16>
    tpu.vector_store %arg12[%c0_26, %c0_27, %c0_28], %31 {strides = array<i32>} : memref<1x16x256xbf16, #tpu.memory_space<vmem>>, vector<1x16x128xbf16>,
    %32 = arith.truncf %25 : vector<16x128xf32> to vector<16x128xbf16>
    %c0_29 = arith.constant 0 : index
    %c0_30 = arith.constant 0 : index
    %c128 = arith.constant 128 : index
    %33 = vector.load %arg12[%c0_29, %c0_30, %c128] : memref<1x16x256xbf16, #tpu.memory_space<vmem>>, vector<1x16x128xbf16>
    %34 = vector.shape_cast %33 : vector<1x16x128xbf16> to vector<16x128xbf16>
    %35 = vector.shape_cast %32 : vector<16x128xbf16> to vector<1x16x128xbf16>
    tpu.vector_store %arg12[%c0_29, %c0_30, %c128], %35 {strides = array<i32>} : memref<1x16x256xbf16, #tpu.memory_space<vmem>>, vector<1x16x128xbf16>,
    return
  }
  func.func @transform_0(%arg0: i32) -> (i32, i32, i32) {
    %c0_i32 = arith.constant 0 : i32
    %c0_i32_0 = arith.constant 0 : i32
    %c0_i32_1 = arith.constant 0 : i32
    return %arg0, %c0_i32, %c0_i32_0 : i32, i32, i32
  }
  func.func @transform_1(%arg0: i32) -> (i32, i32, i32) {
    %c0_i32 = arith.constant 0 : i32
    %c0_i32_0 = arith.constant 0 : i32
    %c0_i32_1 = arith.constant 0 : i32
    return %arg0, %c0_i32, %c0_i32_0 : i32, i32, i32
  }
  func.func @transform_2(%arg0: i32) -> (i32, i32) {
    %c0_i32 = arith.constant 0 : i32
    %c0_i32_0 = arith.constant 0 : i32
    %c0_i32_1 = arith.constant 0 : i32
    return %c0_i32, %c0_i32_0 : i32, i32
  }
  func.func @transform_3(%arg0: i32) -> (i32, i32) {
    %c0_i32 = arith.constant 0 : i32
    %c0_i32_0 = arith.constant 0 : i32
    %c0_i32_1 = arith.constant 0 : i32
    return %c0_i32, %c0_i32_0 : i32, i32
  }
  func.func @transform_4(%arg0: i32) -> (i32, i32) {
    %c0_i32 = arith.constant 0 : i32
    %c0_i32_0 = arith.constant 0 : i32
    %c0_i32_1 = arith.constant 0 : i32
    return %c0_i32, %c0_i32_0 : i32, i32
  }
  func.func @transform_5(%arg0: i32) -> (i32, i32) {
    %c0_i32 = arith.constant 0 : i32
    %c0_i32_0 = arith.constant 0 : i32
    %c0_i32_1 = arith.constant 0 : i32
    return %c0_i32, %c0_i32_0 : i32, i32
  }
  func.func @transform_6(%arg0: i32) -> (i32, i32) {
    %c0_i32 = arith.constant 0 : i32
    %c0_i32_0 = arith.constant 0 : i32
    %c0_i32_1 = arith.constant 0 : i32
    return %c0_i32, %c0_i32_0 : i32, i32
  }
  func.func @transform_7(%arg0: i32) -> (i32, i32) {
    %c0_i32 = arith.constant 0 : i32
    %c0_i32_0 = arith.constant 0 : i32
    %c0_i32_1 = arith.constant 0 : i32
    return %c0_i32, %c0_i32_0 : i32, i32
  }
  func.func @transform_8(%arg0: i32) -> (i32, i32) {
    %c0_i32 = arith.constant 0 : i32
    %c0_i32_0 = arith.constant 0 : i32
    %c0_i32_1 = arith.constant 0 : i32
    return %c0_i32, %c0_i32_0 : i32, i32
  }
  func.func @transform_9(%arg0: i32) -> (i32, i32) {
    %c0_i32 = arith.constant 0 : i32
    %c0_i32_0 = arith.constant 0 : i32
    %c0_i32_1 = arith.constant 0 : i32
    return %c0_i32, %c0_i32_0 : i32, i32
  }
  func.func @transform_10(%arg0: i32) -> (i32, i32) {
    %c0_i32 = arith.constant 0 : i32
    %c0_i32_0 = arith.constant 0 : i32
    %c0_i32_1 = arith.constant 0 : i32
    return %c0_i32, %c0_i32_0 : i32, i32
  }
  func.func @transform_11(%arg0: i32) -> (i32, i32, i32) {
    %c0_i32 = arith.constant 0 : i32
    %c0_i32_0 = arith.constant 0 : i32
    %c0_i32_1 = arith.constant 0 : i32
    return %arg0, %c0_i32, %c0_i32_0 : i32, i32, i32
  }
}

module attributes {stable_mosaic.version = 11 : i64} {
  func.func @_encoder_layer_kernel(%arg0: i32, %arg1: memref<1x16x256xbf16, #tpu.memory_space<vmem>>, %arg2: memref<1x256xf32, #tpu.memory_space<vmem>>, %arg3: memref<1x256xf32, #tpu.memory_space<vmem>>, %arg4: memref<8x256x32xbf16, #tpu.memory_space<vmem>>, %arg5: memref<8x256x32xbf16, #tpu.memory_space<vmem>>, %arg6: memref<8x256x32xbf16, #tpu.memory_space<vmem>>, %arg7: memref<8x1x32xf32, #tpu.memory_space<vmem>>, %arg8: memref<8x1x32xf32, #tpu.memory_space<vmem>>, %arg9: memref<8x1x32xf32, #tpu.memory_space<vmem>>, %arg10: memref<256x256xbf16, #tpu.memory_space<vmem>>, %arg11: memref<1x256xf32, #tpu.memory_space<vmem>>, %arg12: memref<1x256xf32, #tpu.memory_space<vmem>>, %arg13: memref<1x256xf32, #tpu.memory_space<vmem>>, %arg14: memref<256x512xbf16, #tpu.memory_space<vmem>>, %arg15: memref<1x512xf32, #tpu.memory_space<vmem>>, %arg16: memref<512x256xbf16, #tpu.memory_space<vmem>>, %arg17: memref<1x256xf32, #tpu.memory_space<vmem>>, %arg18: memref<1x16x256xbf16, #tpu.memory_space<vmem>>, %arg19: memref<16x256xbf16, #tpu.memory_space<vmem>>) attributes {dimension_semantics = [#tpu.dimension_semantics<parallel>], iteration_bounds = array<i64: 2>, scalar_prefetch = 0 : i64, scratch_operands = 1 : i64, tpu.core_type = #tpu.core_type<tc>, window_params = [{transform_indices = @transform_0, window_bounds = array<i64: 1, 16, 256>}, {pipeline_mode = #tpu.pipeline_mode<synchronous>, transform_indices = @transform_1, window_bounds = array<i64: 1, 256>}, {pipeline_mode = #tpu.pipeline_mode<synchronous>, transform_indices = @transform_2, window_bounds = array<i64: 1, 256>}, {pipeline_mode = #tpu.pipeline_mode<synchronous>, transform_indices = @transform_3, window_bounds = array<i64: 8, 256, 32>}, {pipeline_mode = #tpu.pipeline_mode<synchronous>, transform_indices = @transform_4, window_bounds = array<i64: 8, 256, 32>}, {pipeline_mode = #tpu.pipeline_mode<synchronous>, transform_indices = @transform_5, window_bounds = array<i64: 8, 256, 32>}, {pipeline_mode = #tpu.pipeline_mode<synchronous>, transform_indices = @transform_6, window_bounds = array<i64: 8, 1, 32>}, {pipeline_mode = #tpu.pipeline_mode<synchronous>, transform_indices = @transform_7, window_bounds = array<i64: 8, 1, 32>}, {pipeline_mode = #tpu.pipeline_mode<synchronous>, transform_indices = @transform_8, window_bounds = array<i64: 8, 1, 32>}, {pipeline_mode = #tpu.pipeline_mode<synchronous>, transform_indices = @transform_9, window_bounds = array<i64: 256, 256>}, {pipeline_mode = #tpu.pipeline_mode<synchronous>, transform_indices = @transform_10, window_bounds = array<i64: 1, 256>}, {pipeline_mode = #tpu.pipeline_mode<synchronous>, transform_indices = @transform_11, window_bounds = array<i64: 1, 256>}, {pipeline_mode = #tpu.pipeline_mode<synchronous>, transform_indices = @transform_12, window_bounds = array<i64: 1, 256>}, {pipeline_mode = #tpu.pipeline_mode<synchronous>, transform_indices = @transform_13, window_bounds = array<i64: 256, 512>}, {pipeline_mode = #tpu.pipeline_mode<synchronous>, transform_indices = @transform_14, window_bounds = array<i64: 1, 512>}, {pipeline_mode = #tpu.pipeline_mode<synchronous>, transform_indices = @transform_15, window_bounds = array<i64: 512, 256>}, {pipeline_mode = #tpu.pipeline_mode<synchronous>, transform_indices = @transform_16, window_bounds = array<i64: 1, 256>}, {transform_indices = @transform_17, window_bounds = array<i64: 1, 16, 256>}]} {
    %c0 = arith.constant 0 : index
    %c0_0 = arith.constant 0 : index
    %c0_1 = arith.constant 0 : index
    %0 = vector.load %arg1[%c0, %c0_0, %c0_1] : memref<1x16x256xbf16, #tpu.memory_space<vmem>>, vector<1x16x256xbf16>
    %1 = vector.shape_cast %0 : vector<1x16x256xbf16> to vector<16x256xbf16>
    %2 = arith.extf %1 : vector<16x256xbf16> to vector<16x256xf32>
    %c0_2 = arith.constant 0 : index
    %c0_3 = arith.constant 0 : index
    %3 = vector.load %arg2[%c0_2, %c0_3] : memref<1x256xf32, #tpu.memory_space<vmem>>, vector<1x256xf32>
    %c0_4 = arith.constant 0 : index
    %c0_5 = arith.constant 0 : index
    %4 = vector.load %arg3[%c0_4, %c0_5] : memref<1x256xf32, #tpu.memory_space<vmem>>, vector<1x256xf32>
    %cst = arith.constant dense<0.000000e+00> : vector<16xf32>
    %5 = vector.multi_reduction <add>, %2, %cst [1] : vector<16x256xf32> to vector<16xf32>
    %6 = vector.shape_cast %5 : vector<16xf32> to vector<16x1xf32>
    %cst_6 = arith.constant 2.560000e+02 : f32
    %7 = vector.broadcast %cst_6 : f32 to vector<16x1xf32>
    %8 = arith.divf %6, %7 : vector<16x1xf32>
    %9 = vector.broadcast %8 : vector<16x1xf32> to vector<16x256xf32>
    %10 = arith.subf %2, %9 : vector<16x256xf32>
    %11 = arith.mulf %10, %10 : vector<16x256xf32>
    %cst_7 = arith.constant dense<0.000000e+00> : vector<16xf32>
    %12 = vector.multi_reduction <add>, %11, %cst_7 [1] : vector<16x256xf32> to vector<16xf32>
    %13 = vector.shape_cast %12 : vector<16xf32> to vector<16x1xf32>
    %cst_8 = arith.constant 2.560000e+02 : f32
    %14 = vector.broadcast %cst_8 : f32 to vector<16x1xf32>
    %15 = arith.divf %13, %14 : vector<16x1xf32>
    %16 = vector.broadcast %8 : vector<16x1xf32> to vector<16x256xf32>
    %17 = arith.subf %2, %16 : vector<16x256xf32>
    %cst_9 = arith.constant 9.99999974E-6 : f32
    %18 = vector.broadcast %cst_9 : f32 to vector<16x1xf32>
    %19 = arith.addf %15, %18 : vector<16x1xf32>
    %20 = math.rsqrt %19 : vector<16x1xf32>
    %21 = vector.broadcast %20 : vector<16x1xf32> to vector<16x256xf32>
    %22 = arith.mulf %17, %21 : vector<16x256xf32>
    %23 = vector.broadcast %3 : vector<1x256xf32> to vector<16x256xf32>
    %24 = arith.mulf %22, %23 : vector<16x256xf32>
    %25 = vector.broadcast %4 : vector<1x256xf32> to vector<16x256xf32>
    %26 = arith.addf %24, %25 : vector<16x256xf32>
    %27 = arith.truncf %26 : vector<16x256xf32> to vector<16x256xbf16>
    %c0_10 = arith.constant 0 : index
    %c0_11 = arith.constant 0 : index
    %c0_12 = arith.constant 0 : index
    %28 = vector.load %arg4[%c0_10, %c0_11, %c0_12] : memref<8x256x32xbf16, #tpu.memory_space<vmem>>, vector<1x256x32xbf16>
    %29 = vector.shape_cast %28 : vector<1x256x32xbf16> to vector<256x32xbf16>
    %cst_13 = arith.constant dense<0.000000e+00> : vector<16x32xf32>
    %30 = tpu.matmul %27, %29, %cst_13 {dimension_numbers = #tpu.dot_dimension_numbers<[1], [0], [0], [1], [0, 0, 1, 1], [], []>} : vector<16x256xbf16>, vector<256x32xbf16>, vector<16x32xf32> -> vector<16x32xf32>
    %c0_14 = arith.constant 0 : index
    %c0_15 = arith.constant 0 : index
    %c0_16 = arith.constant 0 : index
    %31 = vector.load %arg7[%c0_14, %c0_15, %c0_16] : memref<8x1x32xf32, #tpu.memory_space<vmem>>, vector<1x1x32xf32>
    %32 = vector.shape_cast %31 : vector<1x1x32xf32> to vector<1x32xf32>
    %33 = vector.broadcast %32 : vector<1x32xf32> to vector<16x32xf32>
    %34 = arith.addf %30, %33 : vector<16x32xf32>
    %c0_17 = arith.constant 0 : index
    %c0_18 = arith.constant 0 : index
    %c0_19 = arith.constant 0 : index
    %35 = vector.load %arg5[%c0_17, %c0_18, %c0_19] : memref<8x256x32xbf16, #tpu.memory_space<vmem>>, vector<1x256x32xbf16>
    %36 = vector.shape_cast %35 : vector<1x256x32xbf16> to vector<256x32xbf16>
    %cst_20 = arith.constant dense<0.000000e+00> : vector<16x32xf32>
    %37 = tpu.matmul %27, %36, %cst_20 {dimension_numbers = #tpu.dot_dimension_numbers<[1], [0], [0], [1], [0, 0, 1, 1], [], []>} : vector<16x256xbf16>, vector<256x32xbf16>, vector<16x32xf32> -> vector<16x32xf32>
    %c0_21 = arith.constant 0 : index
    %c0_22 = arith.constant 0 : index
    %c0_23 = arith.constant 0 : index
    %38 = vector.load %arg8[%c0_21, %c0_22, %c0_23] : memref<8x1x32xf32, #tpu.memory_space<vmem>>, vector<1x1x32xf32>
    %39 = vector.shape_cast %38 : vector<1x1x32xf32> to vector<1x32xf32>
    %40 = vector.broadcast %39 : vector<1x32xf32> to vector<16x32xf32>
    %41 = arith.addf %37, %40 : vector<16x32xf32>
    %c0_24 = arith.constant 0 : index
    %c0_25 = arith.constant 0 : index
    %c0_26 = arith.constant 0 : index
    %42 = vector.load %arg6[%c0_24, %c0_25, %c0_26] : memref<8x256x32xbf16, #tpu.memory_space<vmem>>, vector<1x256x32xbf16>
    %43 = vector.shape_cast %42 : vector<1x256x32xbf16> to vector<256x32xbf16>
    %cst_27 = arith.constant dense<0.000000e+00> : vector<16x32xf32>
    %44 = tpu.matmul %27, %43, %cst_27 {dimension_numbers = #tpu.dot_dimension_numbers<[1], [0], [0], [1], [0, 0, 1, 1], [], []>} : vector<16x256xbf16>, vector<256x32xbf16>, vector<16x32xf32> -> vector<16x32xf32>
    %c0_28 = arith.constant 0 : index
    %c0_29 = arith.constant 0 : index
    %c0_30 = arith.constant 0 : index
    %45 = vector.load %arg9[%c0_28, %c0_29, %c0_30] : memref<8x1x32xf32, #tpu.memory_space<vmem>>, vector<1x1x32xf32>
    %46 = vector.shape_cast %45 : vector<1x1x32xf32> to vector<1x32xf32>
    %47 = vector.broadcast %46 : vector<1x32xf32> to vector<16x32xf32>
    %48 = arith.addf %44, %47 : vector<16x32xf32>
    %49 = arith.truncf %34 : vector<16x32xf32> to vector<16x32xbf16>
    %50 = arith.truncf %41 : vector<16x32xf32> to vector<16x32xbf16>
    %cst_31 = arith.constant dense<0.000000e+00> : vector<16x16xf32>
    %51 = tpu.matmul %49, %50, %cst_31 {dimension_numbers = #tpu.dot_dimension_numbers<[1], [1], [0], [0], [0, 0, 1, 0], [], []>} : vector<16x32xbf16>, vector<16x32xbf16>, vector<16x16xf32> -> vector<16x16xf32>
    %cst_32 = arith.constant dense<0xFF800000> : vector<16xf32>
    %52 = vector.multi_reduction <maximumf>, %51, %cst_32 [1] : vector<16x16xf32> to vector<16xf32>
    %53 = vector.shape_cast %52 : vector<16xf32> to vector<16x1xf32>
    %54 = vector.broadcast %53 : vector<16x1xf32> to vector<16x16xf32>
    %55 = arith.subf %51, %54 : vector<16x16xf32>
    %56 = math.exp %55 : vector<16x16xf32>
    %cst_33 = arith.constant dense<0.000000e+00> : vector<16xf32>
    %57 = vector.multi_reduction <add>, %56, %cst_33 [1] : vector<16x16xf32> to vector<16xf32>
    %58 = vector.shape_cast %57 : vector<16xf32> to vector<16x1xf32>
    %59 = tpu.reciprocal %58 {approx = true} : vector<16x1xf32> -> vector<16x1xf32>
    %60 = vector.broadcast %59 : vector<16x1xf32> to vector<16x16xf32>
    %61 = arith.mulf %56, %60 : vector<16x16xf32>
    %62 = arith.truncf %61 : vector<16x16xf32> to vector<16x16xbf16>
    %63 = arith.truncf %48 : vector<16x32xf32> to vector<16x32xbf16>
    %cst_34 = arith.constant dense<0.000000e+00> : vector<16x32xf32>
    %64 = tpu.matmul %62, %63, %cst_34 {dimension_numbers = #tpu.dot_dimension_numbers<[1], [0], [0], [1], [0, 0, 1, 1], [], []>} : vector<16x16xbf16>, vector<16x32xbf16>, vector<16x32xf32> -> vector<16x32xf32>
    %65 = arith.truncf %64 : vector<16x32xf32> to vector<16x32xbf16>
    %c0_35 = arith.constant 0 : index
    %c0_36 = arith.constant 0 : index
    %66 = vector.load %arg19[%c0_35, %c0_36] : memref<16x256xbf16, #tpu.memory_space<vmem>>, vector<16x32xbf16>
    tpu.vector_store %arg19[%c0_35, %c0_36], %65 {strides = array<i32>} : memref<16x256xbf16, #tpu.memory_space<vmem>>, vector<16x32xbf16>,
    %c1 = arith.constant 1 : index
    %c0_37 = arith.constant 0 : index
    %c0_38 = arith.constant 0 : index
    %67 = vector.load %arg4[%c1, %c0_37, %c0_38] : memref<8x256x32xbf16, #tpu.memory_space<vmem>>, vector<1x256x32xbf16>
    %68 = vector.shape_cast %67 : vector<1x256x32xbf16> to vector<256x32xbf16>
    %cst_39 = arith.constant dense<0.000000e+00> : vector<16x32xf32>
    %69 = tpu.matmul %27, %68, %cst_39 {dimension_numbers = #tpu.dot_dimension_numbers<[1], [0], [0], [1], [0, 0, 1, 1], [], []>} : vector<16x256xbf16>, vector<256x32xbf16>, vector<16x32xf32> -> vector<16x32xf32>
    %c1_40 = arith.constant 1 : index
    %c0_41 = arith.constant 0 : index
    %c0_42 = arith.constant 0 : index
    %70 = vector.load %arg7[%c1_40, %c0_41, %c0_42] : memref<8x1x32xf32, #tpu.memory_space<vmem>>, vector<1x1x32xf32>
    %71 = vector.shape_cast %70 : vector<1x1x32xf32> to vector<1x32xf32>
    %72 = vector.broadcast %71 : vector<1x32xf32> to vector<16x32xf32>
    %73 = arith.addf %69, %72 : vector<16x32xf32>
    %c1_43 = arith.constant 1 : index
    %c0_44 = arith.constant 0 : index
    %c0_45 = arith.constant 0 : index
    %74 = vector.load %arg5[%c1_43, %c0_44, %c0_45] : memref<8x256x32xbf16, #tpu.memory_space<vmem>>, vector<1x256x32xbf16>
    %75 = vector.shape_cast %74 : vector<1x256x32xbf16> to vector<256x32xbf16>
    %cst_46 = arith.constant dense<0.000000e+00> : vector<16x32xf32>
    %76 = tpu.matmul %27, %75, %cst_46 {dimension_numbers = #tpu.dot_dimension_numbers<[1], [0], [0], [1], [0, 0, 1, 1], [], []>} : vector<16x256xbf16>, vector<256x32xbf16>, vector<16x32xf32> -> vector<16x32xf32>
    %c1_47 = arith.constant 1 : index
    %c0_48 = arith.constant 0 : index
    %c0_49 = arith.constant 0 : index
    %77 = vector.load %arg8[%c1_47, %c0_48, %c0_49] : memref<8x1x32xf32, #tpu.memory_space<vmem>>, vector<1x1x32xf32>
    %78 = vector.shape_cast %77 : vector<1x1x32xf32> to vector<1x32xf32>
    %79 = vector.broadcast %78 : vector<1x32xf32> to vector<16x32xf32>
    %80 = arith.addf %76, %79 : vector<16x32xf32>
    %c1_50 = arith.constant 1 : index
    %c0_51 = arith.constant 0 : index
    %c0_52 = arith.constant 0 : index
    %81 = vector.load %arg6[%c1_50, %c0_51, %c0_52] : memref<8x256x32xbf16, #tpu.memory_space<vmem>>, vector<1x256x32xbf16>
    %82 = vector.shape_cast %81 : vector<1x256x32xbf16> to vector<256x32xbf16>
    %cst_53 = arith.constant dense<0.000000e+00> : vector<16x32xf32>
    %83 = tpu.matmul %27, %82, %cst_53 {dimension_numbers = #tpu.dot_dimension_numbers<[1], [0], [0], [1], [0, 0, 1, 1], [], []>} : vector<16x256xbf16>, vector<256x32xbf16>, vector<16x32xf32> -> vector<16x32xf32>
    %c1_54 = arith.constant 1 : index
    %c0_55 = arith.constant 0 : index
    %c0_56 = arith.constant 0 : index
    %84 = vector.load %arg9[%c1_54, %c0_55, %c0_56] : memref<8x1x32xf32, #tpu.memory_space<vmem>>, vector<1x1x32xf32>
    %85 = vector.shape_cast %84 : vector<1x1x32xf32> to vector<1x32xf32>
    %86 = vector.broadcast %85 : vector<1x32xf32> to vector<16x32xf32>
    %87 = arith.addf %83, %86 : vector<16x32xf32>
    %88 = arith.truncf %73 : vector<16x32xf32> to vector<16x32xbf16>
    %89 = arith.truncf %80 : vector<16x32xf32> to vector<16x32xbf16>
    %cst_57 = arith.constant dense<0.000000e+00> : vector<16x16xf32>
    %90 = tpu.matmul %88, %89, %cst_57 {dimension_numbers = #tpu.dot_dimension_numbers<[1], [1], [0], [0], [0, 0, 1, 0], [], []>} : vector<16x32xbf16>, vector<16x32xbf16>, vector<16x16xf32> -> vector<16x16xf32>
    %cst_58 = arith.constant dense<0xFF800000> : vector<16xf32>
    %91 = vector.multi_reduction <maximumf>, %90, %cst_58 [1] : vector<16x16xf32> to vector<16xf32>
    %92 = vector.shape_cast %91 : vector<16xf32> to vector<16x1xf32>
    %93 = vector.broadcast %92 : vector<16x1xf32> to vector<16x16xf32>
    %94 = arith.subf %90, %93 : vector<16x16xf32>
    %95 = math.exp %94 : vector<16x16xf32>
    %cst_59 = arith.constant dense<0.000000e+00> : vector<16xf32>
    %96 = vector.multi_reduction <add>, %95, %cst_59 [1] : vector<16x16xf32> to vector<16xf32>
    %97 = vector.shape_cast %96 : vector<16xf32> to vector<16x1xf32>
    %98 = tpu.reciprocal %97 {approx = true} : vector<16x1xf32> -> vector<16x1xf32>
    %99 = vector.broadcast %98 : vector<16x1xf32> to vector<16x16xf32>
    %100 = arith.mulf %95, %99 : vector<16x16xf32>
    %101 = arith.truncf %100 : vector<16x16xf32> to vector<16x16xbf16>
    %102 = arith.truncf %87 : vector<16x32xf32> to vector<16x32xbf16>
    %cst_60 = arith.constant dense<0.000000e+00> : vector<16x32xf32>
    %103 = tpu.matmul %101, %102, %cst_60 {dimension_numbers = #tpu.dot_dimension_numbers<[1], [0], [0], [1], [0, 0, 1, 1], [], []>} : vector<16x16xbf16>, vector<16x32xbf16>, vector<16x32xf32> -> vector<16x32xf32>
    %104 = arith.truncf %103 : vector<16x32xf32> to vector<16x32xbf16>
    %c0_61 = arith.constant 0 : index
    %c32 = arith.constant 32 : index
    %105 = vector.load %arg19[%c0_61, %c32] : memref<16x256xbf16, #tpu.memory_space<vmem>>, vector<16x32xbf16>
    tpu.vector_store %arg19[%c0_61, %c32], %104 {strides = array<i32>} : memref<16x256xbf16, #tpu.memory_space<vmem>>, vector<16x32xbf16>,
    %c2 = arith.constant 2 : index
    %c0_62 = arith.constant 0 : index
    %c0_63 = arith.constant 0 : index
    %106 = vector.load %arg4[%c2, %c0_62, %c0_63] : memref<8x256x32xbf16, #tpu.memory_space<vmem>>, vector<1x256x32xbf16>
    %107 = vector.shape_cast %106 : vector<1x256x32xbf16> to vector<256x32xbf16>
    %cst_64 = arith.constant dense<0.000000e+00> : vector<16x32xf32>
    %108 = tpu.matmul %27, %107, %cst_64 {dimension_numbers = #tpu.dot_dimension_numbers<[1], [0], [0], [1], [0, 0, 1, 1], [], []>} : vector<16x256xbf16>, vector<256x32xbf16>, vector<16x32xf32> -> vector<16x32xf32>
    %c2_65 = arith.constant 2 : index
    %c0_66 = arith.constant 0 : index
    %c0_67 = arith.constant 0 : index
    %109 = vector.load %arg7[%c2_65, %c0_66, %c0_67] : memref<8x1x32xf32, #tpu.memory_space<vmem>>, vector<1x1x32xf32>
    %110 = vector.shape_cast %109 : vector<1x1x32xf32> to vector<1x32xf32>
    %111 = vector.broadcast %110 : vector<1x32xf32> to vector<16x32xf32>
    %112 = arith.addf %108, %111 : vector<16x32xf32>
    %c2_68 = arith.constant 2 : index
    %c0_69 = arith.constant 0 : index
    %c0_70 = arith.constant 0 : index
    %113 = vector.load %arg5[%c2_68, %c0_69, %c0_70] : memref<8x256x32xbf16, #tpu.memory_space<vmem>>, vector<1x256x32xbf16>
    %114 = vector.shape_cast %113 : vector<1x256x32xbf16> to vector<256x32xbf16>
    %cst_71 = arith.constant dense<0.000000e+00> : vector<16x32xf32>
    %115 = tpu.matmul %27, %114, %cst_71 {dimension_numbers = #tpu.dot_dimension_numbers<[1], [0], [0], [1], [0, 0, 1, 1], [], []>} : vector<16x256xbf16>, vector<256x32xbf16>, vector<16x32xf32> -> vector<16x32xf32>
    %c2_72 = arith.constant 2 : index
    %c0_73 = arith.constant 0 : index
    %c0_74 = arith.constant 0 : index
    %116 = vector.load %arg8[%c2_72, %c0_73, %c0_74] : memref<8x1x32xf32, #tpu.memory_space<vmem>>, vector<1x1x32xf32>
    %117 = vector.shape_cast %116 : vector<1x1x32xf32> to vector<1x32xf32>
    %118 = vector.broadcast %117 : vector<1x32xf32> to vector<16x32xf32>
    %119 = arith.addf %115, %118 : vector<16x32xf32>
    %c2_75 = arith.constant 2 : index
    %c0_76 = arith.constant 0 : index
    %c0_77 = arith.constant 0 : index
    %120 = vector.load %arg6[%c2_75, %c0_76, %c0_77] : memref<8x256x32xbf16, #tpu.memory_space<vmem>>, vector<1x256x32xbf16>
    %121 = vector.shape_cast %120 : vector<1x256x32xbf16> to vector<256x32xbf16>
    %cst_78 = arith.constant dense<0.000000e+00> : vector<16x32xf32>
    %122 = tpu.matmul %27, %121, %cst_78 {dimension_numbers = #tpu.dot_dimension_numbers<[1], [0], [0], [1], [0, 0, 1, 1], [], []>} : vector<16x256xbf16>, vector<256x32xbf16>, vector<16x32xf32> -> vector<16x32xf32>
    %c2_79 = arith.constant 2 : index
    %c0_80 = arith.constant 0 : index
    %c0_81 = arith.constant 0 : index
    %123 = vector.load %arg9[%c2_79, %c0_80, %c0_81] : memref<8x1x32xf32, #tpu.memory_space<vmem>>, vector<1x1x32xf32>
    %124 = vector.shape_cast %123 : vector<1x1x32xf32> to vector<1x32xf32>
    %125 = vector.broadcast %124 : vector<1x32xf32> to vector<16x32xf32>
    %126 = arith.addf %122, %125 : vector<16x32xf32>
    %127 = arith.truncf %112 : vector<16x32xf32> to vector<16x32xbf16>
    %128 = arith.truncf %119 : vector<16x32xf32> to vector<16x32xbf16>
    %cst_82 = arith.constant dense<0.000000e+00> : vector<16x16xf32>
    %129 = tpu.matmul %127, %128, %cst_82 {dimension_numbers = #tpu.dot_dimension_numbers<[1], [1], [0], [0], [0, 0, 1, 0], [], []>} : vector<16x32xbf16>, vector<16x32xbf16>, vector<16x16xf32> -> vector<16x16xf32>
    %cst_83 = arith.constant dense<0xFF800000> : vector<16xf32>
    %130 = vector.multi_reduction <maximumf>, %129, %cst_83 [1] : vector<16x16xf32> to vector<16xf32>
    %131 = vector.shape_cast %130 : vector<16xf32> to vector<16x1xf32>
    %132 = vector.broadcast %131 : vector<16x1xf32> to vector<16x16xf32>
    %133 = arith.subf %129, %132 : vector<16x16xf32>
    %134 = math.exp %133 : vector<16x16xf32>
    %cst_84 = arith.constant dense<0.000000e+00> : vector<16xf32>
    %135 = vector.multi_reduction <add>, %134, %cst_84 [1] : vector<16x16xf32> to vector<16xf32>
    %136 = vector.shape_cast %135 : vector<16xf32> to vector<16x1xf32>
    %137 = tpu.reciprocal %136 {approx = true} : vector<16x1xf32> -> vector<16x1xf32>
    %138 = vector.broadcast %137 : vector<16x1xf32> to vector<16x16xf32>
    %139 = arith.mulf %134, %138 : vector<16x16xf32>
    %140 = arith.truncf %139 : vector<16x16xf32> to vector<16x16xbf16>
    %141 = arith.truncf %126 : vector<16x32xf32> to vector<16x32xbf16>
    %cst_85 = arith.constant dense<0.000000e+00> : vector<16x32xf32>
    %142 = tpu.matmul %140, %141, %cst_85 {dimension_numbers = #tpu.dot_dimension_numbers<[1], [0], [0], [1], [0, 0, 1, 1], [], []>} : vector<16x16xbf16>, vector<16x32xbf16>, vector<16x32xf32> -> vector<16x32xf32>
    %143 = arith.truncf %142 : vector<16x32xf32> to vector<16x32xbf16>
    %c0_86 = arith.constant 0 : index
    %c64 = arith.constant 64 : index
    %144 = vector.load %arg19[%c0_86, %c64] : memref<16x256xbf16, #tpu.memory_space<vmem>>, vector<16x32xbf16>
    tpu.vector_store %arg19[%c0_86, %c64], %143 {strides = array<i32>} : memref<16x256xbf16, #tpu.memory_space<vmem>>, vector<16x32xbf16>,
    %c3 = arith.constant 3 : index
    %c0_87 = arith.constant 0 : index
    %c0_88 = arith.constant 0 : index
    %145 = vector.load %arg4[%c3, %c0_87, %c0_88] : memref<8x256x32xbf16, #tpu.memory_space<vmem>>, vector<1x256x32xbf16>
    %146 = vector.shape_cast %145 : vector<1x256x32xbf16> to vector<256x32xbf16>
    %cst_89 = arith.constant dense<0.000000e+00> : vector<16x32xf32>
    %147 = tpu.matmul %27, %146, %cst_89 {dimension_numbers = #tpu.dot_dimension_numbers<[1], [0], [0], [1], [0, 0, 1, 1], [], []>} : vector<16x256xbf16>, vector<256x32xbf16>, vector<16x32xf32> -> vector<16x32xf32>
    %c3_90 = arith.constant 3 : index
    %c0_91 = arith.constant 0 : index
    %c0_92 = arith.constant 0 : index
    %148 = vector.load %arg7[%c3_90, %c0_91, %c0_92] : memref<8x1x32xf32, #tpu.memory_space<vmem>>, vector<1x1x32xf32>
    %149 = vector.shape_cast %148 : vector<1x1x32xf32> to vector<1x32xf32>
    %150 = vector.broadcast %149 : vector<1x32xf32> to vector<16x32xf32>
    %151 = arith.addf %147, %150 : vector<16x32xf32>
    %c3_93 = arith.constant 3 : index
    %c0_94 = arith.constant 0 : index
    %c0_95 = arith.constant 0 : index
    %152 = vector.load %arg5[%c3_93, %c0_94, %c0_95] : memref<8x256x32xbf16, #tpu.memory_space<vmem>>, vector<1x256x32xbf16>
    %153 = vector.shape_cast %152 : vector<1x256x32xbf16> to vector<256x32xbf16>
    %cst_96 = arith.constant dense<0.000000e+00> : vector<16x32xf32>
    %154 = tpu.matmul %27, %153, %cst_96 {dimension_numbers = #tpu.dot_dimension_numbers<[1], [0], [0], [1], [0, 0, 1, 1], [], []>} : vector<16x256xbf16>, vector<256x32xbf16>, vector<16x32xf32> -> vector<16x32xf32>
    %c3_97 = arith.constant 3 : index
    %c0_98 = arith.constant 0 : index
    %c0_99 = arith.constant 0 : index
    %155 = vector.load %arg8[%c3_97, %c0_98, %c0_99] : memref<8x1x32xf32, #tpu.memory_space<vmem>>, vector<1x1x32xf32>
    %156 = vector.shape_cast %155 : vector<1x1x32xf32> to vector<1x32xf32>
    %157 = vector.broadcast %156 : vector<1x32xf32> to vector<16x32xf32>
    %158 = arith.addf %154, %157 : vector<16x32xf32>
    %c3_100 = arith.constant 3 : index
    %c0_101 = arith.constant 0 : index
    %c0_102 = arith.constant 0 : index
    %159 = vector.load %arg6[%c3_100, %c0_101, %c0_102] : memref<8x256x32xbf16, #tpu.memory_space<vmem>>, vector<1x256x32xbf16>
    %160 = vector.shape_cast %159 : vector<1x256x32xbf16> to vector<256x32xbf16>
    %cst_103 = arith.constant dense<0.000000e+00> : vector<16x32xf32>
    %161 = tpu.matmul %27, %160, %cst_103 {dimension_numbers = #tpu.dot_dimension_numbers<[1], [0], [0], [1], [0, 0, 1, 1], [], []>} : vector<16x256xbf16>, vector<256x32xbf16>, vector<16x32xf32> -> vector<16x32xf32>
    %c3_104 = arith.constant 3 : index
    %c0_105 = arith.constant 0 : index
    %c0_106 = arith.constant 0 : index
    %162 = vector.load %arg9[%c3_104, %c0_105, %c0_106] : memref<8x1x32xf32, #tpu.memory_space<vmem>>, vector<1x1x32xf32>
    %163 = vector.shape_cast %162 : vector<1x1x32xf32> to vector<1x32xf32>
    %164 = vector.broadcast %163 : vector<1x32xf32> to vector<16x32xf32>
    %165 = arith.addf %161, %164 : vector<16x32xf32>
    %166 = arith.truncf %151 : vector<16x32xf32> to vector<16x32xbf16>
    %167 = arith.truncf %158 : vector<16x32xf32> to vector<16x32xbf16>
    %cst_107 = arith.constant dense<0.000000e+00> : vector<16x16xf32>
    %168 = tpu.matmul %166, %167, %cst_107 {dimension_numbers = #tpu.dot_dimension_numbers<[1], [1], [0], [0], [0, 0, 1, 0], [], []>} : vector<16x32xbf16>, vector<16x32xbf16>, vector<16x16xf32> -> vector<16x16xf32>
    %cst_108 = arith.constant dense<0xFF800000> : vector<16xf32>
    %169 = vector.multi_reduction <maximumf>, %168, %cst_108 [1] : vector<16x16xf32> to vector<16xf32>
    %170 = vector.shape_cast %169 : vector<16xf32> to vector<16x1xf32>
    %171 = vector.broadcast %170 : vector<16x1xf32> to vector<16x16xf32>
    %172 = arith.subf %168, %171 : vector<16x16xf32>
    %173 = math.exp %172 : vector<16x16xf32>
    %cst_109 = arith.constant dense<0.000000e+00> : vector<16xf32>
    %174 = vector.multi_reduction <add>, %173, %cst_109 [1] : vector<16x16xf32> to vector<16xf32>
    %175 = vector.shape_cast %174 : vector<16xf32> to vector<16x1xf32>
    %176 = tpu.reciprocal %175 {approx = true} : vector<16x1xf32> -> vector<16x1xf32>
    %177 = vector.broadcast %176 : vector<16x1xf32> to vector<16x16xf32>
    %178 = arith.mulf %173, %177 : vector<16x16xf32>
    %179 = arith.truncf %178 : vector<16x16xf32> to vector<16x16xbf16>
    %180 = arith.truncf %165 : vector<16x32xf32> to vector<16x32xbf16>
    %cst_110 = arith.constant dense<0.000000e+00> : vector<16x32xf32>
    %181 = tpu.matmul %179, %180, %cst_110 {dimension_numbers = #tpu.dot_dimension_numbers<[1], [0], [0], [1], [0, 0, 1, 1], [], []>} : vector<16x16xbf16>, vector<16x32xbf16>, vector<16x32xf32> -> vector<16x32xf32>
    %182 = arith.truncf %181 : vector<16x32xf32> to vector<16x32xbf16>
    %c0_111 = arith.constant 0 : index
    %c96 = arith.constant 96 : index
    %183 = vector.load %arg19[%c0_111, %c96] : memref<16x256xbf16, #tpu.memory_space<vmem>>, vector<16x32xbf16>
    tpu.vector_store %arg19[%c0_111, %c96], %182 {strides = array<i32>} : memref<16x256xbf16, #tpu.memory_space<vmem>>, vector<16x32xbf16>,
    %c4 = arith.constant 4 : index
    %c0_112 = arith.constant 0 : index
    %c0_113 = arith.constant 0 : index
    %184 = vector.load %arg4[%c4, %c0_112, %c0_113] : memref<8x256x32xbf16, #tpu.memory_space<vmem>>, vector<1x256x32xbf16>
    %185 = vector.shape_cast %184 : vector<1x256x32xbf16> to vector<256x32xbf16>
    %cst_114 = arith.constant dense<0.000000e+00> : vector<16x32xf32>
    %186 = tpu.matmul %27, %185, %cst_114 {dimension_numbers = #tpu.dot_dimension_numbers<[1], [0], [0], [1], [0, 0, 1, 1], [], []>} : vector<16x256xbf16>, vector<256x32xbf16>, vector<16x32xf32> -> vector<16x32xf32>
    %c4_115 = arith.constant 4 : index
    %c0_116 = arith.constant 0 : index
    %c0_117 = arith.constant 0 : index
    %187 = vector.load %arg7[%c4_115, %c0_116, %c0_117] : memref<8x1x32xf32, #tpu.memory_space<vmem>>, vector<1x1x32xf32>
    %188 = vector.shape_cast %187 : vector<1x1x32xf32> to vector<1x32xf32>
    %189 = vector.broadcast %188 : vector<1x32xf32> to vector<16x32xf32>
    %190 = arith.addf %186, %189 : vector<16x32xf32>
    %c4_118 = arith.constant 4 : index
    %c0_119 = arith.constant 0 : index
    %c0_120 = arith.constant 0 : index
    %191 = vector.load %arg5[%c4_118, %c0_119, %c0_120] : memref<8x256x32xbf16, #tpu.memory_space<vmem>>, vector<1x256x32xbf16>
    %192 = vector.shape_cast %191 : vector<1x256x32xbf16> to vector<256x32xbf16>
    %cst_121 = arith.constant dense<0.000000e+00> : vector<16x32xf32>
    %193 = tpu.matmul %27, %192, %cst_121 {dimension_numbers = #tpu.dot_dimension_numbers<[1], [0], [0], [1], [0, 0, 1, 1], [], []>} : vector<16x256xbf16>, vector<256x32xbf16>, vector<16x32xf32> -> vector<16x32xf32>
    %c4_122 = arith.constant 4 : index
    %c0_123 = arith.constant 0 : index
    %c0_124 = arith.constant 0 : index
    %194 = vector.load %arg8[%c4_122, %c0_123, %c0_124] : memref<8x1x32xf32, #tpu.memory_space<vmem>>, vector<1x1x32xf32>
    %195 = vector.shape_cast %194 : vector<1x1x32xf32> to vector<1x32xf32>
    %196 = vector.broadcast %195 : vector<1x32xf32> to vector<16x32xf32>
    %197 = arith.addf %193, %196 : vector<16x32xf32>
    %c4_125 = arith.constant 4 : index
    %c0_126 = arith.constant 0 : index
    %c0_127 = arith.constant 0 : index
    %198 = vector.load %arg6[%c4_125, %c0_126, %c0_127] : memref<8x256x32xbf16, #tpu.memory_space<vmem>>, vector<1x256x32xbf16>
    %199 = vector.shape_cast %198 : vector<1x256x32xbf16> to vector<256x32xbf16>
    %cst_128 = arith.constant dense<0.000000e+00> : vector<16x32xf32>
    %200 = tpu.matmul %27, %199, %cst_128 {dimension_numbers = #tpu.dot_dimension_numbers<[1], [0], [0], [1], [0, 0, 1, 1], [], []>} : vector<16x256xbf16>, vector<256x32xbf16>, vector<16x32xf32> -> vector<16x32xf32>
    %c4_129 = arith.constant 4 : index
    %c0_130 = arith.constant 0 : index
    %c0_131 = arith.constant 0 : index
    %201 = vector.load %arg9[%c4_129, %c0_130, %c0_131] : memref<8x1x32xf32, #tpu.memory_space<vmem>>, vector<1x1x32xf32>
    %202 = vector.shape_cast %201 : vector<1x1x32xf32> to vector<1x32xf32>
    %203 = vector.broadcast %202 : vector<1x32xf32> to vector<16x32xf32>
    %204 = arith.addf %200, %203 : vector<16x32xf32>
    %205 = arith.truncf %190 : vector<16x32xf32> to vector<16x32xbf16>
    %206 = arith.truncf %197 : vector<16x32xf32> to vector<16x32xbf16>
    %cst_132 = arith.constant dense<0.000000e+00> : vector<16x16xf32>
    %207 = tpu.matmul %205, %206, %cst_132 {dimension_numbers = #tpu.dot_dimension_numbers<[1], [1], [0], [0], [0, 0, 1, 0], [], []>} : vector<16x32xbf16>, vector<16x32xbf16>, vector<16x16xf32> -> vector<16x16xf32>
    %cst_133 = arith.constant dense<0xFF800000> : vector<16xf32>
    %208 = vector.multi_reduction <maximumf>, %207, %cst_133 [1] : vector<16x16xf32> to vector<16xf32>
    %209 = vector.shape_cast %208 : vector<16xf32> to vector<16x1xf32>
    %210 = vector.broadcast %209 : vector<16x1xf32> to vector<16x16xf32>
    %211 = arith.subf %207, %210 : vector<16x16xf32>
    %212 = math.exp %211 : vector<16x16xf32>
    %cst_134 = arith.constant dense<0.000000e+00> : vector<16xf32>
    %213 = vector.multi_reduction <add>, %212, %cst_134 [1] : vector<16x16xf32> to vector<16xf32>
    %214 = vector.shape_cast %213 : vector<16xf32> to vector<16x1xf32>
    %215 = tpu.reciprocal %214 {approx = true} : vector<16x1xf32> -> vector<16x1xf32>
    %216 = vector.broadcast %215 : vector<16x1xf32> to vector<16x16xf32>
    %217 = arith.mulf %212, %216 : vector<16x16xf32>
    %218 = arith.truncf %217 : vector<16x16xf32> to vector<16x16xbf16>
    %219 = arith.truncf %204 : vector<16x32xf32> to vector<16x32xbf16>
    %cst_135 = arith.constant dense<0.000000e+00> : vector<16x32xf32>
    %220 = tpu.matmul %218, %219, %cst_135 {dimension_numbers = #tpu.dot_dimension_numbers<[1], [0], [0], [1], [0, 0, 1, 1], [], []>} : vector<16x16xbf16>, vector<16x32xbf16>, vector<16x32xf32> -> vector<16x32xf32>
    %221 = arith.truncf %220 : vector<16x32xf32> to vector<16x32xbf16>
    %c0_136 = arith.constant 0 : index
    %c128 = arith.constant 128 : index
    %222 = vector.load %arg19[%c0_136, %c128] : memref<16x256xbf16, #tpu.memory_space<vmem>>, vector<16x32xbf16>
    tpu.vector_store %arg19[%c0_136, %c128], %221 {strides = array<i32>} : memref<16x256xbf16, #tpu.memory_space<vmem>>, vector<16x32xbf16>,
    %c5 = arith.constant 5 : index
    %c0_137 = arith.constant 0 : index
    %c0_138 = arith.constant 0 : index
    %223 = vector.load %arg4[%c5, %c0_137, %c0_138] : memref<8x256x32xbf16, #tpu.memory_space<vmem>>, vector<1x256x32xbf16>
    %224 = vector.shape_cast %223 : vector<1x256x32xbf16> to vector<256x32xbf16>
    %cst_139 = arith.constant dense<0.000000e+00> : vector<16x32xf32>
    %225 = tpu.matmul %27, %224, %cst_139 {dimension_numbers = #tpu.dot_dimension_numbers<[1], [0], [0], [1], [0, 0, 1, 1], [], []>} : vector<16x256xbf16>, vector<256x32xbf16>, vector<16x32xf32> -> vector<16x32xf32>
    %c5_140 = arith.constant 5 : index
    %c0_141 = arith.constant 0 : index
    %c0_142 = arith.constant 0 : index
    %226 = vector.load %arg7[%c5_140, %c0_141, %c0_142] : memref<8x1x32xf32, #tpu.memory_space<vmem>>, vector<1x1x32xf32>
    %227 = vector.shape_cast %226 : vector<1x1x32xf32> to vector<1x32xf32>
    %228 = vector.broadcast %227 : vector<1x32xf32> to vector<16x32xf32>
    %229 = arith.addf %225, %228 : vector<16x32xf32>
    %c5_143 = arith.constant 5 : index
    %c0_144 = arith.constant 0 : index
    %c0_145 = arith.constant 0 : index
    %230 = vector.load %arg5[%c5_143, %c0_144, %c0_145] : memref<8x256x32xbf16, #tpu.memory_space<vmem>>, vector<1x256x32xbf16>
    %231 = vector.shape_cast %230 : vector<1x256x32xbf16> to vector<256x32xbf16>
    %cst_146 = arith.constant dense<0.000000e+00> : vector<16x32xf32>
    %232 = tpu.matmul %27, %231, %cst_146 {dimension_numbers = #tpu.dot_dimension_numbers<[1], [0], [0], [1], [0, 0, 1, 1], [], []>} : vector<16x256xbf16>, vector<256x32xbf16>, vector<16x32xf32> -> vector<16x32xf32>
    %c5_147 = arith.constant 5 : index
    %c0_148 = arith.constant 0 : index
    %c0_149 = arith.constant 0 : index
    %233 = vector.load %arg8[%c5_147, %c0_148, %c0_149] : memref<8x1x32xf32, #tpu.memory_space<vmem>>, vector<1x1x32xf32>
    %234 = vector.shape_cast %233 : vector<1x1x32xf32> to vector<1x32xf32>
    %235 = vector.broadcast %234 : vector<1x32xf32> to vector<16x32xf32>
    %236 = arith.addf %232, %235 : vector<16x32xf32>
    %c5_150 = arith.constant 5 : index
    %c0_151 = arith.constant 0 : index
    %c0_152 = arith.constant 0 : index
    %237 = vector.load %arg6[%c5_150, %c0_151, %c0_152] : memref<8x256x32xbf16, #tpu.memory_space<vmem>>, vector<1x256x32xbf16>
    %238 = vector.shape_cast %237 : vector<1x256x32xbf16> to vector<256x32xbf16>
    %cst_153 = arith.constant dense<0.000000e+00> : vector<16x32xf32>
    %239 = tpu.matmul %27, %238, %cst_153 {dimension_numbers = #tpu.dot_dimension_numbers<[1], [0], [0], [1], [0, 0, 1, 1], [], []>} : vector<16x256xbf16>, vector<256x32xbf16>, vector<16x32xf32> -> vector<16x32xf32>
    %c5_154 = arith.constant 5 : index
    %c0_155 = arith.constant 0 : index
    %c0_156 = arith.constant 0 : index
    %240 = vector.load %arg9[%c5_154, %c0_155, %c0_156] : memref<8x1x32xf32, #tpu.memory_space<vmem>>, vector<1x1x32xf32>
    %241 = vector.shape_cast %240 : vector<1x1x32xf32> to vector<1x32xf32>
    %242 = vector.broadcast %241 : vector<1x32xf32> to vector<16x32xf32>
    %243 = arith.addf %239, %242 : vector<16x32xf32>
    %244 = arith.truncf %229 : vector<16x32xf32> to vector<16x32xbf16>
    %245 = arith.truncf %236 : vector<16x32xf32> to vector<16x32xbf16>
    %cst_157 = arith.constant dense<0.000000e+00> : vector<16x16xf32>
    %246 = tpu.matmul %244, %245, %cst_157 {dimension_numbers = #tpu.dot_dimension_numbers<[1], [1], [0], [0], [0, 0, 1, 0], [], []>} : vector<16x32xbf16>, vector<16x32xbf16>, vector<16x16xf32> -> vector<16x16xf32>
    %cst_158 = arith.constant dense<0xFF800000> : vector<16xf32>
    %247 = vector.multi_reduction <maximumf>, %246, %cst_158 [1] : vector<16x16xf32> to vector<16xf32>
    %248 = vector.shape_cast %247 : vector<16xf32> to vector<16x1xf32>
    %249 = vector.broadcast %248 : vector<16x1xf32> to vector<16x16xf32>
    %250 = arith.subf %246, %249 : vector<16x16xf32>
    %251 = math.exp %250 : vector<16x16xf32>
    %cst_159 = arith.constant dense<0.000000e+00> : vector<16xf32>
    %252 = vector.multi_reduction <add>, %251, %cst_159 [1] : vector<16x16xf32> to vector<16xf32>
    %253 = vector.shape_cast %252 : vector<16xf32> to vector<16x1xf32>
    %254 = tpu.reciprocal %253 {approx = true} : vector<16x1xf32> -> vector<16x1xf32>
    %255 = vector.broadcast %254 : vector<16x1xf32> to vector<16x16xf32>
    %256 = arith.mulf %251, %255 : vector<16x16xf32>
    %257 = arith.truncf %256 : vector<16x16xf32> to vector<16x16xbf16>
    %258 = arith.truncf %243 : vector<16x32xf32> to vector<16x32xbf16>
    %cst_160 = arith.constant dense<0.000000e+00> : vector<16x32xf32>
    %259 = tpu.matmul %257, %258, %cst_160 {dimension_numbers = #tpu.dot_dimension_numbers<[1], [0], [0], [1], [0, 0, 1, 1], [], []>} : vector<16x16xbf16>, vector<16x32xbf16>, vector<16x32xf32> -> vector<16x32xf32>
    %260 = arith.truncf %259 : vector<16x32xf32> to vector<16x32xbf16>
    %c0_161 = arith.constant 0 : index
    %c160 = arith.constant 160 : index
    %261 = vector.load %arg19[%c0_161, %c160] : memref<16x256xbf16, #tpu.memory_space<vmem>>, vector<16x32xbf16>
    tpu.vector_store %arg19[%c0_161, %c160], %260 {strides = array<i32>} : memref<16x256xbf16, #tpu.memory_space<vmem>>, vector<16x32xbf16>,
    %c6 = arith.constant 6 : index
    %c0_162 = arith.constant 0 : index
    %c0_163 = arith.constant 0 : index
    %262 = vector.load %arg4[%c6, %c0_162, %c0_163] : memref<8x256x32xbf16, #tpu.memory_space<vmem>>, vector<1x256x32xbf16>
    %263 = vector.shape_cast %262 : vector<1x256x32xbf16> to vector<256x32xbf16>
    %cst_164 = arith.constant dense<0.000000e+00> : vector<16x32xf32>
    %264 = tpu.matmul %27, %263, %cst_164 {dimension_numbers = #tpu.dot_dimension_numbers<[1], [0], [0], [1], [0, 0, 1, 1], [], []>} : vector<16x256xbf16>, vector<256x32xbf16>, vector<16x32xf32> -> vector<16x32xf32>
    %c6_165 = arith.constant 6 : index
    %c0_166 = arith.constant 0 : index
    %c0_167 = arith.constant 0 : index
    %265 = vector.load %arg7[%c6_165, %c0_166, %c0_167] : memref<8x1x32xf32, #tpu.memory_space<vmem>>, vector<1x1x32xf32>
    %266 = vector.shape_cast %265 : vector<1x1x32xf32> to vector<1x32xf32>
    %267 = vector.broadcast %266 : vector<1x32xf32> to vector<16x32xf32>
    %268 = arith.addf %264, %267 : vector<16x32xf32>
    %c6_168 = arith.constant 6 : index
    %c0_169 = arith.constant 0 : index
    %c0_170 = arith.constant 0 : index
    %269 = vector.load %arg5[%c6_168, %c0_169, %c0_170] : memref<8x256x32xbf16, #tpu.memory_space<vmem>>, vector<1x256x32xbf16>
    %270 = vector.shape_cast %269 : vector<1x256x32xbf16> to vector<256x32xbf16>
    %cst_171 = arith.constant dense<0.000000e+00> : vector<16x32xf32>
    %271 = tpu.matmul %27, %270, %cst_171 {dimension_numbers = #tpu.dot_dimension_numbers<[1], [0], [0], [1], [0, 0, 1, 1], [], []>} : vector<16x256xbf16>, vector<256x32xbf16>, vector<16x32xf32> -> vector<16x32xf32>
    %c6_172 = arith.constant 6 : index
    %c0_173 = arith.constant 0 : index
    %c0_174 = arith.constant 0 : index
    %272 = vector.load %arg8[%c6_172, %c0_173, %c0_174] : memref<8x1x32xf32, #tpu.memory_space<vmem>>, vector<1x1x32xf32>
    %273 = vector.shape_cast %272 : vector<1x1x32xf32> to vector<1x32xf32>
    %274 = vector.broadcast %273 : vector<1x32xf32> to vector<16x32xf32>
    %275 = arith.addf %271, %274 : vector<16x32xf32>
    %c6_175 = arith.constant 6 : index
    %c0_176 = arith.constant 0 : index
    %c0_177 = arith.constant 0 : index
    %276 = vector.load %arg6[%c6_175, %c0_176, %c0_177] : memref<8x256x32xbf16, #tpu.memory_space<vmem>>, vector<1x256x32xbf16>
    %277 = vector.shape_cast %276 : vector<1x256x32xbf16> to vector<256x32xbf16>
    %cst_178 = arith.constant dense<0.000000e+00> : vector<16x32xf32>
    %278 = tpu.matmul %27, %277, %cst_178 {dimension_numbers = #tpu.dot_dimension_numbers<[1], [0], [0], [1], [0, 0, 1, 1], [], []>} : vector<16x256xbf16>, vector<256x32xbf16>, vector<16x32xf32> -> vector<16x32xf32>
    %c6_179 = arith.constant 6 : index
    %c0_180 = arith.constant 0 : index
    %c0_181 = arith.constant 0 : index
    %279 = vector.load %arg9[%c6_179, %c0_180, %c0_181] : memref<8x1x32xf32, #tpu.memory_space<vmem>>, vector<1x1x32xf32>
    %280 = vector.shape_cast %279 : vector<1x1x32xf32> to vector<1x32xf32>
    %281 = vector.broadcast %280 : vector<1x32xf32> to vector<16x32xf32>
    %282 = arith.addf %278, %281 : vector<16x32xf32>
    %283 = arith.truncf %268 : vector<16x32xf32> to vector<16x32xbf16>
    %284 = arith.truncf %275 : vector<16x32xf32> to vector<16x32xbf16>
    %cst_182 = arith.constant dense<0.000000e+00> : vector<16x16xf32>
    %285 = tpu.matmul %283, %284, %cst_182 {dimension_numbers = #tpu.dot_dimension_numbers<[1], [1], [0], [0], [0, 0, 1, 0], [], []>} : vector<16x32xbf16>, vector<16x32xbf16>, vector<16x16xf32> -> vector<16x16xf32>
    %cst_183 = arith.constant dense<0xFF800000> : vector<16xf32>
    %286 = vector.multi_reduction <maximumf>, %285, %cst_183 [1] : vector<16x16xf32> to vector<16xf32>
    %287 = vector.shape_cast %286 : vector<16xf32> to vector<16x1xf32>
    %288 = vector.broadcast %287 : vector<16x1xf32> to vector<16x16xf32>
    %289 = arith.subf %285, %288 : vector<16x16xf32>
    %290 = math.exp %289 : vector<16x16xf32>
    %cst_184 = arith.constant dense<0.000000e+00> : vector<16xf32>
    %291 = vector.multi_reduction <add>, %290, %cst_184 [1] : vector<16x16xf32> to vector<16xf32>
    %292 = vector.shape_cast %291 : vector<16xf32> to vector<16x1xf32>
    %293 = tpu.reciprocal %292 {approx = true} : vector<16x1xf32> -> vector<16x1xf32>
    %294 = vector.broadcast %293 : vector<16x1xf32> to vector<16x16xf32>
    %295 = arith.mulf %290, %294 : vector<16x16xf32>
    %296 = arith.truncf %295 : vector<16x16xf32> to vector<16x16xbf16>
    %297 = arith.truncf %282 : vector<16x32xf32> to vector<16x32xbf16>
    %cst_185 = arith.constant dense<0.000000e+00> : vector<16x32xf32>
    %298 = tpu.matmul %296, %297, %cst_185 {dimension_numbers = #tpu.dot_dimension_numbers<[1], [0], [0], [1], [0, 0, 1, 1], [], []>} : vector<16x16xbf16>, vector<16x32xbf16>, vector<16x32xf32> -> vector<16x32xf32>
    %299 = arith.truncf %298 : vector<16x32xf32> to vector<16x32xbf16>
    %c0_186 = arith.constant 0 : index
    %c192 = arith.constant 192 : index
    %300 = vector.load %arg19[%c0_186, %c192] : memref<16x256xbf16, #tpu.memory_space<vmem>>, vector<16x32xbf16>
    tpu.vector_store %arg19[%c0_186, %c192], %299 {strides = array<i32>} : memref<16x256xbf16, #tpu.memory_space<vmem>>, vector<16x32xbf16>,
    %c7 = arith.constant 7 : index
    %c0_187 = arith.constant 0 : index
    %c0_188 = arith.constant 0 : index
    %301 = vector.load %arg4[%c7, %c0_187, %c0_188] : memref<8x256x32xbf16, #tpu.memory_space<vmem>>, vector<1x256x32xbf16>
    %302 = vector.shape_cast %301 : vector<1x256x32xbf16> to vector<256x32xbf16>
    %cst_189 = arith.constant dense<0.000000e+00> : vector<16x32xf32>
    %303 = tpu.matmul %27, %302, %cst_189 {dimension_numbers = #tpu.dot_dimension_numbers<[1], [0], [0], [1], [0, 0, 1, 1], [], []>} : vector<16x256xbf16>, vector<256x32xbf16>, vector<16x32xf32> -> vector<16x32xf32>
    %c7_190 = arith.constant 7 : index
    %c0_191 = arith.constant 0 : index
    %c0_192 = arith.constant 0 : index
    %304 = vector.load %arg7[%c7_190, %c0_191, %c0_192] : memref<8x1x32xf32, #tpu.memory_space<vmem>>, vector<1x1x32xf32>
    %305 = vector.shape_cast %304 : vector<1x1x32xf32> to vector<1x32xf32>
    %306 = vector.broadcast %305 : vector<1x32xf32> to vector<16x32xf32>
    %307 = arith.addf %303, %306 : vector<16x32xf32>
    %c7_193 = arith.constant 7 : index
    %c0_194 = arith.constant 0 : index
    %c0_195 = arith.constant 0 : index
    %308 = vector.load %arg5[%c7_193, %c0_194, %c0_195] : memref<8x256x32xbf16, #tpu.memory_space<vmem>>, vector<1x256x32xbf16>
    %309 = vector.shape_cast %308 : vector<1x256x32xbf16> to vector<256x32xbf16>
    %cst_196 = arith.constant dense<0.000000e+00> : vector<16x32xf32>
    %310 = tpu.matmul %27, %309, %cst_196 {dimension_numbers = #tpu.dot_dimension_numbers<[1], [0], [0], [1], [0, 0, 1, 1], [], []>} : vector<16x256xbf16>, vector<256x32xbf16>, vector<16x32xf32> -> vector<16x32xf32>
    %c7_197 = arith.constant 7 : index
    %c0_198 = arith.constant 0 : index
    %c0_199 = arith.constant 0 : index
    %311 = vector.load %arg8[%c7_197, %c0_198, %c0_199] : memref<8x1x32xf32, #tpu.memory_space<vmem>>, vector<1x1x32xf32>
    %312 = vector.shape_cast %311 : vector<1x1x32xf32> to vector<1x32xf32>
    %313 = vector.broadcast %312 : vector<1x32xf32> to vector<16x32xf32>
    %314 = arith.addf %310, %313 : vector<16x32xf32>
    %c7_200 = arith.constant 7 : index
    %c0_201 = arith.constant 0 : index
    %c0_202 = arith.constant 0 : index
    %315 = vector.load %arg6[%c7_200, %c0_201, %c0_202] : memref<8x256x32xbf16, #tpu.memory_space<vmem>>, vector<1x256x32xbf16>
    %316 = vector.shape_cast %315 : vector<1x256x32xbf16> to vector<256x32xbf16>
    %cst_203 = arith.constant dense<0.000000e+00> : vector<16x32xf32>
    %317 = tpu.matmul %27, %316, %cst_203 {dimension_numbers = #tpu.dot_dimension_numbers<[1], [0], [0], [1], [0, 0, 1, 1], [], []>} : vector<16x256xbf16>, vector<256x32xbf16>, vector<16x32xf32> -> vector<16x32xf32>
    %c7_204 = arith.constant 7 : index
    %c0_205 = arith.constant 0 : index
    %c0_206 = arith.constant 0 : index
    %318 = vector.load %arg9[%c7_204, %c0_205, %c0_206] : memref<8x1x32xf32, #tpu.memory_space<vmem>>, vector<1x1x32xf32>
    %319 = vector.shape_cast %318 : vector<1x1x32xf32> to vector<1x32xf32>
    %320 = vector.broadcast %319 : vector<1x32xf32> to vector<16x32xf32>
    %321 = arith.addf %317, %320 : vector<16x32xf32>
    %322 = arith.truncf %307 : vector<16x32xf32> to vector<16x32xbf16>
    %323 = arith.truncf %314 : vector<16x32xf32> to vector<16x32xbf16>
    %cst_207 = arith.constant dense<0.000000e+00> : vector<16x16xf32>
    %324 = tpu.matmul %322, %323, %cst_207 {dimension_numbers = #tpu.dot_dimension_numbers<[1], [1], [0], [0], [0, 0, 1, 0], [], []>} : vector<16x32xbf16>, vector<16x32xbf16>, vector<16x16xf32> -> vector<16x16xf32>
    %cst_208 = arith.constant dense<0xFF800000> : vector<16xf32>
    %325 = vector.multi_reduction <maximumf>, %324, %cst_208 [1] : vector<16x16xf32> to vector<16xf32>
    %326 = vector.shape_cast %325 : vector<16xf32> to vector<16x1xf32>
    %327 = vector.broadcast %326 : vector<16x1xf32> to vector<16x16xf32>
    %328 = arith.subf %324, %327 : vector<16x16xf32>
    %329 = math.exp %328 : vector<16x16xf32>
    %cst_209 = arith.constant dense<0.000000e+00> : vector<16xf32>
    %330 = vector.multi_reduction <add>, %329, %cst_209 [1] : vector<16x16xf32> to vector<16xf32>
    %331 = vector.shape_cast %330 : vector<16xf32> to vector<16x1xf32>
    %332 = tpu.reciprocal %331 {approx = true} : vector<16x1xf32> -> vector<16x1xf32>
    %333 = vector.broadcast %332 : vector<16x1xf32> to vector<16x16xf32>
    %334 = arith.mulf %329, %333 : vector<16x16xf32>
    %335 = arith.truncf %334 : vector<16x16xf32> to vector<16x16xbf16>
    %336 = arith.truncf %321 : vector<16x32xf32> to vector<16x32xbf16>
    %cst_210 = arith.constant dense<0.000000e+00> : vector<16x32xf32>
    %337 = tpu.matmul %335, %336, %cst_210 {dimension_numbers = #tpu.dot_dimension_numbers<[1], [0], [0], [1], [0, 0, 1, 1], [], []>} : vector<16x16xbf16>, vector<16x32xbf16>, vector<16x32xf32> -> vector<16x32xf32>
    %338 = arith.truncf %337 : vector<16x32xf32> to vector<16x32xbf16>
    %c0_211 = arith.constant 0 : index
    %c224 = arith.constant 224 : index
    %339 = vector.load %arg19[%c0_211, %c224] : memref<16x256xbf16, #tpu.memory_space<vmem>>, vector<16x32xbf16>
    tpu.vector_store %arg19[%c0_211, %c224], %338 {strides = array<i32>} : memref<16x256xbf16, #tpu.memory_space<vmem>>, vector<16x32xbf16>,
    %c0_212 = arith.constant 0 : index
    %c0_213 = arith.constant 0 : index
    %340 = vector.load %arg19[%c0_212, %c0_213] : memref<16x256xbf16, #tpu.memory_space<vmem>>, vector<16x256xbf16>
    %c0_214 = arith.constant 0 : index
    %c0_215 = arith.constant 0 : index
    %341 = vector.load %arg10[%c0_214, %c0_215] : memref<256x256xbf16, #tpu.memory_space<vmem>>, vector<256x256xbf16>
    %cst_216 = arith.constant dense<0.000000e+00> : vector<16x256xf32>
    %342 = tpu.matmul %340, %341, %cst_216 {dimension_numbers = #tpu.dot_dimension_numbers<[1], [0], [0], [1], [0, 0, 1, 1], [], []>} : vector<16x256xbf16>, vector<256x256xbf16>, vector<16x256xf32> -> vector<16x256xf32>
    %c0_217 = arith.constant 0 : index
    %c0_218 = arith.constant 0 : index
    %343 = vector.load %arg11[%c0_217, %c0_218] : memref<1x256xf32, #tpu.memory_space<vmem>>, vector<1x256xf32>
    %344 = vector.broadcast %343 : vector<1x256xf32> to vector<16x256xf32>
    %345 = arith.addf %342, %344 : vector<16x256xf32>
    %346 = arith.addf %2, %345 : vector<16x256xf32>
    %c0_219 = arith.constant 0 : index
    %c0_220 = arith.constant 0 : index
    %347 = vector.load %arg12[%c0_219, %c0_220] : memref<1x256xf32, #tpu.memory_space<vmem>>, vector<1x256xf32>
    %c0_221 = arith.constant 0 : index
    %c0_222 = arith.constant 0 : index
    %348 = vector.load %arg13[%c0_221, %c0_222] : memref<1x256xf32, #tpu.memory_space<vmem>>, vector<1x256xf32>
    %cst_223 = arith.constant dense<0.000000e+00> : vector<16xf32>
    %349 = vector.multi_reduction <add>, %346, %cst_223 [1] : vector<16x256xf32> to vector<16xf32>
    %350 = vector.shape_cast %349 : vector<16xf32> to vector<16x1xf32>
    %cst_224 = arith.constant 2.560000e+02 : f32
    %351 = vector.broadcast %cst_224 : f32 to vector<16x1xf32>
    %352 = arith.divf %350, %351 : vector<16x1xf32>
    %353 = vector.broadcast %352 : vector<16x1xf32> to vector<16x256xf32>
    %354 = arith.subf %346, %353 : vector<16x256xf32>
    %355 = arith.mulf %354, %354 : vector<16x256xf32>
    %cst_225 = arith.constant dense<0.000000e+00> : vector<16xf32>
    %356 = vector.multi_reduction <add>, %355, %cst_225 [1] : vector<16x256xf32> to vector<16xf32>
    %357 = vector.shape_cast %356 : vector<16xf32> to vector<16x1xf32>
    %cst_226 = arith.constant 2.560000e+02 : f32
    %358 = vector.broadcast %cst_226 : f32 to vector<16x1xf32>
    %359 = arith.divf %357, %358 : vector<16x1xf32>
    %360 = vector.broadcast %352 : vector<16x1xf32> to vector<16x256xf32>
    %361 = arith.subf %346, %360 : vector<16x256xf32>
    %cst_227 = arith.constant 9.99999974E-6 : f32
    %362 = vector.broadcast %cst_227 : f32 to vector<16x1xf32>
    %363 = arith.addf %359, %362 : vector<16x1xf32>
    %364 = math.rsqrt %363 : vector<16x1xf32>
    %365 = vector.broadcast %364 : vector<16x1xf32> to vector<16x256xf32>
    %366 = arith.mulf %361, %365 : vector<16x256xf32>
    %367 = vector.broadcast %347 : vector<1x256xf32> to vector<16x256xf32>
    %368 = arith.mulf %366, %367 : vector<16x256xf32>
    %369 = vector.broadcast %348 : vector<1x256xf32> to vector<16x256xf32>
    %370 = arith.addf %368, %369 : vector<16x256xf32>
    %371 = arith.truncf %370 : vector<16x256xf32> to vector<16x256xbf16>
    %c0_228 = arith.constant 0 : index
    %c0_229 = arith.constant 0 : index
    %372 = vector.load %arg14[%c0_228, %c0_229] : memref<256x512xbf16, #tpu.memory_space<vmem>>, vector<256x512xbf16>
    %cst_230 = arith.constant dense<0.000000e+00> : vector<16x512xf32>
    %373 = tpu.matmul %371, %372, %cst_230 {dimension_numbers = #tpu.dot_dimension_numbers<[1], [0], [0], [1], [0, 0, 1, 1], [], []>} : vector<16x256xbf16>, vector<256x512xbf16>, vector<16x512xf32> -> vector<16x512xf32>
    %c0_231 = arith.constant 0 : index
    %c0_232 = arith.constant 0 : index
    %374 = vector.load %arg15[%c0_231, %c0_232] : memref<1x512xf32, #tpu.memory_space<vmem>>, vector<1x512xf32>
    %375 = vector.broadcast %374 : vector<1x512xf32> to vector<16x512xf32>
    %376 = arith.addf %373, %375 : vector<16x512xf32>
    %cst_233 = arith.constant 0.000000e+00 : f32
    %377 = vector.broadcast %cst_233 : f32 to vector<16x512xf32>
    %378 = arith.maximumf %376, %377 : vector<16x512xf32>
    %379 = arith.truncf %378 : vector<16x512xf32> to vector<16x512xbf16>
    %c0_234 = arith.constant 0 : index
    %c0_235 = arith.constant 0 : index
    %380 = vector.load %arg16[%c0_234, %c0_235] : memref<512x256xbf16, #tpu.memory_space<vmem>>, vector<512x256xbf16>
    %cst_236 = arith.constant dense<0.000000e+00> : vector<16x256xf32>
    %381 = tpu.matmul %379, %380, %cst_236 {dimension_numbers = #tpu.dot_dimension_numbers<[1], [0], [0], [1], [0, 0, 1, 1], [], []>} : vector<16x512xbf16>, vector<512x256xbf16>, vector<16x256xf32> -> vector<16x256xf32>
    %c0_237 = arith.constant 0 : index
    %c0_238 = arith.constant 0 : index
    %382 = vector.load %arg17[%c0_237, %c0_238] : memref<1x256xf32, #tpu.memory_space<vmem>>, vector<1x256xf32>
    %383 = vector.broadcast %382 : vector<1x256xf32> to vector<16x256xf32>
    %384 = arith.addf %381, %383 : vector<16x256xf32>
    %385 = arith.addf %346, %384 : vector<16x256xf32>
    %386 = arith.truncf %385 : vector<16x256xf32> to vector<16x256xbf16>
    %c0_239 = arith.constant 0 : index
    %c0_240 = arith.constant 0 : index
    %c0_241 = arith.constant 0 : index
    %387 = vector.load %arg18[%c0_239, %c0_240, %c0_241] : memref<1x16x256xbf16, #tpu.memory_space<vmem>>, vector<1x16x256xbf16>
    %388 = vector.shape_cast %387 : vector<1x16x256xbf16> to vector<16x256xbf16>
    %389 = vector.shape_cast %386 : vector<16x256xbf16> to vector<1x16x256xbf16>
    tpu.vector_store %arg18[%c0_239, %c0_240, %c0_241], %389 {strides = array<i32>} : memref<1x16x256xbf16, #tpu.memory_space<vmem>>, vector<1x16x256xbf16>,
    return
  }
  func.func @transform_0(%arg0: i32) -> (i32, i32, i32) {
    %c0_i32 = arith.constant 0 : i32
    %c0_i32_0 = arith.constant 0 : i32
    %c0_i32_1 = arith.constant 0 : i32
    return %arg0, %c0_i32, %c0_i32_0 : i32, i32, i32
  }
  func.func @transform_1(%arg0: i32) -> (i32, i32) {
    %c0_i32 = arith.constant 0 : i32
    %c0_i32_0 = arith.constant 0 : i32
    %c0_i32_1 = arith.constant 0 : i32
    return %c0_i32, %c0_i32_0 : i32, i32
  }
  func.func @transform_2(%arg0: i32) -> (i32, i32) {
    %c0_i32 = arith.constant 0 : i32
    %c0_i32_0 = arith.constant 0 : i32
    %c0_i32_1 = arith.constant 0 : i32
    return %c0_i32, %c0_i32_0 : i32, i32
  }
  func.func @transform_3(%arg0: i32) -> (i32, i32, i32) {
    %c0_i32 = arith.constant 0 : i32
    %c0_i32_0 = arith.constant 0 : i32
    %c0_i32_1 = arith.constant 0 : i32
    %c0_i32_2 = arith.constant 0 : i32
    return %c0_i32, %c0_i32_0, %c0_i32_1 : i32, i32, i32
  }
  func.func @transform_4(%arg0: i32) -> (i32, i32, i32) {
    %c0_i32 = arith.constant 0 : i32
    %c0_i32_0 = arith.constant 0 : i32
    %c0_i32_1 = arith.constant 0 : i32
    %c0_i32_2 = arith.constant 0 : i32
    return %c0_i32, %c0_i32_0, %c0_i32_1 : i32, i32, i32
  }
  func.func @transform_5(%arg0: i32) -> (i32, i32, i32) {
    %c0_i32 = arith.constant 0 : i32
    %c0_i32_0 = arith.constant 0 : i32
    %c0_i32_1 = arith.constant 0 : i32
    %c0_i32_2 = arith.constant 0 : i32
    return %c0_i32, %c0_i32_0, %c0_i32_1 : i32, i32, i32
  }
  func.func @transform_6(%arg0: i32) -> (i32, i32, i32) {
    %c0_i32 = arith.constant 0 : i32
    %c0_i32_0 = arith.constant 0 : i32
    %c0_i32_1 = arith.constant 0 : i32
    %c0_i32_2 = arith.constant 0 : i32
    return %c0_i32, %c0_i32_0, %c0_i32_1 : i32, i32, i32
  }
  func.func @transform_7(%arg0: i32) -> (i32, i32, i32) {
    %c0_i32 = arith.constant 0 : i32
    %c0_i32_0 = arith.constant 0 : i32
    %c0_i32_1 = arith.constant 0 : i32
    %c0_i32_2 = arith.constant 0 : i32
    return %c0_i32, %c0_i32_0, %c0_i32_1 : i32, i32, i32
  }
  func.func @transform_8(%arg0: i32) -> (i32, i32, i32) {
    %c0_i32 = arith.constant 0 : i32
    %c0_i32_0 = arith.constant 0 : i32
    %c0_i32_1 = arith.constant 0 : i32
    %c0_i32_2 = arith.constant 0 : i32
    return %c0_i32, %c0_i32_0, %c0_i32_1 : i32, i32, i32
  }
  func.func @transform_9(%arg0: i32) -> (i32, i32) {
    %c0_i32 = arith.constant 0 : i32
    %c0_i32_0 = arith.constant 0 : i32
    %c0_i32_1 = arith.constant 0 : i32
    return %c0_i32, %c0_i32_0 : i32, i32
  }
  func.func @transform_10(%arg0: i32) -> (i32, i32) {
    %c0_i32 = arith.constant 0 : i32
    %c0_i32_0 = arith.constant 0 : i32
    %c0_i32_1 = arith.constant 0 : i32
    return %c0_i32, %c0_i32_0 : i32, i32
  }
  func.func @transform_11(%arg0: i32) -> (i32, i32) {
    %c0_i32 = arith.constant 0 : i32
    %c0_i32_0 = arith.constant 0 : i32
    %c0_i32_1 = arith.constant 0 : i32
    return %c0_i32, %c0_i32_0 : i32, i32
  }
  func.func @transform_12(%arg0: i32) -> (i32, i32) {
    %c0_i32 = arith.constant 0 : i32
    %c0_i32_0 = arith.constant 0 : i32
    %c0_i32_1 = arith.constant 0 : i32
    return %c0_i32, %c0_i32_0 : i32, i32
  }
  func.func @transform_13(%arg0: i32) -> (i32, i32) {
    %c0_i32 = arith.constant 0 : i32
    %c0_i32_0 = arith.constant 0 : i32
    %c0_i32_1 = arith.constant 0 : i32
    return %c0_i32, %c0_i32_0 : i32, i32
  }
  func.func @transform_14(%arg0: i32) -> (i32, i32) {
    %c0_i32 = arith.constant 0 : i32
    %c0_i32_0 = arith.constant 0 : i32
    %c0_i32_1 = arith.constant 0 : i32
    return %c0_i32, %c0_i32_0 : i32, i32
  }
  func.func @transform_15(%arg0: i32) -> (i32, i32) {
    %c0_i32 = arith.constant 0 : i32
    %c0_i32_0 = arith.constant 0 : i32
    %c0_i32_1 = arith.constant 0 : i32
    return %c0_i32, %c0_i32_0 : i32, i32
  }
  func.func @transform_16(%arg0: i32) -> (i32, i32) {
    %c0_i32 = arith.constant 0 : i32
    %c0_i32_0 = arith.constant 0 : i32
    %c0_i32_1 = arith.constant 0 : i32
    return %c0_i32, %c0_i32_0 : i32, i32
  }
  func.func @transform_17(%arg0: i32) -> (i32, i32, i32) {
    %c0_i32 = arith.constant 0 : i32
    %c0_i32_0 = arith.constant 0 : i32
    %c0_i32_1 = arith.constant 0 : i32
    return %arg0, %c0_i32, %c0_i32_0 : i32, i32, i32
  }
}

module attributes {stable_mosaic.version = 11 : i64} {
  func.func @_encoder_layer_kernel(%arg0: i32, %arg1: memref<1x16x256xbf16, #tpu.memory_space<vmem>>, %arg2: memref<1x256xf32, #tpu.memory_space<vmem>>, %arg3: memref<1x256xf32, #tpu.memory_space<vmem>>, %arg4: memref<8x256x32xbf16, #tpu.memory_space<vmem>>, %arg5: memref<8x256x32xbf16, #tpu.memory_space<vmem>>, %arg6: memref<8x256x32xbf16, #tpu.memory_space<vmem>>, %arg7: memref<8x1x32xf32, #tpu.memory_space<vmem>>, %arg8: memref<8x1x32xf32, #tpu.memory_space<vmem>>, %arg9: memref<8x1x32xf32, #tpu.memory_space<vmem>>, %arg10: memref<256x256xbf16, #tpu.memory_space<vmem>>, %arg11: memref<1x256xf32, #tpu.memory_space<vmem>>, %arg12: memref<1x256xf32, #tpu.memory_space<vmem>>, %arg13: memref<1x256xf32, #tpu.memory_space<vmem>>, %arg14: memref<256x512xbf16, #tpu.memory_space<vmem>>, %arg15: memref<1x512xf32, #tpu.memory_space<vmem>>, %arg16: memref<512x256xbf16, #tpu.memory_space<vmem>>, %arg17: memref<1x256xf32, #tpu.memory_space<vmem>>, %arg18: memref<1x16x256xbf16, #tpu.memory_space<vmem>>, %arg19: memref<16x256xbf16, #tpu.memory_space<vmem>>) attributes {dimension_semantics = [#tpu.dimension_semantics<parallel>], iteration_bounds = array<i64: 2>, scalar_prefetch = 0 : i64, scratch_operands = 1 : i64, tpu.core_type = #tpu.core_type<tc>, window_params = [{transform_indices = @transform_0, window_bounds = array<i64: 1, 16, 256>}, {pipeline_mode = #tpu.pipeline_mode<synchronous>, transform_indices = @transform_1, window_bounds = array<i64: 1, 256>}, {pipeline_mode = #tpu.pipeline_mode<synchronous>, transform_indices = @transform_2, window_bounds = array<i64: 1, 256>}, {pipeline_mode = #tpu.pipeline_mode<synchronous>, transform_indices = @transform_3, window_bounds = array<i64: 8, 256, 32>}, {pipeline_mode = #tpu.pipeline_mode<synchronous>, transform_indices = @transform_4, window_bounds = array<i64: 8, 256, 32>}, {pipeline_mode = #tpu.pipeline_mode<synchronous>, transform_indices = @transform_5, window_bounds = array<i64: 8, 256, 32>}, {pipeline_mode = #tpu.pipeline_mode<synchronous>, transform_indices = @transform_6, window_bounds = array<i64: 8, 1, 32>}, {pipeline_mode = #tpu.pipeline_mode<synchronous>, transform_indices = @transform_7, window_bounds = array<i64: 8, 1, 32>}, {pipeline_mode = #tpu.pipeline_mode<synchronous>, transform_indices = @transform_8, window_bounds = array<i64: 8, 1, 32>}, {pipeline_mode = #tpu.pipeline_mode<synchronous>, transform_indices = @transform_9, window_bounds = array<i64: 256, 256>}, {pipeline_mode = #tpu.pipeline_mode<synchronous>, transform_indices = @transform_10, window_bounds = array<i64: 1, 256>}, {pipeline_mode = #tpu.pipeline_mode<synchronous>, transform_indices = @transform_11, window_bounds = array<i64: 1, 256>}, {pipeline_mode = #tpu.pipeline_mode<synchronous>, transform_indices = @transform_12, window_bounds = array<i64: 1, 256>}, {pipeline_mode = #tpu.pipeline_mode<synchronous>, transform_indices = @transform_13, window_bounds = array<i64: 256, 512>}, {pipeline_mode = #tpu.pipeline_mode<synchronous>, transform_indices = @transform_14, window_bounds = array<i64: 1, 512>}, {pipeline_mode = #tpu.pipeline_mode<synchronous>, transform_indices = @transform_15, window_bounds = array<i64: 512, 256>}, {pipeline_mode = #tpu.pipeline_mode<synchronous>, transform_indices = @transform_16, window_bounds = array<i64: 1, 256>}, {transform_indices = @transform_17, window_bounds = array<i64: 1, 16, 256>}]} {
    %c0 = arith.constant 0 : index
    %c0_0 = arith.constant 0 : index
    %c0_1 = arith.constant 0 : index
    %0 = vector.load %arg1[%c0, %c0_0, %c0_1] : memref<1x16x256xbf16, #tpu.memory_space<vmem>>, vector<1x16x256xbf16>
    %1 = vector.shape_cast %0 : vector<1x16x256xbf16> to vector<16x256xbf16>
    %2 = arith.extf %1 : vector<16x256xbf16> to vector<16x256xf32>
    %c0_2 = arith.constant 0 : index
    %c0_3 = arith.constant 0 : index
    %3 = vector.load %arg2[%c0_2, %c0_3] : memref<1x256xf32, #tpu.memory_space<vmem>>, vector<1x256xf32>
    %c0_4 = arith.constant 0 : index
    %c0_5 = arith.constant 0 : index
    %4 = vector.load %arg3[%c0_4, %c0_5] : memref<1x256xf32, #tpu.memory_space<vmem>>, vector<1x256xf32>
    %cst = arith.constant dense<0.000000e+00> : vector<16xf32>
    %5 = vector.multi_reduction <add>, %2, %cst [1] : vector<16x256xf32> to vector<16xf32>
    %6 = vector.shape_cast %5 : vector<16xf32> to vector<16x1xf32>
    %cst_6 = arith.constant 2.560000e+02 : f32
    %7 = vector.broadcast %cst_6 : f32 to vector<16x1xf32>
    %8 = arith.divf %6, %7 : vector<16x1xf32>
    %9 = vector.broadcast %8 : vector<16x1xf32> to vector<16x256xf32>
    %10 = arith.subf %2, %9 : vector<16x256xf32>
    %11 = arith.mulf %10, %10 : vector<16x256xf32>
    %cst_7 = arith.constant dense<0.000000e+00> : vector<16xf32>
    %12 = vector.multi_reduction <add>, %11, %cst_7 [1] : vector<16x256xf32> to vector<16xf32>
    %13 = vector.shape_cast %12 : vector<16xf32> to vector<16x1xf32>
    %cst_8 = arith.constant 2.560000e+02 : f32
    %14 = vector.broadcast %cst_8 : f32 to vector<16x1xf32>
    %15 = arith.divf %13, %14 : vector<16x1xf32>
    %16 = vector.broadcast %8 : vector<16x1xf32> to vector<16x256xf32>
    %17 = arith.subf %2, %16 : vector<16x256xf32>
    %cst_9 = arith.constant 9.99999974E-6 : f32
    %18 = vector.broadcast %cst_9 : f32 to vector<16x1xf32>
    %19 = arith.addf %15, %18 : vector<16x1xf32>
    %20 = math.rsqrt %19 : vector<16x1xf32>
    %21 = vector.broadcast %20 : vector<16x1xf32> to vector<16x256xf32>
    %22 = arith.mulf %17, %21 : vector<16x256xf32>
    %23 = vector.broadcast %3 : vector<1x256xf32> to vector<16x256xf32>
    %24 = arith.mulf %22, %23 : vector<16x256xf32>
    %25 = vector.broadcast %4 : vector<1x256xf32> to vector<16x256xf32>
    %26 = arith.addf %24, %25 : vector<16x256xf32>
    %27 = arith.truncf %26 : vector<16x256xf32> to vector<16x256xbf16>
    %c0_10 = arith.constant 0 : index
    %c0_11 = arith.constant 0 : index
    %c0_12 = arith.constant 0 : index
    %28 = vector.load %arg4[%c0_10, %c0_11, %c0_12] : memref<8x256x32xbf16, #tpu.memory_space<vmem>>, vector<1x256x32xbf16>
    %29 = vector.shape_cast %28 : vector<1x256x32xbf16> to vector<256x32xbf16>
    %cst_13 = arith.constant dense<0.000000e+00> : vector<16x32xf32>
    %30 = tpu.matmul %27, %29, %cst_13 {dimension_numbers = #tpu.dot_dimension_numbers<[1], [0], [0], [1], [0, 0, 1, 1], [], []>} : vector<16x256xbf16>, vector<256x32xbf16>, vector<16x32xf32> -> vector<16x32xf32>
    %c0_14 = arith.constant 0 : index
    %c0_15 = arith.constant 0 : index
    %c0_16 = arith.constant 0 : index
    %31 = vector.load %arg7[%c0_14, %c0_15, %c0_16] : memref<8x1x32xf32, #tpu.memory_space<vmem>>, vector<1x1x32xf32>
    %32 = vector.shape_cast %31 : vector<1x1x32xf32> to vector<1x32xf32>
    %33 = vector.broadcast %32 : vector<1x32xf32> to vector<16x32xf32>
    %34 = arith.addf %30, %33 : vector<16x32xf32>
    %c0_17 = arith.constant 0 : index
    %c0_18 = arith.constant 0 : index
    %c0_19 = arith.constant 0 : index
    %35 = vector.load %arg5[%c0_17, %c0_18, %c0_19] : memref<8x256x32xbf16, #tpu.memory_space<vmem>>, vector<1x256x32xbf16>
    %36 = vector.shape_cast %35 : vector<1x256x32xbf16> to vector<256x32xbf16>
    %cst_20 = arith.constant dense<0.000000e+00> : vector<16x32xf32>
    %37 = tpu.matmul %27, %36, %cst_20 {dimension_numbers = #tpu.dot_dimension_numbers<[1], [0], [0], [1], [0, 0, 1, 1], [], []>} : vector<16x256xbf16>, vector<256x32xbf16>, vector<16x32xf32> -> vector<16x32xf32>
    %c0_21 = arith.constant 0 : index
    %c0_22 = arith.constant 0 : index
    %c0_23 = arith.constant 0 : index
    %38 = vector.load %arg8[%c0_21, %c0_22, %c0_23] : memref<8x1x32xf32, #tpu.memory_space<vmem>>, vector<1x1x32xf32>
    %39 = vector.shape_cast %38 : vector<1x1x32xf32> to vector<1x32xf32>
    %40 = vector.broadcast %39 : vector<1x32xf32> to vector<16x32xf32>
    %41 = arith.addf %37, %40 : vector<16x32xf32>
    %c0_24 = arith.constant 0 : index
    %c0_25 = arith.constant 0 : index
    %c0_26 = arith.constant 0 : index
    %42 = vector.load %arg6[%c0_24, %c0_25, %c0_26] : memref<8x256x32xbf16, #tpu.memory_space<vmem>>, vector<1x256x32xbf16>
    %43 = vector.shape_cast %42 : vector<1x256x32xbf16> to vector<256x32xbf16>
    %cst_27 = arith.constant dense<0.000000e+00> : vector<16x32xf32>
    %44 = tpu.matmul %27, %43, %cst_27 {dimension_numbers = #tpu.dot_dimension_numbers<[1], [0], [0], [1], [0, 0, 1, 1], [], []>} : vector<16x256xbf16>, vector<256x32xbf16>, vector<16x32xf32> -> vector<16x32xf32>
    %c0_28 = arith.constant 0 : index
    %c0_29 = arith.constant 0 : index
    %c0_30 = arith.constant 0 : index
    %45 = vector.load %arg9[%c0_28, %c0_29, %c0_30] : memref<8x1x32xf32, #tpu.memory_space<vmem>>, vector<1x1x32xf32>
    %46 = vector.shape_cast %45 : vector<1x1x32xf32> to vector<1x32xf32>
    %47 = vector.broadcast %46 : vector<1x32xf32> to vector<16x32xf32>
    %48 = arith.addf %44, %47 : vector<16x32xf32>
    %49 = arith.truncf %34 : vector<16x32xf32> to vector<16x32xbf16>
    %50 = arith.truncf %41 : vector<16x32xf32> to vector<16x32xbf16>
    %cst_31 = arith.constant dense<0.000000e+00> : vector<16x16xf32>
    %51 = tpu.matmul %49, %50, %cst_31 {dimension_numbers = #tpu.dot_dimension_numbers<[1], [1], [0], [0], [0, 0, 1, 0], [], []>} : vector<16x32xbf16>, vector<16x32xbf16>, vector<16x16xf32> -> vector<16x16xf32>
    %cst_32 = arith.constant dense<0xFF800000> : vector<16xf32>
    %52 = vector.multi_reduction <maximumf>, %51, %cst_32 [1] : vector<16x16xf32> to vector<16xf32>
    %53 = vector.shape_cast %52 : vector<16xf32> to vector<16x1xf32>
    %54 = vector.broadcast %53 : vector<16x1xf32> to vector<16x16xf32>
    %55 = arith.subf %51, %54 : vector<16x16xf32>
    %56 = math.exp %55 : vector<16x16xf32>
    %cst_33 = arith.constant dense<0.000000e+00> : vector<16xf32>
    %57 = vector.multi_reduction <add>, %56, %cst_33 [1] : vector<16x16xf32> to vector<16xf32>
    %58 = vector.shape_cast %57 : vector<16xf32> to vector<16x1xf32>
    %59 = tpu.reciprocal %58 {approx = true} : vector<16x1xf32> -> vector<16x1xf32>
    %60 = vector.broadcast %59 : vector<16x1xf32> to vector<16x16xf32>
    %61 = arith.mulf %56, %60 : vector<16x16xf32>
    %62 = arith.truncf %61 : vector<16x16xf32> to vector<16x16xbf16>
    %63 = arith.truncf %48 : vector<16x32xf32> to vector<16x32xbf16>
    %cst_34 = arith.constant dense<0.000000e+00> : vector<16x32xf32>
    %64 = tpu.matmul %62, %63, %cst_34 {dimension_numbers = #tpu.dot_dimension_numbers<[1], [0], [0], [1], [0, 0, 1, 1], [], []>} : vector<16x16xbf16>, vector<16x32xbf16>, vector<16x32xf32> -> vector<16x32xf32>
    %65 = arith.truncf %64 : vector<16x32xf32> to vector<16x32xbf16>
    %c0_35 = arith.constant 0 : index
    %c0_36 = arith.constant 0 : index
    %66 = vector.load %arg19[%c0_35, %c0_36] : memref<16x256xbf16, #tpu.memory_space<vmem>>, vector<16x32xbf16>
    tpu.vector_store %arg19[%c0_35, %c0_36], %65 {strides = array<i32>} : memref<16x256xbf16, #tpu.memory_space<vmem>>, vector<16x32xbf16>,
    %c1 = arith.constant 1 : index
    %c0_37 = arith.constant 0 : index
    %c0_38 = arith.constant 0 : index
    %67 = vector.load %arg4[%c1, %c0_37, %c0_38] : memref<8x256x32xbf16, #tpu.memory_space<vmem>>, vector<1x256x32xbf16>
    %68 = vector.shape_cast %67 : vector<1x256x32xbf16> to vector<256x32xbf16>
    %cst_39 = arith.constant dense<0.000000e+00> : vector<16x32xf32>
    %69 = tpu.matmul %27, %68, %cst_39 {dimension_numbers = #tpu.dot_dimension_numbers<[1], [0], [0], [1], [0, 0, 1, 1], [], []>} : vector<16x256xbf16>, vector<256x32xbf16>, vector<16x32xf32> -> vector<16x32xf32>
    %c1_40 = arith.constant 1 : index
    %c0_41 = arith.constant 0 : index
    %c0_42 = arith.constant 0 : index
    %70 = vector.load %arg7[%c1_40, %c0_41, %c0_42] : memref<8x1x32xf32, #tpu.memory_space<vmem>>, vector<1x1x32xf32>
    %71 = vector.shape_cast %70 : vector<1x1x32xf32> to vector<1x32xf32>
    %72 = vector.broadcast %71 : vector<1x32xf32> to vector<16x32xf32>
    %73 = arith.addf %69, %72 : vector<16x32xf32>
    %c1_43 = arith.constant 1 : index
    %c0_44 = arith.constant 0 : index
    %c0_45 = arith.constant 0 : index
    %74 = vector.load %arg5[%c1_43, %c0_44, %c0_45] : memref<8x256x32xbf16, #tpu.memory_space<vmem>>, vector<1x256x32xbf16>
    %75 = vector.shape_cast %74 : vector<1x256x32xbf16> to vector<256x32xbf16>
    %cst_46 = arith.constant dense<0.000000e+00> : vector<16x32xf32>
    %76 = tpu.matmul %27, %75, %cst_46 {dimension_numbers = #tpu.dot_dimension_numbers<[1], [0], [0], [1], [0, 0, 1, 1], [], []>} : vector<16x256xbf16>, vector<256x32xbf16>, vector<16x32xf32> -> vector<16x32xf32>
    %c1_47 = arith.constant 1 : index
    %c0_48 = arith.constant 0 : index
    %c0_49 = arith.constant 0 : index
    %77 = vector.load %arg8[%c1_47, %c0_48, %c0_49] : memref<8x1x32xf32, #tpu.memory_space<vmem>>, vector<1x1x32xf32>
    %78 = vector.shape_cast %77 : vector<1x1x32xf32> to vector<1x32xf32>
    %79 = vector.broadcast %78 : vector<1x32xf32> to vector<16x32xf32>
    %80 = arith.addf %76, %79 : vector<16x32xf32>
    %c1_50 = arith.constant 1 : index
    %c0_51 = arith.constant 0 : index
    %c0_52 = arith.constant 0 : index
    %81 = vector.load %arg6[%c1_50, %c0_51, %c0_52] : memref<8x256x32xbf16, #tpu.memory_space<vmem>>, vector<1x256x32xbf16>
    %82 = vector.shape_cast %81 : vector<1x256x32xbf16> to vector<256x32xbf16>
    %cst_53 = arith.constant dense<0.000000e+00> : vector<16x32xf32>
    %83 = tpu.matmul %27, %82, %cst_53 {dimension_numbers = #tpu.dot_dimension_numbers<[1], [0], [0], [1], [0, 0, 1, 1], [], []>} : vector<16x256xbf16>, vector<256x32xbf16>, vector<16x32xf32> -> vector<16x32xf32>
    %c1_54 = arith.constant 1 : index
    %c0_55 = arith.constant 0 : index
    %c0_56 = arith.constant 0 : index
    %84 = vector.load %arg9[%c1_54, %c0_55, %c0_56] : memref<8x1x32xf32, #tpu.memory_space<vmem>>, vector<1x1x32xf32>
    %85 = vector.shape_cast %84 : vector<1x1x32xf32> to vector<1x32xf32>
    %86 = vector.broadcast %85 : vector<1x32xf32> to vector<16x32xf32>
    %87 = arith.addf %83, %86 : vector<16x32xf32>
    %88 = arith.truncf %73 : vector<16x32xf32> to vector<16x32xbf16>
    %89 = arith.truncf %80 : vector<16x32xf32> to vector<16x32xbf16>
    %cst_57 = arith.constant dense<0.000000e+00> : vector<16x16xf32>
    %90 = tpu.matmul %88, %89, %cst_57 {dimension_numbers = #tpu.dot_dimension_numbers<[1], [1], [0], [0], [0, 0, 1, 0], [], []>} : vector<16x32xbf16>, vector<16x32xbf16>, vector<16x16xf32> -> vector<16x16xf32>
    %cst_58 = arith.constant dense<0xFF800000> : vector<16xf32>
    %91 = vector.multi_reduction <maximumf>, %90, %cst_58 [1] : vector<16x16xf32> to vector<16xf32>
    %92 = vector.shape_cast %91 : vector<16xf32> to vector<16x1xf32>
    %93 = vector.broadcast %92 : vector<16x1xf32> to vector<16x16xf32>
    %94 = arith.subf %90, %93 : vector<16x16xf32>
    %95 = math.exp %94 : vector<16x16xf32>
    %cst_59 = arith.constant dense<0.000000e+00> : vector<16xf32>
    %96 = vector.multi_reduction <add>, %95, %cst_59 [1] : vector<16x16xf32> to vector<16xf32>
    %97 = vector.shape_cast %96 : vector<16xf32> to vector<16x1xf32>
    %98 = tpu.reciprocal %97 {approx = true} : vector<16x1xf32> -> vector<16x1xf32>
    %99 = vector.broadcast %98 : vector<16x1xf32> to vector<16x16xf32>
    %100 = arith.mulf %95, %99 : vector<16x16xf32>
    %101 = arith.truncf %100 : vector<16x16xf32> to vector<16x16xbf16>
    %102 = arith.truncf %87 : vector<16x32xf32> to vector<16x32xbf16>
    %cst_60 = arith.constant dense<0.000000e+00> : vector<16x32xf32>
    %103 = tpu.matmul %101, %102, %cst_60 {dimension_numbers = #tpu.dot_dimension_numbers<[1], [0], [0], [1], [0, 0, 1, 1], [], []>} : vector<16x16xbf16>, vector<16x32xbf16>, vector<16x32xf32> -> vector<16x32xf32>
    %104 = arith.truncf %103 : vector<16x32xf32> to vector<16x32xbf16>
    %c0_61 = arith.constant 0 : index
    %c32 = arith.constant 32 : index
    %105 = vector.load %arg19[%c0_61, %c32] : memref<16x256xbf16, #tpu.memory_space<vmem>>, vector<16x32xbf16>
    tpu.vector_store %arg19[%c0_61, %c32], %104 {strides = array<i32>} : memref<16x256xbf16, #tpu.memory_space<vmem>>, vector<16x32xbf16>,
    %c2 = arith.constant 2 : index
    %c0_62 = arith.constant 0 : index
    %c0_63 = arith.constant 0 : index
    %106 = vector.load %arg4[%c2, %c0_62, %c0_63] : memref<8x256x32xbf16, #tpu.memory_space<vmem>>, vector<1x256x32xbf16>
    %107 = vector.shape_cast %106 : vector<1x256x32xbf16> to vector<256x32xbf16>
    %cst_64 = arith.constant dense<0.000000e+00> : vector<16x32xf32>
    %108 = tpu.matmul %27, %107, %cst_64 {dimension_numbers = #tpu.dot_dimension_numbers<[1], [0], [0], [1], [0, 0, 1, 1], [], []>} : vector<16x256xbf16>, vector<256x32xbf16>, vector<16x32xf32> -> vector<16x32xf32>
    %c2_65 = arith.constant 2 : index
    %c0_66 = arith.constant 0 : index
    %c0_67 = arith.constant 0 : index
    %109 = vector.load %arg7[%c2_65, %c0_66, %c0_67] : memref<8x1x32xf32, #tpu.memory_space<vmem>>, vector<1x1x32xf32>
    %110 = vector.shape_cast %109 : vector<1x1x32xf32> to vector<1x32xf32>
    %111 = vector.broadcast %110 : vector<1x32xf32> to vector<16x32xf32>
    %112 = arith.addf %108, %111 : vector<16x32xf32>
    %c2_68 = arith.constant 2 : index
    %c0_69 = arith.constant 0 : index
    %c0_70 = arith.constant 0 : index
    %113 = vector.load %arg5[%c2_68, %c0_69, %c0_70] : memref<8x256x32xbf16, #tpu.memory_space<vmem>>, vector<1x256x32xbf16>
    %114 = vector.shape_cast %113 : vector<1x256x32xbf16> to vector<256x32xbf16>
    %cst_71 = arith.constant dense<0.000000e+00> : vector<16x32xf32>
    %115 = tpu.matmul %27, %114, %cst_71 {dimension_numbers = #tpu.dot_dimension_numbers<[1], [0], [0], [1], [0, 0, 1, 1], [], []>} : vector<16x256xbf16>, vector<256x32xbf16>, vector<16x32xf32> -> vector<16x32xf32>
    %c2_72 = arith.constant 2 : index
    %c0_73 = arith.constant 0 : index
    %c0_74 = arith.constant 0 : index
    %116 = vector.load %arg8[%c2_72, %c0_73, %c0_74] : memref<8x1x32xf32, #tpu.memory_space<vmem>>, vector<1x1x32xf32>
    %117 = vector.shape_cast %116 : vector<1x1x32xf32> to vector<1x32xf32>
    %118 = vector.broadcast %117 : vector<1x32xf32> to vector<16x32xf32>
    %119 = arith.addf %115, %118 : vector<16x32xf32>
    %c2_75 = arith.constant 2 : index
    %c0_76 = arith.constant 0 : index
    %c0_77 = arith.constant 0 : index
    %120 = vector.load %arg6[%c2_75, %c0_76, %c0_77] : memref<8x256x32xbf16, #tpu.memory_space<vmem>>, vector<1x256x32xbf16>
    %121 = vector.shape_cast %120 : vector<1x256x32xbf16> to vector<256x32xbf16>
    %cst_78 = arith.constant dense<0.000000e+00> : vector<16x32xf32>
    %122 = tpu.matmul %27, %121, %cst_78 {dimension_numbers = #tpu.dot_dimension_numbers<[1], [0], [0], [1], [0, 0, 1, 1], [], []>} : vector<16x256xbf16>, vector<256x32xbf16>, vector<16x32xf32> -> vector<16x32xf32>
    %c2_79 = arith.constant 2 : index
    %c0_80 = arith.constant 0 : index
    %c0_81 = arith.constant 0 : index
    %123 = vector.load %arg9[%c2_79, %c0_80, %c0_81] : memref<8x1x32xf32, #tpu.memory_space<vmem>>, vector<1x1x32xf32>
    %124 = vector.shape_cast %123 : vector<1x1x32xf32> to vector<1x32xf32>
    %125 = vector.broadcast %124 : vector<1x32xf32> to vector<16x32xf32>
    %126 = arith.addf %122, %125 : vector<16x32xf32>
    %127 = arith.truncf %112 : vector<16x32xf32> to vector<16x32xbf16>
    %128 = arith.truncf %119 : vector<16x32xf32> to vector<16x32xbf16>
    %cst_82 = arith.constant dense<0.000000e+00> : vector<16x16xf32>
    %129 = tpu.matmul %127, %128, %cst_82 {dimension_numbers = #tpu.dot_dimension_numbers<[1], [1], [0], [0], [0, 0, 1, 0], [], []>} : vector<16x32xbf16>, vector<16x32xbf16>, vector<16x16xf32> -> vector<16x16xf32>
    %cst_83 = arith.constant dense<0xFF800000> : vector<16xf32>
    %130 = vector.multi_reduction <maximumf>, %129, %cst_83 [1] : vector<16x16xf32> to vector<16xf32>
    %131 = vector.shape_cast %130 : vector<16xf32> to vector<16x1xf32>
    %132 = vector.broadcast %131 : vector<16x1xf32> to vector<16x16xf32>
    %133 = arith.subf %129, %132 : vector<16x16xf32>
    %134 = math.exp %133 : vector<16x16xf32>
    %cst_84 = arith.constant dense<0.000000e+00> : vector<16xf32>
    %135 = vector.multi_reduction <add>, %134, %cst_84 [1] : vector<16x16xf32> to vector<16xf32>
    %136 = vector.shape_cast %135 : vector<16xf32> to vector<16x1xf32>
    %137 = tpu.reciprocal %136 {approx = true} : vector<16x1xf32> -> vector<16x1xf32>
    %138 = vector.broadcast %137 : vector<16x1xf32> to vector<16x16xf32>
    %139 = arith.mulf %134, %138 : vector<16x16xf32>
    %140 = arith.truncf %139 : vector<16x16xf32> to vector<16x16xbf16>
    %141 = arith.truncf %126 : vector<16x32xf32> to vector<16x32xbf16>
    %cst_85 = arith.constant dense<0.000000e+00> : vector<16x32xf32>
    %142 = tpu.matmul %140, %141, %cst_85 {dimension_numbers = #tpu.dot_dimension_numbers<[1], [0], [0], [1], [0, 0, 1, 1], [], []>} : vector<16x16xbf16>, vector<16x32xbf16>, vector<16x32xf32> -> vector<16x32xf32>
    %143 = arith.truncf %142 : vector<16x32xf32> to vector<16x32xbf16>
    %c0_86 = arith.constant 0 : index
    %c64 = arith.constant 64 : index
    %144 = vector.load %arg19[%c0_86, %c64] : memref<16x256xbf16, #tpu.memory_space<vmem>>, vector<16x32xbf16>
    tpu.vector_store %arg19[%c0_86, %c64], %143 {strides = array<i32>} : memref<16x256xbf16, #tpu.memory_space<vmem>>, vector<16x32xbf16>,
    %c3 = arith.constant 3 : index
    %c0_87 = arith.constant 0 : index
    %c0_88 = arith.constant 0 : index
    %145 = vector.load %arg4[%c3, %c0_87, %c0_88] : memref<8x256x32xbf16, #tpu.memory_space<vmem>>, vector<1x256x32xbf16>
    %146 = vector.shape_cast %145 : vector<1x256x32xbf16> to vector<256x32xbf16>
    %cst_89 = arith.constant dense<0.000000e+00> : vector<16x32xf32>
    %147 = tpu.matmul %27, %146, %cst_89 {dimension_numbers = #tpu.dot_dimension_numbers<[1], [0], [0], [1], [0, 0, 1, 1], [], []>} : vector<16x256xbf16>, vector<256x32xbf16>, vector<16x32xf32> -> vector<16x32xf32>
    %c3_90 = arith.constant 3 : index
    %c0_91 = arith.constant 0 : index
    %c0_92 = arith.constant 0 : index
    %148 = vector.load %arg7[%c3_90, %c0_91, %c0_92] : memref<8x1x32xf32, #tpu.memory_space<vmem>>, vector<1x1x32xf32>
    %149 = vector.shape_cast %148 : vector<1x1x32xf32> to vector<1x32xf32>
    %150 = vector.broadcast %149 : vector<1x32xf32> to vector<16x32xf32>
    %151 = arith.addf %147, %150 : vector<16x32xf32>
    %c3_93 = arith.constant 3 : index
    %c0_94 = arith.constant 0 : index
    %c0_95 = arith.constant 0 : index
    %152 = vector.load %arg5[%c3_93, %c0_94, %c0_95] : memref<8x256x32xbf16, #tpu.memory_space<vmem>>, vector<1x256x32xbf16>
    %153 = vector.shape_cast %152 : vector<1x256x32xbf16> to vector<256x32xbf16>
    %cst_96 = arith.constant dense<0.000000e+00> : vector<16x32xf32>
    %154 = tpu.matmul %27, %153, %cst_96 {dimension_numbers = #tpu.dot_dimension_numbers<[1], [0], [0], [1], [0, 0, 1, 1], [], []>} : vector<16x256xbf16>, vector<256x32xbf16>, vector<16x32xf32> -> vector<16x32xf32>
    %c3_97 = arith.constant 3 : index
    %c0_98 = arith.constant 0 : index
    %c0_99 = arith.constant 0 : index
    %155 = vector.load %arg8[%c3_97, %c0_98, %c0_99] : memref<8x1x32xf32, #tpu.memory_space<vmem>>, vector<1x1x32xf32>
    %156 = vector.shape_cast %155 : vector<1x1x32xf32> to vector<1x32xf32>
    %157 = vector.broadcast %156 : vector<1x32xf32> to vector<16x32xf32>
    %158 = arith.addf %154, %157 : vector<16x32xf32>
    %c3_100 = arith.constant 3 : index
    %c0_101 = arith.constant 0 : index
    %c0_102 = arith.constant 0 : index
    %159 = vector.load %arg6[%c3_100, %c0_101, %c0_102] : memref<8x256x32xbf16, #tpu.memory_space<vmem>>, vector<1x256x32xbf16>
    %160 = vector.shape_cast %159 : vector<1x256x32xbf16> to vector<256x32xbf16>
    %cst_103 = arith.constant dense<0.000000e+00> : vector<16x32xf32>
    %161 = tpu.matmul %27, %160, %cst_103 {dimension_numbers = #tpu.dot_dimension_numbers<[1], [0], [0], [1], [0, 0, 1, 1], [], []>} : vector<16x256xbf16>, vector<256x32xbf16>, vector<16x32xf32> -> vector<16x32xf32>
    %c3_104 = arith.constant 3 : index
    %c0_105 = arith.constant 0 : index
    %c0_106 = arith.constant 0 : index
    %162 = vector.load %arg9[%c3_104, %c0_105, %c0_106] : memref<8x1x32xf32, #tpu.memory_space<vmem>>, vector<1x1x32xf32>
    %163 = vector.shape_cast %162 : vector<1x1x32xf32> to vector<1x32xf32>
    %164 = vector.broadcast %163 : vector<1x32xf32> to vector<16x32xf32>
    %165 = arith.addf %161, %164 : vector<16x32xf32>
    %166 = arith.truncf %151 : vector<16x32xf32> to vector<16x32xbf16>
    %167 = arith.truncf %158 : vector<16x32xf32> to vector<16x32xbf16>
    %cst_107 = arith.constant dense<0.000000e+00> : vector<16x16xf32>
    %168 = tpu.matmul %166, %167, %cst_107 {dimension_numbers = #tpu.dot_dimension_numbers<[1], [1], [0], [0], [0, 0, 1, 0], [], []>} : vector<16x32xbf16>, vector<16x32xbf16>, vector<16x16xf32> -> vector<16x16xf32>
    %cst_108 = arith.constant dense<0xFF800000> : vector<16xf32>
    %169 = vector.multi_reduction <maximumf>, %168, %cst_108 [1] : vector<16x16xf32> to vector<16xf32>
    %170 = vector.shape_cast %169 : vector<16xf32> to vector<16x1xf32>
    %171 = vector.broadcast %170 : vector<16x1xf32> to vector<16x16xf32>
    %172 = arith.subf %168, %171 : vector<16x16xf32>
    %173 = math.exp %172 : vector<16x16xf32>
    %cst_109 = arith.constant dense<0.000000e+00> : vector<16xf32>
    %174 = vector.multi_reduction <add>, %173, %cst_109 [1] : vector<16x16xf32> to vector<16xf32>
    %175 = vector.shape_cast %174 : vector<16xf32> to vector<16x1xf32>
    %176 = tpu.reciprocal %175 {approx = true} : vector<16x1xf32> -> vector<16x1xf32>
    %177 = vector.broadcast %176 : vector<16x1xf32> to vector<16x16xf32>
    %178 = arith.mulf %173, %177 : vector<16x16xf32>
    %179 = arith.truncf %178 : vector<16x16xf32> to vector<16x16xbf16>
    %180 = arith.truncf %165 : vector<16x32xf32> to vector<16x32xbf16>
    %cst_110 = arith.constant dense<0.000000e+00> : vector<16x32xf32>
    %181 = tpu.matmul %179, %180, %cst_110 {dimension_numbers = #tpu.dot_dimension_numbers<[1], [0], [0], [1], [0, 0, 1, 1], [], []>} : vector<16x16xbf16>, vector<16x32xbf16>, vector<16x32xf32> -> vector<16x32xf32>
    %182 = arith.truncf %181 : vector<16x32xf32> to vector<16x32xbf16>
    %c0_111 = arith.constant 0 : index
    %c96 = arith.constant 96 : index
    %183 = vector.load %arg19[%c0_111, %c96] : memref<16x256xbf16, #tpu.memory_space<vmem>>, vector<16x32xbf16>
    tpu.vector_store %arg19[%c0_111, %c96], %182 {strides = array<i32>} : memref<16x256xbf16, #tpu.memory_space<vmem>>, vector<16x32xbf16>,
    %c4 = arith.constant 4 : index
    %c0_112 = arith.constant 0 : index
    %c0_113 = arith.constant 0 : index
    %184 = vector.load %arg4[%c4, %c0_112, %c0_113] : memref<8x256x32xbf16, #tpu.memory_space<vmem>>, vector<1x256x32xbf16>
    %185 = vector.shape_cast %184 : vector<1x256x32xbf16> to vector<256x32xbf16>
    %cst_114 = arith.constant dense<0.000000e+00> : vector<16x32xf32>
    %186 = tpu.matmul %27, %185, %cst_114 {dimension_numbers = #tpu.dot_dimension_numbers<[1], [0], [0], [1], [0, 0, 1, 1], [], []>} : vector<16x256xbf16>, vector<256x32xbf16>, vector<16x32xf32> -> vector<16x32xf32>
    %c4_115 = arith.constant 4 : index
    %c0_116 = arith.constant 0 : index
    %c0_117 = arith.constant 0 : index
    %187 = vector.load %arg7[%c4_115, %c0_116, %c0_117] : memref<8x1x32xf32, #tpu.memory_space<vmem>>, vector<1x1x32xf32>
    %188 = vector.shape_cast %187 : vector<1x1x32xf32> to vector<1x32xf32>
    %189 = vector.broadcast %188 : vector<1x32xf32> to vector<16x32xf32>
    %190 = arith.addf %186, %189 : vector<16x32xf32>
    %c4_118 = arith.constant 4 : index
    %c0_119 = arith.constant 0 : index
    %c0_120 = arith.constant 0 : index
    %191 = vector.load %arg5[%c4_118, %c0_119, %c0_120] : memref<8x256x32xbf16, #tpu.memory_space<vmem>>, vector<1x256x32xbf16>
    %192 = vector.shape_cast %191 : vector<1x256x32xbf16> to vector<256x32xbf16>
    %cst_121 = arith.constant dense<0.000000e+00> : vector<16x32xf32>
    %193 = tpu.matmul %27, %192, %cst_121 {dimension_numbers = #tpu.dot_dimension_numbers<[1], [0], [0], [1], [0, 0, 1, 1], [], []>} : vector<16x256xbf16>, vector<256x32xbf16>, vector<16x32xf32> -> vector<16x32xf32>
    %c4_122 = arith.constant 4 : index
    %c0_123 = arith.constant 0 : index
    %c0_124 = arith.constant 0 : index
    %194 = vector.load %arg8[%c4_122, %c0_123, %c0_124] : memref<8x1x32xf32, #tpu.memory_space<vmem>>, vector<1x1x32xf32>
    %195 = vector.shape_cast %194 : vector<1x1x32xf32> to vector<1x32xf32>
    %196 = vector.broadcast %195 : vector<1x32xf32> to vector<16x32xf32>
    %197 = arith.addf %193, %196 : vector<16x32xf32>
    %c4_125 = arith.constant 4 : index
    %c0_126 = arith.constant 0 : index
    %c0_127 = arith.constant 0 : index
    %198 = vector.load %arg6[%c4_125, %c0_126, %c0_127] : memref<8x256x32xbf16, #tpu.memory_space<vmem>>, vector<1x256x32xbf16>
    %199 = vector.shape_cast %198 : vector<1x256x32xbf16> to vector<256x32xbf16>
    %cst_128 = arith.constant dense<0.000000e+00> : vector<16x32xf32>
    %200 = tpu.matmul %27, %199, %cst_128 {dimension_numbers = #tpu.dot_dimension_numbers<[1], [0], [0], [1], [0, 0, 1, 1], [], []>} : vector<16x256xbf16>, vector<256x32xbf16>, vector<16x32xf32> -> vector<16x32xf32>
    %c4_129 = arith.constant 4 : index
    %c0_130 = arith.constant 0 : index
    %c0_131 = arith.constant 0 : index
    %201 = vector.load %arg9[%c4_129, %c0_130, %c0_131] : memref<8x1x32xf32, #tpu.memory_space<vmem>>, vector<1x1x32xf32>
    %202 = vector.shape_cast %201 : vector<1x1x32xf32> to vector<1x32xf32>
    %203 = vector.broadcast %202 : vector<1x32xf32> to vector<16x32xf32>
    %204 = arith.addf %200, %203 : vector<16x32xf32>
    %205 = arith.truncf %190 : vector<16x32xf32> to vector<16x32xbf16>
    %206 = arith.truncf %197 : vector<16x32xf32> to vector<16x32xbf16>
    %cst_132 = arith.constant dense<0.000000e+00> : vector<16x16xf32>
    %207 = tpu.matmul %205, %206, %cst_132 {dimension_numbers = #tpu.dot_dimension_numbers<[1], [1], [0], [0], [0, 0, 1, 0], [], []>} : vector<16x32xbf16>, vector<16x32xbf16>, vector<16x16xf32> -> vector<16x16xf32>
    %cst_133 = arith.constant dense<0xFF800000> : vector<16xf32>
    %208 = vector.multi_reduction <maximumf>, %207, %cst_133 [1] : vector<16x16xf32> to vector<16xf32>
    %209 = vector.shape_cast %208 : vector<16xf32> to vector<16x1xf32>
    %210 = vector.broadcast %209 : vector<16x1xf32> to vector<16x16xf32>
    %211 = arith.subf %207, %210 : vector<16x16xf32>
    %212 = math.exp %211 : vector<16x16xf32>
    %cst_134 = arith.constant dense<0.000000e+00> : vector<16xf32>
    %213 = vector.multi_reduction <add>, %212, %cst_134 [1] : vector<16x16xf32> to vector<16xf32>
    %214 = vector.shape_cast %213 : vector<16xf32> to vector<16x1xf32>
    %215 = tpu.reciprocal %214 {approx = true} : vector<16x1xf32> -> vector<16x1xf32>
    %216 = vector.broadcast %215 : vector<16x1xf32> to vector<16x16xf32>
    %217 = arith.mulf %212, %216 : vector<16x16xf32>
    %218 = arith.truncf %217 : vector<16x16xf32> to vector<16x16xbf16>
    %219 = arith.truncf %204 : vector<16x32xf32> to vector<16x32xbf16>
    %cst_135 = arith.constant dense<0.000000e+00> : vector<16x32xf32>
    %220 = tpu.matmul %218, %219, %cst_135 {dimension_numbers = #tpu.dot_dimension_numbers<[1], [0], [0], [1], [0, 0, 1, 1], [], []>} : vector<16x16xbf16>, vector<16x32xbf16>, vector<16x32xf32> -> vector<16x32xf32>
    %221 = arith.truncf %220 : vector<16x32xf32> to vector<16x32xbf16>
    %c0_136 = arith.constant 0 : index
    %c128 = arith.constant 128 : index
    %222 = vector.load %arg19[%c0_136, %c128] : memref<16x256xbf16, #tpu.memory_space<vmem>>, vector<16x32xbf16>
    tpu.vector_store %arg19[%c0_136, %c128], %221 {strides = array<i32>} : memref<16x256xbf16, #tpu.memory_space<vmem>>, vector<16x32xbf16>,
    %c5 = arith.constant 5 : index
    %c0_137 = arith.constant 0 : index
    %c0_138 = arith.constant 0 : index
    %223 = vector.load %arg4[%c5, %c0_137, %c0_138] : memref<8x256x32xbf16, #tpu.memory_space<vmem>>, vector<1x256x32xbf16>
    %224 = vector.shape_cast %223 : vector<1x256x32xbf16> to vector<256x32xbf16>
    %cst_139 = arith.constant dense<0.000000e+00> : vector<16x32xf32>
    %225 = tpu.matmul %27, %224, %cst_139 {dimension_numbers = #tpu.dot_dimension_numbers<[1], [0], [0], [1], [0, 0, 1, 1], [], []>} : vector<16x256xbf16>, vector<256x32xbf16>, vector<16x32xf32> -> vector<16x32xf32>
    %c5_140 = arith.constant 5 : index
    %c0_141 = arith.constant 0 : index
    %c0_142 = arith.constant 0 : index
    %226 = vector.load %arg7[%c5_140, %c0_141, %c0_142] : memref<8x1x32xf32, #tpu.memory_space<vmem>>, vector<1x1x32xf32>
    %227 = vector.shape_cast %226 : vector<1x1x32xf32> to vector<1x32xf32>
    %228 = vector.broadcast %227 : vector<1x32xf32> to vector<16x32xf32>
    %229 = arith.addf %225, %228 : vector<16x32xf32>
    %c5_143 = arith.constant 5 : index
    %c0_144 = arith.constant 0 : index
    %c0_145 = arith.constant 0 : index
    %230 = vector.load %arg5[%c5_143, %c0_144, %c0_145] : memref<8x256x32xbf16, #tpu.memory_space<vmem>>, vector<1x256x32xbf16>
    %231 = vector.shape_cast %230 : vector<1x256x32xbf16> to vector<256x32xbf16>
    %cst_146 = arith.constant dense<0.000000e+00> : vector<16x32xf32>
    %232 = tpu.matmul %27, %231, %cst_146 {dimension_numbers = #tpu.dot_dimension_numbers<[1], [0], [0], [1], [0, 0, 1, 1], [], []>} : vector<16x256xbf16>, vector<256x32xbf16>, vector<16x32xf32> -> vector<16x32xf32>
    %c5_147 = arith.constant 5 : index
    %c0_148 = arith.constant 0 : index
    %c0_149 = arith.constant 0 : index
    %233 = vector.load %arg8[%c5_147, %c0_148, %c0_149] : memref<8x1x32xf32, #tpu.memory_space<vmem>>, vector<1x1x32xf32>
    %234 = vector.shape_cast %233 : vector<1x1x32xf32> to vector<1x32xf32>
    %235 = vector.broadcast %234 : vector<1x32xf32> to vector<16x32xf32>
    %236 = arith.addf %232, %235 : vector<16x32xf32>
    %c5_150 = arith.constant 5 : index
    %c0_151 = arith.constant 0 : index
    %c0_152 = arith.constant 0 : index
    %237 = vector.load %arg6[%c5_150, %c0_151, %c0_152] : memref<8x256x32xbf16, #tpu.memory_space<vmem>>, vector<1x256x32xbf16>
    %238 = vector.shape_cast %237 : vector<1x256x32xbf16> to vector<256x32xbf16>
    %cst_153 = arith.constant dense<0.000000e+00> : vector<16x32xf32>
    %239 = tpu.matmul %27, %238, %cst_153 {dimension_numbers = #tpu.dot_dimension_numbers<[1], [0], [0], [1], [0, 0, 1, 1], [], []>} : vector<16x256xbf16>, vector<256x32xbf16>, vector<16x32xf32> -> vector<16x32xf32>
    %c5_154 = arith.constant 5 : index
    %c0_155 = arith.constant 0 : index
    %c0_156 = arith.constant 0 : index
    %240 = vector.load %arg9[%c5_154, %c0_155, %c0_156] : memref<8x1x32xf32, #tpu.memory_space<vmem>>, vector<1x1x32xf32>
    %241 = vector.shape_cast %240 : vector<1x1x32xf32> to vector<1x32xf32>
    %242 = vector.broadcast %241 : vector<1x32xf32> to vector<16x32xf32>
    %243 = arith.addf %239, %242 : vector<16x32xf32>
    %244 = arith.truncf %229 : vector<16x32xf32> to vector<16x32xbf16>
    %245 = arith.truncf %236 : vector<16x32xf32> to vector<16x32xbf16>
    %cst_157 = arith.constant dense<0.000000e+00> : vector<16x16xf32>
    %246 = tpu.matmul %244, %245, %cst_157 {dimension_numbers = #tpu.dot_dimension_numbers<[1], [1], [0], [0], [0, 0, 1, 0], [], []>} : vector<16x32xbf16>, vector<16x32xbf16>, vector<16x16xf32> -> vector<16x16xf32>
    %cst_158 = arith.constant dense<0xFF800000> : vector<16xf32>
    %247 = vector.multi_reduction <maximumf>, %246, %cst_158 [1] : vector<16x16xf32> to vector<16xf32>
    %248 = vector.shape_cast %247 : vector<16xf32> to vector<16x1xf32>
    %249 = vector.broadcast %248 : vector<16x1xf32> to vector<16x16xf32>
    %250 = arith.subf %246, %249 : vector<16x16xf32>
    %251 = math.exp %250 : vector<16x16xf32>
    %cst_159 = arith.constant dense<0.000000e+00> : vector<16xf32>
    %252 = vector.multi_reduction <add>, %251, %cst_159 [1] : vector<16x16xf32> to vector<16xf32>
    %253 = vector.shape_cast %252 : vector<16xf32> to vector<16x1xf32>
    %254 = tpu.reciprocal %253 {approx = true} : vector<16x1xf32> -> vector<16x1xf32>
    %255 = vector.broadcast %254 : vector<16x1xf32> to vector<16x16xf32>
    %256 = arith.mulf %251, %255 : vector<16x16xf32>
    %257 = arith.truncf %256 : vector<16x16xf32> to vector<16x16xbf16>
    %258 = arith.truncf %243 : vector<16x32xf32> to vector<16x32xbf16>
    %cst_160 = arith.constant dense<0.000000e+00> : vector<16x32xf32>
    %259 = tpu.matmul %257, %258, %cst_160 {dimension_numbers = #tpu.dot_dimension_numbers<[1], [0], [0], [1], [0, 0, 1, 1], [], []>} : vector<16x16xbf16>, vector<16x32xbf16>, vector<16x32xf32> -> vector<16x32xf32>
    %260 = arith.truncf %259 : vector<16x32xf32> to vector<16x32xbf16>
    %c0_161 = arith.constant 0 : index
    %c160 = arith.constant 160 : index
    %261 = vector.load %arg19[%c0_161, %c160] : memref<16x256xbf16, #tpu.memory_space<vmem>>, vector<16x32xbf16>
    tpu.vector_store %arg19[%c0_161, %c160], %260 {strides = array<i32>} : memref<16x256xbf16, #tpu.memory_space<vmem>>, vector<16x32xbf16>,
    %c6 = arith.constant 6 : index
    %c0_162 = arith.constant 0 : index
    %c0_163 = arith.constant 0 : index
    %262 = vector.load %arg4[%c6, %c0_162, %c0_163] : memref<8x256x32xbf16, #tpu.memory_space<vmem>>, vector<1x256x32xbf16>
    %263 = vector.shape_cast %262 : vector<1x256x32xbf16> to vector<256x32xbf16>
    %cst_164 = arith.constant dense<0.000000e+00> : vector<16x32xf32>
    %264 = tpu.matmul %27, %263, %cst_164 {dimension_numbers = #tpu.dot_dimension_numbers<[1], [0], [0], [1], [0, 0, 1, 1], [], []>} : vector<16x256xbf16>, vector<256x32xbf16>, vector<16x32xf32> -> vector<16x32xf32>
    %c6_165 = arith.constant 6 : index
    %c0_166 = arith.constant 0 : index
    %c0_167 = arith.constant 0 : index
    %265 = vector.load %arg7[%c6_165, %c0_166, %c0_167] : memref<8x1x32xf32, #tpu.memory_space<vmem>>, vector<1x1x32xf32>
    %266 = vector.shape_cast %265 : vector<1x1x32xf32> to vector<1x32xf32>
    %267 = vector.broadcast %266 : vector<1x32xf32> to vector<16x32xf32>
    %268 = arith.addf %264, %267 : vector<16x32xf32>
    %c6_168 = arith.constant 6 : index
    %c0_169 = arith.constant 0 : index
    %c0_170 = arith.constant 0 : index
    %269 = vector.load %arg5[%c6_168, %c0_169, %c0_170] : memref<8x256x32xbf16, #tpu.memory_space<vmem>>, vector<1x256x32xbf16>
    %270 = vector.shape_cast %269 : vector<1x256x32xbf16> to vector<256x32xbf16>
    %cst_171 = arith.constant dense<0.000000e+00> : vector<16x32xf32>
    %271 = tpu.matmul %27, %270, %cst_171 {dimension_numbers = #tpu.dot_dimension_numbers<[1], [0], [0], [1], [0, 0, 1, 1], [], []>} : vector<16x256xbf16>, vector<256x32xbf16>, vector<16x32xf32> -> vector<16x32xf32>
    %c6_172 = arith.constant 6 : index
    %c0_173 = arith.constant 0 : index
    %c0_174 = arith.constant 0 : index
    %272 = vector.load %arg8[%c6_172, %c0_173, %c0_174] : memref<8x1x32xf32, #tpu.memory_space<vmem>>, vector<1x1x32xf32>
    %273 = vector.shape_cast %272 : vector<1x1x32xf32> to vector<1x32xf32>
    %274 = vector.broadcast %273 : vector<1x32xf32> to vector<16x32xf32>
    %275 = arith.addf %271, %274 : vector<16x32xf32>
    %c6_175 = arith.constant 6 : index
    %c0_176 = arith.constant 0 : index
    %c0_177 = arith.constant 0 : index
    %276 = vector.load %arg6[%c6_175, %c0_176, %c0_177] : memref<8x256x32xbf16, #tpu.memory_space<vmem>>, vector<1x256x32xbf16>
    %277 = vector.shape_cast %276 : vector<1x256x32xbf16> to vector<256x32xbf16>
    %cst_178 = arith.constant dense<0.000000e+00> : vector<16x32xf32>
    %278 = tpu.matmul %27, %277, %cst_178 {dimension_numbers = #tpu.dot_dimension_numbers<[1], [0], [0], [1], [0, 0, 1, 1], [], []>} : vector<16x256xbf16>, vector<256x32xbf16>, vector<16x32xf32> -> vector<16x32xf32>
    %c6_179 = arith.constant 6 : index
    %c0_180 = arith.constant 0 : index
    %c0_181 = arith.constant 0 : index
    %279 = vector.load %arg9[%c6_179, %c0_180, %c0_181] : memref<8x1x32xf32, #tpu.memory_space<vmem>>, vector<1x1x32xf32>
    %280 = vector.shape_cast %279 : vector<1x1x32xf32> to vector<1x32xf32>
    %281 = vector.broadcast %280 : vector<1x32xf32> to vector<16x32xf32>
    %282 = arith.addf %278, %281 : vector<16x32xf32>
    %283 = arith.truncf %268 : vector<16x32xf32> to vector<16x32xbf16>
    %284 = arith.truncf %275 : vector<16x32xf32> to vector<16x32xbf16>
    %cst_182 = arith.constant dense<0.000000e+00> : vector<16x16xf32>
    %285 = tpu.matmul %283, %284, %cst_182 {dimension_numbers = #tpu.dot_dimension_numbers<[1], [1], [0], [0], [0, 0, 1, 0], [], []>} : vector<16x32xbf16>, vector<16x32xbf16>, vector<16x16xf32> -> vector<16x16xf32>
    %cst_183 = arith.constant dense<0xFF800000> : vector<16xf32>
    %286 = vector.multi_reduction <maximumf>, %285, %cst_183 [1] : vector<16x16xf32> to vector<16xf32>
    %287 = vector.shape_cast %286 : vector<16xf32> to vector<16x1xf32>
    %288 = vector.broadcast %287 : vector<16x1xf32> to vector<16x16xf32>
    %289 = arith.subf %285, %288 : vector<16x16xf32>
    %290 = math.exp %289 : vector<16x16xf32>
    %cst_184 = arith.constant dense<0.000000e+00> : vector<16xf32>
    %291 = vector.multi_reduction <add>, %290, %cst_184 [1] : vector<16x16xf32> to vector<16xf32>
    %292 = vector.shape_cast %291 : vector<16xf32> to vector<16x1xf32>
    %293 = tpu.reciprocal %292 {approx = true} : vector<16x1xf32> -> vector<16x1xf32>
    %294 = vector.broadcast %293 : vector<16x1xf32> to vector<16x16xf32>
    %295 = arith.mulf %290, %294 : vector<16x16xf32>
    %296 = arith.truncf %295 : vector<16x16xf32> to vector<16x16xbf16>
    %297 = arith.truncf %282 : vector<16x32xf32> to vector<16x32xbf16>
    %cst_185 = arith.constant dense<0.000000e+00> : vector<16x32xf32>
    %298 = tpu.matmul %296, %297, %cst_185 {dimension_numbers = #tpu.dot_dimension_numbers<[1], [0], [0], [1], [0, 0, 1, 1], [], []>} : vector<16x16xbf16>, vector<16x32xbf16>, vector<16x32xf32> -> vector<16x32xf32>
    %299 = arith.truncf %298 : vector<16x32xf32> to vector<16x32xbf16>
    %c0_186 = arith.constant 0 : index
    %c192 = arith.constant 192 : index
    %300 = vector.load %arg19[%c0_186, %c192] : memref<16x256xbf16, #tpu.memory_space<vmem>>, vector<16x32xbf16>
    tpu.vector_store %arg19[%c0_186, %c192], %299 {strides = array<i32>} : memref<16x256xbf16, #tpu.memory_space<vmem>>, vector<16x32xbf16>,
    %c7 = arith.constant 7 : index
    %c0_187 = arith.constant 0 : index
    %c0_188 = arith.constant 0 : index
    %301 = vector.load %arg4[%c7, %c0_187, %c0_188] : memref<8x256x32xbf16, #tpu.memory_space<vmem>>, vector<1x256x32xbf16>
    %302 = vector.shape_cast %301 : vector<1x256x32xbf16> to vector<256x32xbf16>
    %cst_189 = arith.constant dense<0.000000e+00> : vector<16x32xf32>
    %303 = tpu.matmul %27, %302, %cst_189 {dimension_numbers = #tpu.dot_dimension_numbers<[1], [0], [0], [1], [0, 0, 1, 1], [], []>} : vector<16x256xbf16>, vector<256x32xbf16>, vector<16x32xf32> -> vector<16x32xf32>
    %c7_190 = arith.constant 7 : index
    %c0_191 = arith.constant 0 : index
    %c0_192 = arith.constant 0 : index
    %304 = vector.load %arg7[%c7_190, %c0_191, %c0_192] : memref<8x1x32xf32, #tpu.memory_space<vmem>>, vector<1x1x32xf32>
    %305 = vector.shape_cast %304 : vector<1x1x32xf32> to vector<1x32xf32>
    %306 = vector.broadcast %305 : vector<1x32xf32> to vector<16x32xf32>
    %307 = arith.addf %303, %306 : vector<16x32xf32>
    %c7_193 = arith.constant 7 : index
    %c0_194 = arith.constant 0 : index
    %c0_195 = arith.constant 0 : index
    %308 = vector.load %arg5[%c7_193, %c0_194, %c0_195] : memref<8x256x32xbf16, #tpu.memory_space<vmem>>, vector<1x256x32xbf16>
    %309 = vector.shape_cast %308 : vector<1x256x32xbf16> to vector<256x32xbf16>
    %cst_196 = arith.constant dense<0.000000e+00> : vector<16x32xf32>
    %310 = tpu.matmul %27, %309, %cst_196 {dimension_numbers = #tpu.dot_dimension_numbers<[1], [0], [0], [1], [0, 0, 1, 1], [], []>} : vector<16x256xbf16>, vector<256x32xbf16>, vector<16x32xf32> -> vector<16x32xf32>
    %c7_197 = arith.constant 7 : index
    %c0_198 = arith.constant 0 : index
    %c0_199 = arith.constant 0 : index
    %311 = vector.load %arg8[%c7_197, %c0_198, %c0_199] : memref<8x1x32xf32, #tpu.memory_space<vmem>>, vector<1x1x32xf32>
    %312 = vector.shape_cast %311 : vector<1x1x32xf32> to vector<1x32xf32>
    %313 = vector.broadcast %312 : vector<1x32xf32> to vector<16x32xf32>
    %314 = arith.addf %310, %313 : vector<16x32xf32>
    %c7_200 = arith.constant 7 : index
    %c0_201 = arith.constant 0 : index
    %c0_202 = arith.constant 0 : index
    %315 = vector.load %arg6[%c7_200, %c0_201, %c0_202] : memref<8x256x32xbf16, #tpu.memory_space<vmem>>, vector<1x256x32xbf16>
    %316 = vector.shape_cast %315 : vector<1x256x32xbf16> to vector<256x32xbf16>
    %cst_203 = arith.constant dense<0.000000e+00> : vector<16x32xf32>
    %317 = tpu.matmul %27, %316, %cst_203 {dimension_numbers = #tpu.dot_dimension_numbers<[1], [0], [0], [1], [0, 0, 1, 1], [], []>} : vector<16x256xbf16>, vector<256x32xbf16>, vector<16x32xf32> -> vector<16x32xf32>
    %c7_204 = arith.constant 7 : index
    %c0_205 = arith.constant 0 : index
    %c0_206 = arith.constant 0 : index
    %318 = vector.load %arg9[%c7_204, %c0_205, %c0_206] : memref<8x1x32xf32, #tpu.memory_space<vmem>>, vector<1x1x32xf32>
    %319 = vector.shape_cast %318 : vector<1x1x32xf32> to vector<1x32xf32>
    %320 = vector.broadcast %319 : vector<1x32xf32> to vector<16x32xf32>
    %321 = arith.addf %317, %320 : vector<16x32xf32>
    %322 = arith.truncf %307 : vector<16x32xf32> to vector<16x32xbf16>
    %323 = arith.truncf %314 : vector<16x32xf32> to vector<16x32xbf16>
    %cst_207 = arith.constant dense<0.000000e+00> : vector<16x16xf32>
    %324 = tpu.matmul %322, %323, %cst_207 {dimension_numbers = #tpu.dot_dimension_numbers<[1], [1], [0], [0], [0, 0, 1, 0], [], []>} : vector<16x32xbf16>, vector<16x32xbf16>, vector<16x16xf32> -> vector<16x16xf32>
    %cst_208 = arith.constant dense<0xFF800000> : vector<16xf32>
    %325 = vector.multi_reduction <maximumf>, %324, %cst_208 [1] : vector<16x16xf32> to vector<16xf32>
    %326 = vector.shape_cast %325 : vector<16xf32> to vector<16x1xf32>
    %327 = vector.broadcast %326 : vector<16x1xf32> to vector<16x16xf32>
    %328 = arith.subf %324, %327 : vector<16x16xf32>
    %329 = math.exp %328 : vector<16x16xf32>
    %cst_209 = arith.constant dense<0.000000e+00> : vector<16xf32>
    %330 = vector.multi_reduction <add>, %329, %cst_209 [1] : vector<16x16xf32> to vector<16xf32>
    %331 = vector.shape_cast %330 : vector<16xf32> to vector<16x1xf32>
    %332 = tpu.reciprocal %331 {approx = true} : vector<16x1xf32> -> vector<16x1xf32>
    %333 = vector.broadcast %332 : vector<16x1xf32> to vector<16x16xf32>
    %334 = arith.mulf %329, %333 : vector<16x16xf32>
    %335 = arith.truncf %334 : vector<16x16xf32> to vector<16x16xbf16>
    %336 = arith.truncf %321 : vector<16x32xf32> to vector<16x32xbf16>
    %cst_210 = arith.constant dense<0.000000e+00> : vector<16x32xf32>
    %337 = tpu.matmul %335, %336, %cst_210 {dimension_numbers = #tpu.dot_dimension_numbers<[1], [0], [0], [1], [0, 0, 1, 1], [], []>} : vector<16x16xbf16>, vector<16x32xbf16>, vector<16x32xf32> -> vector<16x32xf32>
    %338 = arith.truncf %337 : vector<16x32xf32> to vector<16x32xbf16>
    %c0_211 = arith.constant 0 : index
    %c224 = arith.constant 224 : index
    %339 = vector.load %arg19[%c0_211, %c224] : memref<16x256xbf16, #tpu.memory_space<vmem>>, vector<16x32xbf16>
    tpu.vector_store %arg19[%c0_211, %c224], %338 {strides = array<i32>} : memref<16x256xbf16, #tpu.memory_space<vmem>>, vector<16x32xbf16>,
    %c0_212 = arith.constant 0 : index
    %c0_213 = arith.constant 0 : index
    %340 = vector.load %arg19[%c0_212, %c0_213] : memref<16x256xbf16, #tpu.memory_space<vmem>>, vector<16x256xbf16>
    %c0_214 = arith.constant 0 : index
    %c0_215 = arith.constant 0 : index
    %341 = vector.load %arg10[%c0_214, %c0_215] : memref<256x256xbf16, #tpu.memory_space<vmem>>, vector<256x256xbf16>
    %cst_216 = arith.constant dense<0.000000e+00> : vector<16x256xf32>
    %342 = tpu.matmul %340, %341, %cst_216 {dimension_numbers = #tpu.dot_dimension_numbers<[1], [0], [0], [1], [0, 0, 1, 1], [], []>} : vector<16x256xbf16>, vector<256x256xbf16>, vector<16x256xf32> -> vector<16x256xf32>
    %c0_217 = arith.constant 0 : index
    %c0_218 = arith.constant 0 : index
    %343 = vector.load %arg11[%c0_217, %c0_218] : memref<1x256xf32, #tpu.memory_space<vmem>>, vector<1x256xf32>
    %344 = vector.broadcast %343 : vector<1x256xf32> to vector<16x256xf32>
    %345 = arith.addf %342, %344 : vector<16x256xf32>
    %346 = arith.addf %2, %345 : vector<16x256xf32>
    %c0_219 = arith.constant 0 : index
    %c0_220 = arith.constant 0 : index
    %347 = vector.load %arg12[%c0_219, %c0_220] : memref<1x256xf32, #tpu.memory_space<vmem>>, vector<1x256xf32>
    %c0_221 = arith.constant 0 : index
    %c0_222 = arith.constant 0 : index
    %348 = vector.load %arg13[%c0_221, %c0_222] : memref<1x256xf32, #tpu.memory_space<vmem>>, vector<1x256xf32>
    %cst_223 = arith.constant dense<0.000000e+00> : vector<16xf32>
    %349 = vector.multi_reduction <add>, %346, %cst_223 [1] : vector<16x256xf32> to vector<16xf32>
    %350 = vector.shape_cast %349 : vector<16xf32> to vector<16x1xf32>
    %cst_224 = arith.constant 2.560000e+02 : f32
    %351 = vector.broadcast %cst_224 : f32 to vector<16x1xf32>
    %352 = arith.divf %350, %351 : vector<16x1xf32>
    %353 = vector.broadcast %352 : vector<16x1xf32> to vector<16x256xf32>
    %354 = arith.subf %346, %353 : vector<16x256xf32>
    %355 = arith.mulf %354, %354 : vector<16x256xf32>
    %cst_225 = arith.constant dense<0.000000e+00> : vector<16xf32>
    %356 = vector.multi_reduction <add>, %355, %cst_225 [1] : vector<16x256xf32> to vector<16xf32>
    %357 = vector.shape_cast %356 : vector<16xf32> to vector<16x1xf32>
    %cst_226 = arith.constant 2.560000e+02 : f32
    %358 = vector.broadcast %cst_226 : f32 to vector<16x1xf32>
    %359 = arith.divf %357, %358 : vector<16x1xf32>
    %360 = vector.broadcast %352 : vector<16x1xf32> to vector<16x256xf32>
    %361 = arith.subf %346, %360 : vector<16x256xf32>
    %cst_227 = arith.constant 9.99999974E-6 : f32
    %362 = vector.broadcast %cst_227 : f32 to vector<16x1xf32>
    %363 = arith.addf %359, %362 : vector<16x1xf32>
    %364 = math.rsqrt %363 : vector<16x1xf32>
    %365 = vector.broadcast %364 : vector<16x1xf32> to vector<16x256xf32>
    %366 = arith.mulf %361, %365 : vector<16x256xf32>
    %367 = vector.broadcast %347 : vector<1x256xf32> to vector<16x256xf32>
    %368 = arith.mulf %366, %367 : vector<16x256xf32>
    %369 = vector.broadcast %348 : vector<1x256xf32> to vector<16x256xf32>
    %370 = arith.addf %368, %369 : vector<16x256xf32>
    %371 = arith.truncf %370 : vector<16x256xf32> to vector<16x256xbf16>
    %c0_228 = arith.constant 0 : index
    %c0_229 = arith.constant 0 : index
    %372 = vector.load %arg14[%c0_228, %c0_229] : memref<256x512xbf16, #tpu.memory_space<vmem>>, vector<256x512xbf16>
    %cst_230 = arith.constant dense<0.000000e+00> : vector<16x512xf32>
    %373 = tpu.matmul %371, %372, %cst_230 {dimension_numbers = #tpu.dot_dimension_numbers<[1], [0], [0], [1], [0, 0, 1, 1], [], []>} : vector<16x256xbf16>, vector<256x512xbf16>, vector<16x512xf32> -> vector<16x512xf32>
    %c0_231 = arith.constant 0 : index
    %c0_232 = arith.constant 0 : index
    %374 = vector.load %arg15[%c0_231, %c0_232] : memref<1x512xf32, #tpu.memory_space<vmem>>, vector<1x512xf32>
    %375 = vector.broadcast %374 : vector<1x512xf32> to vector<16x512xf32>
    %376 = arith.addf %373, %375 : vector<16x512xf32>
    %cst_233 = arith.constant 0.000000e+00 : f32
    %377 = vector.broadcast %cst_233 : f32 to vector<16x512xf32>
    %378 = arith.maximumf %376, %377 : vector<16x512xf32>
    %379 = arith.truncf %378 : vector<16x512xf32> to vector<16x512xbf16>
    %c0_234 = arith.constant 0 : index
    %c0_235 = arith.constant 0 : index
    %380 = vector.load %arg16[%c0_234, %c0_235] : memref<512x256xbf16, #tpu.memory_space<vmem>>, vector<512x256xbf16>
    %cst_236 = arith.constant dense<0.000000e+00> : vector<16x256xf32>
    %381 = tpu.matmul %379, %380, %cst_236 {dimension_numbers = #tpu.dot_dimension_numbers<[1], [0], [0], [1], [0, 0, 1, 1], [], []>} : vector<16x512xbf16>, vector<512x256xbf16>, vector<16x256xf32> -> vector<16x256xf32>
    %c0_237 = arith.constant 0 : index
    %c0_238 = arith.constant 0 : index
    %382 = vector.load %arg17[%c0_237, %c0_238] : memref<1x256xf32, #tpu.memory_space<vmem>>, vector<1x256xf32>
    %383 = vector.broadcast %382 : vector<1x256xf32> to vector<16x256xf32>
    %384 = arith.addf %381, %383 : vector<16x256xf32>
    %385 = arith.addf %346, %384 : vector<16x256xf32>
    %386 = arith.truncf %385 : vector<16x256xf32> to vector<16x256xbf16>
    %c0_239 = arith.constant 0 : index
    %c0_240 = arith.constant 0 : index
    %c0_241 = arith.constant 0 : index
    %387 = vector.load %arg18[%c0_239, %c0_240, %c0_241] : memref<1x16x256xbf16, #tpu.memory_space<vmem>>, vector<1x16x256xbf16>
    %388 = vector.shape_cast %387 : vector<1x16x256xbf16> to vector<16x256xbf16>
    %389 = vector.shape_cast %386 : vector<16x256xbf16> to vector<1x16x256xbf16>
    tpu.vector_store %arg18[%c0_239, %c0_240, %c0_241], %389 {strides = array<i32>} : memref<1x16x256xbf16, #tpu.memory_space<vmem>>, vector<1x16x256xbf16>,
    return
  }
  func.func @transform_0(%arg0: i32) -> (i32, i32, i32) {
    %c0_i32 = arith.constant 0 : i32
    %c0_i32_0 = arith.constant 0 : i32
    %c0_i32_1 = arith.constant 0 : i32
    return %arg0, %c0_i32, %c0_i32_0 : i32, i32, i32
  }
  func.func @transform_1(%arg0: i32) -> (i32, i32) {
    %c0_i32 = arith.constant 0 : i32
    %c0_i32_0 = arith.constant 0 : i32
    %c0_i32_1 = arith.constant 0 : i32
    return %c0_i32, %c0_i32_0 : i32, i32
  }
  func.func @transform_2(%arg0: i32) -> (i32, i32) {
    %c0_i32 = arith.constant 0 : i32
    %c0_i32_0 = arith.constant 0 : i32
    %c0_i32_1 = arith.constant 0 : i32
    return %c0_i32, %c0_i32_0 : i32, i32
  }
  func.func @transform_3(%arg0: i32) -> (i32, i32, i32) {
    %c0_i32 = arith.constant 0 : i32
    %c0_i32_0 = arith.constant 0 : i32
    %c0_i32_1 = arith.constant 0 : i32
    %c0_i32_2 = arith.constant 0 : i32
    return %c0_i32, %c0_i32_0, %c0_i32_1 : i32, i32, i32
  }
  func.func @transform_4(%arg0: i32) -> (i32, i32, i32) {
    %c0_i32 = arith.constant 0 : i32
    %c0_i32_0 = arith.constant 0 : i32
    %c0_i32_1 = arith.constant 0 : i32
    %c0_i32_2 = arith.constant 0 : i32
    return %c0_i32, %c0_i32_0, %c0_i32_1 : i32, i32, i32
  }
  func.func @transform_5(%arg0: i32) -> (i32, i32, i32) {
    %c0_i32 = arith.constant 0 : i32
    %c0_i32_0 = arith.constant 0 : i32
    %c0_i32_1 = arith.constant 0 : i32
    %c0_i32_2 = arith.constant 0 : i32
    return %c0_i32, %c0_i32_0, %c0_i32_1 : i32, i32, i32
  }
  func.func @transform_6(%arg0: i32) -> (i32, i32, i32) {
    %c0_i32 = arith.constant 0 : i32
    %c0_i32_0 = arith.constant 0 : i32
    %c0_i32_1 = arith.constant 0 : i32
    %c0_i32_2 = arith.constant 0 : i32
    return %c0_i32, %c0_i32_0, %c0_i32_1 : i32, i32, i32
  }
  func.func @transform_7(%arg0: i32) -> (i32, i32, i32) {
    %c0_i32 = arith.constant 0 : i32
    %c0_i32_0 = arith.constant 0 : i32
    %c0_i32_1 = arith.constant 0 : i32
    %c0_i32_2 = arith.constant 0 : i32
    return %c0_i32, %c0_i32_0, %c0_i32_1 : i32, i32, i32
  }
  func.func @transform_8(%arg0: i32) -> (i32, i32, i32) {
    %c0_i32 = arith.constant 0 : i32
    %c0_i32_0 = arith.constant 0 : i32
    %c0_i32_1 = arith.constant 0 : i32
    %c0_i32_2 = arith.constant 0 : i32
    return %c0_i32, %c0_i32_0, %c0_i32_1 : i32, i32, i32
  }
  func.func @transform_9(%arg0: i32) -> (i32, i32) {
    %c0_i32 = arith.constant 0 : i32
    %c0_i32_0 = arith.constant 0 : i32
    %c0_i32_1 = arith.constant 0 : i32
    return %c0_i32, %c0_i32_0 : i32, i32
  }
  func.func @transform_10(%arg0: i32) -> (i32, i32) {
    %c0_i32 = arith.constant 0 : i32
    %c0_i32_0 = arith.constant 0 : i32
    %c0_i32_1 = arith.constant 0 : i32
    return %c0_i32, %c0_i32_0 : i32, i32
  }
  func.func @transform_11(%arg0: i32) -> (i32, i32) {
    %c0_i32 = arith.constant 0 : i32
    %c0_i32_0 = arith.constant 0 : i32
    %c0_i32_1 = arith.constant 0 : i32
    return %c0_i32, %c0_i32_0 : i32, i32
  }
  func.func @transform_12(%arg0: i32) -> (i32, i32) {
    %c0_i32 = arith.constant 0 : i32
    %c0_i32_0 = arith.constant 0 : i32
    %c0_i32_1 = arith.constant 0 : i32
    return %c0_i32, %c0_i32_0 : i32, i32
  }
  func.func @transform_13(%arg0: i32) -> (i32, i32) {
    %c0_i32 = arith.constant 0 : i32
    %c0_i32_0 = arith.constant 0 : i32
    %c0_i32_1 = arith.constant 0 : i32
    return %c0_i32, %c0_i32_0 : i32, i32
  }
  func.func @transform_14(%arg0: i32) -> (i32, i32) {
    %c0_i32 = arith.constant 0 : i32
    %c0_i32_0 = arith.constant 0 : i32
    %c0_i32_1 = arith.constant 0 : i32
    return %c0_i32, %c0_i32_0 : i32, i32
  }
  func.func @transform_15(%arg0: i32) -> (i32, i32) {
    %c0_i32 = arith.constant 0 : i32
    %c0_i32_0 = arith.constant 0 : i32
    %c0_i32_1 = arith.constant 0 : i32
    return %c0_i32, %c0_i32_0 : i32, i32
  }
  func.func @transform_16(%arg0: i32) -> (i32, i32) {
    %c0_i32 = arith.constant 0 : i32
    %c0_i32_0 = arith.constant 0 : i32
    %c0_i32_1 = arith.constant 0 : i32
    return %c0_i32, %c0_i32_0 : i32, i32
  }
  func.func @transform_17(%arg0: i32) -> (i32, i32, i32) {
    %c0_i32 = arith.constant 0 : i32
    %c0_i32_0 = arith.constant 0 : i32
    %c0_i32_1 = arith.constant 0 : i32
    return %arg0, %c0_i32, %c0_i32_0 : i32, i32, i32
  }
}

</mosaic_0001>

<bundles_post_ra>
// kernel: image_encoder_forward.5
= control target key start
LH: loop header
LB: loop body
LE: loop exit
PB: predicated region body
PF: predicated region fallthrough
CT: control target
= control target key end

     0   :  { %s1072_s12 = smov 0   ;;  %s1074_s13 = smov 0   ;;  %s1182_s0 = inlined_call_operand.vmem [shape: bf16[32,768], index: 0, kind: input, shape index: {}]   ;;  %s1183_s1 = inlined_call_operand.vmem [shape: bf16[768,128], index: 1, kind: input, shape index: {}]   ;;  %s1184_s2 = inlined_call_operand.vmem [shape: f32[1,128], index: 2, kind: input, shape index: {}]   ;;  %s1185_s3 = inlined_call_operand.vmem [shape: bf16[32,128], index: 3, kind: output, shape index: {}]  }
   0x1   :  { %s1076_s14 = smov 0   ;;  %s1078_s15 = smov 0  }
   0x2   :  { %s1080_s16 = smov 0  }
   0x3 LB: > { %s25_s17 = sadd.s32 1, %s1045_s15  ;;  %p48_p1 = scmp.ne.s32.totalorder %s1037_s13, %s1033_s12  ;;  %s1049_s16 = sphi %s1080_s16, %s13_s16   ;;  %s1045_s15 = sphi %s1078_s15, %s1189_s15   ;;  %s1041_s14 = sphi %s1076_s14, %s1188_s14   ;;  %s1037_s13 = sphi %s1074_s13, %s1187_s13   ;;  %s1033_s12 = sphi %s1072_s12, %s1186_s12  }
   0x4   : > { %p26_p0 = scmp.ge.s32.totalorder %s25_s17, 2  ;;  %p49_p2 = scmp.eq.s32.totalorder %s1049_s16, 0 }
   0x5   : > { %s41_s19 = sadd.s32 1, %s1037_s13  ;;  %p809_p5 = scmp.ge.s32.totalorder %s1049_s16, 2 }
   0x6   : > { %s1191_s17 = smov (%p26_p0, %s25_s17), 0  ;;  %p50_p3 = por %p49_p2, %p48_p1 }
   0x7   : > { %s37_s18 = ssub.s32 %s1045_s15, %s1191_s17  ;;  %162 = sbr.rel (%p809_p5) target bundleno = 21 (0x15), region = 20 }
   0x8   : > { %p39_p4 = scmp.eq.s32.totalorder %s37_s18, 0 }
   0xa   : > { %s1107_s20 = scalar_select %p39_p4, %s1037_s13, %s41_s19  }
   0xc   : > { %165 = sbr.rel (!%p50_p3) target bundleno = 21 (0x15), region = 24  ;;  %s167_s21 = sand.u32 (%p50_p3), 1, %s1037_s13  }
   0xd   : > { %s862_s22 = smul.u32 (%p50_p3), 12, %s1045_s15 }
   0xe   : > { %s936_s23 = smul.u32 (%p50_p3), 48, %s167_s21 }
   0xf   : > { %s175_s26 = scalar_lea.vmem (%p50_p3), %s1182_s0, %s862_s22 }
  0x10   : > { %v190_v0 = vld [vmem:[%s175_s26] sm:$0xff] (%p50_p3)  ;;  %v192_v1 = vld [vmem:[%s175_s26 + $0x18] sm:$0xff] (%p50_p3)  ;;  %v194_v2 = vld [vmem:[%s175_s26 + $0x30] sm:$0xff] (%p50_p3)  ;;  %s169_s27 = scalar_lea.vmem (%p50_p3), [#allocation3], %s936_s23 }
  0x11   : > { %191 = vst [vmem:[%s169_s27] sm:$0xff] %v190_v0  ;;  %193 = vst [vmem:[%s169_s27 + $0xc] sm:$0xff] %v192_v1  ;;  %v196_v3 = vld [vmem:[%s175_s26 + $0x48] sm:$0xff]  ;;  %v813_v5 = vld [vmem:[%s175_s26 + $0x20] sm:$0xf] }
  0x12   : > { %195 = vst [vmem:[%s169_s27 + $0x18] sm:$0xff] %v194_v2  ;;  %v811_v4 = vld [vmem:[%s175_s26 + $0x8] sm:$0xf]  ;;  %197 = vst [vmem:[%s169_s27 + $0x24] sm:$0xff] %v196_v3  ;;  %v815_v6 = vld [vmem:[%s175_s26 + $0x38] sm:$0xf] }
  0x13   : > { %812 = vst [vmem:[%s169_s27 + $0x8] sm:$0xf] %v811_v4  ;;  %814 = vst [vmem:[%s169_s27 + $0x14] sm:$0xf] %v813_v5  ;;  %v817_v7 = vld [vmem:[%s175_s26 + $0x50] sm:$0xf] }
  0x14   : > { %816 = vst [vmem:[%s169_s27 + $0x20] sm:$0xf] %v815_v6  ;;  %818 = vst [vmem:[%s169_s27 + $0x2c] sm:$0xf] %v817_v7 }
  0x15 PF: > { %p819_p6 = scmp.ge.s32.totalorder %s1049_s16, 1  ;;  %p230_p7 = scmp.lt.s32.totalorder %s1049_s16, 3 }
  0x17   : > { %p231_p8 = pnand %p819_p6, %p230_p7 }
  0x18   : > { %s237_s28 = sand.u32 (!%p231_p8), 1, %s1033_s12   ;;  %s276_s29 = smul.u32 (!%p231_p8), 48, %s1041_s14 }
  0x19   : > { %234 = sbr.rel (%p231_p8) target bundleno = 299 (0x12b), region = 54  ;;  %p821_p10 = scmp.ne.s32.totalorder (!%p231_p8), %s1041_s14, 0 }
  0x1a   : > { %s937_s30 = smul.u32 (!%p231_p8), 48, %s237_s28  ;;  %p277_p9 = scmp.lt.s32.totalorder (!%p231_p8), %s276_s29, 95 }
  0x1c   : > { %s1124_s8 = scalar_lea.vmem (!%p231_p8), [#allocation3], %s937_s30 }
  0x1e   : > { %s1193_s29 = smov (!%p277_p9, %s276_s29), 95  ;;  %301 = sbr.rel (%p821_p10) target bundleno = 38 (0x26), region = 62 }
  0x1f   : > { %s820_s4 = sshll.u32 %s1193_s29, 2 }
  0x20   : > { %s1122_s7 = scalar_lea.vmem %s1183_s1, %s820_s4 }
  0x23   : > { %v1051_v8 = vmov 0.0  }
  0x24   : > { %302 = vst [vmem:[#allocation2 + $0x10] sm:$0xff] %v1051_v8  ;;  %303 = vst [vmem:[#allocation2] sm:$0xff] %v1051_v8 }
  0x25   : > { %304 = vst [vmem:[#allocation2 + $0x18] sm:$0xff] %v1051_v8  ;;  %305 = vst [vmem:[#allocation2 + $0x8] sm:$0xff] %v1051_v8 }
  0x26 PF: > { %v979_v9 = vld [vmem:[%s1122_s7 + $0x78] sm:$0xff]   ;;  %v982_v12 = vld [vmem:[%s1122_s7 + $0x70] sm:$0xff]   ;;  %v985_v15 = vld [vmem:[%s1122_s7 + $0x68] sm:$0xff]   ;;  %p852_p11 = scmp.ne.s32.totalorder %s1041_s14, 1 }
  0x27   : > { %v980_v10 = vld [vmem:[%s1122_s7 + $0x38] sm:$0xff]   ;;  %878 = vmatprep.subr.bf16.mxu0 %v979_v9  ;;  %v983_v13 = vld [vmem:[%s1122_s7 + $0x30] sm:$0xff]   ;;  %v986_v16 = vld [vmem:[%s1122_s7 + $0x28] sm:$0xff]  }
  0x28   : > { %v981_v11 = vld [vmem:[%s1122_s7 + $0xb8] sm:$0xff]   ;;  %879 = vmatpush3.bf16.msra.mxu0 %v980_v10  ;;  %v984_v14 = vld [vmem:[%s1122_s7 + $0xb0] sm:$0xff]   ;;  %v987_v17 = vld [vmem:[%s1122_s7 + $0xa8] sm:$0xff]  }
  0x29   : > { %916 = vmatprep.subr.bf16.mxu1 %v981_v11  ;;  %880 = vmatprep.subr.bf16.mxu0 %v982_v12  ;;  %v988_v18 = vld [vmem:[%s1122_s7 + $0x60] sm:$0xff]   ;;  %v991_v21 = vld [vmem:[%s1122_s7 + $0x58] sm:$0xff]   ;;  %v994_v24 = vld [vmem:[%s1122_s7 + $0x50] sm:$0xff]  }
  0x2a   : > { %917 = vmatpush3.bf16.msra.mxu1 %v981_v11  ;;  %v989_v19 = vld [vmem:[%s1122_s7 + $0x20] sm:$0xff]   ;;  %v993_v22 = vld [vmem:[%s1122_s7 + $0x98] sm:$0xff]   ;;  %v996_v25 = vld [vmem:[%s1122_s7 + $0x90] sm:$0xff]  }
  0x2b   : > { %918 = vmatprep.subr.bf16.mxu1 %v984_v14  ;;  %v990_v20 = vld [vmem:[%s1122_s7 + $0xa0] sm:$0xff]   ;;  %v992_v23 = vld [vmem:[%s1122_s7 + $0x18] sm:$0xff]   ;;  %v995_v26 = vld [vmem:[%s1122_s7 + $0x10] sm:$0xff]  }
  0x2c   : > { %881 = vmatpush3.bf16.msra.mxu0 %v983_v13  ;;  %v997_v27 = vld [vmem:[%s1122_s7 + $0x48] sm:$0xff]   ;;  %v1000_v30 = vld [vmem:[%s1122_s7 + $0x40] sm:$0xff]   ;;  %v306_v44 = vld [vmem:[#allocation2 + $0x10] sm:$0xff] }
  0x2d   : > { %882 = vmatprep.subr.bf16.mxu0 %v985_v15  ;;  %v998_v28 = vld [vmem:[%s1122_s7 + $0x8] sm:$0xff]   ;;  %v1002_v31 = vld [vmem:[%s1122_s7 + $0x80] sm:$0xff]   ;;  %v308_v58 = vld [vmem:[#allocation2 + $0x18] sm:$0xff] }
  0x2e   : > { %919 = vmatpush3.bf16.msra.mxu1 %v984_v14  ;;  %v999_v29 = vld [vmem:[%s1122_s7 + $0x88] sm:$0xff]   ;;  %v1005_v32 = vld [vmem:[%s1124_s8 + $0x4] ss:$12 sps:$4 sm:$0xff]  }
  0x2f   : > { %920 = vmatprep.subr.bf16.mxu1 %v987_v17  ;;  %v1006_v33 = vld [vmem:[%s1124_s8 + $0x8] ss:$12 sps:$4 sm:$0xff]   ;;  %574 = vmatprep.mubr.bf16.mxu0 %v1005_v32  ;;  %v1003_v35 = vld [vmem:[%s1124_s8] ss:$12 sps:$4 sm:$0xff]   ;;  %v1010_v38 = vld [vmem:[%s1124_s8 + $0x18] ss:$12 sps:$4 sm:$0xff]  }
  0x30   : > { %883 = vmatpush3.bf16.msra.mxu0 %v986_v16  ;;  %v1001_v34 = vld [vmem:[%s1122_s7] sm:$0xff]   ;;  %932 = vmatprep.mubr.bf16.mxu1 %v1006_v33  ;;  %v1008_v36 = vld [vmem:[%s1124_s8 + $0x1c] ss:$12 sps:$4 sm:$0xff]  }
  0x31   : > { %884 = vmatprep.subr.bf16.mxu0 %v988_v18  ;;  %v1007_v37 = vld [vmem:[%s1124_s8 + $0x20] ss:$12 sps:$4 sm:$0xff]  }
  0x32   : > { %921 = vmatpush3.bf16.msra.mxu1 %v987_v17  ;;  %v307_v52 = vld [vmem:[#allocation2] sm:$0xff]  ;;  %v309_v0 = vld [vmem:[#allocation2 + $0x8] sm:$0xff] }
  0x33   : > { %922 = vmatprep.subr.bf16.mxu1 %v990_v20 }
  0x34   : > { %885 = vmatpush3.bf16.msra.mxu0 %v989_v19 }
  0x35   : > { %886 = vmatprep.subr.bf16.mxu0 %v991_v21 }
  0x36   : > { %923 = vmatpush3.bf16.msra.mxu1 %v990_v20 }
  0x37   : > { %924 = vmatprep.subr.bf16.mxu1 %v993_v22 }
  0x38   : > { %887 = vmatpush3.bf16.msra.mxu0 %v992_v23 }
  0x39   : > { %888 = vmatprep.subr.bf16.mxu0 %v994_v24 }
  0x3a   : > { %925 = vmatpush3.bf16.msra.mxu1 %v993_v22 }
  0x3b   : > { %926 = vmatprep.subr.bf16.mxu1 %v996_v25 }
  0x3c   : > { %889 = vmatpush3.bf16.msra.mxu0 %v995_v26 }
  0x3d   : > { %890 = vmatprep.subr.bf16.mxu0 %v997_v27 }
  0x3e   : > { %927 = vmatpush3.bf16.msra.mxu1 %v996_v25 }
  0x3f   : > { %928 = vmatprep.subr.bf16.mxu1 %v999_v29 }
  0x40   : > { %891 = vmatpush3.bf16.msra.mxu0 %v998_v28 }
  0x41   : > { %892 = vmatprep.subr.bf16.mxu0 %v1000_v30 }
  0x42   : > { %929 = vmatpush3.bf16.msra.mxu1 %v999_v29 }
  0x43   : > { %930 = vmatprep.subr.bf16.mxu1 %v1002_v31 }
  0x44   : > { %893 = vmatpush3.bf16.msra.mxu0 %v1001_v34 }
  0x46   : > { %931 = vmatpush3.bf16.msra.mxu1 %v1002_v31 }
  0x47   : > { %575 = vmatmul.mubr.bf16.vlgmr.msra.gmra.mxu0 %v1003_v35 }
  0x48   : > { %582 = vmatprep.mubr.bf16.mxu0 %v1008_v36 }
  0x49   : > { %933 = vmatmul.mubr.bf16.vlgmr.msra.gmra.mxu1 %v1007_v37 }
  0x4f   : > { %583 = vmatmul.mubr.bf16.gmra.mxu0 %v1010_v38 }
 0x107   : > { %v894_v39 = vpop.f32.mrf.mxu0 }
 0x109   : > { %v895_v40 = vpop.f32.mrf.mxu0  ;;  %v934_v41 = vpop.f32.mrf.mxu1 }
 0x10a   : > { %v896_v42 = vadd.f32 %v895_v40, %v894_v39 }
 0x10b   : > { %v897_v43 = vpop.f32.mrf.mxu0  ;;  %v625_v45 = vpop.f32.mrf.mxu1 }
 0x10c   : > { %v626_v46 = vadd.f32 %v896_v42, %v625_v45 }
 0x10d   : > { %v898_v47 = vpop.f32.mrf.mxu0  ;;  %v935_v48 = vpop.f32.mrf.mxu1 }
 0x10e   : > { %v640_v49 = vadd.f32 %v626_v46, %v306_v44  ;;  %v899_v50 = vadd.f32 %v898_v47, %v897_v43 }
 0x10f   : > { %v900_v51 = vpop.f32.mrf.mxu0  ;;  %v628_v53 = vpop.f32.mrf.mxu1 }
 0x110   : > { %644 = vst [vmem:[#allocation2 + $0x10] sm:$0xff] %v640_v49  ;;  %v629_v54 = vadd.f32 %v899_v50, %v628_v53 }
 0x111   : > { %v901_v55 = vpop.f32.mrf.mxu0 }
 0x112   : > { %v641_v56 = vadd.f32 %v629_v54, %v307_v52  ;;  %v902_v57 = vadd.f32 %v901_v55, %v900_v51 }
 0x113   : > { %v903_v59 = vpop.f32.mrf.mxu0 }
 0x114   : > { %645 = vst [vmem:[#allocation2] sm:$0xff] %v641_v56  ;;  %v634_v60 = vadd.f32 %v934_v41, %v902_v57 }
 0x115   : > { %v904_v61 = vpop.f32.mrf.mxu0 }
 0x116   : > { %v642_v62 = vadd.f32 %v634_v60, %v308_v58  ;;  %v905_v63 = vadd.f32 %v904_v61, %v903_v59 }
 0x118   : > { %646 = vst [vmem:[#allocation2 + $0x18] sm:$0xff] %v642_v62  ;;  %v637_v1 = vadd.f32 %v935_v48, %v905_v63  ;;  %651 = sbr.rel (%p852_p11) target bundleno = 299 (0x12b), region = 66 }
 0x11a   : > { %v643_v2 = vadd.f32 %v637_v1, %v309_v0 }
 0x11c   : > { %647 = vst [vmem:[#allocation2 + $0x8] sm:$0xff] %v643_v2 }
 0x11d   : > { %v652_v3 = vld [vmem:[#allocation2 + $0x10] sm:$0xff]  ;;  %v653_v4 = vld [vmem:[#allocation2] sm:$0xff] }
 0x11e   : > { %v853_v5 = vld [vmem:[%s1184_s2] ss:$0 sm:$0xff] }
 0x11f   : > { %v663_v6 = vadd.f32 %v853_v5, %v652_v3  ;;  %v664_v7 = vadd.f32 %v853_v5, %v653_v4  ;;  %v654_v8 = vld [vmem:[#allocation2 + $0x18] sm:$0xff] }
 0x120   : > { %v665_v10 = vadd.f32 %v853_v5, %v654_v8 }
 0x121   : > { %v667_v12 = vmax.f32 %v663_v6, 0.0  ;;  %v668_v13 = vmax.f32 %v664_v7, 0.0 }
 0x122   : > { %v669_v14 = vmax.f32 %v665_v10, 0.0 }
 0x123   : > { %v655_v9 = vld [vmem:[#allocation2 + $0x8] sm:$0xff]  ;;  %v870_v16 = vpack.c.bf16 %v668_v13, %v667_v12 }
 0x124   : > { %v666_v11 = vadd.f32 %v853_v5, %v655_v9 }
 0x125   : > { %871 = vst [vmem:[%s1185_s3] sm:$0xff] %v870_v16  }
 0x126   : > { %v670_v15 = vmax.f32 %v666_v11, 0.0 }
 0x128   : > { %v875_v17 = vpack.c.bf16 %v670_v15, %v669_v14 }
 0x12a   : > { %877 = vst [vmem:[%s1185_s3 + $0x8] sm:$0xff] %v875_v17  }
 0x12b PF: > { %s13_s16 = sadd.s32 1, %s1049_s16   ;;  %s1186_s12 = smov %s1037_s13 }
 0x12c   : > { %p10_p12 = scmp.ge.s32.totalorder %s13_s16, 4   ;;  %s1187_s13 = smov %s1107_s20 }
 0x12d   : > { %s1188_s14 = smov %s1045_s15  ;;  %s1189_s15 = smov %s1191_s17 }
 0x12e   :  { %12 = sbr.rel (!%p10_p12) target bundleno = 3 (0x3), region = 113 }

// kernel: image_encoder_forward.6
= control target key start
LH: loop header
LB: loop body
LE: loop exit
PB: predicated region body
PF: predicated region fallthrough
CT: control target
= control target key end

     0   :  { %s980_s1 = inlined_call_operand.vmem [shape: bf16[512,256], index: 1, kind: input, shape index: {}]   ;;  %s981_s0 = inlined_call_operand.vmem [shape: bf16[16,512], index: 0, kind: input, shape index: {}]   ;;  %s982_s2 = inlined_call_operand.vmem [shape: f32[1,256], index: 2, kind: input, shape index: {}]   ;;  %s983_s3 = inlined_call_operand.vmem [shape: bf16[16,256], index: 3, kind: output, shape index: {}]  }
   0x1   :  { %v645_v0 = vld [vmem:[%s980_s1 + $0x74] ss:$8 sps:$4 sm:$0xff]   ;;  %v649_v2 = vld [vmem:[%s980_s1 + $0x70] ss:$8 sps:$4 sm:$0xff]   ;;  %v651_v4 = vld [vmem:[%s980_s1 + $0x64] ss:$8 sps:$4 sm:$0xff]  }
   0x2   :  { %v647_v1 = vld [vmem:[%s980_s1 + $0x174] ss:$8 sps:$4 sm:$0xff]   ;;  %434 = vmatprep.subr.bf16.mxu0 %v645_v0  ;;  %v650_v3 = vld [vmem:[%s980_s1 + $0x170] ss:$8 sps:$4 sm:$0xff]   ;;  %v653_v5 = vld [vmem:[%s980_s1 + $0x164] ss:$8 sps:$4 sm:$0xff]  }
   0x3   :  { %477 = vmatprep.subr.bf16.mxu1 %v647_v1  ;;  %435 = vmatpush1.bf16.msra.mxu0 %v649_v2  ;;  %v655_v6 = vld [vmem:[%s980_s1 + $0x60] ss:$8 sps:$4 sm:$0xff]   ;;  %v657_v8 = vld [vmem:[%s980_s1 + $0x54] ss:$8 sps:$4 sm:$0xff]   ;;  %v661_v10 = vld [vmem:[%s980_s1 + $0x50] ss:$8 sps:$4 sm:$0xff]  }
   0x4   :  { %478 = vmatpush1.bf16.msra.mxu1 %v650_v3  ;;  %436 = vmatprep.subr.bf16.mxu0 %v651_v4  ;;  %v656_v7 = vld [vmem:[%s980_s1 + $0x160] ss:$8 sps:$4 sm:$0xff]   ;;  %v659_v9 = vld [vmem:[%s980_s1 + $0x154] ss:$8 sps:$4 sm:$0xff]   ;;  %v662_v11 = vld [vmem:[%s980_s1 + $0x150] ss:$8 sps:$4 sm:$0xff]   ;;  %v537_v4 = vlaneseq }
   0x5   :  { %479 = vmatprep.subr.bf16.mxu1 %v653_v5  ;;  %v663_v12 = vld [vmem:[%s980_s1 + $0x44] ss:$8 sps:$4 sm:$0xff]   ;;  %v667_v14 = vld [vmem:[%s980_s1 + $0x40] ss:$8 sps:$4 sm:$0xff]   ;;  %v669_v16 = vld [vmem:[%s980_s1 + $0x34] ss:$8 sps:$4 sm:$0xff]  }
   0x6   :  { %v665_v13 = vld [vmem:[%s980_s1 + $0x144] ss:$8 sps:$4 sm:$0xff]   ;;  %v668_v15 = vld [vmem:[%s980_s1 + $0x140] ss:$8 sps:$4 sm:$0xff]   ;;  %v671_v17 = vld [vmem:[%s980_s1 + $0x134] ss:$8 sps:$4 sm:$0xff]  }
   0x7   :  { %437 = vmatpush1.bf16.msra.mxu0 %v655_v6  ;;  %v673_v18 = vld [vmem:[%s980_s1 + $0x30] ss:$8 sps:$4 sm:$0xff]   ;;  %v675_v20 = vld [vmem:[%s980_s1 + $0x24] ss:$8 sps:$4 sm:$0xff]   ;;  %v679_v22 = vld [vmem:[%s980_s1 + $0x20] ss:$8 sps:$4 sm:$0xff]  }
   0x8   :  { %480 = vmatpush1.bf16.msra.mxu1 %v656_v7  ;;  %438 = vmatprep.subr.bf16.mxu0 %v657_v8  ;;  %v674_v19 = vld [vmem:[%s980_s1 + $0x130] ss:$8 sps:$4 sm:$0xff]   ;;  %v677_v21 = vld [vmem:[%s980_s1 + $0x124] ss:$8 sps:$4 sm:$0xff]   ;;  %v680_v23 = vld [vmem:[%s980_s1 + $0x120] ss:$8 sps:$4 sm:$0xff]  }
   0x9   :  { %481 = vmatprep.subr.bf16.mxu1 %v659_v9  ;;  %v681_v24 = vld [vmem:[%s980_s1 + $0x14] ss:$8 sps:$4 sm:$0xff]   ;;  %v685_v26 = vld [vmem:[%s980_s1 + $0x10] ss:$8 sps:$4 sm:$0xff]   ;;  %v687_v28 = vld [vmem:[%s980_s1 + $0x4] ss:$8 sps:$4 sm:$0xff]  }
   0xa   :  { %v683_v25 = vld [vmem:[%s980_s1 + $0x114] ss:$8 sps:$4 sm:$0xff]   ;;  %v686_v27 = vld [vmem:[%s980_s1 + $0x110] ss:$8 sps:$4 sm:$0xff]   ;;  %v689_v29 = vld [vmem:[%s980_s1 + $0x104] ss:$8 sps:$4 sm:$0xff]  }
   0xb   :  { %439 = vmatpush1.bf16.msra.mxu0 %v661_v10  ;;  %v691_v30 = vld [vmem:[%s980_s1] ss:$8 sps:$4 sm:$0xff]   ;;  %v693_v32 = vld [vmem:[%s980_s1 + $0xf4] ss:$8 sps:$4 sm:$0xff]   ;;  %v697_v34 = vld [vmem:[%s980_s1 + $0xf0] ss:$8 sps:$4 sm:$0xff]  }
   0xc   :  { %482 = vmatpush1.bf16.msra.mxu1 %v662_v11  ;;  %440 = vmatprep.subr.bf16.mxu0 %v663_v12  ;;  %v692_v31 = vld [vmem:[%s980_s1 + $0x100] ss:$8 sps:$4 sm:$0xff]   ;;  %v695_v33 = vld [vmem:[%s980_s1 + $0x1f4] ss:$8 sps:$4 sm:$0xff]   ;;  %v698_v35 = vld [vmem:[%s980_s1 + $0x1f0] ss:$8 sps:$4 sm:$0xff]  }
   0xd   :  { %483 = vmatprep.subr.bf16.mxu1 %v665_v13  ;;  %v699_v36 = vld [vmem:[%s980_s1 + $0xe4] ss:$8 sps:$4 sm:$0xff]   ;;  %v703_v38 = vld [vmem:[%s980_s1 + $0xe0] ss:$8 sps:$4 sm:$0xff]   ;;  %v705_v40 = vld [vmem:[%s980_s1 + $0xd4] ss:$8 sps:$4 sm:$0xff]  }
   0xe   :  { %v701_v37 = vld [vmem:[%s980_s1 + $0x1e4] ss:$8 sps:$4 sm:$0xff]   ;;  %v704_v39 = vld [vmem:[%s980_s1 + $0x1e0] ss:$8 sps:$4 sm:$0xff]   ;;  %v707_v41 = vld [vmem:[%s980_s1 + $0x1d4] ss:$8 sps:$4 sm:$0xff]  }
   0xf   :  { %441 = vmatpush1.bf16.msra.mxu0 %v667_v14  ;;  %v709_v42 = vld [vmem:[%s980_s1 + $0xd0] ss:$8 sps:$4 sm:$0xff]   ;;  %v711_v44 = vld [vmem:[%s980_s1 + $0xc4] ss:$8 sps:$4 sm:$0xff]   ;;  %v715_v46 = vld [vmem:[%s980_s1 + $0xc0] ss:$8 sps:$4 sm:$0xff]  }
  0x10   :  { %484 = vmatpush1.bf16.msra.mxu1 %v668_v15  ;;  %442 = vmatprep.subr.bf16.mxu0 %v669_v16  ;;  %v710_v43 = vld [vmem:[%s980_s1 + $0x1d0] ss:$8 sps:$4 sm:$0xff]   ;;  %v713_v45 = vld [vmem:[%s980_s1 + $0x1c4] ss:$8 sps:$4 sm:$0xff]   ;;  %v716_v48 = vld [vmem:[%s980_s1 + $0x1c0] ss:$8 sps:$4 sm:$0xff]  }
  0x11   :  { %485 = vmatprep.subr.bf16.mxu1 %v671_v17  ;;  %v743_v47 = vld [vmem:[%s981_s0 + $0x4] ss:$16 sps:$4 sm:$0xff]   ;;  %v746_v51 = vld [vmem:[%s981_s0 + $0xc] ss:$16 sps:$4 sm:$0xff]   ;;  %v721_v52 = vld [vmem:[%s980_s1 + $0xb0] ss:$8 sps:$4 sm:$0xff]  }
  0x12   :  { %v717_v49 = vld [vmem:[%s980_s1 + $0xb4] ss:$8 sps:$4 sm:$0xff]   ;;  %466 = vmatprep.mubr.bf16.mxu0 %v743_v47  ;;  %509 = vmatprep.mubr.bf16.mxu1 %v746_v51  ;;  %v722_v53 = vld [vmem:[%s980_s1 + $0x1b0] ss:$8 sps:$4 sm:$0xff]   ;;  %v723_v54 = vld [vmem:[%s980_s1 + $0xa4] ss:$8 sps:$4 sm:$0xff]  }
  0x13   :  { %443 = vmatpush1.bf16.msra.mxu0 %v673_v18  ;;  %v719_v50 = vld [vmem:[%s980_s1 + $0x1b4] ss:$8 sps:$4 sm:$0xff]   ;;  %v725_v55 = vld [vmem:[%s980_s1 + $0x1a4] ss:$8 sps:$4 sm:$0xff]   ;;  %v727_v56 = vld [vmem:[%s980_s1 + $0xa0] ss:$8 sps:$4 sm:$0xff]  }
  0x14   :  { %486 = vmatpush1.bf16.msra.mxu1 %v674_v19  ;;  %444 = vmatprep.subr.bf16.mxu0 %v675_v20  ;;  %v728_v57 = vld [vmem:[%s980_s1 + $0x1a0] ss:$8 sps:$4 sm:$0xff]   ;;  %v729_v58 = vld [vmem:[%s980_s1 + $0x94] ss:$8 sps:$4 sm:$0xff]   ;;  %v733_v60 = vld [vmem:[%s980_s1 + $0x90] ss:$8 sps:$4 sm:$0xff]  }
  0x15   :  { %487 = vmatprep.subr.bf16.mxu1 %v677_v21  ;;  %v731_v59 = vld [vmem:[%s980_s1 + $0x194] ss:$8 sps:$4 sm:$0xff]   ;;  %v734_v61 = vld [vmem:[%s980_s1 + $0x190] ss:$8 sps:$4 sm:$0xff]   ;;  %v735_v62 = vld [vmem:[%s980_s1 + $0x84] ss:$8 sps:$4 sm:$0xff]  }
  0x16   :  { %v737_v63 = vld [vmem:[%s980_s1 + $0x184] ss:$8 sps:$4 sm:$0xff]   ;;  %v739_v0 = vld [vmem:[%s980_s1 + $0x80] ss:$8 sps:$4 sm:$0xff]   ;;  %v538_v5 = vshrl.u32 %v537_v4, 7 }
  0x17   :  { %445 = vmatpush1.bf16.msra.mxu0 %v679_v22  ;;  %v740_v1 = vld [vmem:[%s980_s1 + $0x180] ss:$8 sps:$4 sm:$0xff]  }
  0x18   :  { %488 = vmatpush1.bf16.msra.mxu1 %v680_v23  ;;  %446 = vmatprep.subr.bf16.mxu0 %v681_v24  ;;  %v741_v2 = vld [vmem:[%s981_s0] ss:$16 sps:$4 sm:$0xff]   ;;  %v744_v3 = vld [vmem:[%s981_s0 + $0x8] ss:$16 sps:$4 sm:$0xff]   ;;  %v539_v6 = vsub.s32 0, %v538_v5  ;;  %v543_v8 = vsub.s32 1, %v538_v5 }
  0x19   :  { %489 = vmatprep.subr.bf16.mxu1 %v683_v25  ;;  %v535_v7 = vld [vmem:[%s982_s2] sm:$0x3] }
  0x1a   :  { %v540_v9 = vrot.slane %v535_v7, %v539_v6  ;;  %v544_v13 = vrot.slane %v535_v7, %v543_v8 }
  0x1b   :  { %447 = vmatpush1.bf16.msra.mxu0 %v685_v26 }
  0x1c   :  { %490 = vmatpush1.bf16.msra.mxu1 %v686_v27  ;;  %448 = vmatprep.subr.bf16.mxu0 %v687_v28 }
  0x1d   :  { %491 = vmatprep.subr.bf16.mxu1 %v689_v29 }
  0x1f   :  { %449 = vmatpush1.bf16.msra.mxu0 %v691_v30 }
  0x20   :  { %492 = vmatpush1.bf16.msra.mxu1 %v692_v31  ;;  %450 = vmatprep.subr.bf16.mxu0 %v693_v32 }
  0x21   :  { %493 = vmatprep.subr.bf16.mxu1 %v695_v33 }
  0x23   :  { %451 = vmatpush2.bf16.msra.mxu0 %v697_v34 }
  0x24   :  { %494 = vmatpush2.bf16.msra.mxu1 %v698_v35  ;;  %452 = vmatprep.subr.bf16.mxu0 %v699_v36 }
  0x25   :  { %495 = vmatprep.subr.bf16.mxu1 %v701_v37 }
  0x27   :  { %453 = vmatpush2.bf16.msra.mxu0 %v703_v38 }
  0x28   :  { %496 = vmatpush2.bf16.msra.mxu1 %v704_v39  ;;  %454 = vmatprep.subr.bf16.mxu0 %v705_v40 }
  0x29   :  { %497 = vmatprep.subr.bf16.mxu1 %v707_v41 }
  0x2b   :  { %455 = vmatpush2.bf16.msra.mxu0 %v709_v42 }
  0x2c   :  { %498 = vmatpush2.bf16.msra.mxu1 %v710_v43  ;;  %456 = vmatprep.subr.bf16.mxu0 %v711_v44 }
  0x2d   :  { %499 = vmatprep.subr.bf16.mxu1 %v713_v45 }
  0x2f   :  { %457 = vmatpush2.bf16.msra.mxu0 %v715_v46 }
  0x30   :  { %500 = vmatpush2.bf16.msra.mxu1 %v716_v48  ;;  %458 = vmatprep.subr.bf16.mxu0 %v717_v49 }
  0x31   :  { %501 = vmatprep.subr.bf16.mxu1 %v719_v50 }
  0x33   :  { %459 = vmatpush2.bf16.msra.mxu0 %v721_v52 }
  0x34   :  { %502 = vmatpush2.bf16.msra.mxu1 %v722_v53  ;;  %460 = vmatprep.subr.bf16.mxu0 %v723_v54 }
  0x35   :  { %503 = vmatprep.subr.bf16.mxu1 %v725_v55 }
  0x37   :  { %461 = vmatpush2.bf16.msra.mxu0 %v727_v56 }
  0x38   :  { %504 = vmatpush2.bf16.msra.mxu1 %v728_v57  ;;  %462 = vmatprep.subr.bf16.mxu0 %v729_v58 }
  0x39   :  { %505 = vmatprep.subr.bf16.mxu1 %v731_v59 }
  0x3b   :  { %463 = vmatpush2.bf16.msra.mxu0 %v733_v60 }
  0x3c   :  { %506 = vmatpush2.bf16.msra.mxu1 %v734_v61  ;;  %464 = vmatprep.subr.bf16.mxu0 %v735_v62 }
  0x3d   :  { %507 = vmatprep.subr.bf16.mxu1 %v737_v63 }
  0x3f   :  { %465 = vmatpush2.bf16.msra.mxu0 %v739_v0 }
  0x40   :  { %508 = vmatpush2.bf16.msra.mxu1 %v740_v1 }
  0x42   :  { %467 = vmatmul.mubr.bf16.vlgmr.msra.gmra.mxu0 %v741_v2 }
  0x43   :  { %510 = vmatmul.mubr.bf16.vlgmr.msra.gmra.mxu1 %v744_v3 }
 0x102   :  { %v468_v10 = vpop.f32.mrf.mxu0 }
 0x103   :  { %v511_v11 = vpop.f32.mrf.mxu1 }
 0x104   :  { %v512_v12 = vadd.f32 %v511_v11, %v468_v10  ;;  %v470_v14 = vpop.f32.mrf.mxu0 }
 0x105   :  { %v513_v15 = vpop.f32.mrf.mxu1 }
 0x106   :  { %v547_v16 = vadd.f32 %v540_v9, %v512_v12  ;;  %v514_v17 = vadd.f32 %v513_v15, %v470_v14  ;;  %v472_v18 = vpop.f32.mrf.mxu0 }
 0x107   :  { %v515_v19 = vpop.f32.mrf.mxu1 }
 0x108   :  { %v548_v20 = vadd.f32 %v544_v13, %v514_v17  ;;  %v516_v21 = vadd.f32 %v515_v19, %v472_v18  ;;  %v474_v22 = vpop.f32.mrf.mxu0  ;;  %v551_v24 = vmax.f32 %v547_v16, 0.0 }
 0x109   :  { %v517_v23 = vpop.f32.mrf.mxu1 }
 0x10a   :  { %v552_v25 = vmax.f32 %v548_v20, 0.0  ;;  %v549_v26 = vadd.f32 %v540_v9, %v516_v21  ;;  %v518_v27 = vadd.f32 %v517_v23, %v474_v22 }
 0x10c   :  { %v643_v28 = vpack.c.bf16 %v552_v25, %v551_v24  ;;  %v550_v29 = vadd.f32 %v544_v13, %v518_v27  ;;  %v553_v30 = vmax.f32 %v549_v26, 0.0 }
 0x10e   :  { %567 = vst [vmem:[%s983_s3] sm:$0xff] %v643_v28  ;;  %v554_v31 = vmax.f32 %v550_v29, 0.0 }
 0x110   :  { %v644_v32 = vpack.c.bf16 %v554_v31, %v553_v30 }
 0x112   :  { %568 = vst [vmem:[%s983_s3 + $0x8] sm:$0xff] %v644_v32 }

// kernel: image_encoder_forward.7
= control target key start
LH: loop header
LB: loop body
LE: loop exit
PB: predicated region body
PF: predicated region fallthrough
CT: control target
= control target key end

     0   :  { %s1258_s17 = smov 0   ;;  %s1429_s0 = inlined_call_operand.vmem [shape: bf16[2,4,256], index: 0, kind: input, shape index: {}]   ;;  %s1430_s1 = inlined_call_operand.vmem [shape: bf16[2,16,128], index: 1, kind: input, shape index: {}]   ;;  %s1431_s2 = inlined_call_operand.vmem [shape: bf16[16,4], index: 2, kind: input, shape index: {}]   ;;  %s1432_s3 = inlined_call_operand.vmem [shape: bf16[256,128], index: 3, kind: input, shape index: {}]   ;;  %s1433_s4 = inlined_call_operand.vmem [shape: f32[1,128], index: 4, kind: input, shape index: {}]   ;;  %s1434_s5 = inlined_call_operand.vmem [shape: bf16[128,128], index: 5, kind: input, shape index: {}]   ;;  %s1435_s6 = inlined_call_operand.vmem [shape: f32[1,128], index: 6, kind: input, shape index: {}]   ;;  %s1436_s7 = inlined_call_operand.vmem [shape: bf16[128,128], index: 7, kind: input, shape index: {}]   ;;  %s1437_s8 = inlined_call_operand.vmem [shape: f32[1,128], index: 8, kind: input, shape index: {}]   ;;  %s1438_s9 = inlined_call_operand.vmem [shape: f32[16,128], index: 9, kind: input, shape index: {}]   ;;  %s1439_s10 = inlined_call_operand.vmem [shape: f32[16,128], index: 10, kind: input, shape index: {}]   ;;  %s1440_s11 = inlined_call_operand.vmem [shape: bf16[2,16,256], index: 11, kind: output, shape index: {}]  }
   0x1 LB: > { %s982_s18 = sadd.s32 4294967295, %s1194_s17   ;;  %p986_p0 = scmp.ge.s32.totalorder %s1194_s17, 1  ;;  %s1194_s17 = sphi %s1258_s17, %s21_s17  }
   0x2   : > { %p347_p1 = scmp.lt.s32.totalorder %s1194_s17, 3 }
   0x4   : > { %p348_p2 = pnand %p986_p0, %p347_p1 }
   0x5   : > { %p392_p3 = scmp.lt.s32.totalorder (!%p348_p2), %s982_s18, 1 }
   0x6   : > { %351 = sbr.rel (%p348_p2) target bundleno = 688 (0x2b0), region = 64 }
   0xb   : > { %v1154_v0 = vld [vmem:[%s1432_s3 + $0x78] sm:$0xff]   ;;  %v1156_v2 = vld [vmem:[%s1432_s3 + $0x70] sm:$0xff]   ;;  %v1158_v4 = vld [vmem:[%s1432_s3 + $0x68] sm:$0xff]   ;;  %s1442_s18 = smov (!%p392_p3, %s982_s18), 1  ;;  %v1196_v18 = vmov 0.0   ;;  %vm1197_vm0 = vmmov 0  }
   0xc   : > { %v1155_v1 = vld [vmem:[%s1432_s3 + $0x38] sm:$0xff]   ;;  %1056 = vmatprep.subr.bf16.mxu0 %v1154_v0  ;;  %v1157_v3 = vld [vmem:[%s1432_s3 + $0x30] sm:$0xff]   ;;  %v1159_v5 = vld [vmem:[%s1432_s3 + $0x28] sm:$0xff]   ;;  %s1038_s14 = sshll.u32 %s1442_s18, 2  ;;  %1098 = vmatprep.subr.bf16.mxu1 %v1196_v18  ;;  %s1039_s21 = sshll.u32 %s1442_s18, 3  ;;  %vm607_vm1 = vcmask 1041408  }
   0xd   : > { %1057 = vmatpush3.bf16.msra.mxu0 %v1155_v1  ;;  %v1160_v6 = vld [vmem:[%s1432_s3 + $0x60] sm:$0xff]   ;;  %v1162_v8 = vld [vmem:[%s1432_s3 + $0x58] sm:$0xff]   ;;  %s396_s23 = scalar_lea.vmem %s1429_s0, %s1038_s14  ;;  %v1164_v10 = vld [vmem:[%s1432_s3 + $0x50] sm:$0xff]   ;;  %1100 = vmatprep.mubr.msk.bf16.mxu1 %vm1197_vm0, %v1196_v18  ;;  %s1330_s24 = scalar_lea.vmem %s1430_s1, %s1039_s21  ;;  %vm603_vm2 = vcmask 31744  }
   0xe   : > { %1058 = vmatprep.subr.bf16.mxu0 %v1156_v2  ;;  %v1161_v7 = vld [vmem:[%s1432_s3 + $0x20] sm:$0xff]   ;;  %v1163_v9 = vld [vmem:[%s1432_s3 + $0x18] sm:$0xff]   ;;  %v1165_v12 = vld [vmem:[%s1432_s3 + $0x10] sm:$0xff]   ;;  %s1040_s16 = sshll.u32 %s1442_s18, 4 }
   0xf   : > { %v994_v11 = vld.sshfl [vmem:[%s396_s23] sm:$0x33 pattern:$0x76325410]  ;;  %v1166_v14 = vld [vmem:[%s1432_s3 + $0x48] sm:$0xff]   ;;  %v1171_v29 = vld [vmem:[%s1434_s5 + $0x38] sm:$0xff]   ;;  %s406_s23 = scalar_lea.vmem %s1440_s11, %s1040_s16 }
  0x10   : > { %v456_v13 = vcombine.high %v994_v11, %v994_v11  ;;  %v1167_v15 = vld [vmem:[%s1432_s3 + $0x8] sm:$0xff]   ;;  %v1168_v16 = vld [vmem:[%s1432_s3 + $0x40] sm:$0xff]   ;;  %v1172_v30 = vld [vmem:[%s1434_s5 + $0x30] sm:$0xff]  }
  0x11   : > { %1059 = vmatpush3.bf16.msra.mxu0 %v1157_v3  ;;  %v1169_v17 = vld [vmem:[%s1432_s3] sm:$0xff]   ;;  %v1173_v31 = vld [vmem:[%s1434_s5 + $0x28] sm:$0xff]   ;;  %v1175_v33 = vld [vmem:[%s1434_s5 + $0x18] sm:$0xff]  }
  0x12   : > { %1060 = vmatprep.subr.bf16.mxu0 %v1158_v4  ;;  %587 = vmatprep.mubr.bf16.mxu0 %v456_v13  ;;  %v993_v20 = vld [vmem:[%s1433_s4] ss:$0 sm:$0xff]  ;;  %v1176_v34 = vld [vmem:[%s1434_s5 + $0x10] sm:$0xff]   ;;  %v1177_v35 = vld [vmem:[%s1434_s5 + $0x8] sm:$0xff]  }
  0x13   : > { %v1170_v28 = vld [vmem:[%s1431_s2] sm:$0xff]   ;;  %v1180_v38 = vld [vmem:[%s1436_s7 + $0x38] sm:$0xff]   ;;  %v1181_v39 = vld [vmem:[%s1436_s7 + $0x30] sm:$0xff]  }
  0x14   : > { %v1174_v32 = vld [vmem:[%s1434_s5 + $0x20] sm:$0xff]   ;;  %v1182_v40 = vld [vmem:[%s1436_s7 + $0x28] sm:$0xff]   ;;  %v1184_v42 = vld [vmem:[%s1436_s7 + $0x18] sm:$0xff]  }
  0x15   : > { %1061 = vmatpush3.bf16.msra.mxu0 %v1159_v5  ;;  %v1178_v36 = vld [vmem:[%s1434_s5] sm:$0xff]   ;;  %v1185_v43 = vld [vmem:[%s1436_s7 + $0x10] sm:$0xff]   ;;  %v1186_v44 = vld [vmem:[%s1436_s7 + $0x8] sm:$0xff]  }
  0x16   : > { %1062 = vmatprep.subr.bf16.mxu0 %v1160_v6  ;;  %v1179_v37 = vld [vmem:[%s1330_s24] sm:$0xff]   ;;  %v892_v4 = vld [vmem:[%s1438_s9 + $0x8] sm:$0xff] }
  0x17   : > { %v1183_v41 = vld [vmem:[%s1436_s7 + $0x20] sm:$0xff]   ;;  %v888_v6 = vld [vmem:[%s1439_s10 + $0x8] sm:$0xff] }
  0x18   : > { %v1187_v45 = vld [vmem:[%s1436_s7] sm:$0xff]  }
  0x19   : > { %1063 = vmatpush3.bf16.msra.mxu0 %v1161_v7  ;;  %v1013_v50 = vld [vmem:[%s1435_s6] ss:$0 sm:$0xff] }
  0x1a   : > { %1064 = vmatprep.subr.bf16.mxu0 %v1162_v8  ;;  %v1023_v60 = vld [vmem:[%s1437_s8] ss:$0 sm:$0xff] }
  0x1b   : > { %v891_v61 = vld [vmem:[%s1438_s9] sm:$0xff] }
  0x1c   : > { %v887_v63 = vld [vmem:[%s1439_s10] sm:$0xff] }
  0x1d   : > { %1065 = vmatpush3.bf16.msra.mxu0 %v1163_v9 }
  0x1e   : > { %1066 = vmatprep.subr.bf16.mxu0 %v1164_v10 }
  0x21   : > { %1067 = vmatpush3.bf16.msra.mxu0 %v1165_v12 }
  0x22   : > { %1068 = vmatprep.subr.bf16.mxu0 %v1166_v14 }
  0x25   : > { %1069 = vmatpush3.bf16.msra.mxu0 %v1167_v15 }
  0x26   : > { %1070 = vmatprep.subr.bf16.mxu0 %v1168_v16 }
  0x29   : > { %1071 = vmatpush3.bf16.msra.mxu0 %v1169_v17 }
  0x2a   : > { %1124 = vmatprep.subr.bf16.mxu0 %v1196_v18 }
  0x2c   : > { %588 = vmatmul.mubr.bf16.vlgmr.msra.gmra.mxu0 %v994_v11 }
  0x2d   : > { %1140 = vmatprep.mubr.msk.bf16.mxu0 %vm1197_vm0, %v1196_v18  ;;  %1125 = vmatpush3.bf16.msra.mxu0 %v1180_v38 }
  0x2e   : > { %1126 = vmatprep.subr.bf16.mxu0 %v1196_v18 }
  0x31   : > { %1127 = vmatpush3.bf16.msra.mxu0 %v1181_v39 }
  0x32   : > { %1128 = vmatprep.subr.bf16.mxu0 %v1196_v18 }
  0x35   : > { %1129 = vmatpush3.bf16.msra.mxu0 %v1182_v40 }
  0x36   : > { %1130 = vmatprep.subr.bf16.mxu0 %v1196_v18 }
  0x39   : > { %1131 = vmatpush3.bf16.msra.mxu0 %v1183_v41 }
  0x3a   : > { %1132 = vmatprep.subr.bf16.mxu0 %v1196_v18 }
  0x3d   : > { %1133 = vmatpush3.bf16.msra.mxu0 %v1184_v42 }
  0x3e   : > { %1134 = vmatprep.subr.bf16.mxu0 %v1196_v18 }
  0x41   : > { %1135 = vmatpush3.bf16.msra.mxu0 %v1185_v43 }
  0x42   : > { %1136 = vmatprep.subr.bf16.mxu0 %v1196_v18 }
  0x45   : > { %1137 = vmatpush3.bf16.msra.mxu0 %v1186_v44 }
  0x46   : > { %1138 = vmatprep.subr.bf16.mxu0 %v1196_v18 }
  0x49   : > { %1139 = vmatpush3.bf16.msra.mxu0 %v1187_v45 }
  0xec   : > { %v1072_v19 = vpop.f32.mrf.mxu0 }
  0xee   : > { %v1073_v21 = vpop.f32.mrf.mxu0 }
  0xef   : > { %v1074_v22 = vadd.f32 %v1073_v21, %v1072_v19 }
  0xf0   : > { %v1075_v23 = vpop.f32.mrf.mxu0 }
  0xf1   : > { %v590_v24 = vadd.f32 %v1074_v22, %v993_v20 }
  0xf2   : > { %v1076_v25 = vpop.f32.mrf.mxu0 }
  0xf3   : > { %v597_v26 = vpack.c.bf16 %v590_v24, %v590_v24 }
  0xf5   : > { %v609_v27 = vsel %vm607_vm1, %v597_v26, 0 }
  0xf6   : > { %1099 = vmatpush3.bf16.msra.mxu1 %v609_v27 }
  0xf7   : > { %1104 = vmatprep.subr.bf16.mxu1 %v1196_v18 }
  0xf9   : > { %1101 = vmatmul.mubr.msk.bf16.vlgmr.msra.gmra.mxu1 %vm603_vm2, %v1170_v28 }
  0xfa   : > { %1105 = vmatpush3.bf16.msra.mxu1 %v1171_v29  ;;  %1120 = vmatprep.mubr.msk.bf16.mxu1 %vm1197_vm0, %v1196_v18 }
  0xfb   : > { %1106 = vmatprep.subr.bf16.mxu1 %v1196_v18 }
  0xfe   : > { %1107 = vmatpush3.bf16.msra.mxu1 %v1172_v30 }
  0xff   : > { %1108 = vmatprep.subr.bf16.mxu1 %v1196_v18 }
 0x102   : > { %1109 = vmatpush3.bf16.msra.mxu1 %v1173_v31 }
 0x103   : > { %1110 = vmatprep.subr.bf16.mxu1 %v1196_v18 }
 0x106   : > { %1111 = vmatpush3.bf16.msra.mxu1 %v1174_v32 }
 0x107   : > { %1112 = vmatprep.subr.bf16.mxu1 %v1196_v18 }
 0x10a   : > { %1113 = vmatpush3.bf16.msra.mxu1 %v1175_v33 }
 0x10b   : > { %1114 = vmatprep.subr.bf16.mxu1 %v1196_v18 }
 0x10e   : > { %1115 = vmatpush3.bf16.msra.mxu1 %v1176_v34 }
 0x10f   : > { %1116 = vmatprep.subr.bf16.mxu1 %v1196_v18 }
 0x112   : > { %1117 = vmatpush3.bf16.msra.mxu1 %v1177_v35 }
 0x113   : > { %1118 = vmatprep.subr.bf16.mxu1 %v1196_v18 }
 0x116   : > { %1119 = vmatpush3.bf16.msra.mxu1 %v1178_v36 }
 0x119   : > { %1121 = vmatmul.mubr.bf16.vlgmr.msra.gmra.mxu1 %v1179_v37 }
 0x1b9   : > { %v645_v46 = vpop.f32.mrf.mxu1 }
 0x1ba   : > { %v893_v2 = vadd.f32 %v891_v61, %v645_v46 }
 0x1bb   : > { %v1102_v47 = vpop.f32.mrf.mxu1 }
 0x1bd   : > { %v648_v48 = vpop.f32.mrf.mxu1 }
 0x1be   : > { %v894_v10 = vadd.f32 %v892_v4, %v648_v48 }
 0x1bf   : > { %v1103_v49 = vpop.f32.mrf.mxu1 }
 0x1d9   : > { %v765_v51 = vpop.f32.mrf.mxu1 }
 0x1da   : > { %v766_v53 = vadd.f32 %v1013_v50, %v765_v51 }
 0x1db   : > { %v1122_v52 = vpop.f32.mrf.mxu1 }
 0x1dc   : > { %v772_v57 = vadd.f32 %v766_v53, %v645_v46 }
 0x1dd   : > { %v768_v54 = vpop.f32.mrf.mxu1 }
 0x1de   : > { %v769_v55 = vadd.f32 %v1013_v50, %v768_v54 }
 0x1df   : > { %v1123_v56 = vpop.f32.mrf.mxu1 }
 0x1e0   : > { %v773_v58 = vadd.f32 %v769_v55, %v648_v48 }
 0x1e2   : > { %v774_v59 = vpack.c.bf16 %v773_v58, %v772_v57 }
 0x1e4   : > { %1141 = vmatmul.mubr.bf16.vlgmr.msra.gmra.mxu0 %v774_v59 }
 0x2a4   : > { %v880_v62 = vpop.f32.mrf.mxu0 }
 0x2a5   : > { %v881_v0 = vadd.f32 %v1023_v60, %v880_v62 }
 0x2a6   : > { %v1142_v1 = vpop.f32.mrf.mxu0 }
 0x2a7   : > { %v889_v3 = vadd.f32 %v887_v63, %v881_v0 }
 0x2a8   : > { %v883_v5 = vpop.f32.mrf.mxu0 }
 0x2a9   : > { %v1048_v7 = vpack.c.bf16 %v889_v3, %v893_v2  ;;  %v884_v8 = vadd.f32 %v1023_v60, %v883_v5 }
 0x2aa   : > { %v1143_v9 = vpop.f32.mrf.mxu0 }
 0x2ab   : > { %1049 = vst [vmem:[%s406_s23] sm:$0xff] %v1048_v7   ;;  %v890_v11 = vadd.f32 %v888_v6, %v884_v8 }
 0x2ad   : > { %v1053_v12 = vpack.c.bf16 %v890_v11, %v894_v10 }
 0x2af   : > { %1055 = vst [vmem:[%s406_s23 + $0x8] sm:$0xff] %v1053_v12  }
 0x2b0 PF: > { %s21_s17 = sadd.s32 1, %s1194_s17  }
 0x2b1   : > { %p18_p4 = scmp.ge.s32.totalorder %s21_s17, 4  }
 0x2b3   :  { %20 = sbr.rel (!%p18_p4) target bundleno = 1 (0x1), region = 97 }

// kernel: image_encoder_forward.8
= control target key start
LH: loop header
LB: loop body
LE: loop exit
PB: predicated region body
PF: predicated region fallthrough
CT: control target
= control target key end

     0   :  { %s10122_s24 = smov 0   ;;  %s12187_s0 = inlined_call_operand.vmem [shape: bf16[2,16,256], index: 0, kind: input, shape index: {}]   ;;  %s12188_s1 = inlined_call_operand.vmem [shape: f32[1,256], index: 1, kind: input, shape index: {}]   ;;  %s12189_s2 = inlined_call_operand.vmem [shape: f32[1,256], index: 2, kind: input, shape index: {}]   ;;  %s12190_s3 = inlined_call_operand.vmem [shape: bf16[8,256,32], index: 3, kind: input, shape index: {}]   ;;  %s12191_s4 = inlined_call_operand.vmem [shape: bf16[8,256,32], index: 4, kind: input, shape index: {}]   ;;  %s12192_s5 = inlined_call_operand.vmem [shape: bf16[8,256,32], index: 5, kind: input, shape index: {}]   ;;  %s12193_s6 = inlined_call_operand.vmem [shape: f32[8,1,32], index: 6, kind: input, shape index: {}]   ;;  %s12194_s7 = inlined_call_operand.vmem [shape: f32[8,1,32], index: 7, kind: input, shape index: {}]   ;;  %s12195_s8 = inlined_call_operand.vmem [shape: f32[8,1,32], index: 8, kind: input, shape index: {}]   ;;  %s12196_s9 = inlined_call_operand.vmem [shape: bf16[256,256], index: 9, kind: input, shape index: {}]   ;;  %s12197_s10 = inlined_call_operand.vmem [shape: f32[1,256], index: 10, kind: input, shape index: {}]   ;;  %s12198_s11 = inlined_call_operand.vmem [shape: f32[1,256], index: 11, kind: input, shape index: {}]   ;;  %s12199_s12 = inlined_call_operand.vmem [shape: f32[1,256], index: 12, kind: input, shape index: {}]   ;;  %s12200_s13 = inlined_call_operand.vmem [shape: bf16[256,512], index: 13, kind: input, shape index: {}]   ;;  %s12201_s14 = inlined_call_operand.vmem [shape: f32[1,512], index: 14, kind: input, shape index: {}]   ;;  %s12202_s15 = inlined_call_operand.vmem [shape: bf16[512,256], index: 15, kind: input, shape index: {}]   ;;  %s12203_s16 = inlined_call_operand.vmem [shape: f32[1,256], index: 16, kind: input, shape index: {}]   ;;  %s12204_s17 = inlined_call_operand.vmem [shape: bf16[2,16,256], index: 17, kind: output, shape index: {}]  }
   0x1   :  { %12205 = sst [smem:[#allocation3_spill]] %s12187_s0 }
   0x2   :  { %12206 = sst [smem:[#allocation4_spill]] %s12188_s1 }
   0x3 LB: > { %s7323_s25 = sadd.s32 4294967295, %s10025_s24   ;;  %p7327_p0 = scmp.ge.s32.totalorder %s10025_s24, 1  ;;  %s10025_s24 = sphi %s10122_s24, %s27_s24  }
   0x4   : > { %p487_p1 = scmp.lt.s32.totalorder %s10025_s24, 3 }
   0x6   : > { %p488_p2 = pnand %p7327_p0, %p487_p1 }
   0x7   : > { %p539_p3 = scmp.lt.s32.totalorder (!%p488_p2), %s7323_s25, 1  ;;  %s12207_s29 = sld [smem:[#allocation3_spill]] (!%p488_p2) }
   0x8   : > { %491 = sbr.rel (%p488_p2) target bundleno = 7581 (0x1d9d), region = 88  ;;  %s10029_s21 = smov (!%p488_p2), 32  }
   0x9   : > { %s10030_s22 = smov (!%p488_p2), 64   ;;  %s10031_s23 = smov (!%p488_p2), 96  }
   0xd   : > { %s12210_s25 = smov (!%p539_p3, %s7323_s25), 1  ;;  %v9320_v8 = vld [vmem:[%s12190_s3 + $0x78] sm:$0xff]   ;;  %v9324_v26 = vld [vmem:[%s12190_s3 + $0x70] sm:$0xff]   ;;  %v9328_v30 = vld [vmem:[%s12190_s3 + $0x68] sm:$0xff]   ;;  %v592_v61 = vlaneseq  ;;  %vm10028_vm0 = vmmov 0   ;;  %vm1153_vm1 = vcmask 261120  }
   0xe   : > { %s8631_s26 = sshll.u32 %s12210_s25, 4  ;;  %v9321_v9 = vld [vmem:[%s12192_s5 + $0x78] sm:$0xff]   ;;  %8651 = vmatprep.subr.bf16.mxu1 %v9320_v8  ;;  %v9325_v27 = vld [vmem:[%s12192_s5 + $0x70] sm:$0xff]   ;;  %v9329_v31 = vld [vmem:[%s12192_s5 + $0x68] sm:$0xff]   ;;  %vm1201_vm2 = vcmask 130048   ;;  %vm1278_vm3 = vcmask 257024  }
   0xf   : > { %s543_s0 = scalar_lea.vmem %s12207_s29, %s8631_s26  ;;  %v9322_v10 = vld [vmem:[%s12190_s3 + $0x38] sm:$0xff]   ;;  %8695 = vmatprep.subr.bf16.mxu0 %v9321_v9  ;;  %v9326_v28 = vld [vmem:[%s12190_s3 + $0x30] sm:$0xff]   ;;  %v9330_v32 = vld [vmem:[%s12190_s3 + $0x28] sm:$0xff]   ;;  %v10272_v63 = vshrl.u32 %v592_v61, 7  ;;  %s12208_s29 = sld [smem:[#allocation4_spill]]  ;;  %vm1944_vm4 = vcmask 519424  }
  0x10   : > { %v550_v0 = vld [vmem:[%s543_s0] sm:$0xff]  ;;  %v551_v1 = vld [vmem:[%s543_s0 + $0x8] sm:$0xff]  ;;  %v9323_v11 = vld [vmem:[%s12192_s5 + $0x38] sm:$0xff]   ;;  %8652 = vmatpush3.bf16.msra.mxu1 %v9322_v10  ;;  %vm2610_vm5 = vcmask 781824   ;;  %vm3276_vm6 = vcmask 1044224   ;;  %s548_s28 = scalar_lea.vmem %s12204_s17, %s8631_s26 }
  0x11   : > { %v10138_v2 = vunpack.c.l.bf16 %v550_v0  ;;  %v10140_v3 = vunpack.c.h.bf16 %v550_v0  ;;  %v10142_v4 = vunpack.c.l.bf16 %v551_v1  ;;  %v10144_v5 = vunpack.c.h.bf16 %v551_v1  ;;  %8696 = vmatpush3.bf16.msra.mxu0 %v9323_v11  ;;  %v9327_v29 = vld [vmem:[%s12192_s5 + $0x30] sm:$0xff]   ;;  %8653 = vmatprep.subr.bf16.mxu1 %v9324_v26  ;;  %v9331_v33 = vld [vmem:[%s12192_s5 + $0x28] sm:$0xff]   ;;  %v9332_v34 = vld [vmem:[%s12190_s3 + $0x60] sm:$0xff]  }
  0x12   : > { %8697 = vmatprep.subr.bf16.mxu0 %v9325_v27  ;;  %v9333_v35 = vld [vmem:[%s12192_s5 + $0x60] sm:$0xff]   ;;  %v9336_v38 = vld [vmem:[%s12190_s3 + $0x58] sm:$0xff]   ;;  %v9340_v42 = vld [vmem:[%s12190_s3 + $0x50] sm:$0xff]   ;;  %v10278_v1 = vsub.s32 0, %v10272_v63 }
  0x13   : > { %v558_v6 = vadd.f32 %v10140_v3, %v10138_v2  ;;  %v561_v7 = vadd.f32 %v10144_v5, %v10142_v4  ;;  %v9334_v36 = vld [vmem:[%s12190_s3 + $0x20] sm:$0xff]   ;;  %v9337_v39 = vld [vmem:[%s12192_s5 + $0x58] sm:$0xff]   ;;  %v9341_v43 = vld [vmem:[%s12192_s5 + $0x50] sm:$0xff]  }
  0x14   : > { %8654 = vmatpush3.bf16.msra.mxu1 %v9326_v28  ;;  %v9335_v37 = vld [vmem:[%s12192_s5 + $0x20] sm:$0xff]   ;;  %v9338_v40 = vld [vmem:[%s12190_s3 + $0x18] sm:$0xff]   ;;  %v9342_v44 = vld [vmem:[%s12190_s3 + $0x10] sm:$0xff]  }
  0x15   : > { %559 = vadd.xlane.f32.xlu0 %v558_v6  ;;  %8698 = vmatpush3.bf16.msra.mxu0 %v9327_v29  ;;  %v9339_v41 = vld [vmem:[%s12192_s5 + $0x18] sm:$0xff]   ;;  %v9343_v45 = vld [vmem:[%s12192_s5 + $0x10] sm:$0xff]   ;;  %v9344_v46 = vld [vmem:[%s12190_s3 + $0x48] sm:$0xff]   ;;  %v10281_v6 = vsub.s32 1, %v10272_v63 }
  0x16   : > { %8655 = vmatprep.subr.bf16.mxu1 %v9328_v30  ;;  %8699 = vmatprep.subr.bf16.mxu0 %v9329_v31  ;;  %v9345_v47 = vld [vmem:[%s12192_s5 + $0x48] sm:$0xff]   ;;  %v9348_v50 = vld [vmem:[%s12190_s3 + $0x40] sm:$0xff]   ;;  %v9352_v54 = vld [vmem:[%s12191_s4 + $0x78] sm:$0xff]  }
  0x17   : > { %v9346_v48 = vld [vmem:[%s12190_s3 + $0x8] sm:$0xff]   ;;  %v9349_v51 = vld [vmem:[%s12192_s5 + $0x40] sm:$0xff]   ;;  %v9353_v55 = vld [vmem:[%s12191_s4 + $0xf8] sm:$0xff]  }
  0x18   : > { %8656 = vmatpush3.bf16.msra.mxu1 %v9330_v32  ;;  %v9347_v49 = vld [vmem:[%s12192_s5 + $0x8] sm:$0xff]   ;;  %v9350_v52 = vld [vmem:[%s12190_s3] sm:$0xff]   ;;  %v9358_v32 = vld [vmem:[%s12191_s4 + $0x30] sm:$0xff]  }
  0x19   : > { %562 = vadd.xlane.f32.xlu0 %v561_v7  ;;  %8700 = vmatpush3.bf16.msra.mxu0 %v9331_v33  ;;  %v9351_v53 = vld [vmem:[%s12192_s5] sm:$0xff]   ;;  %v9359_v33 = vld [vmem:[%s12191_s4 + $0xb0] sm:$0xff]  }
  0x1a   : > { %8657 = vmatprep.subr.bf16.mxu1 %v9332_v34  ;;  %8701 = vmatprep.subr.bf16.mxu0 %v9333_v35  ;;  %v556_v0 = vld [vmem:[%s12208_s29] sm:$0x3]  ;;  %v9360_v34 = vld [vmem:[%s12191_s4 + $0x68] sm:$0xff]  }
  0x1b   : > { %v557_v7 = vld [vmem:[%s12189_s2] sm:$0x3]  ;;  %v595_v9 = vrot.slane %v556_v0, %v10278_v1  ;;  %v599_v10 = vrot.slane %v556_v0, %v10281_v6  ;;  %v9361_v35 = vld [vmem:[%s12191_s4 + $0xe8] sm:$0xff]  }
  0x1c   : > { %8658 = vmatpush3.bf16.msra.mxu1 %v9334_v36  ;;  %v9362_v36 = vld [vmem:[%s12191_s4 + $0x28] sm:$0xff]  }
  0x1d   : > { %8702 = vmatpush3.bf16.msra.mxu0 %v9335_v37  ;;  %8659 = vmatprep.subr.bf16.mxu1 %v9336_v38  ;;  %v9363_v37 = vld [vmem:[%s12191_s4 + $0xa8] sm:$0xff]   ;;  %v9364_v38 = vld [vmem:[%s12191_s4 + $0x60] sm:$0xff]  }
  0x1e   : > { %8703 = vmatprep.subr.bf16.mxu0 %v9337_v39  ;;  %v9365_v39 = vld [vmem:[%s12191_s4 + $0xe0] sm:$0xff]  }
  0x20   : > { %8660 = vmatpush3.bf16.msra.mxu1 %v9338_v40  ;;  %v9366_v40 = vld [vmem:[%s12191_s4 + $0x20] sm:$0xff]  }
  0x21   : > { %8704 = vmatpush3.bf16.msra.mxu0 %v9339_v41  ;;  %8661 = vmatprep.subr.bf16.mxu1 %v9340_v42  ;;  %v9367_v41 = vld [vmem:[%s12191_s4 + $0xa0] sm:$0xff]   ;;  %v9368_v42 = vld [vmem:[%s12191_s4 + $0x58] sm:$0xff]  }
  0x22   : > { %8705 = vmatprep.subr.bf16.mxu0 %v9341_v43  ;;  %v9369_v43 = vld [vmem:[%s12191_s4 + $0xd8] sm:$0xff]  }
  0x24   : > { %8662 = vmatpush3.bf16.msra.mxu1 %v9342_v44  ;;  %v9370_v44 = vld [vmem:[%s12191_s4 + $0x18] sm:$0xff]  }
  0x25   : > { %8706 = vmatpush3.bf16.msra.mxu0 %v9343_v45  ;;  %8663 = vmatprep.subr.bf16.mxu1 %v9344_v46  ;;  %v9371_v45 = vld [vmem:[%s12191_s4 + $0x98] sm:$0xff]   ;;  %v9372_v46 = vld [vmem:[%s12191_s4 + $0x50] sm:$0xff]  }
  0x26   : > { %8707 = vmatprep.subr.bf16.mxu0 %v9345_v47  ;;  %v9373_v47 = vld [vmem:[%s12191_s4 + $0xd0] sm:$0xff]  }
  0x28   : > { %8664 = vmatpush3.bf16.msra.mxu1 %v9346_v48  ;;  %v9374_v48 = vld [vmem:[%s12191_s4 + $0x10] sm:$0xff]  }
  0x29   : > { %8708 = vmatpush3.bf16.msra.mxu0 %v9347_v49  ;;  %8665 = vmatprep.subr.bf16.mxu1 %v9348_v50  ;;  %v9375_v49 = vld [vmem:[%s12191_s4 + $0x90] sm:$0xff]   ;;  %v9376_v50 = vld [vmem:[%s12191_s4 + $0x48] sm:$0xff]  }
  0x2a   : > { %8709 = vmatprep.subr.bf16.mxu0 %v9349_v51  ;;  %v9377_v51 = vld [vmem:[%s12191_s4 + $0xc8] sm:$0xff]  }
  0x2c   : > { %8666 = vmatpush3.bf16.msra.mxu1 %v9350_v52  ;;  %v9378_v52 = vld [vmem:[%s12191_s4 + $0x8] sm:$0xff]  }
  0x2d   : > { %8710 = vmatpush3.bf16.msra.mxu0 %v9351_v53  ;;  %8673 = vmatprep.subr.bf16.mxu1 %v9352_v54  ;;  %v9379_v53 = vld [vmem:[%s12191_s4 + $0x88] sm:$0xff]   ;;  %v9380_v54 = vld [vmem:[%s12191_s4 + $0x40] sm:$0xff]  }
  0x2e   : > { %8743 = vmatprep.subr.bf16.mxu0 %v9353_v55  ;;  %v9381_v55 = vld [vmem:[%s12191_s4 + $0xc0] sm:$0xff]  }
  0x9e   : > { %v560_v12 = vpop.xlane.xlu0 %559 }
  0x9f   : > { %v565_v13 = vmul.f32 0.00390625, %v560_v12 }
  0xa1   : > { %v10163_v14 = vsub.f32 %v10138_v2, %v565_v13  ;;  %v10166_v15 = vsub.f32 %v10140_v3, %v565_v13 }
  0xa2   : > { %v563_v16 = vpop.xlane.xlu0 %562 }
  0xa3   : > { %v566_v17 = vmul.f32 0.00390625, %v563_v16  ;;  %v571_v18 = vmul.f32 %v10163_v14, %v10163_v14  ;;  %v572_v19 = vmul.f32 %v10166_v15, %v10166_v15  ;;  %v610_v16 = vrot.slane %v557_v7, %v10278_v1 }
  0xa5   : > { %v10173_v20 = vsub.f32 %v10142_v4, %v566_v17  ;;  %v10176_v21 = vsub.f32 %v10144_v5, %v566_v17  ;;  %v575_v22 = vadd.f32 %v572_v19, %v571_v18  ;;  %v614_v17 = vrot.slane %v557_v7, %v10281_v6 }
  0xa7   : > { %576 = vadd.xlane.f32.xlu1 %v575_v22  ;;  %v573_v23 = vmul.f32 %v10173_v20, %v10173_v20  ;;  %v574_v24 = vmul.f32 %v10176_v21, %v10176_v21 }
  0xa9   : > { %v578_v25 = vadd.f32 %v574_v24, %v573_v23 }
  0xab   : > { %579 = vadd.xlane.f32.xlu1 %v578_v25 }
 0x130   : > { %v577_v56 = vpop.xlane.xlu1 %576 }
 0x131   : > { %v581_v57 = vmul.f32 0.00390625, %v577_v56  ;;  %v9382_v56 = vld [vmem:[%s12191_s4] sm:$0xff]  }
 0x133   : > { %v583_v58 = vadd.f32 1e-05, %v581_v57  ;;  %v9383_v57 = vld [vmem:[%s12191_s4 + $0x80] sm:$0xff]  }
 0x134   : > { %v580_v59 = vpop.xlane.xlu1 %579 }
 0x135   : > { %9947 = vrsqrt.f32 %v583_v58  ;;  %v582_v60 = vmul.f32 0.00390625, %v580_v59  ;;  %v10027_v58 = vmov 0.0  }
 0x137   : > { %v584_v62 = vadd.f32 1e-05, %v582_v60 }
 0x139   : > { %9949 = vrsqrt.f32 %v584_v62 }
 0x142   : > { %v9948_v8 = vpop.eup %9947 }
 0x143   : > { %v587_v11 = vmul.f32 %v9948_v8, %v10163_v14  ;;  %v588_v12 = vmul.f32 %v9948_v8, %v10166_v15  ;;  %v9354_v14 = vld [vmem:[%s12191_s4 + $0x38] sm:$0xff]  }
 0x144   : > { %v9355_v15 = vld [vmem:[%s12191_s4 + $0xb8] sm:$0xff]  }
 0x145   : > { %v602_v18 = vmul.f32 %v595_v9, %v587_v11  ;;  %v603_v19 = vmul.f32 %v599_v10, %v588_v12 }
 0x146   : > { %v9950_v13 = vpop.eup %9949 }
 0x147   : > { %v589_v22 = vmul.f32 %v9950_v13, %v10173_v20  ;;  %v590_v23 = vmul.f32 %v9950_v13, %v10176_v21  ;;  %v617_v26 = vadd.f32 %v610_v16, %v602_v18  ;;  %v618_v27 = vadd.f32 %v614_v17, %v603_v19  ;;  %v9356_v20 = vld [vmem:[%s12191_s4 + $0x70] sm:$0xff]  }
 0x148   : > { %v9357_v21 = vld [vmem:[%s12191_s4 + $0xf0] sm:$0xff]  }
 0x149   : > { %v604_v24 = vmul.f32 %v595_v9, %v589_v22  ;;  %v605_v25 = vmul.f32 %v599_v10, %v590_v23  ;;  %v7349_v22 = vld [vmem:[%s12194_s7] ss:$0 sm:$0xff]  ;;  %v7470_v23 = vld [vmem:[%s12194_s7 + $0x1] ss:$0 sm:$0xff] }
 0x14b   : > { %v619_v28 = vadd.f32 %v610_v16, %v604_v24  ;;  %v620_v29 = vadd.f32 %v614_v17, %v605_v25 }
 0x14d   : > { %v10300_v30 = vpack.c.bf16 %v619_v28, %v617_v26  ;;  %v10302_v31 = vpack.c.bf16 %v620_v29, %v618_v27 }
 0x14f   : > { %790 = vmatprep.mubr.bf16.mxu1 %v10302_v31  ;;  %1142 = vmatprep.mubr.bf16.mxu0 %v10302_v31 }
 0x150   : > { %791 = vmatmul.mubr.bf16.vlgmr.msra.gmra.mxu1 %v10300_v30  ;;  %1143 = vmatmul.mubr.bf16.vlgmr.msra.gmra.mxu0 %v10300_v30 }
 0x151   : > { %8674 = vmatpush3.bf16.msra.mxu1 %v9354_v14  ;;  %8744 = vmatpush3.bf16.msra.mxu0 %v9355_v15 }
 0x152   : > { %966 = vmatprep.mubr.bf16.mxu1 %v10302_v31  ;;  %1628 = vmatprep.mubr.bf16.mxu0 %v10302_v31 }
 0x153   : > { %8675 = vmatprep.subr.bf16.mxu1 %v9356_v20  ;;  %8745 = vmatprep.subr.bf16.mxu0 %v9357_v21 }
 0x155   : > { %8676 = vmatpush3.bf16.msra.mxu1 %v9358_v32  ;;  %8746 = vmatpush3.bf16.msra.mxu0 %v9359_v33 }
 0x156   : > { %8677 = vmatprep.subr.bf16.mxu1 %v9360_v34  ;;  %8747 = vmatprep.subr.bf16.mxu0 %v9361_v35 }
 0x159   : > { %8678 = vmatpush3.bf16.msra.mxu1 %v9362_v36  ;;  %8748 = vmatpush3.bf16.msra.mxu0 %v9363_v37  ;;  %v7332_v37 = vld [vmem:[%s12193_s6] ss:$0 sm:$0xff] }
 0x15a   : > { %8679 = vmatprep.subr.bf16.mxu1 %v9364_v38  ;;  %8749 = vmatprep.subr.bf16.mxu0 %v9365_v39  ;;  %v7366_v39 = vld [vmem:[%s12195_s8] ss:$0 sm:$0xff] }
 0x15d   : > { %8680 = vmatpush3.bf16.msra.mxu1 %v9366_v40  ;;  %8750 = vmatpush3.bf16.msra.mxu0 %v9367_v41 }
 0x15e   : > { %8681 = vmatprep.subr.bf16.mxu1 %v9368_v42  ;;  %8751 = vmatprep.subr.bf16.mxu0 %v9369_v43 }
 0x161   : > { %8682 = vmatpush3.bf16.msra.mxu1 %v9370_v44  ;;  %8752 = vmatpush3.bf16.msra.mxu0 %v9371_v45 }
 0x162   : > { %8683 = vmatprep.subr.bf16.mxu1 %v9372_v46  ;;  %8753 = vmatprep.subr.bf16.mxu0 %v9373_v47 }
 0x165   : > { %8684 = vmatpush3.bf16.msra.mxu1 %v9374_v48  ;;  %8754 = vmatpush3.bf16.msra.mxu0 %v9375_v49 }
 0x166   : > { %8685 = vmatprep.subr.bf16.mxu1 %v9376_v50  ;;  %8755 = vmatprep.subr.bf16.mxu0 %v9377_v51 }
 0x169   : > { %8686 = vmatpush3.bf16.msra.mxu1 %v9378_v52  ;;  %8756 = vmatpush3.bf16.msra.mxu0 %v9379_v53 }
 0x16a   : > { %8687 = vmatprep.subr.bf16.mxu1 %v9380_v54  ;;  %8757 = vmatprep.subr.bf16.mxu0 %v9381_v55 }
 0x16d   : > { %8688 = vmatpush3.bf16.msra.mxu1 %v9382_v56  ;;  %8758 = vmatpush3.bf16.msra.mxu0 %v9383_v57 }
 0x16e   : > { %9211 = vmatprep.subr.bf16.mxu1 %v10027_v58  ;;  %9223 = vmatprep.subr.bf16.mxu0 %v10027_v58 }
 0x170   : > { %967 = vmatmul.mubr.bf16.vlgmr.msra.gmra.mxu1 %v10300_v30  ;;  %1629 = vmatmul.mubr.bf16.vlgmr.msra.gmra.mxu0 %v10300_v30 }
 0x171   : > { %9213 = vmatprep.mubr.msk.bf16.mxu1 %vm10028_vm0, %v10027_v58  ;;  %9225 = vmatprep.mubr.msk.bf16.mxu0 %vm10028_vm0, %v10027_v58 }
 0x210   : > { %v8667_v59 = vpop.f32.mrf.mxu1  ;;  %v8711_v60 = vpop.f32.mrf.mxu0 }
 0x212   : > { %v8668_v61 = vpop.f32.mrf.mxu1  ;;  %v8712_v62 = vpop.f32.mrf.mxu0 }
 0x213   : > { %v8669_v34 = vadd.f32 %v8668_v61, %v8667_v59  ;;  %v8713_v38 = vadd.f32 %v8712_v62, %v8711_v60 }
 0x214   : > { %v8670_v0 = vpop.f32.mrf.mxu1  ;;  %v8714_v7 = vpop.f32.mrf.mxu0 }
 0x215   : > { %v793_v42 = vadd.f32 %v8669_v34, %v7332_v37  ;;  %v1145_v43 = vadd.f32 %v8713_v38, %v7366_v39  ;;  %v9403_v34 = vld [vmem:[%s12192_s5 + $0xb0] sm:$0xff]   ;;  %v9407_v38 = vld [vmem:[%s12192_s5 + $0xa0] sm:$0xff]  }
 0x216   : > { %v8671_v8 = vpop.f32.mrf.mxu1  ;;  %v8715_v9 = vpop.f32.mrf.mxu0 }
 0x217   : > { %v8672_v20 = vadd.f32 %v8671_v8, %v8670_v0  ;;  %v8716_v33 = vadd.f32 %v8715_v9, %v8714_v7  ;;  %v9384_v0 = vld [vmem:[%s12190_s3 + $0xf8] sm:$0xff]  }
 0x219   : > { %v796_v40 = vadd.f32 %v8672_v20, %v7332_v37  ;;  %v1148_v41 = vadd.f32 %v8716_v33, %v7366_v39  ;;  %v9399_v20 = vld [vmem:[%s12190_s3 + $0x80] sm:$0xff]   ;;  %v9402_v33 = vld [vmem:[%s12192_s5 + $0xf0] sm:$0xff]   ;;  %v9408_v39 = vld [vmem:[%s12192_s5 + $0xd8] sm:$0xff]  }
 0x21a   : > { %v9406_v37 = vld [vmem:[%s12192_s5 + $0xe0] sm:$0xff]  }
 0x21b   : > { %v1151_v44 = vpack.c.bf16 %v796_v40, %v793_v42  ;;  %v1225_v45 = vpack.c.bf16 %v1148_v41, %v1145_v43  ;;  %v9409_v40 = vld [vmem:[%s12192_s5 + $0x98] sm:$0xff]   ;;  %v9410_v41 = vld [vmem:[%s12192_s5 + $0xd0] sm:$0xff]   ;;  %v9412_v43 = vld [vmem:[%s12192_s5 + $0xc8] sm:$0xff]  }
 0x21c   : > { %v9411_v42 = vld [vmem:[%s12192_s5 + $0x90] sm:$0xff]  }
 0x230   : > { %v8689_v10 = vpop.f32.mrf.mxu1  ;;  %v8759_v11 = vpop.f32.mrf.mxu0 }
 0x232   : > { %v8690_v12 = vpop.f32.mrf.mxu1  ;;  %v8760_v13 = vpop.f32.mrf.mxu0 }
 0x233   : > { %v8691_v18 = vadd.f32 %v8690_v12, %v8689_v10  ;;  %v8761_v19 = vadd.f32 %v8760_v13, %v8759_v11  ;;  %v9385_v13 = vld [vmem:[%s12190_s3 + $0xb8] sm:$0xff]  }
 0x234   : > { %v8692_v16 = vpop.f32.mrf.mxu1  ;;  %v8762_v17 = vpop.f32.mrf.mxu0 }
 0x235   : > { %v969_v28 = vadd.f32 %v8691_v18, %v7349_v22  ;;  %v1631_v29 = vadd.f32 %v8761_v19, %v7470_v23  ;;  %v9387_v18 = vld [vmem:[%s12190_s3 + $0xb0] sm:$0xff]   ;;  %v9388_v19 = vld [vmem:[%s12190_s3 + $0xe8] sm:$0xff]  }
 0x236   : > { %v8693_v24 = vpop.f32.mrf.mxu1  ;;  %v8763_v25 = vpop.f32.mrf.mxu0 }
 0x237   : > { %v8694_v26 = vadd.f32 %v8693_v24, %v8692_v16  ;;  %v8764_v27 = vadd.f32 %v8763_v25, %v8762_v17  ;;  %v9386_v17 = vld [vmem:[%s12190_s3 + $0xf0] sm:$0xff]   ;;  %v9391_v24 = vld [vmem:[%s12190_s3 + $0xa0] sm:$0xff]   ;;  %v9392_v25 = vld [vmem:[%s12190_s3 + $0xd8] sm:$0xff]  }
 0x239   : > { %v972_v14 = vadd.f32 %v8694_v26, %v7349_v22  ;;  %v1634_v15 = vadd.f32 %v8764_v27, %v7470_v23  ;;  %v9389_v22 = vld [vmem:[%s12190_s3 + $0xa8] sm:$0xff]   ;;  %v9390_v23 = vld [vmem:[%s12190_s3 + $0xe0] sm:$0xff]   ;;  %v9393_v26 = vld [vmem:[%s12190_s3 + $0x98] sm:$0xff]  }
 0x23a   : > { %v9394_v27 = vld [vmem:[%s12190_s3 + $0xd0] sm:$0xff]  }
 0x23b   : > { %v1152_v21 = vpack.c.bf16 %v972_v14, %v969_v28  ;;  %v1816_v32 = vpack.c.bf16 %v1634_v15, %v1631_v29  ;;  %v9395_v28 = vld [vmem:[%s12190_s3 + $0x90] sm:$0xff]   ;;  %v9396_v29 = vld [vmem:[%s12190_s3 + $0xc8] sm:$0xff]   ;;  %v9398_v15 = vld [vmem:[%s12190_s3 + $0xc0] sm:$0xff]  }
 0x23c   : > { %v9397_v14 = vld [vmem:[%s12190_s3 + $0x88] sm:$0xff]  }
 0x23d   : > { %v1158_v35 = vsel %vm1153_vm1, %v1152_v21, 0  ;;  %v1821_v36 = vsel %vm1153_vm1, %v1816_v32, 0  ;;  %v9400_v21 = vld [vmem:[%s12192_s5 + $0xf8] sm:$0xff]  }
 0x23e   : > { %9212 = vmatpush3.bf16.xpose.msra.mxu1 %v1158_v35  ;;  %9224 = vmatpush3.bf16.xpose.msra.mxu0 %v1821_v36  ;;  %v9401_v32 = vld [vmem:[%s12192_s5 + $0xb8] sm:$0xff]   ;;  %v9404_v35 = vld [vmem:[%s12192_s5 + $0xe8] sm:$0xff]  }
 0x23f   : > { %9217 = vmatprep.subr.bf16.mxu1 %v10027_v58  ;;  %9229 = vmatprep.subr.bf16.mxu0 %v10027_v58  ;;  %v9405_v36 = vld [vmem:[%s12192_s5 + $0xa8] sm:$0xff]  }
 0x245   : > { %9214 = vmatmul.mubr.msk.bf16.vlgmr.msra.gmra.mxu1 %vm1153_vm1, %v1151_v44  ;;  %v9413_v44 = vld [vmem:[%s12192_s5 + $0x88] sm:$0xff]  }
 0x246   : > { %9218 = vmatpush3.bf16.msra.mxu1 %v1225_v45  ;;  %9219 = vmatprep.mubr.msk.bf16.mxu1 %vm10028_vm0, %v10027_v58  ;;  %v9414_v45 = vld [vmem:[%s12192_s5 + $0xc0] sm:$0xff]  }
 0x247   : > { %8721 = vmatprep.subr.bf16.mxu1 %v9384_v0  ;;  %v9431_v0 = vld [vmem:[%s12191_s4 + $0x100] sm:$0xff]  }
 0x305   : > { %v1194_v46 = vpop.f32.mrf.mxu1 }
 0x306   : > { %v1202_v47 = vsel %vm1201_vm2, %v1194_v46, -inf }
 0x307   : > { %1203 = vmax.xlane.f32.xlu0 %v1202_v47  ;;  %v9215_v48 = vpop.f32.mrf.mxu1  ;;  %v9416_v47 = vld [vmem:[%s12191_s4 + $0x178] sm:$0xff]  }
 0x308   : > { %v9417_v48 = vld [vmem:[%s12191_s4 + $0x138] sm:$0xff]  }
 0x309   : > { %v1197_v49 = vpop.f32.mrf.mxu1 }
 0x30a   : > { %v1205_v50 = vsel %vm1201_vm2, %v1197_v49, -inf }
 0x30b   : > { %1206 = vmax.xlane.f32.xlu1 %v1205_v50  ;;  %v9216_v51 = vpop.f32.mrf.mxu1  ;;  %v9419_v50 = vld [vmem:[%s12191_s4 + $0x130] sm:$0xff]  }
 0x30c   : > { %v9420_v51 = vld [vmem:[%s12191_s4 + $0x168] sm:$0xff]  }
 0x390   : > { %v1204_v52 = vpop.xlane.xlu0 %1203 }
 0x391   : > { %v1208_v53 = vsub.f32 %v1194_v46, %v1204_v52  ;;  %v9415_v46 = vld [vmem:[%s12192_s5 + $0x80] sm:$0xff]   ;;  %v9421_v52 = vld [vmem:[%s12191_s4 + $0x128] sm:$0xff]  }
 0x393   : > { %v1210_v54 = vmul.f32 1.442695, %v1208_v53  ;;  %v9422_v53 = vld [vmem:[%s12191_s4 + $0x160] sm:$0xff]  }
 0x394   : > { %v1207_v55 = vpop.xlane.xlu1 %1206 }
 0x395   : > { %9951 = vpow2.f32 %v1210_v54  ;;  %v1209_v56 = vsub.f32 %v1197_v49, %v1207_v55  ;;  %v9418_v49 = vld [vmem:[%s12191_s4 + $0x170] sm:$0xff]   ;;  %v9423_v54 = vld [vmem:[%s12191_s4 + $0x120] sm:$0xff]   ;;  %v9424_v55 = vld [vmem:[%s12191_s4 + $0x158] sm:$0xff]  }
 0x397   : > { %v1212_v57 = vmul.f32 1.442695, %v1209_v56  ;;  %v9425_v56 = vld [vmem:[%s12191_s4 + $0x118] sm:$0xff]  }
 0x399   : > { %9953 = vpow2.f32 %v1212_v57  ;;  %v9426_v57 = vld [vmem:[%s12191_s4 + $0x150] sm:$0xff]  }
 0x3a2   : > { %v9952_v59 = vpop.eup %9951 }
 0x3a3   : > { %v1214_v60 = vsel %vm1201_vm2, %v9952_v59, 0.0 }
 0x3a4   : > { %1215 = vadd.xlane.f32.xlu0 %v1214_v60  ;;  %v9428_v60 = vld [vmem:[%s12191_s4 + $0x148] sm:$0xff]  }
 0x3a6   : > { %v9954_v61 = vpop.eup %9953 }
 0x3a7   : > { %v1217_v62 = vsel %vm1201_vm2, %v9954_v61, 0.0 }
 0x3a8   : > { %1218 = vadd.xlane.f32.xlu1 %v1217_v62  ;;  %v9430_v62 = vld [vmem:[%s12191_s4 + $0x140] sm:$0xff]  }
 0x42d   : > { %v1216_v7 = vpop.xlane.xlu0 %1215 }
 0x42e   : > { %9955 = vrcp.f32 %v1216_v7 }
 0x431   : > { %v1219_v8 = vpop.xlane.xlu1 %1218 }
 0x432   : > { %9957 = vrcp.f32 %v1219_v8 }
 0x43b   : > { %v9956_v9 = vpop.eup %9955 }
 0x43c   : > { %v1222_v11 = vmul.f32 %v9956_v9, %v9952_v59  ;;  %v9427_v59 = vld [vmem:[%s12191_s4 + $0x110] sm:$0xff]  }
 0x43f   : > { %v9958_v10 = vpop.eup %9957 }
 0x440   : > { %v1223_v12 = vmul.f32 %v9958_v10, %v9954_v61  ;;  %v9429_v61 = vld [vmem:[%s12191_s4 + $0x108] sm:$0xff]  }
 0x442   : > { %v1224_v16 = vpack.c.bf16 %v1223_v12, %v1222_v11 }
 0x444   : > { %9220 = vmatmul.mubr.msk.bf16.vlgmr.msra.gmra.mxu1 %vm1201_vm2, %v1224_v16 }
 0x445   : > { %8722 = vmatpush3.bf16.msra.mxu1 %v9385_v13  ;;  %1450 = vmatprep.mubr.bf16.mxu1 %v10302_v31 }
 0x446   : > { %8723 = vmatprep.subr.bf16.mxu1 %v9386_v17 }
 0x449   : > { %8724 = vmatpush3.bf16.msra.mxu1 %v9387_v18 }
 0x44a   : > { %8725 = vmatprep.subr.bf16.mxu1 %v9388_v19  ;;  %v7420_v19 = vld [vmem:[%s12193_s6 + $0x1] ss:$0 sm:$0xff] }
 0x44d   : > { %8726 = vmatpush3.bf16.msra.mxu1 %v9389_v22 }
 0x44e   : > { %8727 = vmatprep.subr.bf16.mxu1 %v9390_v23 }
 0x451   : > { %8728 = vmatpush3.bf16.msra.mxu1 %v9391_v24 }
 0x452   : > { %8729 = vmatprep.subr.bf16.mxu1 %v9392_v25 }
 0x455   : > { %8730 = vmatpush3.bf16.msra.mxu1 %v9393_v26 }
 0x456   : > { %8731 = vmatprep.subr.bf16.mxu1 %v9394_v27 }
 0x459   : > { %8732 = vmatpush3.bf16.msra.mxu1 %v9395_v28 }
 0x45a   : > { %8733 = vmatprep.subr.bf16.mxu1 %v9396_v29 }
 0x45d   : > { %8734 = vmatpush3.bf16.msra.mxu1 %v9397_v14 }
 0x45e   : > { %8735 = vmatprep.subr.bf16.mxu1 %v9398_v15  ;;  %v7520_v15 = vld [vmem:[%s12195_s8 + $0x1] ss:$0 sm:$0xff] }
 0x461   : > { %8736 = vmatpush3.bf16.msra.mxu1 %v9399_v20 }
 0x462   : > { %8765 = vmatprep.subr.bf16.mxu1 %v9400_v21 }
 0x464   : > { %1451 = vmatmul.mubr.bf16.vlgmr.msra.gmra.mxu1 %v10300_v30 }
 0x465   : > { %8766 = vmatpush3.bf16.msra.mxu1 %v9401_v32  ;;  %1806 = vmatprep.mubr.bf16.mxu1 %v10302_v31 }
 0x466   : > { %8767 = vmatprep.subr.bf16.mxu1 %v9402_v33 }
 0x469   : > { %8768 = vmatpush3.bf16.msra.mxu1 %v9403_v34 }
 0x46a   : > { %8769 = vmatprep.subr.bf16.mxu1 %v9404_v35 }
 0x46d   : > { %8770 = vmatpush3.bf16.msra.mxu1 %v9405_v36 }
 0x46e   : > { %8771 = vmatprep.subr.bf16.mxu1 %v9406_v37 }
 0x471   : > { %8772 = vmatpush3.bf16.msra.mxu1 %v9407_v38 }
 0x472   : > { %8773 = vmatprep.subr.bf16.mxu1 %v9408_v39  ;;  %v7624_v39 = vld [vmem:[%s12194_s7 + $0x2] ss:$0 sm:$0xff] }
 0x475   : > { %8774 = vmatpush3.bf16.msra.mxu1 %v9409_v40 }
 0x476   : > { %8775 = vmatprep.subr.bf16.mxu1 %v9410_v41 }
 0x479   : > { %8776 = vmatpush3.bf16.msra.mxu1 %v9411_v42 }
 0x47a   : > { %8777 = vmatprep.subr.bf16.mxu1 %v9412_v43 }
 0x47d   : > { %8778 = vmatpush3.bf16.msra.mxu1 %v9413_v44 }
 0x47e   : > { %8779 = vmatprep.subr.bf16.mxu1 %v9414_v45 }
 0x481   : > { %8780 = vmatpush3.bf16.msra.mxu1 %v9415_v46 }
 0x482   : > { %8813 = vmatprep.subr.bf16.mxu1 %v9416_v47 }
 0x484   : > { %1807 = vmatmul.mubr.bf16.vlgmr.msra.gmra.mxu1 %v10300_v30 }
 0x485   : > { %8814 = vmatpush3.bf16.msra.mxu1 %v9417_v48  ;;  %2294 = vmatprep.mubr.bf16.mxu1 %v10302_v31 }
 0x486   : > { %8815 = vmatprep.subr.bf16.mxu1 %v9418_v49 }
 0x489   : > { %8816 = vmatpush3.bf16.msra.mxu1 %v9419_v50 }
 0x48a   : > { %8817 = vmatprep.subr.bf16.mxu1 %v9420_v51 }
 0x48d   : > { %8818 = vmatpush3.bf16.msra.mxu1 %v9421_v52 }
 0x48e   : > { %8819 = vmatprep.subr.bf16.mxu1 %v9422_v53 }
 0x491   : > { %8820 = vmatpush3.bf16.msra.mxu1 %v9423_v54 }
 0x492   : > { %8821 = vmatprep.subr.bf16.mxu1 %v9424_v55 }
 0x495   : > { %8822 = vmatpush3.bf16.msra.mxu1 %v9425_v56 }
 0x496   : > { %8823 = vmatprep.subr.bf16.mxu1 %v9426_v57 }
 0x499   : > { %8824 = vmatpush3.bf16.msra.mxu1 %v9427_v59 }
 0x49a   : > { %8825 = vmatprep.subr.bf16.mxu1 %v9428_v60 }
 0x49d   : > { %8826 = vmatpush3.bf16.msra.mxu1 %v9429_v61 }
 0x49e   : > { %8827 = vmatprep.subr.bf16.mxu1 %v9430_v62 }
 0x4a1   : > { %8828 = vmatpush3.bf16.msra.mxu1 %v9431_v0  ;;  %v9432_v0 = vld [vmem:[%s12190_s3 + $0x178] sm:$0xff]  }
 0x4a2   : > { %9235 = vmatprep.subr.bf16.mxu1 %v10027_v58 }
 0x4a4   : > { %2295 = vmatmul.mubr.bf16.vlgmr.msra.gmra.mxu1 %v10300_v30 }
 0x4a5   : > { %9237 = vmatprep.mubr.msk.bf16.mxu1 %vm10028_vm0, %v10027_v58 }
 0x504   : > { %v1263_v7 = vpop.f32.mrf.mxu1 }
 0x505   : > { %v8633_v8 = vpack.c.bf16 %v1263_v7, %v1263_v7 }
 0x506   : > { %v9221_v9 = vpop.f32.mrf.mxu1 }
 0x507   : > { %1279 = vst.msk [vmem:[#allocation2] sm:$0xf] %vm1278_vm3, %v8633_v8 }
 0x508   : > { %v1266_v10 = vpop.f32.mrf.mxu1 }
 0x509   : > { %v8634_v11 = vpack.c.bf16 %v1266_v10, %v1266_v10 }
 0x50a   : > { %v9222_v12 = vpop.f32.mrf.mxu1 }
 0x50b   : > { %1280 = vst.msk [vmem:[#allocation2 + $0x8] sm:$0xf] %vm1278_vm3, %v8634_v11 }
 0x524   : > { %v8737_v13 = vpop.f32.mrf.mxu1 }
 0x526   : > { %v8738_v16 = vpop.f32.mrf.mxu1 }
 0x527   : > { %v8739_v18 = vadd.f32 %v8738_v16, %v8737_v13  ;;  %v9433_v13 = vld [vmem:[%s12190_s3 + $0x138] sm:$0xff]  }
 0x528   : > { %v8740_v17 = vpop.f32.mrf.mxu1 }
 0x529   : > { %v1453_v24 = vadd.f32 %v8739_v18, %v7420_v19  ;;  %v9435_v18 = vld [vmem:[%s12190_s3 + $0x130] sm:$0xff]  }
 0x52a   : > { %v8741_v22 = vpop.f32.mrf.mxu1 }
 0x52b   : > { %v8742_v23 = vadd.f32 %v8741_v22, %v8740_v17  ;;  %v9434_v17 = vld [vmem:[%s12190_s3 + $0x170] sm:$0xff]   ;;  %v9437_v22 = vld [vmem:[%s12190_s3 + $0x128] sm:$0xff]  }
 0x52d   : > { %v1456_v25 = vadd.f32 %v8742_v23, %v7420_v19  ;;  %v9436_v19 = vld [vmem:[%s12190_s3 + $0x168] sm:$0xff]   ;;  %v9438_v23 = vld [vmem:[%s12190_s3 + $0x160] sm:$0xff]  }
 0x52f   : > { %v1815_v26 = vpack.c.bf16 %v1456_v25, %v1453_v24  ;;  %v9439_v24 = vld [vmem:[%s12190_s3 + $0x120] sm:$0xff]   ;;  %v9440_v25 = vld [vmem:[%s12190_s3 + $0x158] sm:$0xff]  }
 0x531   : > { %9226 = vmatmul.mubr.msk.bf16.vlgmr.msra.gmra.mxu0 %vm1153_vm1, %v1815_v26  ;;  %v9441_v26 = vld [vmem:[%s12190_s3 + $0x118] sm:$0xff]  }
 0x532   : > { %9231 = vmatprep.mubr.msk.bf16.mxu0 %vm10028_vm0, %v10027_v58 }
 0x544   : > { %v8781_v27 = vpop.f32.mrf.mxu1 }
 0x546   : > { %v8782_v28 = vpop.f32.mrf.mxu1 }
 0x547   : > { %v8783_v14 = vadd.f32 %v8782_v28, %v8781_v27  ;;  %v9442_v27 = vld [vmem:[%s12190_s3 + $0x150] sm:$0xff]  }
 0x548   : > { %v8784_v29 = vpop.f32.mrf.mxu1  ;;  %v9443_v28 = vld [vmem:[%s12190_s3 + $0x110] sm:$0xff]  }
 0x549   : > { %v1809_v32 = vadd.f32 %v8783_v14, %v7520_v15  ;;  %v9445_v14 = vld [vmem:[%s12190_s3 + $0x108] sm:$0xff]  }
 0x54a   : > { %v8785_v20 = vpop.f32.mrf.mxu1 }
 0x54b   : > { %v8786_v21 = vadd.f32 %v8785_v20, %v8784_v29  ;;  %v9444_v29 = vld [vmem:[%s12190_s3 + $0x148] sm:$0xff]   ;;  %v9447_v20 = vld [vmem:[%s12190_s3 + $0x100] sm:$0xff]  }
 0x54d   : > { %v1812_v33 = vadd.f32 %v8786_v21, %v7520_v15  ;;  %v9446_v15 = vld [vmem:[%s12190_s3 + $0x140] sm:$0xff]   ;;  %v9448_v21 = vld [vmem:[%s12192_s5 + $0x178] sm:$0xff]  }
 0x54f   : > { %v1887_v34 = vpack.c.bf16 %v1812_v33, %v1809_v32  ;;  %v9449_v32 = vld [vmem:[%s12192_s5 + $0x138] sm:$0xff]   ;;  %v9450_v33 = vld [vmem:[%s12192_s5 + $0x170] sm:$0xff]  }
 0x551   : > { %9230 = vmatpush3.bf16.msra.mxu0 %v1887_v34  ;;  %v9451_v34 = vld [vmem:[%s12192_s5 + $0x130] sm:$0xff]  }
 0x552   : > { %8791 = vmatprep.subr.bf16.mxu0 %v9432_v0  ;;  %v9479_v0 = vld [vmem:[%s12191_s4 + $0x180] sm:$0xff]  }
 0x564   : > { %v8829_v35 = vpop.f32.mrf.mxu1 }
 0x566   : > { %v8830_v36 = vpop.f32.mrf.mxu1 }
 0x567   : > { %v8831_v38 = vadd.f32 %v8830_v36, %v8829_v35  ;;  %v9452_v35 = vld [vmem:[%s12192_s5 + $0x168] sm:$0xff]  }
 0x568   : > { %v8832_v37 = vpop.f32.mrf.mxu1  ;;  %v9453_v36 = vld [vmem:[%s12192_s5 + $0x128] sm:$0xff]  }
 0x569   : > { %v2297_v42 = vadd.f32 %v8831_v38, %v7624_v39  ;;  %v9455_v38 = vld [vmem:[%s12192_s5 + $0x120] sm:$0xff]  }
 0x56a   : > { %v8833_v40 = vpop.f32.mrf.mxu1 }
 0x56b   : > { %v8834_v41 = vadd.f32 %v8833_v40, %v8832_v37  ;;  %v9454_v37 = vld [vmem:[%s12192_s5 + $0x160] sm:$0xff]   ;;  %v9457_v40 = vld [vmem:[%s12192_s5 + $0x118] sm:$0xff]  }
 0x56d   : > { %v2300_v43 = vadd.f32 %v8834_v41, %v7624_v39  ;;  %v9456_v39 = vld [vmem:[%s12192_s5 + $0x158] sm:$0xff]   ;;  %v9458_v41 = vld [vmem:[%s12192_s5 + $0x150] sm:$0xff]  }
 0x56f   : > { %v2482_v44 = vpack.c.bf16 %v2300_v43, %v2297_v42  ;;  %v9459_v42 = vld [vmem:[%s12192_s5 + $0x110] sm:$0xff]   ;;  %v9460_v43 = vld [vmem:[%s12192_s5 + $0x148] sm:$0xff]  }
 0x571   : > { %v2487_v45 = vsel %vm1153_vm1, %v2482_v44, 0  ;;  %v9461_v44 = vld [vmem:[%s12192_s5 + $0x108] sm:$0xff]  }
 0x572   : > { %9236 = vmatpush3.bf16.xpose.msra.mxu1 %v2487_v45  ;;  %v9462_v45 = vld [vmem:[%s12192_s5 + $0x140] sm:$0xff]  }
 0x573   : > { %9241 = vmatprep.subr.bf16.mxu1 %v10027_v58 }
 0x5f1   : > { %v1857_v46 = vpop.f32.mrf.mxu0 }
 0x5f2   : > { %v1864_v47 = vsel %vm1201_vm2, %v1857_v46, -inf }
 0x5f3   : > { %1865 = vmax.xlane.f32.xlu0 %v1864_v47  ;;  %v9227_v48 = vpop.f32.mrf.mxu0  ;;  %v9464_v47 = vld [vmem:[%s12191_s4 + $0x1f8] sm:$0xff]  }
 0x5f4   : > { %v9465_v48 = vld [vmem:[%s12191_s4 + $0x1b8] sm:$0xff]  }
 0x5f5   : > { %v1860_v49 = vpop.f32.mrf.mxu0 }
 0x5f6   : > { %v1867_v50 = vsel %vm1201_vm2, %v1860_v49, -inf }
 0x5f7   : > { %1868 = vmax.xlane.f32.xlu1 %v1867_v50  ;;  %v9228_v51 = vpop.f32.mrf.mxu0  ;;  %v9467_v50 = vld [vmem:[%s12191_s4 + $0x1b0] sm:$0xff]  }
 0x5f8   : > { %v9468_v51 = vld [vmem:[%s12191_s4 + $0x1e8] sm:$0xff]  }
 0x67c   : > { %v1866_v52 = vpop.xlane.xlu0 %1865 }
 0x67d   : > { %v1870_v53 = vsub.f32 %v1857_v46, %v1866_v52  ;;  %v9463_v46 = vld [vmem:[%s12192_s5 + $0x100] sm:$0xff]   ;;  %v9469_v52 = vld [vmem:[%s12191_s4 + $0x1a8] sm:$0xff]  }
 0x67f   : > { %v1872_v54 = vmul.f32 1.442695, %v1870_v53  ;;  %v9470_v53 = vld [vmem:[%s12191_s4 + $0x1e0] sm:$0xff]  }
 0x680   : > { %v1869_v55 = vpop.xlane.xlu1 %1868 }
 0x681   : > { %9959 = vpow2.f32 %v1872_v54  ;;  %v1871_v56 = vsub.f32 %v1860_v49, %v1869_v55  ;;  %v9466_v49 = vld [vmem:[%s12191_s4 + $0x1f0] sm:$0xff]   ;;  %v9471_v54 = vld [vmem:[%s12191_s4 + $0x1a0] sm:$0xff]   ;;  %v9472_v55 = vld [vmem:[%s12191_s4 + $0x1d8] sm:$0xff]  }
 0x683   : > { %v1874_v57 = vmul.f32 1.442695, %v1871_v56  ;;  %v9473_v56 = vld [vmem:[%s12191_s4 + $0x198] sm:$0xff]  }
 0x685   : > { %9961 = vpow2.f32 %v1874_v57  ;;  %v9474_v57 = vld [vmem:[%s12191_s4 + $0x1d0] sm:$0xff]  }
 0x68e   : > { %v9960_v59 = vpop.eup %9959 }
 0x68f   : > { %v1876_v60 = vsel %vm1201_vm2, %v9960_v59, 0.0 }
 0x690   : > { %1877 = vadd.xlane.f32.xlu0 %v1876_v60  ;;  %v9476_v60 = vld [vmem:[%s12191_s4 + $0x1c8] sm:$0xff]  }
 0x692   : > { %v9962_v61 = vpop.eup %9961 }
 0x693   : > { %v1879_v62 = vsel %vm1201_vm2, %v9962_v61, 0.0 }
 0x694   : > { %1880 = vadd.xlane.f32.xlu1 %v1879_v62  ;;  %v9478_v62 = vld [vmem:[%s12191_s4 + $0x1c0] sm:$0xff]  }
 0x719   : > { %v1878_v7 = vpop.xlane.xlu0 %1877 }
 0x71a   : > { %9963 = vrcp.f32 %v1878_v7 }
 0x71d   : > { %v1881_v8 = vpop.xlane.xlu1 %1880 }
 0x71e   : > { %9965 = vrcp.f32 %v1881_v8 }
 0x727   : > { %v9964_v9 = vpop.eup %9963 }
 0x728   : > { %v1884_v11 = vmul.f32 %v9964_v9, %v9960_v59  ;;  %v9475_v59 = vld [vmem:[%s12191_s4 + $0x190] sm:$0xff]  }
 0x72b   : > { %v9966_v10 = vpop.eup %9965 }
 0x72c   : > { %v1885_v12 = vmul.f32 %v9966_v10, %v9962_v61  ;;  %v9477_v61 = vld [vmem:[%s12191_s4 + $0x188] sm:$0xff]  }
 0x72e   : > { %v1886_v16 = vpack.c.bf16 %v1885_v12, %v1884_v11 }
 0x730   : > { %9232 = vmatmul.mubr.msk.bf16.vlgmr.msra.gmra.mxu0 %vm1201_vm2, %v1886_v16 }
 0x731   : > { %8792 = vmatpush3.bf16.msra.mxu0 %v9433_v13  ;;  %2116 = vmatprep.mubr.bf16.mxu0 %v10302_v31 }
 0x732   : > { %8793 = vmatprep.subr.bf16.mxu0 %v9434_v17  ;;  %v7574_v17 = vld [vmem:[%s12193_s6 + $0x2] ss:$0 sm:$0xff] }
 0x735   : > { %8794 = vmatpush3.bf16.msra.mxu0 %v9435_v18 }
 0x736   : > { %8795 = vmatprep.subr.bf16.mxu0 %v9436_v19 }
 0x739   : > { %8796 = vmatpush3.bf16.msra.mxu0 %v9437_v22 }
 0x73a   : > { %8797 = vmatprep.subr.bf16.mxu0 %v9438_v23 }
 0x73d   : > { %8798 = vmatpush3.bf16.msra.mxu0 %v9439_v24 }
 0x73e   : > { %8799 = vmatprep.subr.bf16.mxu0 %v9440_v25 }
 0x741   : > { %8800 = vmatpush3.bf16.msra.mxu0 %v9441_v26 }
 0x742   : > { %8801 = vmatprep.subr.bf16.mxu0 %v9442_v27 }
 0x745   : > { %8802 = vmatpush3.bf16.msra.mxu0 %v9443_v28 }
 0x746   : > { %8803 = vmatprep.subr.bf16.mxu0 %v9444_v29  ;;  %v7674_v29 = vld [vmem:[%s12195_s8 + $0x2] ss:$0 sm:$0xff] }
 0x749   : > { %8804 = vmatpush3.bf16.msra.mxu0 %v9445_v14 }
 0x74a   : > { %8805 = vmatprep.subr.bf16.mxu0 %v9446_v15 }
 0x74d   : > { %8806 = vmatpush3.bf16.msra.mxu0 %v9447_v20 }
 0x74e   : > { %8835 = vmatprep.subr.bf16.mxu0 %v9448_v21 }
 0x750   : > { %2117 = vmatmul.mubr.bf16.vlgmr.msra.gmra.mxu0 %v10300_v30 }
 0x751   : > { %8836 = vmatpush3.bf16.msra.mxu0 %v9449_v32  ;;  %2472 = vmatprep.mubr.bf16.mxu0 %v10302_v31 }
 0x752   : > { %8837 = vmatprep.subr.bf16.mxu0 %v9450_v33 }
 0x755   : > { %8838 = vmatpush3.bf16.msra.mxu0 %v9451_v34 }
 0x756   : > { %8839 = vmatprep.subr.bf16.mxu0 %v9452_v35 }
 0x759   : > { %8840 = vmatpush3.bf16.msra.mxu0 %v9453_v36 }
 0x75a   : > { %8841 = vmatprep.subr.bf16.mxu0 %v9454_v37  ;;  %v7778_v37 = vld [vmem:[%s12194_s7 + $0x3] ss:$0 sm:$0xff] }
 0x75d   : > { %8842 = vmatpush3.bf16.msra.mxu0 %v9455_v38 }
 0x75e   : > { %8843 = vmatprep.subr.bf16.mxu0 %v9456_v39 }
 0x761   : > { %8844 = vmatpush3.bf16.msra.mxu0 %v9457_v40 }
 0x762   : > { %8845 = vmatprep.subr.bf16.mxu0 %v9458_v41 }
 0x765   : > { %8846 = vmatpush3.bf16.msra.mxu0 %v9459_v42 }
 0x766   : > { %8847 = vmatprep.subr.bf16.mxu0 %v9460_v43 }
 0x769   : > { %8848 = vmatpush3.bf16.msra.mxu0 %v9461_v44 }
 0x76a   : > { %8849 = vmatprep.subr.bf16.mxu0 %v9462_v45 }
 0x76d   : > { %8850 = vmatpush3.bf16.msra.mxu0 %v9463_v46 }
 0x76e   : > { %8883 = vmatprep.subr.bf16.mxu0 %v9464_v47 }
 0x770   : > { %2473 = vmatmul.mubr.bf16.vlgmr.msra.gmra.mxu0 %v10300_v30 }
 0x771   : > { %8884 = vmatpush3.bf16.msra.mxu0 %v9465_v48  ;;  %2960 = vmatprep.mubr.bf16.mxu0 %v10302_v31 }
 0x772   : > { %8885 = vmatprep.subr.bf16.mxu0 %v9466_v49 }
 0x775   : > { %8886 = vmatpush3.bf16.msra.mxu0 %v9467_v50 }
 0x776   : > { %8887 = vmatprep.subr.bf16.mxu0 %v9468_v51 }
 0x779   : > { %8888 = vmatpush3.bf16.msra.mxu0 %v9469_v52 }
 0x77a   : > { %8889 = vmatprep.subr.bf16.mxu0 %v9470_v53 }
 0x77d   : > { %8890 = vmatpush3.bf16.msra.mxu0 %v9471_v54 }
 0x77e   : > { %8891 = vmatprep.subr.bf16.mxu0 %v9472_v55 }
 0x781   : > { %8892 = vmatpush3.bf16.msra.mxu0 %v9473_v56 }
 0x782   : > { %8893 = vmatprep.subr.bf16.mxu0 %v9474_v57 }
 0x785   : > { %8894 = vmatpush3.bf16.msra.mxu0 %v9475_v59 }
 0x786   : > { %8895 = vmatprep.subr.bf16.mxu0 %v9476_v60 }
 0x789   : > { %8896 = vmatpush3.bf16.msra.mxu0 %v9477_v61  ;;  %v9480_v61 = vld [vmem:[%s12190_s3 + $0x1f8] sm:$0xff]  }
 0x78a   : > { %8897 = vmatprep.subr.bf16.mxu0 %v9478_v62 }
 0x78d   : > { %8898 = vmatpush3.bf16.msra.mxu0 %v9479_v0 }
 0x78e   : > { %9247 = vmatprep.subr.bf16.mxu0 %v10027_v58 }
 0x790   : > { %2961 = vmatmul.mubr.bf16.vlgmr.msra.gmra.mxu0 %v10300_v30 }
 0x791   : > { %9249 = vmatprep.mubr.msk.bf16.mxu0 %vm10028_vm0, %v10027_v58 }
 0x7f0   : > { %v10753_v7 = vpop.f32.mrf.mxu0 }
 0x7f2   : > { %v9233_v8 = vpop.f32.mrf.mxu0 }
 0x7f4   : > { %v10755_v9 = vpop.f32.mrf.mxu0 }
 0x7f6   : > { %v9234_v10 = vpop.f32.mrf.mxu0 }
 0x810   : > { %v8807_v11 = vpop.f32.mrf.mxu0 }
 0x812   : > { %v8808_v12 = vpop.f32.mrf.mxu0 }
 0x813   : > { %v8809_v16 = vadd.f32 %v8808_v12, %v8807_v11 }
 0x814   : > { %v8810_v13 = vpop.f32.mrf.mxu0 }
 0x815   : > { %v2119_v22 = vadd.f32 %v8809_v16, %v7574_v17 }
 0x816   : > { %v8811_v18 = vpop.f32.mrf.mxu0 }
 0x817   : > { %v8812_v19 = vadd.f32 %v8811_v18, %v8810_v13  ;;  %v9481_v13 = vld [vmem:[%s12190_s3 + $0x1b8] sm:$0xff]   ;;  %v9483_v18 = vld [vmem:[%s12190_s3 + $0x1b0] sm:$0xff]  }
 0x819   : > { %v2122_v23 = vadd.f32 %v8812_v19, %v7574_v17  ;;  %v9482_v17 = vld [vmem:[%s12190_s3 + $0x1f0] sm:$0xff]   ;;  %v9484_v19 = vld [vmem:[%s12190_s3 + $0x1e8] sm:$0xff]  }
 0x81b   : > { %v2481_v24 = vpack.c.bf16 %v2122_v23, %v2119_v22  ;;  %v9485_v22 = vld [vmem:[%s12190_s3 + $0x1a8] sm:$0xff]   ;;  %v9486_v23 = vld [vmem:[%s12190_s3 + $0x1e0] sm:$0xff]  }
 0x81d   : > { %9238 = vmatmul.mubr.msk.bf16.vlgmr.msra.gmra.mxu1 %vm1153_vm1, %v2481_v24  ;;  %v9487_v24 = vld [vmem:[%s12190_s3 + $0x1a0] sm:$0xff]  }
 0x81e   : > { %9243 = vmatprep.mubr.msk.bf16.mxu1 %vm10028_vm0, %v10027_v58 }
 0x830   : > { %v8851_v25 = vpop.f32.mrf.mxu0 }
 0x832   : > { %v8852_v26 = vpop.f32.mrf.mxu0 }
 0x833   : > { %v8853_v28 = vadd.f32 %v8852_v26, %v8851_v25  ;;  %v9488_v25 = vld [vmem:[%s12190_s3 + $0x1d8] sm:$0xff]  }
 0x834   : > { %v8854_v27 = vpop.f32.mrf.mxu0  ;;  %v9489_v26 = vld [vmem:[%s12190_s3 + $0x198] sm:$0xff]  }
 0x835   : > { %v2475_v20 = vadd.f32 %v8853_v28, %v7674_v29  ;;  %v9491_v28 = vld [vmem:[%s12190_s3 + $0x190] sm:$0xff]  }
 0x836   : > { %v8855_v14 = vpop.f32.mrf.mxu0 }
 0x837   : > { %v8856_v15 = vadd.f32 %v8855_v14, %v8854_v27  ;;  %v9490_v27 = vld [vmem:[%s12190_s3 + $0x1d0] sm:$0xff]   ;;  %v9493_v14 = vld [vmem:[%s12190_s3 + $0x188] sm:$0xff]  }
 0x839   : > { %v2478_v21 = vadd.f32 %v8856_v15, %v7674_v29  ;;  %v9492_v29 = vld [vmem:[%s12190_s3 + $0x1c8] sm:$0xff]   ;;  %v9494_v15 = vld [vmem:[%s12190_s3 + $0x1c0] sm:$0xff]  }
 0x83b   : > { %v2553_v32 = vpack.c.bf16 %v2478_v21, %v2475_v20  ;;  %v9495_v20 = vld [vmem:[%s12190_s3 + $0x180] sm:$0xff]   ;;  %v9496_v21 = vld [vmem:[%s12192_s5 + $0x1f8] sm:$0xff]  }
 0x83d   : > { %9242 = vmatpush3.bf16.msra.mxu1 %v2553_v32  ;;  %v9497_v32 = vld [vmem:[%s12192_s5 + $0x1b8] sm:$0xff]  }
 0x83e   : > { %8861 = vmatprep.subr.bf16.mxu1 %v9480_v61  ;;  %v9525_v61 = vld [vmem:[%s12191_s4 + $0x208] sm:$0xff]  }
 0x850   : > { %v8899_v33 = vpop.f32.mrf.mxu0 }
 0x852   : > { %v8900_v34 = vpop.f32.mrf.mxu0 }
 0x853   : > { %v8901_v36 = vadd.f32 %v8900_v34, %v8899_v33  ;;  %v9498_v33 = vld [vmem:[%s12192_s5 + $0x1f0] sm:$0xff]  }
 0x854   : > { %v8902_v35 = vpop.f32.mrf.mxu0  ;;  %v9499_v34 = vld [vmem:[%s12192_s5 + $0x1b0] sm:$0xff]  }
 0x855   : > { %v2963_v40 = vadd.f32 %v8901_v36, %v7778_v37  ;;  %v9501_v36 = vld [vmem:[%s12192_s5 + $0x1a8] sm:$0xff]  }
 0x856   : > { %v8903_v38 = vpop.f32.mrf.mxu0 }
 0x857   : > { %v8904_v39 = vadd.f32 %v8903_v38, %v8902_v35  ;;  %v9500_v35 = vld [vmem:[%s12192_s5 + $0x1e8] sm:$0xff]   ;;  %v9503_v38 = vld [vmem:[%s12192_s5 + $0x1a0] sm:$0xff]  }
 0x859   : > { %v2966_v41 = vadd.f32 %v8904_v39, %v7778_v37  ;;  %v9502_v37 = vld [vmem:[%s12192_s5 + $0x1e0] sm:$0xff]   ;;  %v9504_v39 = vld [vmem:[%s12192_s5 + $0x1d8] sm:$0xff]  }
 0x85b   : > { %v3148_v42 = vpack.c.bf16 %v2966_v41, %v2963_v40  ;;  %v9505_v40 = vld [vmem:[%s12192_s5 + $0x198] sm:$0xff]   ;;  %v9506_v41 = vld [vmem:[%s12192_s5 + $0x1d0] sm:$0xff]  }
 0x85d   : > { %v3153_v43 = vsel %vm1153_vm1, %v3148_v42, 0  ;;  %v9507_v42 = vld [vmem:[%s12192_s5 + $0x190] sm:$0xff]  }
 0x85e   : > { %9248 = vmatpush3.bf16.xpose.msra.mxu0 %v3153_v43  ;;  %v9508_v43 = vld [vmem:[%s12192_s5 + $0x1c8] sm:$0xff]  }
 0x85f   : > { %9253 = vmatprep.subr.bf16.mxu0 %v10027_v58 }
 0x8dd   : > { %v2523_v44 = vpop.f32.mrf.mxu1 }
 0x8de   : > { %v2530_v45 = vsel %vm1201_vm2, %v2523_v44, -inf }
 0x8df   : > { %2531 = vmax.xlane.f32.xlu0 %v2530_v45  ;;  %v9239_v46 = vpop.f32.mrf.mxu1  ;;  %v9510_v45 = vld [vmem:[%s12192_s5 + $0x1c0] sm:$0xff]  }
 0x8e0   : > { %v9511_v46 = vld [vmem:[%s12192_s5 + $0x180] sm:$0xff]  }
 0x8e1   : > { %v2526_v47 = vpop.f32.mrf.mxu1 }
 0x8e2   : > { %v2533_v48 = vsel %vm1201_vm2, %v2526_v47, -inf }
 0x8e3   : > { %2534 = vmax.xlane.f32.xlu1 %v2533_v48  ;;  %v9240_v49 = vpop.f32.mrf.mxu1  ;;  %v9513_v48 = vld [vmem:[%s12191_s4 + $0x238] sm:$0xff]  }
 0x8e4   : > { %v9514_v49 = vld [vmem:[%s12191_s4 + $0x270] sm:$0xff]  }
 0x968   : > { %v2532_v50 = vpop.xlane.xlu0 %2531 }
 0x969   : > { %v2536_v51 = vsub.f32 %v2523_v44, %v2532_v50  ;;  %v9509_v44 = vld [vmem:[%s12192_s5 + $0x188] sm:$0xff]   ;;  %v9515_v50 = vld [vmem:[%s12191_s4 + $0x230] sm:$0xff]  }
 0x96b   : > { %v2538_v52 = vmul.f32 1.442695, %v2536_v51  ;;  %v9516_v51 = vld [vmem:[%s12191_s4 + $0x268] sm:$0xff]  }
 0x96c   : > { %v2535_v53 = vpop.xlane.xlu1 %2534 }
 0x96d   : > { %9967 = vpow2.f32 %v2538_v52  ;;  %v2537_v54 = vsub.f32 %v2526_v47, %v2535_v53  ;;  %v9512_v47 = vld [vmem:[%s12191_s4 + $0x278] sm:$0xff]   ;;  %v9517_v52 = vld [vmem:[%s12191_s4 + $0x228] sm:$0xff]   ;;  %v9518_v53 = vld [vmem:[%s12191_s4 + $0x260] sm:$0xff]  }
 0x96f   : > { %v2540_v55 = vmul.f32 1.442695, %v2537_v54  ;;  %v9519_v54 = vld [vmem:[%s12191_s4 + $0x220] sm:$0xff]  }
 0x971   : > { %9969 = vpow2.f32 %v2540_v55  ;;  %v9520_v55 = vld [vmem:[%s12191_s4 + $0x258] sm:$0xff]  }
 0x97a   : > { %v9968_v56 = vpop.eup %9967 }
 0x97b   : > { %v2542_v57 = vsel %vm1201_vm2, %v9968_v56, 0.0 }
 0x97c   : > { %2543 = vadd.xlane.f32.xlu0 %v2542_v57  ;;  %v9522_v57 = vld [vmem:[%s12191_s4 + $0x250] sm:$0xff]  }
 0x97e   : > { %v9970_v59 = vpop.eup %9969 }
 0x97f   : > { %v2545_v60 = vsel %vm1201_vm2, %v9970_v59, 0.0 }
 0x980   : > { %2546 = vadd.xlane.f32.xlu1 %v2545_v60  ;;  %v9524_v60 = vld [vmem:[%s12191_s4 + $0x248] sm:$0xff]  }
 0xa05   : > { %v2544_v62 = vpop.xlane.xlu0 %2543 }
 0xa06   : > { %9971 = vrcp.f32 %v2544_v62  ;;  %v9526_v62 = vld [vmem:[%s12191_s4 + $0x240] sm:$0xff]  }
 0xa09   : > { %v2547_v0 = vpop.xlane.xlu1 %2546 }
 0xa0a   : > { %9973 = vrcp.f32 %v2547_v0  ;;  %v9527_v0 = vld [vmem:[%s12191_s4 + $0x200] sm:$0xff]  }
 0xa13   : > { %v9972_v8 = vpop.eup %9971 }
 0xa14   : > { %v2550_v11 = vmul.f32 %v9972_v8, %v9968_v56  ;;  %v9521_v56 = vld [vmem:[%s12191_s4 + $0x218] sm:$0xff]  }
 0xa17   : > { %v9974_v10 = vpop.eup %9973 }
 0xa18   : > { %v2551_v12 = vmul.f32 %v9974_v10, %v9970_v59  ;;  %v9523_v59 = vld [vmem:[%s12191_s4 + $0x210] sm:$0xff]  }
 0xa1a   : > { %v2552_v16 = vpack.c.bf16 %v2551_v12, %v2550_v11 }
 0xa1c   : > { %9244 = vmatmul.mubr.msk.bf16.vlgmr.msra.gmra.mxu1 %vm1201_vm2, %v2552_v16 }
 0xa1d   : > { %8862 = vmatpush3.bf16.msra.mxu1 %v9481_v13  ;;  %2782 = vmatprep.mubr.bf16.mxu1 %v10302_v31 }
 0xa1e   : > { %8863 = vmatprep.subr.bf16.mxu1 %v9482_v17 }
 0xa21   : > { %8864 = vmatpush3.bf16.msra.mxu1 %v9483_v18 }
 0xa22   : > { %8865 = vmatprep.subr.bf16.mxu1 %v9484_v19  ;;  %v7728_v19 = vld [vmem:[%s12193_s6 + $0x3] ss:$0 sm:$0xff] }
 0xa25   : > { %8866 = vmatpush3.bf16.msra.mxu1 %v9485_v22 }
 0xa26   : > { %8867 = vmatprep.subr.bf16.mxu1 %v9486_v23 }
 0xa29   : > { %8868 = vmatpush3.bf16.msra.mxu1 %v9487_v24 }
 0xa2a   : > { %8869 = vmatprep.subr.bf16.mxu1 %v9488_v25 }
 0xa2d   : > { %8870 = vmatpush3.bf16.msra.mxu1 %v9489_v26 }
 0xa2e   : > { %8871 = vmatprep.subr.bf16.mxu1 %v9490_v27 }
 0xa31   : > { %8872 = vmatpush3.bf16.msra.mxu1 %v9491_v28 }
 0xa32   : > { %8873 = vmatprep.subr.bf16.mxu1 %v9492_v29 }
 0xa35   : > { %8874 = vmatpush3.bf16.msra.mxu1 %v9493_v14 }
 0xa36   : > { %8875 = vmatprep.subr.bf16.mxu1 %v9494_v15  ;;  %v7828_v15 = vld [vmem:[%s12195_s8 + $0x3] ss:$0 sm:$0xff] }
 0xa39   : > { %8876 = vmatpush3.bf16.msra.mxu1 %v9495_v20 }
 0xa3a   : > { %8905 = vmatprep.subr.bf16.mxu1 %v9496_v21 }
 0xa3c   : > { %2783 = vmatmul.mubr.bf16.vlgmr.msra.gmra.mxu1 %v10300_v30 }
 0xa3d   : > { %8906 = vmatpush3.bf16.msra.mxu1 %v9497_v32  ;;  %3138 = vmatprep.mubr.bf16.mxu1 %v10302_v31 }
 0xa3e   : > { %8907 = vmatprep.subr.bf16.mxu1 %v9498_v33 }
 0xa41   : > { %8908 = vmatpush3.bf16.msra.mxu1 %v9499_v34 }
 0xa42   : > { %8909 = vmatprep.subr.bf16.mxu1 %v9500_v35 }
 0xa45   : > { %8910 = vmatpush3.bf16.msra.mxu1 %v9501_v36 }
 0xa46   : > { %8911 = vmatprep.subr.bf16.mxu1 %v9502_v37 }
 0xa49   : > { %8912 = vmatpush3.bf16.msra.mxu1 %v9503_v38 }
 0xa4a   : > { %8913 = vmatprep.subr.bf16.mxu1 %v9504_v39  ;;  %v7932_v39 = vld [vmem:[%s12194_s7 + $0x4] ss:$0 sm:$0xff] }
 0xa4d   : > { %8914 = vmatpush3.bf16.msra.mxu1 %v9505_v40 }
 0xa4e   : > { %8915 = vmatprep.subr.bf16.mxu1 %v9506_v41 }
 0xa51   : > { %8916 = vmatpush3.bf16.msra.mxu1 %v9507_v42 }
 0xa52   : > { %8917 = vmatprep.subr.bf16.mxu1 %v9508_v43 }
 0xa55   : > { %8918 = vmatpush3.bf16.msra.mxu1 %v9509_v44 }
 0xa56   : > { %8919 = vmatprep.subr.bf16.mxu1 %v9510_v45 }
 0xa59   : > { %8920 = vmatpush3.bf16.msra.mxu1 %v9511_v46 }
 0xa5a   : > { %8953 = vmatprep.subr.bf16.mxu1 %v9512_v47 }
 0xa5c   : > { %3139 = vmatmul.mubr.bf16.vlgmr.msra.gmra.mxu1 %v10300_v30 }
 0xa5d   : > { %8954 = vmatpush3.bf16.msra.mxu1 %v9513_v48  ;;  %3626 = vmatprep.mubr.bf16.mxu1 %v10302_v31 }
 0xa5e   : > { %8955 = vmatprep.subr.bf16.mxu1 %v9514_v49 }
 0xa61   : > { %8956 = vmatpush3.bf16.msra.mxu1 %v9515_v50 }
 0xa62   : > { %8957 = vmatprep.subr.bf16.mxu1 %v9516_v51 }
 0xa65   : > { %8958 = vmatpush3.bf16.msra.mxu1 %v9517_v52 }
 0xa66   : > { %8959 = vmatprep.subr.bf16.mxu1 %v9518_v53 }
 0xa69   : > { %8960 = vmatpush3.bf16.msra.mxu1 %v9519_v54 }
 0xa6a   : > { %8961 = vmatprep.subr.bf16.mxu1 %v9520_v55 }
 0xa6d   : > { %8962 = vmatpush3.bf16.msra.mxu1 %v9521_v56 }
 0xa6e   : > { %8963 = vmatprep.subr.bf16.mxu1 %v9522_v57 }
 0xa71   : > { %8964 = vmatpush3.bf16.msra.mxu1 %v9523_v59 }
 0xa72   : > { %8965 = vmatprep.subr.bf16.mxu1 %v9524_v60 }
 0xa75   : > { %8966 = vmatpush3.bf16.msra.mxu1 %v9525_v61 }
 0xa76   : > { %8967 = vmatprep.subr.bf16.mxu1 %v9526_v62 }
 0xa79   : > { %8968 = vmatpush3.bf16.msra.mxu1 %v9527_v0  ;;  %v9528_v0 = vld [vmem:[%s12190_s3 + $0x278] sm:$0xff]  }
 0xa7a   : > { %9259 = vmatprep.subr.bf16.mxu1 %v10027_v58 }
 0xa7c   : > { %3627 = vmatmul.mubr.bf16.vlgmr.msra.gmra.mxu1 %v10300_v30 }
 0xa7d   : > { %9261 = vmatprep.mubr.msk.bf16.mxu1 %vm10028_vm0, %v10027_v58 }
 0xadc   : > { %v10929_v8 = vpop.f32.mrf.mxu1 }
 0xade   : > { %v9245_v10 = vpop.f32.mrf.mxu1 }
 0xae0   : > { %v10931_v11 = vpop.f32.mrf.mxu1 }
 0xae2   : > { %v9246_v12 = vpop.f32.mrf.mxu1 }
 0xafc   : > { %v8877_v13 = vpop.f32.mrf.mxu1 }
 0xafe   : > { %v8878_v16 = vpop.f32.mrf.mxu1 }
 0xaff   : > { %v8879_v18 = vadd.f32 %v8878_v16, %v8877_v13 }
 0xb00   : > { %v8880_v17 = vpop.f32.mrf.mxu1 }
 0xb01   : > { %v2785_v24 = vadd.f32 %v8879_v18, %v7728_v19 }
 0xb02   : > { %v8881_v22 = vpop.f32.mrf.mxu1 }
 0xb03   : > { %v8882_v23 = vadd.f32 %v8881_v22, %v8880_v17 }
 0xb05   : > { %v2788_v25 = vadd.f32 %v8882_v23, %v7728_v19  ;;  %v9529_v19 = vld [vmem:[%s12190_s3 + $0x238] sm:$0xff]   ;;  %v9530_v23 = vld [vmem:[%s12190_s3 + $0x270] sm:$0xff]  }
 0xb07   : > { %v3147_v26 = vpack.c.bf16 %v2788_v25, %v2785_v24  ;;  %v9531_v24 = vld [vmem:[%s12190_s3 + $0x230] sm:$0xff]   ;;  %v9532_v25 = vld [vmem:[%s12190_s3 + $0x268] sm:$0xff]  }
 0xb09   : > { %9250 = vmatmul.mubr.msk.bf16.vlgmr.msra.gmra.mxu0 %vm1153_vm1, %v3147_v26  ;;  %v9533_v26 = vld [vmem:[%s12190_s3 + $0x228] sm:$0xff]  }
 0xb0a   : > { %9255 = vmatprep.mubr.msk.bf16.mxu0 %vm10028_vm0, %v10027_v58 }
 0xb1c   : > { %v8921_v27 = vpop.f32.mrf.mxu1 }
 0xb1e   : > { %v8922_v28 = vpop.f32.mrf.mxu1 }
 0xb1f   : > { %v8923_v14 = vadd.f32 %v8922_v28, %v8921_v27  ;;  %v9534_v27 = vld [vmem:[%s12190_s3 + $0x260] sm:$0xff]  }
 0xb20   : > { %v8924_v29 = vpop.f32.mrf.mxu1  ;;  %v9535_v28 = vld [vmem:[%s12190_s3 + $0x220] sm:$0xff]  }
 0xb21   : > { %v3141_v32 = vadd.f32 %v8923_v14, %v7828_v15  ;;  %v9537_v14 = vld [vmem:[%s12190_s3 + $0x218] sm:$0xff]  }
 0xb22   : > { %v8925_v20 = vpop.f32.mrf.mxu1 }
 0xb23   : > { %v8926_v21 = vadd.f32 %v8925_v20, %v8924_v29  ;;  %v9536_v29 = vld [vmem:[%s12190_s3 + $0x258] sm:$0xff]   ;;  %v9539_v20 = vld [vmem:[%s12190_s3 + $0x210] sm:$0xff]  }
 0xb25   : > { %v3144_v33 = vadd.f32 %v8926_v21, %v7828_v15  ;;  %v9538_v15 = vld [vmem:[%s12190_s3 + $0x250] sm:$0xff]   ;;  %v9540_v21 = vld [vmem:[%s12190_s3 + $0x248] sm:$0xff]  }
 0xb27   : > { %v3219_v34 = vpack.c.bf16 %v3144_v33, %v3141_v32  ;;  %v9541_v32 = vld [vmem:[%s12190_s3 + $0x208] sm:$0xff]   ;;  %v9542_v33 = vld [vmem:[%s12190_s3 + $0x240] sm:$0xff]  }
 0xb29   : > { %9254 = vmatpush3.bf16.msra.mxu0 %v3219_v34  ;;  %v9543_v34 = vld [vmem:[%s12190_s3 + $0x200] sm:$0xff]  }
 0xb2a   : > { %8931 = vmatprep.subr.bf16.mxu0 %v9528_v0  ;;  %v9571_v0 = vld [vmem:[%s12191_s4 + $0x290] sm:$0xff]  }
 0xb3c   : > { %v8969_v35 = vpop.f32.mrf.mxu1 }
 0xb3e   : > { %v8970_v36 = vpop.f32.mrf.mxu1 }
 0xb3f   : > { %v8971_v38 = vadd.f32 %v8970_v36, %v8969_v35  ;;  %v9544_v35 = vld [vmem:[%s12192_s5 + $0x278] sm:$0xff]  }
 0xb40   : > { %v8972_v37 = vpop.f32.mrf.mxu1  ;;  %v9545_v36 = vld [vmem:[%s12192_s5 + $0x238] sm:$0xff]  }
 0xb41   : > { %v3629_v42 = vadd.f32 %v8971_v38, %v7932_v39  ;;  %v9547_v38 = vld [vmem:[%s12192_s5 + $0x230] sm:$0xff]  }
 0xb42   : > { %v8973_v40 = vpop.f32.mrf.mxu1 }
 0xb43   : > { %v8974_v41 = vadd.f32 %v8973_v40, %v8972_v37  ;;  %v9546_v37 = vld [vmem:[%s12192_s5 + $0x270] sm:$0xff]   ;;  %v9549_v40 = vld [vmem:[%s12192_s5 + $0x228] sm:$0xff]  }
 0xb45   : > { %v3632_v43 = vadd.f32 %v8974_v41, %v7932_v39  ;;  %v9548_v39 = vld [vmem:[%s12192_s5 + $0x268] sm:$0xff]   ;;  %v9550_v41 = vld [vmem:[%s12192_s5 + $0x260] sm:$0xff]  }
 0xb47   : > { %v3814_v44 = vpack.c.bf16 %v3632_v43, %v3629_v42  ;;  %v9551_v42 = vld [vmem:[%s12192_s5 + $0x220] sm:$0xff]   ;;  %v9552_v43 = vld [vmem:[%s12192_s5 + $0x258] sm:$0xff]  }
 0xb49   : > { %v3819_v45 = vsel %vm1153_vm1, %v3814_v44, 0  ;;  %v9553_v44 = vld [vmem:[%s12192_s5 + $0x218] sm:$0xff]  }
 0xb4a   : > { %9260 = vmatpush3.bf16.xpose.msra.mxu1 %v3819_v45  ;;  %v9554_v45 = vld [vmem:[%s12192_s5 + $0x250] sm:$0xff]  }
 0xb4b   : > { %9265 = vmatprep.subr.bf16.mxu1 %v10027_v58 }
 0xbc9   : > { %v3189_v46 = vpop.f32.mrf.mxu0 }
 0xbca   : > { %v3196_v47 = vsel %vm1201_vm2, %v3189_v46, -inf }
 0xbcb   : > { %3197 = vmax.xlane.f32.xlu0 %v3196_v47  ;;  %v9251_v48 = vpop.f32.mrf.mxu0  ;;  %v9556_v47 = vld [vmem:[%s12192_s5 + $0x248] sm:$0xff]  }
 0xbcc   : > { %v9557_v48 = vld [vmem:[%s12192_s5 + $0x208] sm:$0xff]  }
 0xbcd   : > { %v3192_v49 = vpop.f32.mrf.mxu0 }
 0xbce   : > { %v3199_v50 = vsel %vm1201_vm2, %v3192_v49, -inf }
 0xbcf   : > { %3200 = vmax.xlane.f32.xlu1 %v3199_v50  ;;  %v9252_v51 = vpop.f32.mrf.mxu0  ;;  %v9559_v50 = vld [vmem:[%s12192_s5 + $0x200] sm:$0xff]  }
 0xbd0   : > { %v9560_v51 = vld [vmem:[%s12191_s4 + $0x2f8] sm:$0xff]  }
 0xc54   : > { %v3198_v52 = vpop.xlane.xlu0 %3197 }
 0xc55   : > { %v3202_v53 = vsub.f32 %v3189_v46, %v3198_v52  ;;  %v9555_v46 = vld [vmem:[%s12192_s5 + $0x210] sm:$0xff]   ;;  %v9561_v52 = vld [vmem:[%s12191_s4 + $0x2b8] sm:$0xff]  }
 0xc57   : > { %v3204_v54 = vmul.f32 1.442695, %v3202_v53  ;;  %v9562_v53 = vld [vmem:[%s12191_s4 + $0x2f0] sm:$0xff]  }
 0xc58   : > { %v3201_v55 = vpop.xlane.xlu1 %3200 }
 0xc59   : > { %9975 = vpow2.f32 %v3204_v54  ;;  %v3203_v56 = vsub.f32 %v3192_v49, %v3201_v55  ;;  %v9558_v49 = vld [vmem:[%s12192_s5 + $0x240] sm:$0xff]   ;;  %v9563_v54 = vld [vmem:[%s12191_s4 + $0x2b0] sm:$0xff]   ;;  %v9564_v55 = vld [vmem:[%s12191_s4 + $0x2e8] sm:$0xff]  }
 0xc5b   : > { %v3206_v57 = vmul.f32 1.442695, %v3203_v56  ;;  %v9565_v56 = vld [vmem:[%s12191_s4 + $0x2a8] sm:$0xff]  }
 0xc5d   : > { %9977 = vpow2.f32 %v3206_v57  ;;  %v9566_v57 = vld [vmem:[%s12191_s4 + $0x2e0] sm:$0xff]  }
 0xc66   : > { %v9976_v59 = vpop.eup %9975 }
 0xc67   : > { %v3208_v60 = vsel %vm1201_vm2, %v9976_v59, 0.0 }
 0xc68   : > { %3209 = vadd.xlane.f32.xlu0 %v3208_v60  ;;  %v9568_v60 = vld [vmem:[%s12191_s4 + $0x2d8] sm:$0xff]  }
 0xc6a   : > { %v9978_v61 = vpop.eup %9977 }
 0xc6b   : > { %v3211_v62 = vsel %vm1201_vm2, %v9978_v61, 0.0 }
 0xc6c   : > { %3212 = vadd.xlane.f32.xlu1 %v3211_v62  ;;  %v9570_v62 = vld [vmem:[%s12191_s4 + $0x2d0] sm:$0xff]  }
 0xcf1   : > { %v3210_v10 = vpop.xlane.xlu0 %3209 }
 0xcf2   : > { %9979 = vrcp.f32 %v3210_v10  ;;  %v9572_v10 = vld [vmem:[%s12191_s4 + $0x2c8] sm:$0xff]  }
 0xcf5   : > { %v3213_v12 = vpop.xlane.xlu1 %3212 }
 0xcf6   : > { %9981 = vrcp.f32 %v3213_v12  ;;  %v9573_v12 = vld [vmem:[%s12191_s4 + $0x288] sm:$0xff]  }
 0xcff   : > { %v9980_v13 = vpop.eup %9979 }
 0xd00   : > { %v3216_v17 = vmul.f32 %v9980_v13, %v9976_v59  ;;  %v9567_v59 = vld [vmem:[%s12191_s4 + $0x2a0] sm:$0xff]  }
 0xd01   : > { %v9574_v13 = vld [vmem:[%s12191_s4 + $0x2c0] sm:$0xff]  }
 0xd03   : > { %v9982_v16 = vpop.eup %9981 }
 0xd04   : > { %v3217_v18 = vmul.f32 %v9982_v16, %v9978_v61  ;;  %v9569_v61 = vld [vmem:[%s12191_s4 + $0x298] sm:$0xff]   ;;  %v9575_v16 = vld [vmem:[%s12191_s4 + $0x280] sm:$0xff]  }
 0xd06   : > { %v3218_v22 = vpack.c.bf16 %v3217_v18, %v3216_v17 }
 0xd08   : > { %9256 = vmatmul.mubr.msk.bf16.vlgmr.msra.gmra.mxu0 %vm1201_vm2, %v3218_v22 }
 0xd09   : > { %8932 = vmatpush3.bf16.msra.mxu0 %v9529_v19  ;;  %3448 = vmatprep.mubr.bf16.mxu0 %v10302_v31 }
 0xd0a   : > { %8933 = vmatprep.subr.bf16.mxu0 %v9530_v23 }
 0xd0d   : > { %8934 = vmatpush3.bf16.msra.mxu0 %v9531_v24 }
 0xd0e   : > { %8935 = vmatprep.subr.bf16.mxu0 %v9532_v25 }
 0xd11   : > { %8936 = vmatpush3.bf16.msra.mxu0 %v9533_v26 }
 0xd12   : > { %8937 = vmatprep.subr.bf16.mxu0 %v9534_v27  ;;  %v7882_v27 = vld [vmem:[%s12193_s6 + $0x4] ss:$0 sm:$0xff] }
 0xd15   : > { %8938 = vmatpush3.bf16.msra.mxu0 %v9535_v28 }
 0xd16   : > { %8939 = vmatprep.subr.bf16.mxu0 %v9536_v29 }
 0xd19   : > { %8940 = vmatpush3.bf16.msra.mxu0 %v9537_v14 }
 0xd1a   : > { %8941 = vmatprep.subr.bf16.mxu0 %v9538_v15 }
 0xd1d   : > { %8942 = vmatpush3.bf16.msra.mxu0 %v9539_v20 }
 0xd1e   : > { %8943 = vmatprep.subr.bf16.mxu0 %v9540_v21 }
 0xd21   : > { %8944 = vmatpush3.bf16.msra.mxu0 %v9541_v32 }
 0xd22   : > { %8945 = vmatprep.subr.bf16.mxu0 %v9542_v33 }
 0xd25   : > { %8946 = vmatpush3.bf16.msra.mxu0 %v9543_v34 }
 0xd26   : > { %8975 = vmatprep.subr.bf16.mxu0 %v9544_v35  ;;  %v7982_v35 = vld [vmem:[%s12195_s8 + $0x4] ss:$0 sm:$0xff] }
 0xd28   : > { %3449 = vmatmul.mubr.bf16.vlgmr.msra.gmra.mxu0 %v10300_v30 }
 0xd29   : > { %8976 = vmatpush3.bf16.msra.mxu0 %v9545_v36  ;;  %3804 = vmatprep.mubr.bf16.mxu0 %v10302_v31 }
 0xd2a   : > { %8977 = vmatprep.subr.bf16.mxu0 %v9546_v37 }
 0xd2d   : > { %8978 = vmatpush3.bf16.msra.mxu0 %v9547_v38 }
 0xd2e   : > { %8979 = vmatprep.subr.bf16.mxu0 %v9548_v39 }
 0xd31   : > { %8980 = vmatpush3.bf16.msra.mxu0 %v9549_v40 }
 0xd32   : > { %8981 = vmatprep.subr.bf16.mxu0 %v9550_v41 }
 0xd35   : > { %8982 = vmatpush3.bf16.msra.mxu0 %v9551_v42 }
 0xd36   : > { %8983 = vmatprep.subr.bf16.mxu0 %v9552_v43 }
 0xd39   : > { %8984 = vmatpush3.bf16.msra.mxu0 %v9553_v44 }
 0xd3a   : > { %8985 = vmatprep.subr.bf16.mxu0 %v9554_v45  ;;  %v8086_v45 = vld [vmem:[%s12194_s7 + $0x5] ss:$0 sm:$0xff] }
 0xd3d   : > { %8986 = vmatpush3.bf16.msra.mxu0 %v9555_v46 }
 0xd3e   : > { %8987 = vmatprep.subr.bf16.mxu0 %v9556_v47 }
 0xd41   : > { %8988 = vmatpush3.bf16.msra.mxu0 %v9557_v48 }
 0xd42   : > { %8989 = vmatprep.subr.bf16.mxu0 %v9558_v49 }
 0xd45   : > { %8990 = vmatpush3.bf16.msra.mxu0 %v9559_v50 }
 0xd46   : > { %9023 = vmatprep.subr.bf16.mxu0 %v9560_v51 }
 0xd48   : > { %3805 = vmatmul.mubr.bf16.vlgmr.msra.gmra.mxu0 %v10300_v30 }
 0xd49   : > { %9024 = vmatpush3.bf16.msra.mxu0 %v9561_v52  ;;  %4287 = vmatprep.mubr.bf16.mxu0 %v10302_v31 }
 0xd4a   : > { %9025 = vmatprep.subr.bf16.mxu0 %v9562_v53 }
 0xd4d   : > { %9026 = vmatpush3.bf16.msra.mxu0 %v9563_v54 }
 0xd4e   : > { %9027 = vmatprep.subr.bf16.mxu0 %v9564_v55 }
 0xd51   : > { %9028 = vmatpush3.bf16.msra.mxu0 %v9565_v56 }
 0xd52   : > { %9029 = vmatprep.subr.bf16.mxu0 %v9566_v57 }
 0xd55   : > { %9030 = vmatpush3.bf16.msra.mxu0 %v9567_v59 }
 0xd56   : > { %9031 = vmatprep.subr.bf16.mxu0 %v9568_v60 }
 0xd59   : > { %9032 = vmatpush3.bf16.msra.mxu0 %v9569_v61 }
 0xd5a   : > { %9033 = vmatprep.subr.bf16.mxu0 %v9570_v62 }
 0xd5d   : > { %9034 = vmatpush3.bf16.msra.mxu0 %v9571_v0 }
 0xd5e   : > { %9035 = vmatprep.subr.bf16.mxu0 %v9572_v10 }
 0xd61   : > { %9036 = vmatpush3.bf16.msra.mxu0 %v9573_v12 }
 0xd62   : > { %9037 = vmatprep.subr.bf16.mxu0 %v9574_v13 }
 0xd65   : > { %9038 = vmatpush3.bf16.msra.mxu0 %v9575_v16 }
 0xd66   : > { %9271 = vmatprep.subr.bf16.mxu0 %v10027_v58 }
 0xd68   : > { %4288 = vmatmul.mubr.bf16.vlgmr.msra.gmra.mxu0 %v10300_v30 }
 0xd69   : > { %9273 = vmatprep.mubr.msk.bf16.mxu0 %vm10028_vm0, %v10027_v58 }
 0xdc8   : > { %v11105_v17 = vpop.f32.mrf.mxu0 }
 0xdca   : > { %v9257_v18 = vpop.f32.mrf.mxu0 }
 0xdcc   : > { %v11107_v19 = vpop.f32.mrf.mxu0 }
 0xdce   : > { %v9258_v22 = vpop.f32.mrf.mxu0 }
 0xdcf   : > { %v9576_v22 = vld [vmem:[%s12190_s3 + $0x2f8] sm:$0xff]  }
 0xde8   : > { %v8947_v23 = vpop.f32.mrf.mxu0 }
 0xdea   : > { %v8948_v24 = vpop.f32.mrf.mxu0 }
 0xdeb   : > { %v8949_v26 = vadd.f32 %v8948_v24, %v8947_v23 }
 0xdec   : > { %v8950_v25 = vpop.f32.mrf.mxu0 }
 0xded   : > { %v3451_v14 = vadd.f32 %v8949_v26, %v7882_v27 }
 0xdee   : > { %v8951_v28 = vpop.f32.mrf.mxu0 }
 0xdef   : > { %v8952_v29 = vadd.f32 %v8951_v28, %v8950_v25 }
 0xdf1   : > { %v3454_v15 = vadd.f32 %v8952_v29, %v7882_v27  ;;  %v9577_v29 = vld [vmem:[%s12190_s3 + $0x2b8] sm:$0xff]  }
 0xdf3   : > { %v3813_v20 = vpack.c.bf16 %v3454_v15, %v3451_v14  ;;  %v9578_v15 = vld [vmem:[%s12190_s3 + $0x2f0] sm:$0xff]  }
 0xdf5   : > { %9262 = vmatmul.mubr.msk.bf16.vlgmr.msra.gmra.mxu1 %vm1153_vm1, %v3813_v20  ;;  %v9579_v20 = vld [vmem:[%s12190_s3 + $0x2b0] sm:$0xff]  }
 0xdf6   : > { %9267 = vmatprep.mubr.msk.bf16.mxu1 %vm10028_vm0, %v10027_v58 }
 0xe08   : > { %v8991_v21 = vpop.f32.mrf.mxu0 }
 0xe0a   : > { %v8992_v32 = vpop.f32.mrf.mxu0 }
 0xe0b   : > { %v8993_v34 = vadd.f32 %v8992_v32, %v8991_v21  ;;  %v9580_v21 = vld [vmem:[%s12190_s3 + $0x2e8] sm:$0xff]  }
 0xe0c   : > { %v8994_v33 = vpop.f32.mrf.mxu0  ;;  %v9581_v32 = vld [vmem:[%s12190_s3 + $0x2a8] sm:$0xff]  }
 0xe0d   : > { %v3807_v38 = vadd.f32 %v8993_v34, %v7982_v35  ;;  %v9583_v34 = vld [vmem:[%s12190_s3 + $0x2a0] sm:$0xff]  }
 0xe0e   : > { %v8995_v36 = vpop.f32.mrf.mxu0 }
 0xe0f   : > { %v8996_v37 = vadd.f32 %v8995_v36, %v8994_v33  ;;  %v9582_v33 = vld [vmem:[%s12190_s3 + $0x2e0] sm:$0xff]   ;;  %v9585_v36 = vld [vmem:[%s12190_s3 + $0x298] sm:$0xff]  }
 0xe11   : > { %v3810_v39 = vadd.f32 %v8996_v37, %v7982_v35  ;;  %v9584_v35 = vld [vmem:[%s12190_s3 + $0x2d8] sm:$0xff]   ;;  %v9586_v37 = vld [vmem:[%s12190_s3 + $0x2d0] sm:$0xff]  }
 0xe13   : > { %v3885_v40 = vpack.c.bf16 %v3810_v39, %v3807_v38  ;;  %v9587_v38 = vld [vmem:[%s12190_s3 + $0x290] sm:$0xff]   ;;  %v9588_v39 = vld [vmem:[%s12190_s3 + $0x2c8] sm:$0xff]  }
 0xe15   : > { %9266 = vmatpush3.bf16.msra.mxu1 %v3885_v40  ;;  %v9589_v40 = vld [vmem:[%s12190_s3 + $0x288] sm:$0xff]  }
 0xe16   : > { %9001 = vmatprep.subr.bf16.mxu1 %v9576_v22  ;;  %v9617_v22 = vld [vmem:[%s12191_s4 + $0x318] sm:$0xff]  }
 0xe28   : > { %v9039_v41 = vpop.f32.mrf.mxu0 }
 0xe2a   : > { %v9040_v42 = vpop.f32.mrf.mxu0 }
 0xe2b   : > { %v9041_v44 = vadd.f32 %v9040_v42, %v9039_v41  ;;  %v9590_v41 = vld [vmem:[%s12190_s3 + $0x2c0] sm:$0xff]  }
 0xe2c   : > { %v9042_v43 = vpop.f32.mrf.mxu0  ;;  %v9591_v42 = vld [vmem:[%s12190_s3 + $0x280] sm:$0xff]  }
 0xe2d   : > { %v4290_v48 = vadd.f32 %v9041_v44, %v8086_v45  ;;  %v9593_v44 = vld [vmem:[%s12192_s5 + $0x2b8] sm:$0xff]  }
 0xe2e   : > { %v9043_v46 = vpop.f32.mrf.mxu0 }
 0xe2f   : > { %v9044_v47 = vadd.f32 %v9043_v46, %v9042_v43  ;;  %v9592_v43 = vld [vmem:[%s12192_s5 + $0x2f8] sm:$0xff]   ;;  %v9595_v46 = vld [vmem:[%s12192_s5 + $0x2b0] sm:$0xff]  }
 0xe31   : > { %v4293_v49 = vadd.f32 %v9044_v47, %v8086_v45  ;;  %v9594_v45 = vld [vmem:[%s12192_s5 + $0x2f0] sm:$0xff]   ;;  %v9596_v47 = vld [vmem:[%s12192_s5 + $0x2e8] sm:$0xff]  }
 0xe33   : > { %v4475_v50 = vpack.c.bf16 %v4293_v49, %v4290_v48  ;;  %v9597_v48 = vld [vmem:[%s12192_s5 + $0x2a8] sm:$0xff]   ;;  %v9598_v49 = vld [vmem:[%s12192_s5 + $0x2e0] sm:$0xff]  }
 0xe35   : > { %v4480_v51 = vsel %vm1153_vm1, %v4475_v50, 0  ;;  %v9599_v50 = vld [vmem:[%s12192_s5 + $0x2a0] sm:$0xff]  }
 0xe36   : > { %9272 = vmatpush3.bf16.xpose.msra.mxu0 %v4480_v51  ;;  %v9600_v51 = vld [vmem:[%s12192_s5 + $0x2d8] sm:$0xff]  }
 0xe37   : > { %9277 = vmatprep.subr.bf16.mxu0 %v10027_v58 }
 0xeb5   : > { %v3855_v52 = vpop.f32.mrf.mxu1 }
 0xeb6   : > { %v3862_v53 = vsel %vm1201_vm2, %v3855_v52, -inf }
 0xeb7   : > { %3863 = vmax.xlane.f32.xlu0 %v3862_v53  ;;  %v9263_v54 = vpop.f32.mrf.mxu1  ;;  %v9602_v53 = vld [vmem:[%s12192_s5 + $0x2d0] sm:$0xff]  }
 0xeb8   : > { %v9603_v54 = vld [vmem:[%s12192_s5 + $0x290] sm:$0xff]  }
 0xeb9   : > { %v3858_v55 = vpop.f32.mrf.mxu1 }
 0xeba   : > { %v3865_v56 = vsel %vm1201_vm2, %v3858_v55, -inf }
 0xebb   : > { %3866 = vmax.xlane.f32.xlu1 %v3865_v56  ;;  %v9264_v57 = vpop.f32.mrf.mxu1  ;;  %v9605_v56 = vld [vmem:[%s12192_s5 + $0x288] sm:$0xff]  }
 0xebc   : > { %v9606_v57 = vld [vmem:[%s12192_s5 + $0x2c0] sm:$0xff]  }
 0xf40   : > { %v3864_v59 = vpop.xlane.xlu0 %3863 }
 0xf41   : > { %v3868_v60 = vsub.f32 %v3855_v52, %v3864_v59  ;;  %v9601_v52 = vld [vmem:[%s12192_s5 + $0x298] sm:$0xff]   ;;  %v9607_v59 = vld [vmem:[%s12192_s5 + $0x280] sm:$0xff]  }
 0xf43   : > { %v3870_v61 = vmul.f32 1.442695, %v3868_v60  ;;  %v9608_v60 = vld [vmem:[%s12191_s4 + $0x378] sm:$0xff]  }
 0xf44   : > { %v3867_v62 = vpop.xlane.xlu1 %3866 }
 0xf45   : > { %9983 = vpow2.f32 %v3870_v61  ;;  %v3869_v0 = vsub.f32 %v3858_v55, %v3867_v62  ;;  %v9604_v55 = vld [vmem:[%s12192_s5 + $0x2c8] sm:$0xff]   ;;  %v9609_v61 = vld [vmem:[%s12191_s4 + $0x338] sm:$0xff]   ;;  %v9610_v62 = vld [vmem:[%s12191_s4 + $0x370] sm:$0xff]  }
 0xf47   : > { %v3872_v10 = vmul.f32 1.442695, %v3869_v0  ;;  %v9611_v0 = vld [vmem:[%s12191_s4 + $0x330] sm:$0xff]  }
 0xf49   : > { %9985 = vpow2.f32 %v3872_v10  ;;  %v9612_v10 = vld [vmem:[%s12191_s4 + $0x368] sm:$0xff]  }
 0xf52   : > { %v9984_v12 = vpop.eup %9983 }
 0xf53   : > { %v3874_v13 = vsel %vm1201_vm2, %v9984_v12, 0.0 }
 0xf54   : > { %3875 = vadd.xlane.f32.xlu0 %v3874_v13  ;;  %v9614_v13 = vld [vmem:[%s12191_s4 + $0x360] sm:$0xff]  }
 0xf56   : > { %v9986_v16 = vpop.eup %9985 }
 0xf57   : > { %v3877_v18 = vsel %vm1201_vm2, %v9986_v16, 0.0 }
 0xf58   : > { %3878 = vadd.xlane.f32.xlu1 %v3877_v18  ;;  %v9616_v18 = vld [vmem:[%s12191_s4 + $0x358] sm:$0xff]  }
 0xfdd   : > { %v3876_v23 = vpop.xlane.xlu0 %3875 }
 0xfde   : > { %9987 = vrcp.f32 %v3876_v23  ;;  %v9618_v23 = vld [vmem:[%s12191_s4 + $0x350] sm:$0xff]  }
 0xfe1   : > { %v3879_v24 = vpop.xlane.xlu1 %3878 }
 0xfe2   : > { %9989 = vrcp.f32 %v3879_v24  ;;  %v9619_v24 = vld [vmem:[%s12191_s4 + $0x310] sm:$0xff]  }
 0xfeb   : > { %v9988_v25 = vpop.eup %9987 }
 0xfec   : > { %v3882_v27 = vmul.f32 %v9988_v25, %v9984_v12  ;;  %v9613_v12 = vld [vmem:[%s12191_s4 + $0x328] sm:$0xff]  }
 0xfed   : > { %v9620_v25 = vld [vmem:[%s12191_s4 + $0x348] sm:$0xff]  }
 0xfef   : > { %v9990_v26 = vpop.eup %9989 }
 0xff0   : > { %v3883_v28 = vmul.f32 %v9990_v26, %v9986_v16  ;;  %v9615_v16 = vld [vmem:[%s12191_s4 + $0x320] sm:$0xff]   ;;  %v9621_v26 = vld [vmem:[%s12191_s4 + $0x308] sm:$0xff]  }
 0xff2   : > { %v3884_v14 = vpack.c.bf16 %v3883_v28, %v3882_v27  ;;  %v9622_v27 = vld [vmem:[%s12191_s4 + $0x340] sm:$0xff]  }
 0xff3   : > { %v9623_v28 = vld [vmem:[%s12191_s4 + $0x300] sm:$0xff]  }
 0xff4   : > { %9268 = vmatmul.mubr.msk.bf16.vlgmr.msra.gmra.mxu1 %vm1201_vm2, %v3884_v14 }
 0xff5   : > { %9002 = vmatpush3.bf16.msra.mxu1 %v9577_v29  ;;  %4109 = vmatprep.mubr.bf16.mxu1 %v10302_v31 }
 0xff6   : > { %9003 = vmatprep.subr.bf16.mxu1 %v9578_v15 }
 0xff9   : > { %9004 = vmatpush3.bf16.msra.mxu1 %v9579_v20 }
 0xffa   : > { %9005 = vmatprep.subr.bf16.mxu1 %v9580_v21 }
 0xffd   : > { %9006 = vmatpush3.bf16.msra.mxu1 %v9581_v32 }
 0xffe   : > { %9007 = vmatprep.subr.bf16.mxu1 %v9582_v33 }
0x1001   : > { %9008 = vmatpush3.bf16.msra.mxu1 %v9583_v34 }
0x1002   : > { %9009 = vmatprep.subr.bf16.mxu1 %v9584_v35 }
0x1005   : > { %9010 = vmatpush3.bf16.msra.mxu1 %v9585_v36 }
0x1006   : > { %9011 = vmatprep.subr.bf16.mxu1 %v9586_v37  ;;  %v8036_v37 = vld [vmem:[%s12193_s6 + $0x5] ss:$0 sm:$0xff] }
0x1009   : > { %9012 = vmatpush3.bf16.msra.mxu1 %v9587_v38 }
0x100a   : > { %9013 = vmatprep.subr.bf16.mxu1 %v9588_v39 }
0x100d   : > { %9014 = vmatpush3.bf16.msra.mxu1 %v9589_v40 }
0x100e   : > { %9015 = vmatprep.subr.bf16.mxu1 %v9590_v41 }
0x1011   : > { %9016 = vmatpush3.bf16.msra.mxu1 %v9591_v42 }
0x1012   : > { %9045 = vmatprep.subr.bf16.mxu1 %v9592_v43 }
0x1014   : > { %4110 = vmatmul.mubr.bf16.vlgmr.msra.gmra.mxu1 %v10300_v30 }
0x1015   : > { %9046 = vmatpush3.bf16.msra.mxu1 %v9593_v44  ;;  %4465 = vmatprep.mubr.bf16.mxu1 %v10302_v31 }
0x1016   : > { %9047 = vmatprep.subr.bf16.mxu1 %v9594_v45 }
0x1019   : > { %9048 = vmatpush3.bf16.msra.mxu1 %v9595_v46 }
0x101a   : > { %9049 = vmatprep.subr.bf16.mxu1 %v9596_v47  ;;  %v8136_v47 = vld [vmem:[%s12195_s8 + $0x5] ss:$0 sm:$0xff] }
0x101d   : > { %9050 = vmatpush3.bf16.msra.mxu1 %v9597_v48 }
0x101e   : > { %9051 = vmatprep.subr.bf16.mxu1 %v9598_v49 }
0x1021   : > { %9052 = vmatpush3.bf16.msra.mxu1 %v9599_v50 }
0x1022   : > { %9053 = vmatprep.subr.bf16.mxu1 %v9600_v51 }
0x1025   : > { %9054 = vmatpush3.bf16.msra.mxu1 %v9601_v52 }
0x1026   : > { %9055 = vmatprep.subr.bf16.mxu1 %v9602_v53 }
0x1029   : > { %9056 = vmatpush3.bf16.msra.mxu1 %v9603_v54 }
0x102a   : > { %9057 = vmatprep.subr.bf16.mxu1 %v9604_v55 }
0x102d   : > { %9058 = vmatpush3.bf16.msra.mxu1 %v9605_v56 }
0x102e   : > { %9059 = vmatprep.subr.bf16.mxu1 %v9606_v57  ;;  %v8240_v57 = vld [vmem:[%s12194_s7 + $0x6] ss:$0 sm:$0xff] }
0x1031   : > { %9060 = vmatpush3.bf16.msra.mxu1 %v9607_v59 }
0x1032   : > { %9093 = vmatprep.subr.bf16.mxu1 %v9608_v60 }
0x1034   : > { %4466 = vmatmul.mubr.bf16.vlgmr.msra.gmra.mxu1 %v10300_v30 }
0x1035   : > { %9094 = vmatpush3.bf16.msra.mxu1 %v9609_v61  ;;  %4952 = vmatprep.mubr.bf16.mxu1 %v10302_v31 }
0x1036   : > { %9095 = vmatprep.subr.bf16.mxu1 %v9610_v62 }
0x1039   : > { %9096 = vmatpush3.bf16.msra.mxu1 %v9611_v0 }
0x103a   : > { %9097 = vmatprep.subr.bf16.mxu1 %v9612_v10 }
0x103d   : > { %9098 = vmatpush3.bf16.msra.mxu1 %v9613_v12 }
0x103e   : > { %9099 = vmatprep.subr.bf16.mxu1 %v9614_v13 }
0x1041   : > { %9100 = vmatpush3.bf16.msra.mxu1 %v9615_v16 }
0x1042   : > { %9101 = vmatprep.subr.bf16.mxu1 %v9616_v18 }
0x1045   : > { %9102 = vmatpush3.bf16.msra.mxu1 %v9617_v22 }
0x1046   : > { %9103 = vmatprep.subr.bf16.mxu1 %v9618_v23 }
0x1049   : > { %9104 = vmatpush3.bf16.msra.mxu1 %v9619_v24 }
0x104a   : > { %9105 = vmatprep.subr.bf16.mxu1 %v9620_v25 }
0x104d   : > { %9106 = vmatpush3.bf16.msra.mxu1 %v9621_v26 }
0x104e   : > { %9107 = vmatprep.subr.bf16.mxu1 %v9622_v27 }
0x1051   : > { %9108 = vmatpush3.bf16.msra.mxu1 %v9623_v28 }
0x1052   : > { %9283 = vmatprep.subr.bf16.mxu1 %v10027_v58 }
0x1054   : > { %4953 = vmatmul.mubr.bf16.vlgmr.msra.gmra.mxu1 %v10300_v30 }
0x1055   : > { %9285 = vmatprep.mubr.msk.bf16.mxu1 %vm10028_vm0, %v10027_v58 }
0x10b4   : > { %v3923_v29 = vpop.f32.mrf.mxu1 }
0x10b5   : > { %v8641_v14 = vpack.c.bf16 %v3923_v29, %v3923_v29 }
0x10b6   : > { %v9269_v15 = vpop.f32.mrf.mxu1 }
0x10b7   : > { %3938 = vst.msk [vmem:[#allocation2 + $0x4] sm:$0xf] %vm1278_vm3, %v8641_v14 }
0x10b8   : > { %v3926_v20 = vpop.f32.mrf.mxu1 }
0x10b9   : > { %v8642_v21 = vpack.c.bf16 %v3926_v20, %v3926_v20 }
0x10ba   : > { %v9270_v32 = vpop.f32.mrf.mxu1 }
0x10bb   : > { %3939 = vst.msk [vmem:[#allocation2 + $0xc] sm:$0xf] %vm1278_vm3, %v8642_v21  ;;  %v9624_v32 = vld [vmem:[%s12190_s3 + $0x378] sm:$0xff]  }
0x10d4   : > { %v9017_v33 = vpop.f32.mrf.mxu1 }
0x10d6   : > { %v9018_v34 = vpop.f32.mrf.mxu1 }
0x10d7   : > { %v9019_v36 = vadd.f32 %v9018_v34, %v9017_v33 }
0x10d8   : > { %v9020_v35 = vpop.f32.mrf.mxu1 }
0x10d9   : > { %v4112_v40 = vadd.f32 %v9019_v36, %v8036_v37 }
0x10da   : > { %v9021_v38 = vpop.f32.mrf.mxu1 }
0x10db   : > { %v9022_v39 = vadd.f32 %v9021_v38, %v9020_v35 }
0x10dd   : > { %v4115_v41 = vadd.f32 %v9022_v39, %v8036_v37  ;;  %v9625_v39 = vld [vmem:[%s12190_s3 + $0x338] sm:$0xff]  }
0x10df   : > { %v4474_v42 = vpack.c.bf16 %v4115_v41, %v4112_v40  ;;  %v9626_v41 = vld [vmem:[%s12190_s3 + $0x370] sm:$0xff]  }
0x10e1   : > { %9274 = vmatmul.mubr.msk.bf16.vlgmr.msra.gmra.mxu0 %vm1153_vm1, %v4474_v42  ;;  %v9627_v42 = vld [vmem:[%s12190_s3 + $0x330] sm:$0xff]  }
0x10e2   : > { %9279 = vmatprep.mubr.msk.bf16.mxu0 %vm10028_vm0, %v10027_v58 }
0x10f4   : > { %v9061_v43 = vpop.f32.mrf.mxu1 }
0x10f6   : > { %v9062_v44 = vpop.f32.mrf.mxu1 }
0x10f7   : > { %v9063_v46 = vadd.f32 %v9062_v44, %v9061_v43  ;;  %v9628_v43 = vld [vmem:[%s12190_s3 + $0x368] sm:$0xff]  }
0x10f8   : > { %v9064_v45 = vpop.f32.mrf.mxu1  ;;  %v9629_v44 = vld [vmem:[%s12190_s3 + $0x328] sm:$0xff]  }
0x10f9   : > { %v4468_v50 = vadd.f32 %v9063_v46, %v8136_v47  ;;  %v9631_v46 = vld [vmem:[%s12190_s3 + $0x320] sm:$0xff]  }
0x10fa   : > { %v9065_v48 = vpop.f32.mrf.mxu1 }
0x10fb   : > { %v9066_v49 = vadd.f32 %v9065_v48, %v9064_v45  ;;  %v9630_v45 = vld [vmem:[%s12190_s3 + $0x360] sm:$0xff]   ;;  %v9633_v48 = vld [vmem:[%s12190_s3 + $0x318] sm:$0xff]  }
0x10fd   : > { %v4471_v51 = vadd.f32 %v9066_v49, %v8136_v47  ;;  %v9632_v47 = vld [vmem:[%s12190_s3 + $0x358] sm:$0xff]   ;;  %v9634_v49 = vld [vmem:[%s12190_s3 + $0x350] sm:$0xff]  }
0x10ff   : > { %v4546_v52 = vpack.c.bf16 %v4471_v51, %v4468_v50  ;;  %v9635_v50 = vld [vmem:[%s12190_s3 + $0x310] sm:$0xff]   ;;  %v9636_v51 = vld [vmem:[%s12190_s3 + $0x348] sm:$0xff]  }
0x1101   : > { %9278 = vmatpush3.bf16.msra.mxu0 %v4546_v52  ;;  %v9637_v52 = vld [vmem:[%s12190_s3 + $0x308] sm:$0xff]  }
0x1102   : > { %9071 = vmatprep.subr.bf16.mxu0 %v9624_v32  ;;  %v9665_v32 = vld [vmem:[%s12191_s4 + $0x398] sm:$0xff]  }
0x1114   : > { %v9109_v53 = vpop.f32.mrf.mxu1 }
0x1116   : > { %v9110_v54 = vpop.f32.mrf.mxu1 }
0x1117   : > { %v9111_v56 = vadd.f32 %v9110_v54, %v9109_v53  ;;  %v9638_v53 = vld [vmem:[%s12190_s3 + $0x340] sm:$0xff]  }
0x1118   : > { %v9112_v55 = vpop.f32.mrf.mxu1  ;;  %v9639_v54 = vld [vmem:[%s12190_s3 + $0x300] sm:$0xff]  }
0x1119   : > { %v4955_v61 = vadd.f32 %v9111_v56, %v8240_v57  ;;  %v9641_v56 = vld [vmem:[%s12192_s5 + $0x338] sm:$0xff]  }
0x111a   : > { %v9113_v59 = vpop.f32.mrf.mxu1 }
0x111b   : > { %v9114_v60 = vadd.f32 %v9113_v59, %v9112_v55  ;;  %v9640_v55 = vld [vmem:[%s12192_s5 + $0x378] sm:$0xff]   ;;  %v9643_v59 = vld [vmem:[%s12192_s5 + $0x330] sm:$0xff]  }
0x111d   : > { %v4958_v62 = vadd.f32 %v9114_v60, %v8240_v57  ;;  %v9642_v57 = vld [vmem:[%s12192_s5 + $0x370] sm:$0xff]   ;;  %v9644_v60 = vld [vmem:[%s12192_s5 + $0x368] sm:$0xff]  }
0x111f   : > { %v5140_v0 = vpack.c.bf16 %v4958_v62, %v4955_v61  ;;  %v9645_v61 = vld [vmem:[%s12192_s5 + $0x328] sm:$0xff]   ;;  %v9646_v62 = vld [vmem:[%s12192_s5 + $0x360] sm:$0xff]  }
0x1121   : > { %v5145_v10 = vsel %vm1153_vm1, %v5140_v0, 0  ;;  %v9647_v0 = vld [vmem:[%s12192_s5 + $0x320] sm:$0xff]  }
0x1122   : > { %9284 = vmatpush3.bf16.xpose.msra.mxu1 %v5145_v10  ;;  %v9648_v10 = vld [vmem:[%s12192_s5 + $0x358] sm:$0xff]  }
0x1123   : > { %9289 = vmatprep.subr.bf16.mxu1 %v10027_v58 }
0x11a1   : > { %v4516_v12 = vpop.f32.mrf.mxu0 }
0x11a2   : > { %v4523_v13 = vsel %vm1201_vm2, %v4516_v12, -inf }
0x11a3   : > { %4524 = vmax.xlane.f32.xlu0 %v4523_v13  ;;  %v9275_v16 = vpop.f32.mrf.mxu0  ;;  %v9650_v13 = vld [vmem:[%s12192_s5 + $0x350] sm:$0xff]  }
0x11a4   : > { %v9651_v16 = vld [vmem:[%s12192_s5 + $0x310] sm:$0xff]  }
0x11a5   : > { %v4519_v18 = vpop.f32.mrf.mxu0 }
0x11a6   : > { %v4526_v22 = vsel %vm1201_vm2, %v4519_v18, -inf }
0x11a7   : > { %4527 = vmax.xlane.f32.xlu1 %v4526_v22  ;;  %v9276_v23 = vpop.f32.mrf.mxu0  ;;  %v9653_v22 = vld [vmem:[%s12192_s5 + $0x308] sm:$0xff]  }
0x11a8   : > { %v9654_v23 = vld [vmem:[%s12192_s5 + $0x340] sm:$0xff]  }
0x122c   : > { %v4525_v24 = vpop.xlane.xlu0 %4524 }
0x122d   : > { %v4529_v25 = vsub.f32 %v4516_v12, %v4525_v24  ;;  %v9649_v12 = vld [vmem:[%s12192_s5 + $0x318] sm:$0xff]   ;;  %v9655_v24 = vld [vmem:[%s12192_s5 + $0x300] sm:$0xff]  }
0x122f   : > { %v4531_v26 = vmul.f32 1.442695, %v4529_v25  ;;  %v9656_v25 = vld [vmem:[%s12191_s4 + $0x3f8] sm:$0xff]  }
0x1230   : > { %v4528_v27 = vpop.xlane.xlu1 %4527 }
0x1231   : > { %9991 = vpow2.f32 %v4531_v26  ;;  %v4530_v28 = vsub.f32 %v4519_v18, %v4528_v27  ;;  %v9652_v18 = vld [vmem:[%s12192_s5 + $0x348] sm:$0xff]   ;;  %v9657_v26 = vld [vmem:[%s12191_s4 + $0x3b8] sm:$0xff]   ;;  %v9658_v27 = vld [vmem:[%s12191_s4 + $0x3f0] sm:$0xff]  }
0x1233   : > { %v4533_v29 = vmul.f32 1.442695, %v4530_v28  ;;  %v9659_v28 = vld [vmem:[%s12191_s4 + $0x3b0] sm:$0xff]  }
0x1235   : > { %9993 = vpow2.f32 %v4533_v29  ;;  %v9660_v29 = vld [vmem:[%s12191_s4 + $0x3e8] sm:$0xff]  }
0x123e   : > { %v9992_v14 = vpop.eup %9991 }
0x123f   : > { %v4535_v15 = vsel %vm1201_vm2, %v9992_v14, 0.0 }
0x1240   : > { %4536 = vadd.xlane.f32.xlu0 %v4535_v15  ;;  %v9662_v15 = vld [vmem:[%s12191_s4 + $0x3e0] sm:$0xff]  }
0x1242   : > { %v9994_v20 = vpop.eup %9993 }
0x1243   : > { %v4538_v21 = vsel %vm1201_vm2, %v9994_v20, 0.0 }
0x1244   : > { %4539 = vadd.xlane.f32.xlu1 %v4538_v21  ;;  %v9664_v21 = vld [vmem:[%s12191_s4 + $0x3d8] sm:$0xff]  }
0x12c9   : > { %v4537_v33 = vpop.xlane.xlu0 %4536 }
0x12ca   : > { %9995 = vrcp.f32 %v4537_v33  ;;  %v9666_v33 = vld [vmem:[%s12191_s4 + $0x3d0] sm:$0xff]  }
0x12cd   : > { %v4540_v34 = vpop.xlane.xlu1 %4539 }
0x12ce   : > { %9997 = vrcp.f32 %v4540_v34  ;;  %v9667_v34 = vld [vmem:[%s12191_s4 + $0x390] sm:$0xff]  }
0x12d7   : > { %v9996_v35 = vpop.eup %9995 }
0x12d8   : > { %v4543_v37 = vmul.f32 %v9996_v35, %v9992_v14  ;;  %v9661_v14 = vld [vmem:[%s12191_s4 + $0x3a8] sm:$0xff]  }
0x12d9   : > { %v9668_v35 = vld [vmem:[%s12191_s4 + $0x3c8] sm:$0xff]  }
0x12db   : > { %v9998_v36 = vpop.eup %9997 }
0x12dc   : > { %v4544_v38 = vmul.f32 %v9998_v36, %v9994_v20  ;;  %v9663_v20 = vld [vmem:[%s12191_s4 + $0x3a0] sm:$0xff]   ;;  %v9669_v36 = vld [vmem:[%s12191_s4 + $0x388] sm:$0xff]  }
0x12de   : > { %v4545_v40 = vpack.c.bf16 %v4544_v38, %v4543_v37  ;;  %v9670_v37 = vld [vmem:[%s12191_s4 + $0x3c0] sm:$0xff]  }
0x12df   : > { %v9671_v38 = vld [vmem:[%s12191_s4 + $0x380] sm:$0xff]  }
0x12e0   : > { %9280 = vmatmul.mubr.msk.bf16.vlgmr.msra.gmra.mxu0 %vm1201_vm2, %v4545_v40 }
0x12e1   : > { %9072 = vmatpush3.bf16.msra.mxu0 %v9625_v39  ;;  %4774 = vmatprep.mubr.bf16.mxu0 %v10302_v31 }
0x12e2   : > { %9073 = vmatprep.subr.bf16.mxu0 %v9626_v41 }
0x12e5   : > { %9074 = vmatpush3.bf16.msra.mxu0 %v9627_v42 }
0x12e6   : > { %9075 = vmatprep.subr.bf16.mxu0 %v9628_v43 }
0x12e9   : > { %9076 = vmatpush3.bf16.msra.mxu0 %v9629_v44 }
0x12ea   : > { %9077 = vmatprep.subr.bf16.mxu0 %v9630_v45 }
0x12ed   : > { %9078 = vmatpush3.bf16.msra.mxu0 %v9631_v46 }
0x12ee   : > { %9079 = vmatprep.subr.bf16.mxu0 %v9632_v47  ;;  %v8190_v47 = vld [vmem:[%s12193_s6 + $0x6] ss:$0 sm:$0xff] }
0x12f1   : > { %9080 = vmatpush3.bf16.msra.mxu0 %v9633_v48 }
0x12f2   : > { %9081 = vmatprep.subr.bf16.mxu0 %v9634_v49 }
0x12f5   : > { %9082 = vmatpush3.bf16.msra.mxu0 %v9635_v50 }
0x12f6   : > { %9083 = vmatprep.subr.bf16.mxu0 %v9636_v51 }
0x12f9   : > { %9084 = vmatpush3.bf16.msra.mxu0 %v9637_v52 }
0x12fa   : > { %9085 = vmatprep.subr.bf16.mxu0 %v9638_v53 }
0x12fd   : > { %9086 = vmatpush3.bf16.msra.mxu0 %v9639_v54 }
0x12fe   : > { %9115 = vmatprep.subr.bf16.mxu0 %v9640_v55 }
0x1300   : > { %4775 = vmatmul.mubr.bf16.vlgmr.msra.gmra.mxu0 %v10300_v30 }
0x1301   : > { %9116 = vmatpush3.bf16.msra.mxu0 %v9641_v56  ;;  %5130 = vmatprep.mubr.bf16.mxu0 %v10302_v31 }
0x1302   : > { %9117 = vmatprep.subr.bf16.mxu0 %v9642_v57  ;;  %v8290_v57 = vld [vmem:[%s12195_s8 + $0x6] ss:$0 sm:$0xff] }
0x1305   : > { %9118 = vmatpush3.bf16.msra.mxu0 %v9643_v59 }
0x1306   : > { %9119 = vmatprep.subr.bf16.mxu0 %v9644_v60 }
0x1309   : > { %9120 = vmatpush3.bf16.msra.mxu0 %v9645_v61 }
0x130a   : > { %9121 = vmatprep.subr.bf16.mxu0 %v9646_v62 }
0x130d   : > { %9122 = vmatpush3.bf16.msra.mxu0 %v9647_v0 }
0x130e   : > { %9123 = vmatprep.subr.bf16.mxu0 %v9648_v10 }
0x1311   : > { %9124 = vmatpush3.bf16.msra.mxu0 %v9649_v12 }
0x1312   : > { %9125 = vmatprep.subr.bf16.mxu0 %v9650_v13 }
0x1315   : > { %9126 = vmatpush3.bf16.msra.mxu0 %v9651_v16 }
0x1316   : > { %9127 = vmatprep.subr.bf16.mxu0 %v9652_v18  ;;  %v8394_v18 = vld [vmem:[%s12194_s7 + $0x7] ss:$0 sm:$0xff] }
0x1319   : > { %9128 = vmatpush3.bf16.msra.mxu0 %v9653_v22 }
0x131a   : > { %9129 = vmatprep.subr.bf16.mxu0 %v9654_v23 }
0x131d   : > { %9130 = vmatpush3.bf16.msra.mxu0 %v9655_v24 }
0x131e   : > { %9163 = vmatprep.subr.bf16.mxu0 %v9656_v25 }
0x1320   : > { %5131 = vmatmul.mubr.bf16.vlgmr.msra.gmra.mxu0 %v10300_v30 }
0x1321   : > { %9164 = vmatpush3.bf16.msra.mxu0 %v9657_v26  ;;  %5617 = vmatprep.mubr.bf16.mxu0 %v10302_v31 }
0x1322   : > { %9165 = vmatprep.subr.bf16.mxu0 %v9658_v27 }
0x1325   : > { %9166 = vmatpush3.bf16.msra.mxu0 %v9659_v28 }
0x1326   : > { %9167 = vmatprep.subr.bf16.mxu0 %v9660_v29 }
0x1329   : > { %9168 = vmatpush3.bf16.msra.mxu0 %v9661_v14 }
0x132a   : > { %9169 = vmatprep.subr.bf16.mxu0 %v9662_v15 }
0x132d   : > { %9170 = vmatpush3.bf16.msra.mxu0 %v9663_v20 }
0x132e   : > { %9171 = vmatprep.subr.bf16.mxu0 %v9664_v21 }
0x1331   : > { %9172 = vmatpush3.bf16.msra.mxu0 %v9665_v32 }
0x1332   : > { %9173 = vmatprep.subr.bf16.mxu0 %v9666_v33 }
0x1335   : > { %9174 = vmatpush3.bf16.msra.mxu0 %v9667_v34 }
0x1336   : > { %9175 = vmatprep.subr.bf16.mxu0 %v9668_v35 }
0x1339   : > { %9176 = vmatpush3.bf16.msra.mxu0 %v9669_v36 }
0x133a   : > { %9177 = vmatprep.subr.bf16.mxu0 %v9670_v37 }
0x133d   : > { %9178 = vmatpush3.bf16.msra.mxu0 %v9671_v38 }
0x133e   : > { %9295 = vmatprep.subr.bf16.mxu0 %v10027_v58 }
0x1340   : > { %5618 = vmatmul.mubr.bf16.vlgmr.msra.gmra.mxu0 %v10300_v30 }
0x1341   : > { %9297 = vmatprep.mubr.msk.bf16.mxu0 %vm10028_vm0, %v10027_v58 }
0x13a0   : > { %v11455_v39 = vpop.f32.mrf.mxu0 }
0x13a2   : > { %v9281_v40 = vpop.f32.mrf.mxu0 }
0x13a4   : > { %v11457_v41 = vpop.f32.mrf.mxu0 }
0x13a6   : > { %v9282_v42 = vpop.f32.mrf.mxu0 }
0x13c0   : > { %v9087_v43 = vpop.f32.mrf.mxu0 }
0x13c2   : > { %v9088_v44 = vpop.f32.mrf.mxu0 }
0x13c3   : > { %v9089_v46 = vadd.f32 %v9088_v44, %v9087_v43  ;;  %v9672_v44 = vld [vmem:[%s12190_s3 + $0x3f8] sm:$0xff]  }
0x13c4   : > { %v9090_v45 = vpop.f32.mrf.mxu0 }
0x13c5   : > { %v4777_v50 = vadd.f32 %v9089_v46, %v8190_v47 }
0x13c6   : > { %v9091_v48 = vpop.f32.mrf.mxu0 }
0x13c7   : > { %v9092_v49 = vadd.f32 %v9091_v48, %v9090_v45 }
0x13c9   : > { %v4780_v51 = vadd.f32 %v9092_v49, %v8190_v47 }
0x13cb   : > { %v5139_v52 = vpack.c.bf16 %v4780_v51, %v4777_v50  ;;  %v9673_v51 = vld [vmem:[%s12190_s3 + $0x3b8] sm:$0xff]  }
0x13cd   : > { %9286 = vmatmul.mubr.msk.bf16.vlgmr.msra.gmra.mxu1 %vm1153_vm1, %v5139_v52 }
0x13ce   : > { %9291 = vmatprep.mubr.msk.bf16.mxu1 %vm10028_vm0, %v10027_v58 }
0x13e0   : > { %v9131_v53 = vpop.f32.mrf.mxu0 }
0x13e2   : > { %v9132_v54 = vpop.f32.mrf.mxu0 }
0x13e3   : > { %v9133_v56 = vadd.f32 %v9132_v54, %v9131_v53  ;;  %v9674_v53 = vld [vmem:[%s12190_s3 + $0x3f0] sm:$0xff]  }
0x13e4   : > { %v9134_v55 = vpop.f32.mrf.mxu0  ;;  %v9675_v54 = vld [vmem:[%s12190_s3 + $0x3b0] sm:$0xff]  }
0x13e5   : > { %v5133_v61 = vadd.f32 %v9133_v56, %v8290_v57  ;;  %v9677_v56 = vld [vmem:[%s12190_s3 + $0x3a8] sm:$0xff]  }
0x13e6   : > { %v9135_v59 = vpop.f32.mrf.mxu0 }
0x13e7   : > { %v9136_v60 = vadd.f32 %v9135_v59, %v9134_v55  ;;  %v9676_v55 = vld [vmem:[%s12190_s3 + $0x3e8] sm:$0xff]   ;;  %v9679_v59 = vld [vmem:[%s12190_s3 + $0x3a0] sm:$0xff]  }
0x13e9   : > { %v5136_v62 = vadd.f32 %v9136_v60, %v8290_v57  ;;  %v9678_v57 = vld [vmem:[%s12190_s3 + $0x3e0] sm:$0xff]   ;;  %v9680_v60 = vld [vmem:[%s12190_s3 + $0x3d8] sm:$0xff]  }
0x13eb   : > { %v5211_v0 = vpack.c.bf16 %v5136_v62, %v5133_v61  ;;  %v9681_v61 = vld [vmem:[%s12190_s3 + $0x398] sm:$0xff]   ;;  %v9682_v62 = vld [vmem:[%s12190_s3 + $0x3d0] sm:$0xff]  }
0x13ed   : > { %9290 = vmatpush3.bf16.msra.mxu1 %v5211_v0  ;;  %v9683_v0 = vld [vmem:[%s12190_s3 + $0x390] sm:$0xff]  }
0x13ee   : > { %9141 = vmatprep.subr.bf16.mxu1 %v9672_v44  ;;  %v8344_v44 = vld [vmem:[%s12193_s6 + $0x7] ss:$0 sm:$0xff] }
0x1400   : > { %v9179_v10 = vpop.f32.mrf.mxu0 }
0x1402   : > { %v9180_v12 = vpop.f32.mrf.mxu0 }
0x1403   : > { %v9181_v16 = vadd.f32 %v9180_v12, %v9179_v10  ;;  %v9684_v10 = vld [vmem:[%s12190_s3 + $0x3c8] sm:$0xff]  }
0x1404   : > { %v9182_v13 = vpop.f32.mrf.mxu0  ;;  %v9685_v12 = vld [vmem:[%s12190_s3 + $0x388] sm:$0xff]  }
0x1405   : > { %v5620_v24 = vadd.f32 %v9181_v16, %v8394_v18  ;;  %v9687_v16 = vld [vmem:[%s12190_s3 + $0x380] sm:$0xff]  }
0x1406   : > { %v9183_v22 = vpop.f32.mrf.mxu0 }
0x1407   : > { %v9184_v23 = vadd.f32 %v9183_v22, %v9182_v13  ;;  %v9686_v13 = vld [vmem:[%s12190_s3 + $0x3c0] sm:$0xff]   ;;  %v9689_v22 = vld [vmem:[%s12192_s5 + $0x3b8] sm:$0xff]  }
0x1409   : > { %v5623_v25 = vadd.f32 %v9184_v23, %v8394_v18  ;;  %v9688_v18 = vld [vmem:[%s12192_s5 + $0x3f8] sm:$0xff]   ;;  %v9690_v23 = vld [vmem:[%s12192_s5 + $0x3f0] sm:$0xff]  }
0x140b   : > { %v5805_v26 = vpack.c.bf16 %v5623_v25, %v5620_v24  ;;  %v9691_v24 = vld [vmem:[%s12192_s5 + $0x3b0] sm:$0xff]   ;;  %v9692_v25 = vld [vmem:[%s12192_s5 + $0x3e8] sm:$0xff]  }
0x140d   : > { %v5810_v27 = vsel %vm1153_vm1, %v5805_v26, 0  ;;  %v9693_v26 = vld [vmem:[%s12192_s5 + $0x3a8] sm:$0xff]  }
0x140e   : > { %9296 = vmatpush3.bf16.xpose.msra.mxu0 %v5810_v27  ;;  %v9694_v27 = vld [vmem:[%s12192_s5 + $0x3e0] sm:$0xff]  }
0x140f   : > { %9301 = vmatprep.subr.bf16.mxu0 %v10027_v58 }
0x148d   : > { %v5181_v28 = vpop.f32.mrf.mxu1 }
0x148e   : > { %v5188_v29 = vsel %vm1201_vm2, %v5181_v28, -inf }
0x148f   : > { %5189 = vmax.xlane.f32.xlu0 %v5188_v29  ;;  %v9287_v14 = vpop.f32.mrf.mxu1  ;;  %v9697_v29 = vld [vmem:[%s12192_s5 + $0x398] sm:$0xff]  }
0x1490   : > { %v9698_v14 = vld [vmem:[%s12192_s5 + $0x3d0] sm:$0xff]  }
0x1491   : > { %v5184_v15 = vpop.f32.mrf.mxu1 }
0x1492   : > { %v5191_v20 = vsel %vm1201_vm2, %v5184_v15, -inf }
0x1493   : > { %5192 = vmax.xlane.f32.xlu1 %v5191_v20  ;;  %v9288_v21 = vpop.f32.mrf.mxu1  ;;  %v9700_v20 = vld [vmem:[%s12192_s5 + $0x3c8] sm:$0xff]  }
0x1494   : > { %v9701_v21 = vld [vmem:[%s12192_s5 + $0x388] sm:$0xff]  }
0x1518   : > { %v5190_v32 = vpop.xlane.xlu0 %5189 }
0x1519   : > { %v5194_v33 = vsub.f32 %v5181_v28, %v5190_v32  ;;  %v9696_v28 = vld [vmem:[%s12192_s5 + $0x3d8] sm:$0xff]   ;;  %v9702_v32 = vld [vmem:[%s12192_s5 + $0x3c0] sm:$0xff]  }
0x151b   : > { %v5196_v34 = vmul.f32 1.442695, %v5194_v33  ;;  %v9703_v33 = vld [vmem:[%s12192_s5 + $0x380] sm:$0xff]  }
0x151c   : > { %v5193_v35 = vpop.xlane.xlu1 %5192 }
0x151d   : > { %9999 = vpow2.f32 %v5196_v34  ;;  %v5195_v36 = vsub.f32 %v5184_v15, %v5193_v35  ;;  %v9699_v15 = vld [vmem:[%s12192_s5 + $0x390] sm:$0xff]  }
0x151f   : > { %v5198_v37 = vmul.f32 1.442695, %v5195_v36 }
0x1521   : > { %10001 = vpow2.f32 %v5198_v37 }
0x152a   : > { %v10000_v38 = vpop.eup %9999 }
0x152b   : > { %v5200_v40 = vsel %vm1201_vm2, %v10000_v38, 0.0 }
0x152c   : > { %5201 = vadd.xlane.f32.xlu0 %v5200_v40 }
0x152e   : > { %v10002_v42 = vpop.eup %10001 }
0x152f   : > { %v5203_v43 = vsel %vm1201_vm2, %v10002_v42, 0.0 }
0x1530   : > { %5204 = vadd.xlane.f32.xlu1 %v5203_v43 }
0x15b5   : > { %v5202_v45 = vpop.xlane.xlu0 %5201 }
0x15b6   : > { %10003 = vrcp.f32 %v5202_v45 }
0x15b9   : > { %v5205_v46 = vpop.xlane.xlu1 %5204 }
0x15ba   : > { %10005 = vrcp.f32 %v5205_v46 }
0x15c3   : > { %v10004_v47 = vpop.eup %10003 }
0x15c4   : > { %v5208_v49 = vmul.f32 %v10004_v47, %v10000_v38 }
0x15c7   : > { %v10006_v48 = vpop.eup %10005 }
0x15c8   : > { %v5209_v50 = vmul.f32 %v10006_v48, %v10002_v42 }
0x15ca   : > { %v5210_v52 = vpack.c.bf16 %v5209_v50, %v5208_v49 }
0x15cc   : > { %9292 = vmatmul.mubr.msk.bf16.vlgmr.msra.gmra.mxu1 %vm1201_vm2, %v5210_v52 }
0x15cd   : > { %9142 = vmatpush3.bf16.msra.mxu1 %v9673_v51  ;;  %5439 = vmatprep.mubr.bf16.mxu1 %v10302_v31 }
0x15ce   : > { %9143 = vmatprep.subr.bf16.mxu1 %v9674_v53  ;;  %v8444_v53 = vld [vmem:[%s12195_s8 + $0x7] ss:$0 sm:$0xff] }
0x15d1   : > { %9144 = vmatpush3.bf16.msra.mxu1 %v9675_v54 }
0x15d2   : > { %9145 = vmatprep.subr.bf16.mxu1 %v9676_v55 }
0x15d5   : > { %9146 = vmatpush3.bf16.msra.mxu1 %v9677_v56 }
0x15d6   : > { %9147 = vmatprep.subr.bf16.mxu1 %v9678_v57 }
0x15d9   : > { %9148 = vmatpush3.bf16.msra.mxu1 %v9679_v59 }
0x15da   : > { %9149 = vmatprep.subr.bf16.mxu1 %v9680_v60 }
0x15dd   : > { %9150 = vmatpush3.bf16.msra.mxu1 %v9681_v61 }
0x15de   : > { %9151 = vmatprep.subr.bf16.mxu1 %v9682_v62 }
0x15e1   : > { %9152 = vmatpush3.bf16.msra.mxu1 %v9683_v0 }
0x15e2   : > { %9153 = vmatprep.subr.bf16.mxu1 %v9684_v10 }
0x15e5   : > { %9154 = vmatpush3.bf16.msra.mxu1 %v9685_v12 }
0x15e6   : > { %9155 = vmatprep.subr.bf16.mxu1 %v9686_v13 }
0x15e9   : > { %9156 = vmatpush3.bf16.msra.mxu1 %v9687_v16 }
0x15ea   : > { %9185 = vmatprep.subr.bf16.mxu1 %v9688_v18 }
0x15ec   : > { %5440 = vmatmul.mubr.bf16.vlgmr.msra.gmra.mxu1 %v10300_v30 }
0x15ed   : > { %9186 = vmatpush3.bf16.msra.mxu1 %v9689_v22  ;;  %5795 = vmatprep.mubr.bf16.mxu1 %v10302_v31  ;;  %v9695_v31 = vld [vmem:[%s12192_s5 + $0x3a0] sm:$0xff]  }
0x15ee   : > { %9187 = vmatprep.subr.bf16.mxu1 %v9690_v23 }
0x15f1   : > { %9188 = vmatpush3.bf16.msra.mxu1 %v9691_v24 }
0x15f2   : > { %9189 = vmatprep.subr.bf16.mxu1 %v9692_v25 }
0x15f5   : > { %9190 = vmatpush3.bf16.msra.mxu1 %v9693_v26 }
0x15f6   : > { %9191 = vmatprep.subr.bf16.mxu1 %v9694_v27 }
0x15f9   : > { %9192 = vmatpush3.bf16.msra.mxu1 %v9695_v31  ;;  %v8636_v31 = vpack.c.bf16 %v10755_v9, %v10755_v9  ;;  %v8639_v9 = vpack.c.bf16 %v11105_v17, %v11105_v17 }
0x15fa   : > { %9193 = vmatprep.subr.bf16.mxu1 %v9696_v28  ;;  %v8635_v28 = vpack.c.bf16 %v10753_v7, %v10753_v7  ;;  %v8638_v7 = vpack.c.bf16 %v10931_v11, %v10931_v11 }
0x15fd   : > { %9194 = vmatpush3.bf16.msra.mxu1 %v9697_v29  ;;  %v8643_v29 = vpack.c.bf16 %v11455_v39, %v11455_v39  ;;  %v8640_v39 = vpack.c.bf16 %v11107_v19, %v11107_v19 }
0x15fe   : > { %9195 = vmatprep.subr.bf16.mxu1 %v9698_v14  ;;  %v8637_v14 = vpack.c.bf16 %v10929_v8, %v10929_v8 }
0x1601   : > { %9196 = vmatpush3.bf16.msra.mxu1 %v9699_v15  ;;  %v8644_v15 = vpack.c.bf16 %v11457_v41, %v11457_v41 }
0x1602   : > { %9197 = vmatprep.subr.bf16.mxu1 %v9700_v20 }
0x1605   : > { %9198 = vmatpush3.bf16.msra.mxu1 %v9701_v21 }
0x1606   : > { %9199 = vmatprep.subr.bf16.mxu1 %v9702_v32 }
0x1609   : > { %9200 = vmatpush3.bf16.msra.mxu1 %v9703_v33 }
0x160c   : > { %5796 = vmatmul.mubr.bf16.vlgmr.msra.gmra.mxu1 %v10300_v30 }
0x168c   : > { %v5249_v34 = vpop.f32.mrf.mxu1 }
0x168d   : > { %v8645_v20 = vpack.c.bf16 %v5249_v34, %v5249_v34 }
0x168e   : > { %v9293_v35 = vpop.f32.mrf.mxu1 }
0x1690   : > { %v11578_v36 = vpop.f32.mrf.mxu1 }
0x1691   : > { %v8646_v8 = vpack.c.bf16 %v11578_v36, %v11578_v36 }
0x1692   : > { %v9294_v37 = vpop.f32.mrf.mxu1 }
0x16ac   : > { %v9157_v38 = vpop.f32.mrf.mxu1 }
0x16ae   : > { %v9158_v40 = vpop.f32.mrf.mxu1 }
0x16af   : > { %v9159_v43 = vadd.f32 %v9158_v40, %v9157_v38 }
0x16b0   : > { %v9160_v42 = vpop.f32.mrf.mxu1 }
0x16b1   : > { %v5442_v47 = vadd.f32 %v9159_v43, %v8344_v44 }
0x16b2   : > { %v9161_v45 = vpop.f32.mrf.mxu1 }
0x16b3   : > { %v9162_v46 = vadd.f32 %v9161_v45, %v9160_v42 }
0x16b5   : > { %v5445_v48 = vadd.f32 %v9162_v46, %v8344_v44  ;;  %v9704_v46 = vld [vmem:[%s12196_s9 + $0x70] ss:$8 sps:$4 sm:$0xff]  }
0x16b7   : > { %v5804_v49 = vpack.c.bf16 %v5445_v48, %v5442_v47  ;;  %v9706_v47 = vld [vmem:[%s12196_s9 + $0x74] ss:$8 sps:$4 sm:$0xff]   ;;  %v9709_v48 = vld [vmem:[%s12196_s9 + $0x64] ss:$8 sps:$4 sm:$0xff]  }
0x16b9   : > { %9298 = vmatmul.mubr.msk.bf16.vlgmr.msra.gmra.mxu0 %vm1153_vm1, %v5804_v49  ;;  %v9707_v49 = vld [vmem:[%s12196_s9 + $0x60] ss:$8 sps:$4 sm:$0xff]  }
0x16ba   : > { %9303 = vmatprep.mubr.msk.bf16.mxu0 %vm10028_vm0, %v10027_v58 }
0x16cc   : > { %v9201_v30 = vpop.f32.mrf.mxu1 }
0x16ce   : > { %v9202_v50 = vpop.f32.mrf.mxu1 }
0x16cf   : > { %v9203_v52 = vadd.f32 %v9202_v50, %v9201_v30  ;;  %v9712_v30 = vld [vmem:[%s12196_s9 + $0x54] ss:$8 sps:$4 sm:$0xff]   ;;  %v9710_v50 = vld [vmem:[%s12196_s9 + $0x50] ss:$8 sps:$4 sm:$0xff]  }
0x16d0   : > { %v9204_v51 = vpop.f32.mrf.mxu1 }
0x16d1   : > { %v5798_v56 = vadd.f32 %v9203_v52, %v8444_v53  ;;  %v9713_v52 = vld [vmem:[%s12196_s9 + $0x40] ss:$8 sps:$4 sm:$0xff]  }
0x16d2   : > { %v9205_v54 = vpop.f32.mrf.mxu1 }
0x16d3   : > { %v9206_v55 = vadd.f32 %v9205_v54, %v9204_v51  ;;  %v9715_v51 = vld [vmem:[%s12196_s9 + $0x44] ss:$8 sps:$4 sm:$0xff]   ;;  %v9716_v54 = vld [vmem:[%s12196_s9 + $0x30] ss:$8 sps:$4 sm:$0xff]  }
0x16d5   : > { %v5801_v57 = vadd.f32 %v9206_v55, %v8444_v53  ;;  %v9718_v53 = vld [vmem:[%s12196_s9 + $0x34] ss:$8 sps:$4 sm:$0xff]   ;;  %v9721_v55 = vld [vmem:[%s12196_s9 + $0x24] ss:$8 sps:$4 sm:$0xff]  }
0x16d7   : > { %v5876_v59 = vpack.c.bf16 %v5801_v57, %v5798_v56  ;;  %v9719_v56 = vld [vmem:[%s12196_s9 + $0x20] ss:$8 sps:$4 sm:$0xff]   ;;  %v9724_v57 = vld [vmem:[%s12196_s9 + $0x14] ss:$8 sps:$4 sm:$0xff]  }
0x16d9   : > { %9302 = vmatpush3.bf16.msra.mxu0 %v5876_v59  ;;  %v9722_v59 = vld [vmem:[%s12196_s9 + $0x10] ss:$8 sps:$4 sm:$0xff]  }
0x16da   : > { %6151 = vmatprep.subr.bf16.mxu0 %v9706_v47  ;;  %v9757_v47 = vld [vmem:[%s12200_s13 + $0xe4] ss:$16 sps:$4 sm:$0xff]  }
0x16db   : > { %6670 = vmatprep.subr.bf16.mxu1 %v9757_v47  ;;  %v9821_v47 = vld [vmem:[%s12200_s13 + $0x180] ss:$16 sps:$4 sm:$0xff]  }
0x1779   : > { %v5846_v60 = vpop.f32.mrf.mxu0 }
0x177a   : > { %v5853_v61 = vsel %vm1201_vm2, %v5846_v60, -inf }
0x177b   : > { %5854 = vmax.xlane.f32.xlu0 %v5853_v61  ;;  %v9299_v62 = vpop.f32.mrf.mxu0  ;;  %v9725_v61 = vld [vmem:[%s12196_s9] ss:$8 sps:$4 sm:$0xff]  }
0x177c   : > { %v9730_v62 = vld [vmem:[%s12196_s9 + $0xf4] ss:$8 sps:$4 sm:$0xff]  }
0x177d   : > { %v5849_v58 = vpop.f32.mrf.mxu0 }
0x177e   : > { %v5856_v0 = vsel %vm1201_vm2, %v5849_v58, -inf }
0x177f   : > { %5857 = vmax.xlane.f32.xlu1 %v5856_v0  ;;  %v9300_v10 = vpop.f32.mrf.mxu0  ;;  %v9733_v0 = vld [vmem:[%s12196_s9 + $0xe4] ss:$8 sps:$4 sm:$0xff]  }
0x1780   : > { %v9731_v10 = vld [vmem:[%s12196_s9 + $0xe0] ss:$8 sps:$4 sm:$0xff]  }
0x1804   : > { %v5855_v12 = vpop.xlane.xlu0 %5854 }
0x1805   : > { %v5859_v13 = vsub.f32 %v5846_v60, %v5855_v12  ;;  %v9727_v60 = vld [vmem:[%s12196_s9 + $0x4] ss:$8 sps:$4 sm:$0xff]   ;;  %v9736_v12 = vld [vmem:[%s12196_s9 + $0xd4] ss:$8 sps:$4 sm:$0xff]  }
0x1807   : > { %v5861_v16 = vmul.f32 1.442695, %v5859_v13  ;;  %v9734_v13 = vld [vmem:[%s12196_s9 + $0xd0] ss:$8 sps:$4 sm:$0xff]  }
0x1808   : > { %v5858_v18 = vpop.xlane.xlu1 %5857 }
0x1809   : > { %10007 = vpow2.f32 %v5861_v16  ;;  %v5860_v22 = vsub.f32 %v5849_v58, %v5858_v18  ;;  %v9728_v58 = vld [vmem:[%s12196_s9 + $0xf0] ss:$8 sps:$4 sm:$0xff]   ;;  %v9739_v16 = vld [vmem:[%s12196_s9 + $0xc4] ss:$8 sps:$4 sm:$0xff]   ;;  %v9737_v18 = vld [vmem:[%s12196_s9 + $0xc0] ss:$8 sps:$4 sm:$0xff]  }
0x180b   : > { %v5863_v23 = vmul.f32 1.442695, %v5860_v22  ;;  %v9742_v22 = vld [vmem:[%s12196_s9 + $0xb4] ss:$8 sps:$4 sm:$0xff]  }
0x180d   : > { %10009 = vpow2.f32 %v5863_v23  ;;  %v9740_v23 = vld [vmem:[%s12196_s9 + $0xb0] ss:$8 sps:$4 sm:$0xff]  }
0x1816   : > { %v10008_v24 = vpop.eup %10007 }
0x1817   : > { %v5865_v25 = vsel %vm1201_vm2, %v10008_v24, 0.0 }
0x1818   : > { %5866 = vadd.xlane.f32.xlu0 %v5865_v25  ;;  %v9745_v25 = vld [vmem:[%s12196_s9 + $0xa4] ss:$8 sps:$4 sm:$0xff]  }
0x181a   : > { %v10010_v26 = vpop.eup %10009 }
0x181b   : > { %v5868_v27 = vsel %vm1201_vm2, %v10010_v26, 0.0 }
0x181c   : > { %5869 = vadd.xlane.f32.xlu1 %v5868_v27  ;;  %v9748_v27 = vld [vmem:[%s12196_s9 + $0x94] ss:$8 sps:$4 sm:$0xff]  }
0x182d   : > { %1940 = vrot.lane.b32.xlu1 %v8636_v31, %s10029_s21  ;;  %v9751_v31 = vld [vmem:[%s12196_s9 + $0x84] ss:$8 sps:$4 sm:$0xff]  }
0x182e   : > { %1938 = vrot.lane.b32.xlu0 %v8635_v28, %s10029_s21  ;;  %v9749_v28 = vld [vmem:[%s12196_s9 + $0x80] ss:$8 sps:$4 sm:$0xff]  }
0x1831   : > { %4597 = vrot.lane.b32.xlu1 %v8643_v29, %s10029_s21 }
0x1832   : > { %2604 = vrot.lane.b32.xlu0 %v8637_v14, %s10030_s22 }
0x1835   : > { %4599 = vrot.lane.b32.xlu1 %v8644_v15, %s10029_s21 }
0x1836   : > { %5262 = vrot.lane.b32.xlu0 %v8645_v20, %s10030_s22 }
0x1839   : > { %2606 = vrot.lane.b32.xlu1 %v8638_v7, %s10030_s22 }
0x183a   : > { %3270 = vrot.lane.b32.xlu0 %v8639_v9, %s10031_s23 }
0x183d   : > { %5264 = vrot.lane.b32.xlu1 %v8646_v8, %s10030_s22 }
0x1841   : > { %3272 = vrot.lane.b32.xlu1 %v8640_v39, %s10031_s23 }
0x18a1   : > { %v5867_v41 = vpop.xlane.xlu0 %5866 }
0x18a2   : > { %10011 = vrcp.f32 %v5867_v41 }
0x18a5   : > { %v1939_v11 = vpop.permute.xlu0 %1938  ;;  %v5870_v21 = vpop.xlane.xlu1 %5869 }
0x18a6   : > { %1945 = vst.msk [vmem:[#allocation2] sm:$0xf] %vm1944_vm4, %v1939_v11  ;;  %10013 = vrcp.f32 %v5870_v21  ;;  %v5969_v21 = vld [vmem:[%s12197_s10] sm:$0x3] }
0x18a9   : > { %v2605_v17 = vpop.permute.xlu0 %2604  ;;  %v1941_v32 = vpop.permute.xlu1 %1940 }
0x18aa   : > { %2611 = vst.msk [vmem:[#allocation2] sm:$0xf] %vm2610_vm5, %v2605_v17  ;;  %v5974_v17 = vrot.slane %v5969_v21, %v10278_v1 }
0x18ab   : > { %1946 = vst.msk [vmem:[#allocation2 + $0x8] sm:$0xf] %vm1944_vm4, %v1941_v32  ;;  %v5978_v32 = vrot.slane %v5969_v21, %v10281_v6 }
0x18ad   : > { %v5263_v33 = vpop.permute.xlu0 %5262  ;;  %v4598_v34 = vpop.permute.xlu1 %4597 }
0x18ae   : > { %4603 = vst.msk [vmem:[#allocation2 + $0x4] sm:$0xf] %vm1944_vm4, %v4598_v34 }
0x18af   : > { %5268 = vst.msk [vmem:[#allocation2 + $0x4] sm:$0xf] %vm2610_vm5, %v5263_v33  ;;  %v10012_v19 = vpop.eup %10011 }
0x18b0   : > { %v5873_v38 = vmul.f32 %v10012_v19, %v10008_v24  ;;  %v9743_v24 = vld [vmem:[%s12196_s9 + $0xa0] ss:$8 sps:$4 sm:$0xff]  }
0x18b1   : > { %v3271_v35 = vpop.permute.xlu0 %3270  ;;  %v4600_v36 = vpop.permute.xlu1 %4599 }
0x18b2   : > { %3277 = vst.msk [vmem:[#allocation2] sm:$0xf] %vm3276_vm6, %v3271_v35 }
0x18b3   : > { %4604 = vst.msk [vmem:[#allocation2 + $0xc] sm:$0xf] %vm1944_vm4, %v4600_v36  ;;  %v10014_v37 = vpop.eup %10013 }
0x18b4   : > { %v5874_v40 = vmul.f32 %v10014_v37, %v10010_v26  ;;  %v9746_v26 = vld [vmem:[%s12196_s9 + $0x90] ss:$8 sps:$4 sm:$0xff]  }
0x18b5   : > { %v2607_v42 = vpop.permute.xlu1 %2606 }
0x18b6   : > { %2612 = vst.msk [vmem:[#allocation2 + $0x8] sm:$0xf] %vm2610_vm5, %v2607_v42  ;;  %v5875_v43 = vpack.c.bf16 %v5874_v40, %v5873_v38 }
0x18b8   : > { %9304 = vmatmul.mubr.msk.bf16.vlgmr.msra.gmra.mxu0 %vm1201_vm2, %v5875_v43 }
0x18b9   : > { %v5265_v44 = vpop.permute.xlu1 %5264  ;;  %6152 = vmatpush1.bf16.msra.mxu0 %v9704_v46 }
0x18ba   : > { %5269 = vst.msk [vmem:[#allocation2 + $0xc] sm:$0xf] %vm2610_vm5, %v5265_v44  ;;  %6153 = vmatprep.subr.bf16.mxu0 %v9709_v48  ;;  %v9763_v48 = vld [vmem:[%s12200_s13 + $0xc4] ss:$16 sps:$4 sm:$0xff]  }
0x18bd   : > { %v3273_v45 = vpop.permute.xlu1 %3272  ;;  %6154 = vmatpush1.bf16.msra.mxu0 %v9707_v49  ;;  %v9766_v49 = vld [vmem:[%s12200_s13 + $0xcc] ss:$16 sps:$4 sm:$0xff]  }
0x18be   : > { %3278 = vst.msk [vmem:[#allocation2 + $0x8] sm:$0xf] %vm3276_vm6, %v3273_v45  ;;  %6155 = vmatprep.subr.bf16.mxu0 %v9712_v30  ;;  %v9761_v30 = vld [vmem:[%s12200_s13 + $0xc0] ss:$16 sps:$4 sm:$0xff]  }
0x18c1   : > { %6156 = vmatpush1.bf16.msra.mxu0 %v9710_v50  ;;  %v9764_v50 = vld [vmem:[%s12200_s13 + $0xc8] ss:$16 sps:$4 sm:$0xff]  }
0x18c2   : > { %6157 = vmatprep.subr.bf16.mxu0 %v9715_v51  ;;  %v9769_v51 = vld [vmem:[%s12200_s13 + $0xa4] ss:$16 sps:$4 sm:$0xff]  }
0x18c5   : > { %6158 = vmatpush1.bf16.msra.mxu0 %v9713_v52  ;;  %v9752_v41 = vld [vmem:[#allocation2] ss:$8 sps:$4 sm:$0xff]   ;;  %v9772_v52 = vld [vmem:[%s12200_s13 + $0xac] ss:$16 sps:$4 sm:$0xff]  }
0x18c6   : > { %6159 = vmatprep.subr.bf16.mxu0 %v9718_v53  ;;  %v9767_v53 = vld [vmem:[%s12200_s13 + $0xa0] ss:$16 sps:$4 sm:$0xff]  }
0x18c9   : > { %6160 = vmatpush1.bf16.msra.mxu0 %v9716_v54  ;;  %v9770_v54 = vld [vmem:[%s12200_s13 + $0xa8] ss:$16 sps:$4 sm:$0xff]  }
0x18ca   : > { %6161 = vmatprep.subr.bf16.mxu0 %v9721_v55  ;;  %v9775_v55 = vld [vmem:[%s12200_s13 + $0x84] ss:$16 sps:$4 sm:$0xff]  }
0x18cd   : > { %6162 = vmatpush1.bf16.msra.mxu0 %v9719_v56  ;;  %v9778_v56 = vld [vmem:[%s12200_s13 + $0x8c] ss:$16 sps:$4 sm:$0xff]  }
0x18ce   : > { %6163 = vmatprep.subr.bf16.mxu0 %v9724_v57  ;;  %v9773_v57 = vld [vmem:[%s12200_s13 + $0x80] ss:$16 sps:$4 sm:$0xff]  }
0x18d1   : > { %6164 = vmatpush1.bf16.msra.mxu0 %v9722_v59  ;;  %v9776_v59 = vld [vmem:[%s12200_s13 + $0x88] ss:$16 sps:$4 sm:$0xff]  }
0x18d2   : > { %6165 = vmatprep.subr.bf16.mxu0 %v9727_v60  ;;  %v9781_v60 = vld [vmem:[%s12200_s13 + $0x64] ss:$16 sps:$4 sm:$0xff]  }
0x18d5   : > { %6166 = vmatpush1.bf16.msra.mxu0 %v9725_v61  ;;  %v9784_v61 = vld [vmem:[%s12200_s13 + $0x6c] ss:$16 sps:$4 sm:$0xff]  }
0x18d6   : > { %6167 = vmatprep.subr.bf16.mxu0 %v9730_v62  ;;  %v9779_v62 = vld [vmem:[%s12200_s13 + $0x60] ss:$16 sps:$4 sm:$0xff]  }
0x18d9   : > { %6168 = vmatpush2.bf16.msra.mxu0 %v9728_v58  ;;  %v9782_v58 = vld [vmem:[%s12200_s13 + $0x68] ss:$16 sps:$4 sm:$0xff]  }
0x18da   : > { %6169 = vmatprep.subr.bf16.mxu0 %v9733_v0  ;;  %v9787_v0 = vld [vmem:[%s12200_s13 + $0x44] ss:$16 sps:$4 sm:$0xff]  }
0x18dd   : > { %6170 = vmatpush2.bf16.msra.mxu0 %v9731_v10  ;;  %v9790_v10 = vld [vmem:[%s12200_s13 + $0x4c] ss:$16 sps:$4 sm:$0xff]  }
0x18de   : > { %6171 = vmatprep.subr.bf16.mxu0 %v9736_v12  ;;  %v9785_v12 = vld [vmem:[%s12200_s13 + $0x40] ss:$16 sps:$4 sm:$0xff]  }
0x18e1   : > { %6172 = vmatpush2.bf16.msra.mxu0 %v9734_v13  ;;  %v9788_v13 = vld [vmem:[%s12200_s13 + $0x48] ss:$16 sps:$4 sm:$0xff]  }
0x18e2   : > { %6173 = vmatprep.subr.bf16.mxu0 %v9739_v16  ;;  %v9793_v16 = vld [vmem:[%s12200_s13 + $0x24] ss:$16 sps:$4 sm:$0xff]  }
0x18e5   : > { %6174 = vmatpush2.bf16.msra.mxu0 %v9737_v18  ;;  %v9796_v18 = vld [vmem:[%s12200_s13 + $0x2c] ss:$16 sps:$4 sm:$0xff]  }
0x18e6   : > { %6175 = vmatprep.subr.bf16.mxu0 %v9742_v22  ;;  %v9791_v22 = vld [vmem:[%s12200_s13 + $0x20] ss:$16 sps:$4 sm:$0xff]  }
0x18e9   : > { %6176 = vmatpush2.bf16.msra.mxu0 %v9740_v23  ;;  %v9794_v23 = vld [vmem:[%s12200_s13 + $0x28] ss:$16 sps:$4 sm:$0xff]  }
0x18ea   : > { %6177 = vmatprep.subr.bf16.mxu0 %v9745_v25  ;;  %v9802_v25 = vld [vmem:[%s12200_s13 + $0xc] ss:$16 sps:$4 sm:$0xff]  }
0x18ed   : > { %6178 = vmatpush2.bf16.msra.mxu0 %v9743_v24  ;;  %v9799_v24 = vld [vmem:[%s12200_s13 + $0x4] ss:$16 sps:$4 sm:$0xff]  }
0x18ee   : > { %6179 = vmatprep.subr.bf16.mxu0 %v9748_v27  ;;  %v9800_v27 = vld [vmem:[%s12200_s13 + $0x8] ss:$16 sps:$4 sm:$0xff]  }
0x18f1   : > { %6180 = vmatpush2.bf16.msra.mxu0 %v9746_v26  ;;  %v9797_v26 = vld [vmem:[%s12200_s13] ss:$16 sps:$4 sm:$0xff]  }
0x18f2   : > { %6181 = vmatprep.subr.bf16.mxu0 %v9751_v31  ;;  %v9805_v31 = vld [vmem:[%s12200_s13 + $0x1e4] ss:$16 sps:$4 sm:$0xff]  }
0x18f5   : > { %6182 = vmatpush2.bf16.msra.mxu0 %v9749_v28  ;;  %v9808_v28 = vld [vmem:[%s12200_s13 + $0x1ec] ss:$16 sps:$4 sm:$0xff]  }
0x1978   : > { %v5914_v29 = vpop.f32.mrf.mxu0 }
0x1979   : > { %v8647_v14 = vpack.c.bf16 %v5914_v29, %v5914_v29  ;;  %v9803_v29 = vld [vmem:[%s12200_s13 + $0x1e0] ss:$16 sps:$4 sm:$0xff]  }
0x197a   : > { %v9305_v15 = vpop.f32.mrf.mxu0 }
0x197b   : > { %5927 = vrot.lane.b32.xlu0 %v8647_v14, %s10031_s23  ;;  %v9806_v14 = vld [vmem:[%s12200_s13 + $0x1e8] ss:$16 sps:$4 sm:$0xff]  }
0x197c   : > { %v5917_v20 = vpop.f32.mrf.mxu0 }
0x197d   : > { %v8648_v7 = vpack.c.bf16 %v5917_v20, %v5917_v20 }
0x197e   : > { %v9306_v9 = vpop.f32.mrf.mxu0 }
0x197f   : > { %5929 = vrot.lane.b32.xlu1 %v8648_v7, %s10031_s23 }
0x19ed   : > { %v5928_v8 = vpop.permute.xlu0 %5927 }
0x19ee   : > { %5933 = vst.msk [vmem:[#allocation2 + $0x4] sm:$0xf] %vm3276_vm6, %v5928_v8 }
0x19f1   : > { %v5930_v39 = vpop.permute.xlu1 %5929 }
0x19f2   : > { %5934 = vst.msk [vmem:[#allocation2 + $0xc] sm:$0xf] %vm3276_vm6, %v5930_v39 }
0x19f9   : > { %v9754_v11 = vld [vmem:[#allocation2 + $0x4] ss:$8 sps:$4 sm:$0xff]  }
0x19fa   : > { %6183 = vmatprep.mubr.bf16.mxu0 %v9754_v11 }
0x19fb   : > { %6184 = vmatmul.mubr.bf16.vlgmr.msra.gmra.mxu0 %v9752_v41 }
0x1abb   : > { %v6185_v33 = vpop.f32.mrf.mxu0 }
0x1abc   : > { %v6186_v34 = vadd.f32 %v6185_v33, %v5974_v17 }
0x1abd   : > { %v6187_v19 = vpop.f32.mrf.mxu0 }
0x1abe   : > { %v6188_v35 = vadd.f32 %v6187_v19, %v5978_v32  ;;  %v11730_v37 = vadd.f32 %v6186_v34, %v10138_v2 }
0x1abf   : > { %v6189_v36 = vpop.f32.mrf.mxu0 }
0x1ac0   : > { %v11733_v38 = vadd.f32 %v6188_v35, %v10140_v3  ;;  %v6190_v40 = vadd.f32 %v6189_v36, %v5974_v17  ;;  %v9755_v3 = vld [vmem:[%s12200_s13 + $0xe0] ss:$16 sps:$4 sm:$0xff]   ;;  %v9811_v35 = vld [vmem:[%s12200_s13 + $0x1c4] ss:$16 sps:$4 sm:$0xff]   ;;  %v9814_v36 = vld [vmem:[%s12200_s13 + $0x1cc] ss:$16 sps:$4 sm:$0xff]  }
0x1ac1   : > { %v6191_v42 = vpop.f32.mrf.mxu0  ;;  %6671 = vmatpush1.bf16.msra.mxu1 %v9755_v3  ;;  %v9818_v3 = vld [vmem:[%s12200_s13 + $0x1a8] ss:$16 sps:$4 sm:$0xff]  }
0x1ac2   : > { %v6192_v43 = vadd.f32 %v6191_v42, %v5978_v32  ;;  %v6200_v44 = vadd.f32 %v11733_v38, %v11730_v37  ;;  %v11738_v45 = vadd.f32 %v6190_v40, %v10142_v4  ;;  %v9758_v4 = vld [vmem:[%s12200_s13 + $0xe8] ss:$16 sps:$4 sm:$0xff]   ;;  %6672 = vmatprep.subr.bf16.mxu1 %v9763_v48  ;;  %v9809_v40 = vld [vmem:[%s12200_s13 + $0x1c0] ss:$16 sps:$4 sm:$0xff]   ;;  %v9826_v48 = vld [vmem:[%s12200_s13 + $0x18c] ss:$16 sps:$4 sm:$0xff]  }
0x1ac3   : > { %v9812_v42 = vld [vmem:[%s12200_s13 + $0x1c8] ss:$16 sps:$4 sm:$0xff]  }
0x1ac4   : > { %v11741_v46 = vadd.f32 %v6192_v43, %v10144_v5  ;;  %6201 = vadd.xlane.f32.xlu0 %v6200_v44  ;;  %v9760_v5 = vld [vmem:[%s12200_s13 + $0xec] ss:$16 sps:$4 sm:$0xff]   ;;  %v9817_v43 = vld [vmem:[%s12200_s13 + $0x1a4] ss:$16 sps:$4 sm:$0xff]  }
0x1ac5   : > { %6713 = vmatprep.subr.bf16.mxu0 %v9760_v5  ;;  %6673 = vmatpush1.bf16.msra.mxu1 %v9761_v30  ;;  %v9820_v44 = vld [vmem:[%s12200_s13 + $0x1ac] ss:$16 sps:$4 sm:$0xff]   ;;  %v9824_v5 = vld [vmem:[%s12200_s13 + $0x188] ss:$16 sps:$4 sm:$0xff]  }
0x1ac6   : > { %v6203_v2 = vadd.f32 %v11741_v46, %v11738_v45  ;;  %6714 = vmatpush1.bf16.msra.mxu0 %v9758_v4  ;;  %6674 = vmatprep.subr.bf16.mxu1 %v9769_v51  ;;  %v9823_v4 = vld [vmem:[%s12200_s13 + $0x184] ss:$16 sps:$4 sm:$0xff]   ;;  %v9832_v30 = vld [vmem:[%s12200_s13 + $0x16c] ss:$16 sps:$4 sm:$0xff]   ;;  %v9830_v51 = vld [vmem:[%s12200_s13 + $0x168] ss:$16 sps:$4 sm:$0xff]  }
0x1ac7   : > { %6715 = vmatprep.subr.bf16.mxu0 %v9766_v49  ;;  %v9829_v49 = vld [vmem:[%s12200_s13 + $0x164] ss:$16 sps:$4 sm:$0xff]  }
0x1ac8   : > { %6204 = vadd.xlane.f32.xlu1 %v6203_v2  ;;  %v9815_v2 = vld [vmem:[%s12200_s13 + $0x1a0] ss:$16 sps:$4 sm:$0xff]  }
0x1ac9   : > { %6675 = vmatpush1.bf16.msra.mxu1 %v9767_v53  ;;  %v9838_v53 = vld [vmem:[%s12200_s13 + $0x14c] ss:$16 sps:$4 sm:$0xff]  }
0x1aca   : > { %6716 = vmatpush1.bf16.msra.mxu0 %v9764_v50  ;;  %6676 = vmatprep.subr.bf16.mxu1 %v9775_v55  ;;  %v9827_v50 = vld [vmem:[%s12200_s13 + $0x160] ss:$16 sps:$4 sm:$0xff]   ;;  %v9836_v55 = vld [vmem:[%s12200_s13 + $0x148] ss:$16 sps:$4 sm:$0xff]  }
0x1acb   : > { %6717 = vmatprep.subr.bf16.mxu0 %v9772_v52  ;;  %v9835_v52 = vld [vmem:[%s12200_s13 + $0x144] ss:$16 sps:$4 sm:$0xff]  }
0x1acd   : > { %6677 = vmatpush1.bf16.msra.mxu1 %v9773_v57  ;;  %v9844_v57 = vld [vmem:[%s12200_s13 + $0x12c] ss:$16 sps:$4 sm:$0xff]  }
0x1ace   : > { %6718 = vmatpush1.bf16.msra.mxu0 %v9770_v54  ;;  %6678 = vmatprep.subr.bf16.mxu1 %v9781_v60  ;;  %v9833_v54 = vld [vmem:[%s12200_s13 + $0x140] ss:$16 sps:$4 sm:$0xff]   ;;  %v9842_v60 = vld [vmem:[%s12200_s13 + $0x128] ss:$16 sps:$4 sm:$0xff]  }
0x1acf   : > { %6719 = vmatprep.subr.bf16.mxu0 %v9778_v56  ;;  %v9841_v56 = vld [vmem:[%s12200_s13 + $0x124] ss:$16 sps:$4 sm:$0xff]  }
0x1ad1   : > { %6679 = vmatpush1.bf16.msra.mxu1 %v9779_v62  ;;  %v9850_v62 = vld [vmem:[%s12200_s13 + $0x10c] ss:$16 sps:$4 sm:$0xff]  }
0x1ad2   : > { %6720 = vmatpush1.bf16.msra.mxu0 %v9776_v59  ;;  %6680 = vmatprep.subr.bf16.mxu1 %v9787_v0  ;;  %v9839_v59 = vld [vmem:[%s12200_s13 + $0x120] ss:$16 sps:$4 sm:$0xff]   ;;  %v9848_v0 = vld [vmem:[%s12200_s13 + $0x108] ss:$16 sps:$4 sm:$0xff]  }
0x1ad3   : > { %6721 = vmatprep.subr.bf16.mxu0 %v9784_v61  ;;  %v9847_v61 = vld [vmem:[%s12200_s13 + $0x104] ss:$16 sps:$4 sm:$0xff]  }
0x1ad5   : > { %6681 = vmatpush1.bf16.msra.mxu1 %v9785_v12  ;;  %v9856_v12 = vld [vmem:[%s12202_s15 + $0x174] ss:$8 sps:$4 sm:$0xff]  }
0x1ad6   : > { %6722 = vmatpush1.bf16.msra.mxu0 %v9782_v58  ;;  %6682 = vmatprep.subr.bf16.mxu1 %v9793_v16  ;;  %v9845_v58 = vld [vmem:[%s12200_s13 + $0x100] ss:$16 sps:$4 sm:$0xff]  }
0x1ad7   : > { %6723 = vmatprep.subr.bf16.mxu0 %v9790_v10  ;;  %v9853_v10 = vld [vmem:[%s12202_s15 + $0x74] ss:$8 sps:$4 sm:$0xff]  }
0x1ad9   : > { %6683 = vmatpush1.bf16.msra.mxu1 %v9791_v22 }
0x1ada   : > { %6724 = vmatpush1.bf16.msra.mxu0 %v9788_v13  ;;  %6684 = vmatprep.subr.bf16.mxu1 %v9799_v24 }
0x1adb   : > { %6725 = vmatprep.subr.bf16.mxu0 %v9796_v18 }
0x1add   : > { %6685 = vmatpush1.bf16.msra.mxu1 %v9797_v26 }
0x1ade   : > { %6726 = vmatpush1.bf16.msra.mxu0 %v9794_v23  ;;  %6686 = vmatprep.subr.bf16.mxu1 %v9805_v31 }
0x1adf   : > { %6727 = vmatprep.subr.bf16.mxu0 %v9802_v25  ;;  %v6198_v25 = vld [vmem:[%s12198_s11] sm:$0x3] }
0x1ae1   : > { %6687 = vmatpush2.bf16.msra.mxu1 %v9803_v29  ;;  %v6240_v29 = vrot.slane %v6198_v25, %v10281_v6 }
0x1ae2   : > { %6728 = vmatpush1.bf16.msra.mxu0 %v9800_v27  ;;  %6688 = vmatprep.subr.bf16.mxu1 %v9811_v35  ;;  %v6199_v27 = vld [vmem:[%s12199_s12] sm:$0x3] }
0x1ae3   : > { %6729 = vmatprep.subr.bf16.mxu0 %v9808_v28  ;;  %v6236_v28 = vrot.slane %v6198_v25, %v10278_v1  ;;  %v9910_v25 = vld [vmem:[%s12202_s15 + $0x1e4] ss:$8 sps:$4 sm:$0xff]  }
0x1ae5   : > { %6689 = vmatpush2.bf16.msra.mxu1 %v9809_v40 }
0x1ae6   : > { %6730 = vmatpush2.bf16.msra.mxu0 %v9806_v14  ;;  %6690 = vmatprep.subr.bf16.mxu1 %v9817_v43  ;;  %v9862_v43 = vld [vmem:[%s12202_s15 + $0x164] ss:$8 sps:$4 sm:$0xff]  }
0x1ae7   : > { %6731 = vmatprep.subr.bf16.mxu0 %v9814_v36 }
0x1ae9   : > { %6691 = vmatpush2.bf16.msra.mxu1 %v9815_v2  ;;  %v9860_v2 = vld [vmem:[%s12202_s15 + $0x160] ss:$8 sps:$4 sm:$0xff]  }
0x1aea   : > { %6732 = vmatpush2.bf16.msra.mxu0 %v9812_v42  ;;  %6692 = vmatprep.subr.bf16.mxu1 %v9823_v4  ;;  %v9863_v4 = vld [vmem:[%s12202_s15 + $0x50] ss:$8 sps:$4 sm:$0xff]  }
0x1aeb   : > { %6733 = vmatprep.subr.bf16.mxu0 %v9820_v44  ;;  %v9857_v44 = vld [vmem:[%s12202_s15 + $0x60] ss:$8 sps:$4 sm:$0xff]  }
0x1aed   : > { %6693 = vmatpush2.bf16.msra.mxu1 %v9821_v47  ;;  %v9868_v47 = vld [vmem:[%s12202_s15 + $0x154] ss:$8 sps:$4 sm:$0xff]  }
0x1aee   : > { %6734 = vmatpush2.bf16.msra.mxu0 %v9818_v3  ;;  %6694 = vmatprep.subr.bf16.mxu1 %v9829_v49  ;;  %v9865_v3 = vld [vmem:[%s12202_s15 + $0x54] ss:$8 sps:$4 sm:$0xff]   ;;  %v9874_v49 = vld [vmem:[%s12202_s15 + $0x144] ss:$8 sps:$4 sm:$0xff]  }
0x1aef   : > { %6735 = vmatprep.subr.bf16.mxu0 %v9826_v48  ;;  %v9871_v48 = vld [vmem:[%s12202_s15 + $0x44] ss:$8 sps:$4 sm:$0xff]  }
0x1af1   : > { %6695 = vmatpush2.bf16.msra.mxu1 %v9827_v50  ;;  %v9872_v50 = vld [vmem:[%s12202_s15 + $0x140] ss:$8 sps:$4 sm:$0xff]  }
0x1af2   : > { %6736 = vmatpush2.bf16.msra.mxu0 %v9824_v5  ;;  %6696 = vmatprep.subr.bf16.mxu1 %v9835_v52  ;;  %v9866_v5 = vld [vmem:[%s12202_s15 + $0x150] ss:$8 sps:$4 sm:$0xff]   ;;  %v9880_v52 = vld [vmem:[%s12202_s15 + $0x134] ss:$8 sps:$4 sm:$0xff]  }
0x1af3   : > { %6737 = vmatprep.subr.bf16.mxu0 %v9832_v30  ;;  %v9869_v30 = vld [vmem:[%s12202_s15 + $0x40] ss:$8 sps:$4 sm:$0xff]  }
0x1af5   : > { %6697 = vmatpush2.bf16.msra.mxu1 %v9833_v54  ;;  %v9878_v54 = vld [vmem:[%s12202_s15 + $0x130] ss:$8 sps:$4 sm:$0xff]  }
0x1af6   : > { %6738 = vmatpush2.bf16.msra.mxu0 %v9830_v51  ;;  %6698 = vmatprep.subr.bf16.mxu1 %v9841_v56  ;;  %v9877_v51 = vld [vmem:[%s12202_s15 + $0x34] ss:$8 sps:$4 sm:$0xff]   ;;  %v9886_v56 = vld [vmem:[%s12202_s15 + $0x124] ss:$8 sps:$4 sm:$0xff]  }
0x1af7   : > { %6739 = vmatprep.subr.bf16.mxu0 %v9838_v53  ;;  %v9875_v53 = vld [vmem:[%s12202_s15 + $0x30] ss:$8 sps:$4 sm:$0xff]  }
0x1af9   : > { %6699 = vmatpush2.bf16.msra.mxu1 %v9839_v59  ;;  %v9884_v59 = vld [vmem:[%s12202_s15 + $0x120] ss:$8 sps:$4 sm:$0xff]  }
0x1afa   : > { %6740 = vmatpush2.bf16.msra.mxu0 %v9836_v55  ;;  %6700 = vmatprep.subr.bf16.mxu1 %v9847_v61  ;;  %v9883_v55 = vld [vmem:[%s12202_s15 + $0x24] ss:$8 sps:$4 sm:$0xff]   ;;  %v9892_v61 = vld [vmem:[%s12202_s15 + $0x114] ss:$8 sps:$4 sm:$0xff]  }
0x1afb   : > { %6741 = vmatprep.subr.bf16.mxu0 %v9844_v57  ;;  %v9881_v57 = vld [vmem:[%s12202_s15 + $0x20] ss:$8 sps:$4 sm:$0xff]  }
0x1afd   : > { %6701 = vmatpush2.bf16.msra.mxu1 %v9845_v58  ;;  %v9890_v58 = vld [vmem:[%s12202_s15 + $0x110] ss:$8 sps:$4 sm:$0xff]  }
0x1afe   : > { %6742 = vmatpush2.bf16.msra.mxu0 %v9842_v60  ;;  %7164 = vmatprep.subr.bf16.mxu1 %v9853_v10  ;;  %v9889_v60 = vld [vmem:[%s12202_s15 + $0x14] ss:$8 sps:$4 sm:$0xff]   ;;  %v9898_v10 = vld [vmem:[%s12202_s15 + $0x104] ss:$8 sps:$4 sm:$0xff]  }
0x1aff   : > { %6743 = vmatprep.subr.bf16.mxu0 %v9850_v62  ;;  %v9887_v62 = vld [vmem:[%s12202_s15 + $0x10] ss:$8 sps:$4 sm:$0xff]  }
0x1b02   : > { %6744 = vmatpush2.bf16.msra.mxu0 %v9848_v0  ;;  %v9895_v0 = vld [vmem:[%s12202_s15 + $0x4] ss:$8 sps:$4 sm:$0xff]  }
0x1b03   : > { %7207 = vmatprep.subr.bf16.mxu0 %v9856_v12  ;;  %v9893_v12 = vld [vmem:[%s12202_s15] ss:$8 sps:$4 sm:$0xff]  }
0x1b4d   : > { %v6202_v15 = vpop.xlane.xlu0 %6201 }
0x1b4e   : > { %v6206_v20 = vmul.f32 0.00390625, %v6202_v15 }
0x1b50   : > { %v11854_v7 = vsub.f32 %v11730_v37, %v6206_v20  ;;  %v11857_v9 = vsub.f32 %v11733_v38, %v6206_v20  ;;  %v6251_v20 = vrot.slane %v6199_v27, %v10278_v1 }
0x1b51   : > { %v6205_v8 = vpop.xlane.xlu1 %6204 }
0x1b52   : > { %v6207_v39 = vmul.f32 0.00390625, %v6205_v8  ;;  %v6212_v41 = vmul.f32 %v11854_v7, %v11854_v7  ;;  %v6213_v11 = vmul.f32 %v11857_v9, %v11857_v9  ;;  %v6255_v8 = vrot.slane %v6199_v27, %v10281_v6  ;;  %v9908_v27 = vld [vmem:[%s12202_s15 + $0x1e0] ss:$8 sps:$4 sm:$0xff]  }
0x1b54   : > { %v11864_v21 = vsub.f32 %v11738_v45, %v6207_v39  ;;  %v11867_v17 = vsub.f32 %v11741_v46, %v6207_v39  ;;  %v6216_v32 = vadd.f32 %v6213_v11, %v6212_v41 }
0x1b56   : > { %6217 = vadd.xlane.f32.xlu0 %v6216_v32  ;;  %v6214_v33 = vmul.f32 %v11864_v21, %v11864_v21  ;;  %v6215_v34 = vmul.f32 %v11867_v17, %v11867_v17 }
0x1b58   : > { %v6219_v19 = vadd.f32 %v6215_v34, %v6214_v33 }
0x1b5a   : > { %6220 = vadd.xlane.f32.xlu0 %v6219_v19 }
0x1bdf   : > { %v6218_v13 = vpop.xlane.xlu0 %6217 }
0x1be0   : > { %v6222_v16 = vmul.f32 0.00390625, %v6218_v13  ;;  %v9896_v13 = vld [vmem:[%s12202_s15 + $0x100] ss:$8 sps:$4 sm:$0xff]  }
0x1be2   : > { %v6224_v18 = vadd.f32 1e-05, %v6222_v16  ;;  %v9901_v16 = vld [vmem:[%s12202_s15 + $0xf4] ss:$8 sps:$4 sm:$0xff]  }
0x1be3   : > { %v6221_v22 = vpop.xlane.xlu0 %6220 }
0x1be4   : > { %10015 = vrsqrt.f32 %v6224_v18  ;;  %v6223_v23 = vmul.f32 0.00390625, %v6221_v22  ;;  %v9904_v18 = vld [vmem:[%s12202_s15 + $0x1f4] ss:$8 sps:$4 sm:$0xff]   ;;  %v9899_v22 = vld [vmem:[%s12202_s15 + $0xf0] ss:$8 sps:$4 sm:$0xff]  }
0x1be6   : > { %v6225_v24 = vadd.f32 1e-05, %v6223_v23  ;;  %v9902_v23 = vld [vmem:[%s12202_s15 + $0x1f0] ss:$8 sps:$4 sm:$0xff]  }
0x1be8   : > { %10017 = vrsqrt.f32 %v6225_v24  ;;  %v9907_v24 = vld [vmem:[%s12202_s15 + $0xe4] ss:$8 sps:$4 sm:$0xff]  }
0x1bf1   : > { %v10016_v26 = vpop.eup %10015 }
0x1bf2   : > { %v6229_v31 = vmul.f32 %v10016_v26, %v11857_v9  ;;  %v6228_v14 = vmul.f32 %v10016_v26, %v11854_v7  ;;  %v9851_v7 = vld [vmem:[%s12202_s15 + $0x70] ss:$8 sps:$4 sm:$0xff]   ;;  %v9905_v26 = vld [vmem:[%s12202_s15 + $0xe0] ss:$8 sps:$4 sm:$0xff]  }
0x1bf4   : > { %v6244_v41 = vmul.f32 %v6240_v29, %v6229_v31  ;;  %v6243_v32 = vmul.f32 %v6236_v28, %v6228_v14  ;;  %v9913_v31 = vld [vmem:[%s12202_s15 + $0xd4] ss:$8 sps:$4 sm:$0xff]   ;;  %v9914_v14 = vld [vmem:[%s12202_s15 + $0x1d0] ss:$8 sps:$4 sm:$0xff]  }
0x1bf5   : > { %v10018_v15 = vpop.eup %10017 }
0x1bf6   : > { %v6231_v39 = vmul.f32 %v10018_v15, %v11867_v17  ;;  %v6230_v11 = vmul.f32 %v10018_v15, %v11864_v21  ;;  %v6259_v9 = vadd.f32 %v6255_v8, %v6244_v41  ;;  %v6258_v35 = vadd.f32 %v6251_v20, %v6243_v32  ;;  %v9854_v17 = vld [vmem:[%s12202_s15 + $0x170] ss:$8 sps:$4 sm:$0xff]   ;;  %v9859_v21 = vld [vmem:[%s12202_s15 + $0x64] ss:$8 sps:$4 sm:$0xff]   ;;  %v9925_v41 = vld [vmem:[%s12202_s15 + $0xb4] ss:$8 sps:$4 sm:$0xff]  }
0x1bf7   : > { %v9919_v15 = vld [vmem:[%s12202_s15 + $0xc4] ss:$8 sps:$4 sm:$0xff]   ;;  %v9923_v32 = vld [vmem:[%s12202_s15 + $0xb0] ss:$8 sps:$4 sm:$0xff]  }
0x1bf8   : > { %v6246_v33 = vmul.f32 %v6240_v29, %v6231_v39  ;;  %v6245_v34 = vmul.f32 %v6236_v28, %v6230_v11  ;;  %v9916_v28 = vld [vmem:[%s12202_s15 + $0x1d4] ss:$8 sps:$4 sm:$0xff]   ;;  %v9911_v29 = vld [vmem:[%s12202_s15 + $0xd0] ss:$8 sps:$4 sm:$0xff]   ;;  %v9920_v39 = vld [vmem:[%s12202_s15 + $0x1c0] ss:$8 sps:$4 sm:$0xff]  }
0x1bf9   : > { %v9928_v11 = vld [vmem:[%s12202_s15 + $0x1b4] ss:$8 sps:$4 sm:$0xff]  }
0x1bfa   : > { %v6261_v19 = vadd.f32 %v6255_v8, %v6246_v33  ;;  %v6260_v36 = vadd.f32 %v6251_v20, %v6245_v34  ;;  %v9922_v20 = vld [vmem:[%s12202_s15 + $0x1c4] ss:$8 sps:$4 sm:$0xff]   ;;  %v9917_v8 = vld [vmem:[%s12202_s15 + $0xc0] ss:$8 sps:$4 sm:$0xff]   ;;  %v9926_v33 = vld [vmem:[%s12202_s15 + $0x1b0] ss:$8 sps:$4 sm:$0xff]  }
0x1bfb   : > { %v9931_v34 = vld [vmem:[%s12202_s15 + $0xa4] ss:$8 sps:$4 sm:$0xff]  }
0x1bfc   : > { %v6263_v40 = vpack.c.bf16 %v6261_v19, %v6259_v9  ;;  %v6262_v42 = vpack.c.bf16 %v6260_v36, %v6258_v35  ;;  %v9934_v9 = vld [vmem:[%s12202_s15 + $0x1a4] ss:$8 sps:$4 sm:$0xff]   ;;  %v9929_v19 = vld [vmem:[%s12202_s15 + $0xa0] ss:$8 sps:$4 sm:$0xff]   ;;  %v9937_v36 = vld [vmem:[%s12202_s15 + $0x94] ss:$8 sps:$4 sm:$0xff]  }
0x1bfd   : > { %v9932_v35 = vld [vmem:[%s12202_s15 + $0x1a0] ss:$8 sps:$4 sm:$0xff]  }
0x1bfe   : > { %6702 = vmatprep.mubr.bf16.mxu1 %v6263_v40  ;;  %6745 = vmatprep.mubr.bf16.mxu0 %v6263_v40  ;;  %v9940_v40 = vld [vmem:[%s12202_s15 + $0x194] ss:$8 sps:$4 sm:$0xff]  }
0x1bff   : > { %6703 = vmatmul.mubr.bf16.vlgmr.msra.gmra.mxu1 %v6262_v42  ;;  %6746 = vmatmul.mubr.bf16.vlgmr.msra.gmra.mxu0 %v6262_v42  ;;  %v9935_v42 = vld [vmem:[%s12202_s15 + $0x90] ss:$8 sps:$4 sm:$0xff]  }
0x1c00   : > { %7165 = vmatpush1.bf16.msra.mxu1 %v9851_v7  ;;  %7208 = vmatpush1.bf16.msra.mxu0 %v9854_v17  ;;  %v9938_v7 = vld [vmem:[%s12202_s15 + $0x190] ss:$8 sps:$4 sm:$0xff]   ;;  %v9943_v17 = vld [vmem:[%s12202_s15 + $0x84] ss:$8 sps:$4 sm:$0xff]  }
0x1c01   : > { %7166 = vmatprep.subr.bf16.mxu1 %v9859_v21  ;;  %7209 = vmatprep.subr.bf16.mxu0 %v9862_v43  ;;  %v9946_v21 = vld [vmem:[%s12202_s15 + $0x184] ss:$8 sps:$4 sm:$0xff]   ;;  %v9941_v43 = vld [vmem:[%s12202_s15 + $0x80] ss:$8 sps:$4 sm:$0xff]  }
0x1c04   : > { %7167 = vmatpush1.bf16.msra.mxu1 %v9857_v44  ;;  %7210 = vmatpush1.bf16.msra.mxu0 %v9860_v2  ;;  %v9944_v44 = vld [vmem:[%s12202_s15 + $0x180] ss:$8 sps:$4 sm:$0xff]   ;;  %v6344_v2 = vsub.s32 3, %v10272_v63 }
0x1c05   : > { %7168 = vmatprep.subr.bf16.mxu1 %v9865_v3  ;;  %7211 = vmatprep.subr.bf16.mxu0 %v9868_v47  ;;  %v6340_v3 = vsub.s32 2, %v10272_v63  ;;  %v6328_v47 = vld [vmem:[%s12201_s14] sm:$0xf] }
0x1c08   : > { %7169 = vmatpush1.bf16.msra.mxu1 %v9863_v4  ;;  %7212 = vmatpush1.bf16.msra.mxu0 %v9866_v5 }
0x1c09   : > { %7170 = vmatprep.subr.bf16.mxu1 %v9871_v48  ;;  %7213 = vmatprep.subr.bf16.mxu0 %v9874_v49  ;;  %v6337_v48 = vrot.slane %v6328_v47, %v10281_v6  ;;  %v6345_v49 = vrot.slane %v6328_v47, %v6344_v2 }
0x1c0c   : > { %7171 = vmatpush1.bf16.msra.mxu1 %v9869_v30  ;;  %7214 = vmatpush1.bf16.msra.mxu0 %v9872_v50  ;;  %v6333_v30 = vrot.slane %v6328_v47, %v10278_v1  ;;  %v6341_v50 = vrot.slane %v6328_v47, %v6340_v3 }
0x1c0d   : > { %7172 = vmatprep.subr.bf16.mxu1 %v9877_v51  ;;  %7215 = vmatprep.subr.bf16.mxu0 %v9880_v52 }
0x1c10   : > { %7173 = vmatpush1.bf16.msra.mxu1 %v9875_v53  ;;  %7216 = vmatpush1.bf16.msra.mxu0 %v9878_v54 }
0x1c11   : > { %7174 = vmatprep.subr.bf16.mxu1 %v9883_v55  ;;  %7217 = vmatprep.subr.bf16.mxu0 %v9886_v56 }
0x1c14   : > { %7175 = vmatpush1.bf16.msra.mxu1 %v9881_v57  ;;  %7218 = vmatpush1.bf16.msra.mxu0 %v9884_v59 }
0x1c15   : > { %7176 = vmatprep.subr.bf16.mxu1 %v9889_v60  ;;  %7219 = vmatprep.subr.bf16.mxu0 %v9892_v61 }
0x1c18   : > { %7177 = vmatpush1.bf16.msra.mxu1 %v9887_v62  ;;  %7220 = vmatpush1.bf16.msra.mxu0 %v9890_v58 }
0x1c19   : > { %7178 = vmatprep.subr.bf16.mxu1 %v9895_v0  ;;  %7221 = vmatprep.subr.bf16.mxu0 %v9898_v10 }
0x1c1c   : > { %7179 = vmatpush1.bf16.msra.mxu1 %v9893_v12  ;;  %7222 = vmatpush1.bf16.msra.mxu0 %v9896_v13 }
0x1c1d   : > { %7180 = vmatprep.subr.bf16.mxu1 %v9901_v16  ;;  %7223 = vmatprep.subr.bf16.mxu0 %v9904_v18 }
0x1c20   : > { %7181 = vmatpush2.bf16.msra.mxu1 %v9899_v22  ;;  %7224 = vmatpush2.bf16.msra.mxu0 %v9902_v23 }
0x1c21   : > { %7182 = vmatprep.subr.bf16.mxu1 %v9907_v24  ;;  %7225 = vmatprep.subr.bf16.mxu0 %v9910_v25 }
0x1c24   : > { %7183 = vmatpush2.bf16.msra.mxu1 %v9905_v26  ;;  %7226 = vmatpush2.bf16.msra.mxu0 %v9908_v27 }
0x1c25   : > { %7184 = vmatprep.subr.bf16.mxu1 %v9913_v31  ;;  %7227 = vmatprep.subr.bf16.mxu0 %v9916_v28  ;;  %v6832_v28 = vld [vmem:[%s12203_s16] sm:$0x3] }
0x1c28   : > { %7185 = vmatpush2.bf16.msra.mxu1 %v9911_v29  ;;  %7228 = vmatpush2.bf16.msra.mxu0 %v9914_v14  ;;  %v6837_v29 = vrot.slane %v6832_v28, %v10278_v1  ;;  %v6841_v14 = vrot.slane %v6832_v28, %v10281_v6 }
0x1c29   : > { %7186 = vmatprep.subr.bf16.mxu1 %v9919_v15  ;;  %7229 = vmatprep.subr.bf16.mxu0 %v9922_v20 }
0x1c2c   : > { %7187 = vmatpush2.bf16.msra.mxu1 %v9917_v8  ;;  %7230 = vmatpush2.bf16.msra.mxu0 %v9920_v39 }
0x1c2d   : > { %7188 = vmatprep.subr.bf16.mxu1 %v9925_v41  ;;  %7231 = vmatprep.subr.bf16.mxu0 %v9928_v11 }
0x1c30   : > { %7189 = vmatpush2.bf16.msra.mxu1 %v9923_v32  ;;  %7232 = vmatpush2.bf16.msra.mxu0 %v9926_v33 }
0x1c31   : > { %7190 = vmatprep.subr.bf16.mxu1 %v9931_v34  ;;  %7233 = vmatprep.subr.bf16.mxu0 %v9934_v9 }
0x1c34   : > { %7191 = vmatpush2.bf16.msra.mxu1 %v9929_v19  ;;  %7234 = vmatpush2.bf16.msra.mxu0 %v9932_v35 }
0x1c35   : > { %7192 = vmatprep.subr.bf16.mxu1 %v9937_v36  ;;  %7235 = vmatprep.subr.bf16.mxu0 %v9940_v40 }
0x1c38   : > { %7193 = vmatpush2.bf16.msra.mxu1 %v9935_v42  ;;  %7236 = vmatpush2.bf16.msra.mxu0 %v9938_v7 }
0x1c39   : > { %7194 = vmatprep.subr.bf16.mxu1 %v9943_v17  ;;  %7237 = vmatprep.subr.bf16.mxu0 %v9946_v21 }
0x1c3c   : > { %7195 = vmatpush2.bf16.msra.mxu1 %v9941_v43  ;;  %7238 = vmatpush2.bf16.msra.mxu0 %v9944_v44 }
0x1cbf   : > { %v6704_v4 = vpop.f32.mrf.mxu1  ;;  %v6747_v5 = vpop.f32.mrf.mxu0 }
0x1cc0   : > { %v6705_v59 = vadd.f32 %v6704_v4, %v6333_v30  ;;  %v6748_v60 = vadd.f32 %v6747_v5, %v6341_v50 }
0x1cc1   : > { %v6706_v51 = vpop.f32.mrf.mxu1  ;;  %v6749_v52 = vpop.f32.mrf.mxu0 }
0x1cc2   : > { %v6707_v55 = vadd.f32 %v6706_v51, %v6337_v48  ;;  %v6750_v56 = vadd.f32 %v6749_v52, %v6345_v49  ;;  %v6756_v23 = vmax.f32 %v6705_v59, 0.0  ;;  %v6758_v24 = vmax.f32 %v6748_v60, 0.0 }
0x1cc3   : > { %v6708_v53 = vpop.f32.mrf.mxu1  ;;  %v6751_v54 = vpop.f32.mrf.mxu0 }
0x1cc4   : > { %v6709_v57 = vadd.f32 %v6708_v53, %v6333_v30  ;;  %v6752_v63 = vadd.f32 %v6751_v54, %v6341_v50  ;;  %v6757_v13 = vmax.f32 %v6707_v55, 0.0  ;;  %v6759_v16 = vmax.f32 %v6750_v56, 0.0 }
0x1cc5   : > { %v6710_v61 = vpop.f32.mrf.mxu1  ;;  %v6753_v62 = vpop.f32.mrf.mxu0 }
0x1cc6   : > { %v6711_v58 = vadd.f32 %v6710_v61, %v6337_v48  ;;  %v6754_v0 = vadd.f32 %v6753_v62, %v6345_v49  ;;  %v6760_v10 = vmax.f32 %v6709_v57, 0.0  ;;  %v6762_v12 = vmax.f32 %v6752_v63, 0.0 }
0x1cc8   : > { %v6761_v18 = vmax.f32 %v6711_v58, 0.0  ;;  %v6763_v22 = vmax.f32 %v6754_v0, 0.0  ;;  %v6764_v27 = vpack.c.bf16 %v6760_v10, %v6756_v23  ;;  %v6766_v31 = vpack.c.bf16 %v6762_v12, %v6758_v24 }
0x1cca   : > { %v6765_v25 = vpack.c.bf16 %v6761_v18, %v6757_v13  ;;  %v6767_v26 = vpack.c.bf16 %v6763_v22, %v6759_v16 }
0x1ccc   : > { %7196 = vmatprep.mubr.bf16.mxu1 %v6765_v25  ;;  %7239 = vmatprep.mubr.bf16.mxu0 %v6767_v26 }
0x1ccd   : > { %7197 = vmatmul.mubr.bf16.vlgmr.msra.gmra.mxu1 %v6764_v27  ;;  %7240 = vmatmul.mubr.bf16.vlgmr.msra.gmra.mxu0 %v6766_v31 }
0x1d8d   : > { %v7198_v15 = vpop.f32.mrf.mxu1  ;;  %v7241_v20 = vpop.f32.mrf.mxu0 }
0x1d8e   : > { %v7199_v8 = vadd.f32 %v7198_v15, %v6837_v29 }
0x1d8f   : > { %v7200_v39 = vpop.f32.mrf.mxu1  ;;  %v7243_v41 = vpop.f32.mrf.mxu0 }
0x1d90   : > { %v7242_v11 = vadd.f32 %v7241_v20, %v7199_v8  ;;  %v7201_v32 = vadd.f32 %v7200_v39, %v6841_v14 }
0x1d91   : > { %v7202_v33 = vpop.f32.mrf.mxu1  ;;  %v7245_v34 = vpop.f32.mrf.mxu0 }
0x1d92   : > { %v7244_v9 = vadd.f32 %v7243_v41, %v7201_v32  ;;  %v7203_v19 = vadd.f32 %v7202_v33, %v6837_v29  ;;  %v7250_v36 = vadd.f32 %v7242_v11, %v11730_v37 }
0x1d93   : > { %v7204_v35 = vpop.f32.mrf.mxu1  ;;  %v7247_v6 = vpop.f32.mrf.mxu0 }
0x1d94   : > { %v7251_v40 = vadd.f32 %v7244_v9, %v11733_v38  ;;  %v7246_v1 = vadd.f32 %v7245_v34, %v7203_v19  ;;  %v7205_v42 = vadd.f32 %v7204_v35, %v6841_v14 }
0x1d96   : > { %v8649_v7 = vpack.c.bf16 %v7251_v40, %v7250_v36  ;;  %v7248_v17 = vadd.f32 %v7247_v6, %v7205_v42  ;;  %v7252_v21 = vadd.f32 %v7246_v1, %v11738_v45 }
0x1d98   : > { %7266 = vst [vmem:[%s548_s28] sm:$0xff] %v8649_v7  ;;  %v7253_v43 = vadd.f32 %v7248_v17, %v11741_v46 }
0x1d9a   : > { %v8650_v44 = vpack.c.bf16 %v7253_v43, %v7252_v21 }
0x1d9c   : > { %7267 = vst [vmem:[%s548_s28 + $0x8] sm:$0xff] %v8650_v44 }
0x1d9d PF: > { %s27_s24 = sadd.s32 1, %s10025_s24  }
0x1d9e   : > { %p24_p4 = scmp.ge.s32.totalorder %s27_s24, 4  }
0x1da0   :  { %26 = sbr.rel (!%p24_p4) target bundleno = 3 (0x3), region = 160 }

// kernel: image_encoder_forward.9
= control target key start
LH: loop header
LB: loop body
LE: loop exit
PB: predicated region body
PF: predicated region fallthrough
CT: control target
= control target key end

     0   :  { %s12375_s0 = inlined_call_operand.vmem [shape: bf16[2,16,256], index: 0, kind: input, shape index: {}]   ;;  %s12376_s1 = inlined_call_operand.vmem [shape: f32[1,256], index: 1, kind: input, shape index: {}]   ;;  %s12377_s2 = inlined_call_operand.vmem [shape: f32[1,256], index: 2, kind: input, shape index: {}]   ;;  %s12378_s3 = inlined_call_operand.vmem [shape: bf16[8,256,32], index: 3, kind: input, shape index: {}]   ;;  %s12379_s4 = inlined_call_operand.vmem [shape: bf16[8,256,32], index: 4, kind: input, shape index: {}]   ;;  %s12380_s5 = inlined_call_operand.vmem [shape: bf16[8,256,32], index: 5, kind: input, shape index: {}]   ;;  %s12381_s6 = inlined_call_operand.vmem [shape: f32[8,1,32], index: 6, kind: input, shape index: {}]   ;;  %s12382_s7 = inlined_call_operand.vmem [shape: f32[8,1,32], index: 7, kind: input, shape index: {}]   ;;  %s12383_s8 = inlined_call_operand.vmem [shape: f32[8,1,32], index: 8, kind: input, shape index: {}]   ;;  %s12384_s9 = inlined_call_operand.vmem [shape: bf16[256,256], index: 9, kind: input, shape index: {}]   ;;  %s12385_s10 = inlined_call_operand.vmem [shape: f32[1,256], index: 10, kind: input, shape index: {}]   ;;  %s12386_s11 = inlined_call_operand.vmem [shape: f32[1,256], index: 11, kind: input, shape index: {}]   ;;  %s12387_s12 = inlined_call_operand.vmem [shape: f32[1,256], index: 12, kind: input, shape index: {}]   ;;  %s12388_s13 = inlined_call_operand.vmem [shape: bf16[256,512], index: 13, kind: input, shape index: {}]   ;;  %s12389_s14 = inlined_call_operand.vmem [shape: f32[1,512], index: 14, kind: input, shape index: {}]   ;;  %s12390_s15 = inlined_call_operand.vmem [shape: bf16[512,256], index: 15, kind: input, shape index: {}]   ;;  %s12391_s16 = inlined_call_operand.vmem [shape: f32[1,256], index: 16, kind: input, shape index: {}]   ;;  %s12392_s17 = inlined_call_operand.hbm [shape: bf16[2,16,256], index: 17, kind: output, shape index: {}]  }
   0x1   :  { %12399 = sst [smem:[#allocation10_spill]] %s12375_s0 }
   0x2   :  { %12400 = sst [smem:[#allocation11_spill]] %s12376_s1 }
   0x3   :  { %12401 = sst [smem:[#allocation12_spill]] %s12377_s2 }
   0x4   :  { %22 = vsyncpa [#allocation4], 0 }
   0x5   :  { %24 = vsyncpa [#allocation4 + $0x1], 0  ;;  %s10232_s24 = smov 0   ;;  %s10234_s25 = smov 0  }
   0x6   :  { %s10236_s26 = smov 0   ;;  %s10238_s27 = smov 0  }
   0x7 LB: > { %12402 = sst [smem:[#allocation6_spill]] %s10128_s26  ;;  %s10253_s28 = sadd.s32 4294967295, %s10132_s27   ;;  %s10132_s27 = sphi %s10238_s27, %s12413_s27   ;;  %s10128_s26 = sphi %s10236_s26, %s12415_s26   ;;  %s10124_s25 = sphi %s10234_s25, %s12417_s25   ;;  %s10120_s24 = sphi %s10232_s24, %s12416_s24  }
   0x8   : > { %s7342_s29 = sadd.s32 4294967294, %s10132_s27   ;;  %s10257_s0 = sadd.s32 1, %s10132_s27  }
   0x9   : > { %12403 = sst [smem:[#allocation7_spill]] %s10257_s0  ;;  %s399_s30 = sadd.s32 1, %s10128_s26 }
   0xa   : > { %s396_s18 = ssub.s32 %s10132_s27, %s10257_s0  ;;  %p409_p0 = scmp.ne.s32.totalorder %s10128_s26, %s10124_s25 }
   0xb   : > { %p397_p1 = scmp.eq.s32.totalorder %s396_s18, 0  ;;  %p410_p2 = scmp.eq.s32.totalorder %s10253_s28, 1 }
   0xc   : > { %p415_p3 = scmp.ne.s32.totalorder %s10124_s25, %s10120_s24  ;;  %p416_p4 = scmp.eq.s32.totalorder %s7342_s29, 1 }
   0xd   : > { %s10268_s19 = scalar_select %p397_p1, %s10128_s26, %s399_s30  }
   0xe   : > { %p10270_p5 = por %p410_p2, %p409_p0  ;;  %p10274_p6 = por %p416_p4, %p415_p3 }
   0xf   : > { %12404 = sst [smem:[#allocation8_spill]] %s10268_s19  ;;  %p7345_p7 = scmp.ge.s32.totalorder %s10132_s27, 1 }
  0x10   : > { %s12406_s20 = scalar_select %p10274_p6, 1, 0 }
  0x11   : > { %p490_p8 = scmp.lt.s32.totalorder %s10132_s27, 3 }
  0x12   : > { %12407 = sst [smem:[#allocation9_spill]] %s12406_s20 }
  0x13   : > { %p491_p9 = pnand %p7345_p7, %p490_p8 }
  0x14   : > { %p542_p10 = scmp.lt.s32.totalorder (!%p491_p9), %s10253_s28, 1  ;;  %s12408_s30 = sld [smem:[#allocation10_spill]] (!%p491_p9) }
  0x15   : > { %494 = sbr.rel (%p491_p9) target bundleno = 7608 (0x1db8), region = 88  ;;  %s12410_s2 = sld [smem:[#allocation12_spill]] (!%p491_p9) }
  0x16   : > { %s10137_s23 = smov (!%p491_p9), 64   ;;  %s12397_s29 = smov (!%p491_p9), 96  }
  0x17   : > { %s12411_s26 = smov (!%p491_p9), 96   ;;  %s10139_s19 = smov (!%p491_p9), [#allocation3]  }
  0x1a   : > { %s543_s21 = scalar_select %p542_p10, %s10253_s28, 1  ;;  %v9373_v8 = vld [vmem:[%s12378_s3 + $0x78] sm:$0xff]   ;;  %v9377_v26 = vld [vmem:[%s12378_s3 + $0x70] sm:$0xff]   ;;  %v9381_v30 = vld [vmem:[%s12378_s3 + $0x68] sm:$0xff]   ;;  %v590_v61 = vlaneseq  ;;  %vm10135_vm0 = vmmov 0   ;;  %vm1151_vm1 = vcmask 261120  }
  0x1b   : > { %v9374_v9 = vld [vmem:[%s12380_s5 + $0x78] sm:$0xff]   ;;  %8671 = vmatprep.subr.bf16.mxu1 %v9373_v8  ;;  %v9378_v27 = vld [vmem:[%s12380_s5 + $0x70] sm:$0xff]   ;;  %v9382_v31 = vld [vmem:[%s12380_s5 + $0x68] sm:$0xff]   ;;  %vm1199_vm2 = vcmask 130048   ;;  %vm1276_vm3 = vcmask 257024   ;;  %vm1942_vm4 = vcmask 519424  }
  0x1c   : > { %s8651_s22 = sshll.u32 %s543_s21, 4  ;;  %v9375_v10 = vld [vmem:[%s12378_s3 + $0x38] sm:$0xff]   ;;  %8715 = vmatprep.subr.bf16.mxu0 %v9374_v9  ;;  %v9379_v28 = vld [vmem:[%s12378_s3 + $0x30] sm:$0xff]   ;;  %v9383_v32 = vld [vmem:[%s12378_s3 + $0x28] sm:$0xff]   ;;  %v10419_v63 = vshrl.u32 %v590_v61, 7  ;;  %s12409_s21 = sld [smem:[#allocation11_spill]] }
  0x1d   : > { %s546_s18 = scalar_lea.vmem %s12408_s30, %s8651_s22  ;;  %v9376_v11 = vld [vmem:[%s12380_s5 + $0x38] sm:$0xff]   ;;  %8672 = vmatpush3.bf16.msra.mxu1 %v9375_v10  ;;  %v9380_v29 = vld [vmem:[%s12380_s5 + $0x30] sm:$0xff]   ;;  %v9384_v33 = vld [vmem:[%s12380_s5 + $0x28] sm:$0xff]   ;;  %s10136_s22 = smov 32   ;;  %vm2608_vm5 = vcmask 781824   ;;  %vm3274_vm6 = vcmask 1044224  }
  0x1e   : > { %v548_v0 = vld [vmem:[%s546_s18] sm:$0xff]  ;;  %v549_v1 = vld [vmem:[%s546_s18 + $0x8] sm:$0xff]  ;;  %8716 = vmatpush3.bf16.msra.mxu0 %v9376_v11  ;;  %8673 = vmatprep.subr.bf16.mxu1 %v9377_v26  ;;  %v9389_v38 = vld [vmem:[%s12378_s3 + $0x58] sm:$0xff]   ;;  %s8670_s18 = sshll.u32 %s10253_s28, 8 }
  0x1f   : > { %v10285_v2 = vunpack.c.l.bf16 %v548_v0  ;;  %v10287_v3 = vunpack.c.h.bf16 %v548_v0  ;;  %v10289_v4 = vunpack.c.l.bf16 %v549_v1  ;;  %v10291_v5 = vunpack.c.h.bf16 %v549_v1  ;;  %8717 = vmatprep.subr.bf16.mxu0 %v9378_v27  ;;  %v9385_v34 = vld [vmem:[%s12378_s3 + $0x60] sm:$0xff]   ;;  %v9390_v39 = vld [vmem:[%s12380_s5 + $0x58] sm:$0xff]   ;;  %v9393_v42 = vld [vmem:[%s12378_s3 + $0x50] sm:$0xff]  }
  0x20   : > { %v9386_v35 = vld [vmem:[%s12380_s5 + $0x60] sm:$0xff]   ;;  %v9391_v40 = vld [vmem:[%s12378_s3 + $0x18] sm:$0xff]   ;;  %v9394_v43 = vld [vmem:[%s12380_s5 + $0x50] sm:$0xff]   ;;  %v10425_v1 = vsub.s32 0, %v10419_v63 }
  0x21   : > { %v556_v6 = vadd.f32 %v10287_v3, %v10285_v2  ;;  %v559_v7 = vadd.f32 %v10291_v5, %v10289_v4  ;;  %8674 = vmatpush3.bf16.msra.mxu1 %v9379_v28  ;;  %v9387_v36 = vld [vmem:[%s12378_s3 + $0x20] sm:$0xff]   ;;  %v9392_v41 = vld [vmem:[%s12380_s5 + $0x18] sm:$0xff]   ;;  %v9395_v44 = vld [vmem:[%s12378_s3 + $0x10] sm:$0xff]  }
  0x22   : > { %8718 = vmatpush3.bf16.msra.mxu0 %v9380_v29  ;;  %8675 = vmatprep.subr.bf16.mxu1 %v9381_v30  ;;  %v9388_v37 = vld [vmem:[%s12380_s5 + $0x20] sm:$0xff]   ;;  %v9396_v45 = vld [vmem:[%s12380_s5 + $0x10] sm:$0xff]   ;;  %v9397_v46 = vld [vmem:[%s12378_s3 + $0x48] sm:$0xff]  }
  0x23   : > { %557 = vadd.xlane.f32.xlu0 %v556_v6  ;;  %8719 = vmatprep.subr.bf16.mxu0 %v9382_v31  ;;  %v9398_v47 = vld [vmem:[%s12380_s5 + $0x48] sm:$0xff]   ;;  %v9401_v50 = vld [vmem:[%s12378_s3 + $0x40] sm:$0xff]   ;;  %v9405_v54 = vld [vmem:[%s12379_s4 + $0x78] sm:$0xff]   ;;  %v10428_v6 = vsub.s32 1, %v10419_v63 }
  0x24   : > { %v9399_v48 = vld [vmem:[%s12378_s3 + $0x8] sm:$0xff]   ;;  %v9402_v51 = vld [vmem:[%s12380_s5 + $0x40] sm:$0xff]   ;;  %v9406_v55 = vld [vmem:[%s12379_s4 + $0xf8] sm:$0xff]  }
  0x25   : > { %8676 = vmatpush3.bf16.msra.mxu1 %v9383_v32  ;;  %v9400_v49 = vld [vmem:[%s12380_s5 + $0x8] sm:$0xff]   ;;  %v9403_v52 = vld [vmem:[%s12378_s3] sm:$0xff]   ;;  %v9411_v32 = vld [vmem:[%s12379_s4 + $0x30] sm:$0xff]  }
  0x26   : > { %8720 = vmatpush3.bf16.msra.mxu0 %v9384_v33  ;;  %8677 = vmatprep.subr.bf16.mxu1 %v9385_v34  ;;  %v9404_v53 = vld [vmem:[%s12380_s5] sm:$0xff]   ;;  %v9412_v33 = vld [vmem:[%s12379_s4 + $0xb0] sm:$0xff]   ;;  %v9413_v34 = vld [vmem:[%s12379_s4 + $0x68] sm:$0xff]  }
  0x27   : > { %560 = vadd.xlane.f32.xlu0 %v559_v7  ;;  %8721 = vmatprep.subr.bf16.mxu0 %v9386_v35  ;;  %v554_v0 = vld [vmem:[%s12409_s21] sm:$0x3]  ;;  %v9414_v35 = vld [vmem:[%s12379_s4 + $0xe8] sm:$0xff]   ;;  %s10076_s21 = sshll.u32 %s10139_s19, 4  ;;  %s10077_s21 = int_to_ptr.vmem [resolvable:$false] %s10076_s21 }
  0x28   : > { %v555_v7 = vld [vmem:[%s12410_s2] sm:$0x3]  ;;  %v593_v9 = vrot.slane %v554_v0, %v10425_v1  ;;  %v597_v10 = vrot.slane %v554_v0, %v10428_v6 }
  0x29   : > { %8678 = vmatpush3.bf16.msra.mxu1 %v9387_v36  ;;  %v9415_v36 = vld [vmem:[%s12379_s4 + $0x28] sm:$0xff]  }
  0x2a   : > { %8722 = vmatpush3.bf16.msra.mxu0 %v9388_v37  ;;  %8679 = vmatprep.subr.bf16.mxu1 %v9389_v38  ;;  %v9416_v37 = vld [vmem:[%s12379_s4 + $0xa8] sm:$0xff]   ;;  %v9417_v38 = vld [vmem:[%s12379_s4 + $0x60] sm:$0xff]  }
  0x2b   : > { %8723 = vmatprep.subr.bf16.mxu0 %v9390_v39  ;;  %v9418_v39 = vld [vmem:[%s12379_s4 + $0xe0] sm:$0xff]  }
  0x2d   : > { %8680 = vmatpush3.bf16.msra.mxu1 %v9391_v40  ;;  %v9419_v40 = vld [vmem:[%s12379_s4 + $0x20] sm:$0xff]  }
  0x2e   : > { %8724 = vmatpush3.bf16.msra.mxu0 %v9392_v41  ;;  %8681 = vmatprep.subr.bf16.mxu1 %v9393_v42  ;;  %v9420_v41 = vld [vmem:[%s12379_s4 + $0xa0] sm:$0xff]   ;;  %v9421_v42 = vld [vmem:[%s12379_s4 + $0x58] sm:$0xff]  }
  0x2f   : > { %8725 = vmatprep.subr.bf16.mxu0 %v9394_v43  ;;  %v9422_v43 = vld [vmem:[%s12379_s4 + $0xd8] sm:$0xff]  }
  0x31   : > { %8682 = vmatpush3.bf16.msra.mxu1 %v9395_v44  ;;  %v9423_v44 = vld [vmem:[%s12379_s4 + $0x18] sm:$0xff]  }
  0x32   : > { %8726 = vmatpush3.bf16.msra.mxu0 %v9396_v45  ;;  %8683 = vmatprep.subr.bf16.mxu1 %v9397_v46  ;;  %v9424_v45 = vld [vmem:[%s12379_s4 + $0x98] sm:$0xff]   ;;  %v9425_v46 = vld [vmem:[%s12379_s4 + $0x50] sm:$0xff]  }
  0x33   : > { %8727 = vmatprep.subr.bf16.mxu0 %v9398_v47  ;;  %v9426_v47 = vld [vmem:[%s12379_s4 + $0xd0] sm:$0xff]  }
  0x35   : > { %8684 = vmatpush3.bf16.msra.mxu1 %v9399_v48  ;;  %v9427_v48 = vld [vmem:[%s12379_s4 + $0x10] sm:$0xff]  }
  0x36   : > { %8728 = vmatpush3.bf16.msra.mxu0 %v9400_v49  ;;  %8685 = vmatprep.subr.bf16.mxu1 %v9401_v50  ;;  %v9428_v49 = vld [vmem:[%s12379_s4 + $0x90] sm:$0xff]   ;;  %v9429_v50 = vld [vmem:[%s12379_s4 + $0x48] sm:$0xff]  }
  0x37   : > { %8729 = vmatprep.subr.bf16.mxu0 %v9402_v51  ;;  %v9430_v51 = vld [vmem:[%s12379_s4 + $0xc8] sm:$0xff]  }
  0x39   : > { %8686 = vmatpush3.bf16.msra.mxu1 %v9403_v52  ;;  %v9431_v52 = vld [vmem:[%s12379_s4 + $0x8] sm:$0xff]  }
  0x3a   : > { %8730 = vmatpush3.bf16.msra.mxu0 %v9404_v53  ;;  %8693 = vmatprep.subr.bf16.mxu1 %v9405_v54  ;;  %v9432_v53 = vld [vmem:[%s12379_s4 + $0x88] sm:$0xff]   ;;  %v9433_v54 = vld [vmem:[%s12379_s4 + $0x40] sm:$0xff]  }
  0x3b   : > { %8763 = vmatprep.subr.bf16.mxu0 %v9406_v55  ;;  %v9434_v55 = vld [vmem:[%s12379_s4 + $0xc0] sm:$0xff]  }
  0xac   : > { %v558_v12 = vpop.xlane.xlu0 %557 }
  0xad   : > { %v563_v13 = vmul.f32 0.00390625, %v558_v12 }
  0xaf   : > { %v10310_v14 = vsub.f32 %v10285_v2, %v563_v13  ;;  %v10313_v15 = vsub.f32 %v10287_v3, %v563_v13 }
  0xb0   : > { %v561_v16 = vpop.xlane.xlu0 %560 }
  0xb1   : > { %v564_v17 = vmul.f32 0.00390625, %v561_v16  ;;  %v569_v18 = vmul.f32 %v10310_v14, %v10310_v14  ;;  %v570_v19 = vmul.f32 %v10313_v15, %v10313_v15  ;;  %v608_v16 = vrot.slane %v555_v7, %v10425_v1 }
  0xb3   : > { %v10320_v20 = vsub.f32 %v10289_v4, %v564_v17  ;;  %v10323_v21 = vsub.f32 %v10291_v5, %v564_v17  ;;  %v573_v22 = vadd.f32 %v570_v19, %v569_v18  ;;  %v612_v17 = vrot.slane %v555_v7, %v10428_v6 }
  0xb5   : > { %574 = vadd.xlane.f32.xlu1 %v573_v22  ;;  %v571_v23 = vmul.f32 %v10320_v20, %v10320_v20  ;;  %v572_v24 = vmul.f32 %v10323_v21, %v10323_v21 }
  0xb7   : > { %v576_v25 = vadd.f32 %v572_v24, %v571_v23 }
  0xb9   : > { %577 = vadd.xlane.f32.xlu1 %v576_v25 }
 0x13e   : > { %v575_v56 = vpop.xlane.xlu1 %574 }
 0x13f   : > { %v579_v57 = vmul.f32 0.00390625, %v575_v56  ;;  %v9435_v56 = vld [vmem:[%s12379_s4] sm:$0xff]  }
 0x141   : > { %v581_v58 = vadd.f32 1e-05, %v579_v57  ;;  %v9436_v57 = vld [vmem:[%s12379_s4 + $0x80] sm:$0xff]  }
 0x142   : > { %v578_v59 = vpop.xlane.xlu1 %577 }
 0x143   : > { %10000 = vrsqrt.f32 %v581_v58  ;;  %v580_v60 = vmul.f32 0.00390625, %v578_v59  ;;  %v10134_v58 = vmov 0.0  }
 0x145   : > { %v582_v62 = vadd.f32 1e-05, %v580_v60 }
 0x147   : > { %10002 = vrsqrt.f32 %v582_v62 }
 0x150   : > { %v10001_v8 = vpop.eup %10000 }
 0x151   : > { %v585_v11 = vmul.f32 %v10001_v8, %v10310_v14  ;;  %v586_v12 = vmul.f32 %v10001_v8, %v10313_v15  ;;  %v9407_v14 = vld [vmem:[%s12379_s4 + $0x38] sm:$0xff]  }
 0x152   : > { %v9408_v15 = vld [vmem:[%s12379_s4 + $0xb8] sm:$0xff]  }
 0x153   : > { %v600_v18 = vmul.f32 %v593_v9, %v585_v11  ;;  %v601_v19 = vmul.f32 %v597_v10, %v586_v12 }
 0x154   : > { %v10003_v13 = vpop.eup %10002 }
 0x155   : > { %v587_v22 = vmul.f32 %v10003_v13, %v10320_v20  ;;  %v588_v23 = vmul.f32 %v10003_v13, %v10323_v21  ;;  %v615_v26 = vadd.f32 %v608_v16, %v600_v18  ;;  %v616_v27 = vadd.f32 %v612_v17, %v601_v19  ;;  %v9409_v20 = vld [vmem:[%s12379_s4 + $0x70] sm:$0xff]  }
 0x156   : > { %v9410_v21 = vld [vmem:[%s12379_s4 + $0xf0] sm:$0xff]  }
 0x157   : > { %v602_v24 = vmul.f32 %v593_v9, %v587_v22  ;;  %v603_v25 = vmul.f32 %v597_v10, %v588_v23  ;;  %v7366_v22 = vld [vmem:[%s12382_s7] ss:$0 sm:$0xff]  ;;  %v7487_v23 = vld [vmem:[%s12382_s7 + $0x1] ss:$0 sm:$0xff] }
 0x159   : > { %v617_v28 = vadd.f32 %v608_v16, %v602_v24  ;;  %v618_v29 = vadd.f32 %v612_v17, %v603_v25 }
 0x15b   : > { %v10447_v30 = vpack.c.bf16 %v617_v28, %v615_v26  ;;  %v10449_v31 = vpack.c.bf16 %v618_v29, %v616_v27 }
 0x15d   : > { %788 = vmatprep.mubr.bf16.mxu1 %v10449_v31  ;;  %1140 = vmatprep.mubr.bf16.mxu0 %v10449_v31 }
 0x15e   : > { %789 = vmatmul.mubr.bf16.vlgmr.msra.gmra.mxu1 %v10447_v30  ;;  %1141 = vmatmul.mubr.bf16.vlgmr.msra.gmra.mxu0 %v10447_v30 }
 0x15f   : > { %8694 = vmatpush3.bf16.msra.mxu1 %v9407_v14  ;;  %8764 = vmatpush3.bf16.msra.mxu0 %v9408_v15 }
 0x160   : > { %964 = vmatprep.mubr.bf16.mxu1 %v10449_v31  ;;  %1626 = vmatprep.mubr.bf16.mxu0 %v10449_v31 }
 0x161   : > { %8695 = vmatprep.subr.bf16.mxu1 %v9409_v20  ;;  %8765 = vmatprep.subr.bf16.mxu0 %v9410_v21 }
 0x163   : > { %8696 = vmatpush3.bf16.msra.mxu1 %v9411_v32  ;;  %8766 = vmatpush3.bf16.msra.mxu0 %v9412_v33 }
 0x164   : > { %8697 = vmatprep.subr.bf16.mxu1 %v9413_v34  ;;  %8767 = vmatprep.subr.bf16.mxu0 %v9414_v35 }
 0x167   : > { %8698 = vmatpush3.bf16.msra.mxu1 %v9415_v36  ;;  %8768 = vmatpush3.bf16.msra.mxu0 %v9416_v37  ;;  %v7349_v37 = vld [vmem:[%s12381_s6] ss:$0 sm:$0xff] }
 0x168   : > { %8699 = vmatprep.subr.bf16.mxu1 %v9417_v38  ;;  %8769 = vmatprep.subr.bf16.mxu0 %v9418_v39  ;;  %v7383_v39 = vld [vmem:[%s12383_s8] ss:$0 sm:$0xff] }
 0x16b   : > { %8700 = vmatpush3.bf16.msra.mxu1 %v9419_v40  ;;  %8770 = vmatpush3.bf16.msra.mxu0 %v9420_v41 }
 0x16c   : > { %8701 = vmatprep.subr.bf16.mxu1 %v9421_v42  ;;  %8771 = vmatprep.subr.bf16.mxu0 %v9422_v43 }
 0x16f   : > { %8702 = vmatpush3.bf16.msra.mxu1 %v9423_v44  ;;  %8772 = vmatpush3.bf16.msra.mxu0 %v9424_v45 }
 0x170   : > { %8703 = vmatprep.subr.bf16.mxu1 %v9425_v46  ;;  %8773 = vmatprep.subr.bf16.mxu0 %v9426_v47 }
 0x173   : > { %8704 = vmatpush3.bf16.msra.mxu1 %v9427_v48  ;;  %8774 = vmatpush3.bf16.msra.mxu0 %v9428_v49 }
 0x174   : > { %8705 = vmatprep.subr.bf16.mxu1 %v9429_v50  ;;  %8775 = vmatprep.subr.bf16.mxu0 %v9430_v51 }
 0x177   : > { %8706 = vmatpush3.bf16.msra.mxu1 %v9431_v52  ;;  %8776 = vmatpush3.bf16.msra.mxu0 %v9432_v53 }
 0x178   : > { %8707 = vmatprep.subr.bf16.mxu1 %v9433_v54  ;;  %8777 = vmatprep.subr.bf16.mxu0 %v9434_v55 }
 0x17b   : > { %8708 = vmatpush3.bf16.msra.mxu1 %v9435_v56  ;;  %8778 = vmatpush3.bf16.msra.mxu0 %v9436_v57 }
 0x17c   : > { %9231 = vmatprep.subr.bf16.mxu1 %v10134_v58  ;;  %9243 = vmatprep.subr.bf16.mxu0 %v10134_v58 }
 0x17e   : > { %965 = vmatmul.mubr.bf16.vlgmr.msra.gmra.mxu1 %v10447_v30  ;;  %1627 = vmatmul.mubr.bf16.vlgmr.msra.gmra.mxu0 %v10447_v30 }
 0x17f   : > { %9233 = vmatprep.mubr.msk.bf16.mxu1 %vm10135_vm0, %v10134_v58  ;;  %9245 = vmatprep.mubr.msk.bf16.mxu0 %vm10135_vm0, %v10134_v58 }
 0x21e   : > { %v8687_v59 = vpop.f32.mrf.mxu1  ;;  %v8731_v60 = vpop.f32.mrf.mxu0 }
 0x220   : > { %v8688_v61 = vpop.f32.mrf.mxu1  ;;  %v8732_v62 = vpop.f32.mrf.mxu0 }
 0x221   : > { %v8689_v34 = vadd.f32 %v8688_v61, %v8687_v59  ;;  %v8733_v38 = vadd.f32 %v8732_v62, %v8731_v60 }
 0x222   : > { %v8690_v0 = vpop.f32.mrf.mxu1  ;;  %v8734_v7 = vpop.f32.mrf.mxu0 }
 0x223   : > { %v791_v42 = vadd.f32 %v8689_v34, %v7349_v37  ;;  %v1143_v43 = vadd.f32 %v8733_v38, %v7383_v39  ;;  %v9456_v34 = vld [vmem:[%s12380_s5 + $0xb0] sm:$0xff]   ;;  %v9460_v38 = vld [vmem:[%s12380_s5 + $0xa0] sm:$0xff]  }
 0x224   : > { %v8691_v8 = vpop.f32.mrf.mxu1  ;;  %v8735_v9 = vpop.f32.mrf.mxu0 }
 0x225   : > { %v8692_v20 = vadd.f32 %v8691_v8, %v8690_v0  ;;  %v8736_v33 = vadd.f32 %v8735_v9, %v8734_v7  ;;  %v9437_v0 = vld [vmem:[%s12378_s3 + $0xf8] sm:$0xff]  }
 0x227   : > { %v794_v40 = vadd.f32 %v8692_v20, %v7349_v37  ;;  %v1146_v41 = vadd.f32 %v8736_v33, %v7383_v39  ;;  %v9452_v20 = vld [vmem:[%s12378_s3 + $0x80] sm:$0xff]   ;;  %v9455_v33 = vld [vmem:[%s12380_s5 + $0xf0] sm:$0xff]   ;;  %v9461_v39 = vld [vmem:[%s12380_s5 + $0xd8] sm:$0xff]  }
 0x228   : > { %v9459_v37 = vld [vmem:[%s12380_s5 + $0xe0] sm:$0xff]  }
 0x229   : > { %v1149_v44 = vpack.c.bf16 %v794_v40, %v791_v42  ;;  %v1223_v45 = vpack.c.bf16 %v1146_v41, %v1143_v43  ;;  %v9462_v40 = vld [vmem:[%s12380_s5 + $0x98] sm:$0xff]   ;;  %v9463_v41 = vld [vmem:[%s12380_s5 + $0xd0] sm:$0xff]   ;;  %v9465_v43 = vld [vmem:[%s12380_s5 + $0xc8] sm:$0xff]  }
 0x22a   : > { %v9464_v42 = vld [vmem:[%s12380_s5 + $0x90] sm:$0xff]  }
 0x23e   : > { %v8709_v10 = vpop.f32.mrf.mxu1  ;;  %v8779_v11 = vpop.f32.mrf.mxu0 }
 0x240   : > { %v8710_v12 = vpop.f32.mrf.mxu1  ;;  %v8780_v13 = vpop.f32.mrf.mxu0 }
 0x241   : > { %v8711_v18 = vadd.f32 %v8710_v12, %v8709_v10  ;;  %v8781_v19 = vadd.f32 %v8780_v13, %v8779_v11  ;;  %v9438_v13 = vld [vmem:[%s12378_s3 + $0xb8] sm:$0xff]  }
 0x242   : > { %v8712_v16 = vpop.f32.mrf.mxu1  ;;  %v8782_v17 = vpop.f32.mrf.mxu0 }
 0x243   : > { %v967_v28 = vadd.f32 %v8711_v18, %v7366_v22  ;;  %v1629_v29 = vadd.f32 %v8781_v19, %v7487_v23  ;;  %v9440_v18 = vld [vmem:[%s12378_s3 + $0xb0] sm:$0xff]   ;;  %v9441_v19 = vld [vmem:[%s12378_s3 + $0xe8] sm:$0xff]  }
 0x244   : > { %v8713_v24 = vpop.f32.mrf.mxu1  ;;  %v8783_v25 = vpop.f32.mrf.mxu0 }
 0x245   : > { %v8714_v26 = vadd.f32 %v8713_v24, %v8712_v16  ;;  %v8784_v27 = vadd.f32 %v8783_v25, %v8782_v17  ;;  %v9439_v17 = vld [vmem:[%s12378_s3 + $0xf0] sm:$0xff]   ;;  %v9444_v24 = vld [vmem:[%s12378_s3 + $0xa0] sm:$0xff]   ;;  %v9445_v25 = vld [vmem:[%s12378_s3 + $0xd8] sm:$0xff]  }
 0x247   : > { %v970_v14 = vadd.f32 %v8714_v26, %v7366_v22  ;;  %v1632_v15 = vadd.f32 %v8784_v27, %v7487_v23  ;;  %v9442_v22 = vld [vmem:[%s12378_s3 + $0xa8] sm:$0xff]   ;;  %v9443_v23 = vld [vmem:[%s12378_s3 + $0xe0] sm:$0xff]   ;;  %v9446_v26 = vld [vmem:[%s12378_s3 + $0x98] sm:$0xff]  }
 0x248   : > { %v9447_v27 = vld [vmem:[%s12378_s3 + $0xd0] sm:$0xff]  }
 0x249   : > { %v1150_v21 = vpack.c.bf16 %v970_v14, %v967_v28  ;;  %v1814_v32 = vpack.c.bf16 %v1632_v15, %v1629_v29  ;;  %v9448_v28 = vld [vmem:[%s12378_s3 + $0x90] sm:$0xff]   ;;  %v9449_v29 = vld [vmem:[%s12378_s3 + $0xc8] sm:$0xff]   ;;  %v9451_v15 = vld [vmem:[%s12378_s3 + $0xc0] sm:$0xff]  }
 0x24a   : > { %v9450_v14 = vld [vmem:[%s12378_s3 + $0x88] sm:$0xff]  }
 0x24b   : > { %v1156_v35 = vsel %vm1151_vm1, %v1150_v21, 0  ;;  %v1819_v36 = vsel %vm1151_vm1, %v1814_v32, 0  ;;  %v9453_v21 = vld [vmem:[%s12380_s5 + $0xf8] sm:$0xff]  }
 0x24c   : > { %9232 = vmatpush3.bf16.xpose.msra.mxu1 %v1156_v35  ;;  %9244 = vmatpush3.bf16.xpose.msra.mxu0 %v1819_v36  ;;  %v9454_v32 = vld [vmem:[%s12380_s5 + $0xb8] sm:$0xff]   ;;  %v9457_v35 = vld [vmem:[%s12380_s5 + $0xe8] sm:$0xff]  }
 0x24d   : > { %9237 = vmatprep.subr.bf16.mxu1 %v10134_v58  ;;  %9249 = vmatprep.subr.bf16.mxu0 %v10134_v58  ;;  %v9458_v36 = vld [vmem:[%s12380_s5 + $0xa8] sm:$0xff]  }
 0x253   : > { %9234 = vmatmul.mubr.msk.bf16.vlgmr.msra.gmra.mxu1 %vm1151_vm1, %v1149_v44  ;;  %v9466_v44 = vld [vmem:[%s12380_s5 + $0x88] sm:$0xff]  }
 0x254   : > { %9238 = vmatpush3.bf16.msra.mxu1 %v1223_v45  ;;  %9239 = vmatprep.mubr.msk.bf16.mxu1 %vm10135_vm0, %v10134_v58  ;;  %v9467_v45 = vld [vmem:[%s12380_s5 + $0xc0] sm:$0xff]  }
 0x255   : > { %8741 = vmatprep.subr.bf16.mxu1 %v9437_v0  ;;  %v9484_v0 = vld [vmem:[%s12379_s4 + $0x100] sm:$0xff]  }
 0x313   : > { %v1192_v46 = vpop.f32.mrf.mxu1 }
 0x314   : > { %v1200_v47 = vsel %vm1199_vm2, %v1192_v46, -inf }
 0x315   : > { %1201 = vmax.xlane.f32.xlu0 %v1200_v47  ;;  %v9235_v48 = vpop.f32.mrf.mxu1  ;;  %v9469_v47 = vld [vmem:[%s12379_s4 + $0x178] sm:$0xff]  }
 0x316   : > { %v9470_v48 = vld [vmem:[%s12379_s4 + $0x138] sm:$0xff]  }
 0x317   : > { %v1195_v49 = vpop.f32.mrf.mxu1 }
 0x318   : > { %v1203_v50 = vsel %vm1199_vm2, %v1195_v49, -inf }
 0x319   : > { %1204 = vmax.xlane.f32.xlu1 %v1203_v50  ;;  %v9236_v51 = vpop.f32.mrf.mxu1  ;;  %v9472_v50 = vld [vmem:[%s12379_s4 + $0x130] sm:$0xff]  }
 0x31a   : > { %v9473_v51 = vld [vmem:[%s12379_s4 + $0x168] sm:$0xff]  }
 0x39e   : > { %v1202_v52 = vpop.xlane.xlu0 %1201 }
 0x39f   : > { %v1206_v53 = vsub.f32 %v1192_v46, %v1202_v52  ;;  %v9468_v46 = vld [vmem:[%s12380_s5 + $0x80] sm:$0xff]   ;;  %v9474_v52 = vld [vmem:[%s12379_s4 + $0x128] sm:$0xff]  }
 0x3a1   : > { %v1208_v54 = vmul.f32 1.442695, %v1206_v53  ;;  %v9475_v53 = vld [vmem:[%s12379_s4 + $0x160] sm:$0xff]  }
 0x3a2   : > { %v1205_v55 = vpop.xlane.xlu1 %1204 }
 0x3a3   : > { %10004 = vpow2.f32 %v1208_v54  ;;  %v1207_v56 = vsub.f32 %v1195_v49, %v1205_v55  ;;  %v9471_v49 = vld [vmem:[%s12379_s4 + $0x170] sm:$0xff]   ;;  %v9476_v54 = vld [vmem:[%s12379_s4 + $0x120] sm:$0xff]   ;;  %v9477_v55 = vld [vmem:[%s12379_s4 + $0x158] sm:$0xff]  }
 0x3a5   : > { %v1210_v57 = vmul.f32 1.442695, %v1207_v56  ;;  %v9478_v56 = vld [vmem:[%s12379_s4 + $0x118] sm:$0xff]  }
 0x3a7   : > { %10006 = vpow2.f32 %v1210_v57  ;;  %v9479_v57 = vld [vmem:[%s12379_s4 + $0x150] sm:$0xff]  }
 0x3b0   : > { %v10005_v59 = vpop.eup %10004 }
 0x3b1   : > { %v1212_v60 = vsel %vm1199_vm2, %v10005_v59, 0.0 }
 0x3b2   : > { %1213 = vadd.xlane.f32.xlu0 %v1212_v60  ;;  %v9481_v60 = vld [vmem:[%s12379_s4 + $0x148] sm:$0xff]  }
 0x3b4   : > { %v10007_v61 = vpop.eup %10006 }
 0x3b5   : > { %v1215_v62 = vsel %vm1199_vm2, %v10007_v61, 0.0 }
 0x3b6   : > { %1216 = vadd.xlane.f32.xlu1 %v1215_v62  ;;  %v9483_v62 = vld [vmem:[%s12379_s4 + $0x140] sm:$0xff]  }
 0x43b   : > { %v1214_v7 = vpop.xlane.xlu0 %1213 }
 0x43c   : > { %10008 = vrcp.f32 %v1214_v7 }
 0x43f   : > { %v1217_v8 = vpop.xlane.xlu1 %1216 }
 0x440   : > { %10010 = vrcp.f32 %v1217_v8 }
 0x449   : > { %v10009_v9 = vpop.eup %10008 }
 0x44a   : > { %v1220_v11 = vmul.f32 %v10009_v9, %v10005_v59  ;;  %v9480_v59 = vld [vmem:[%s12379_s4 + $0x110] sm:$0xff]  }
 0x44d   : > { %v10011_v10 = vpop.eup %10010 }
 0x44e   : > { %v1221_v12 = vmul.f32 %v10011_v10, %v10007_v61  ;;  %v9482_v61 = vld [vmem:[%s12379_s4 + $0x108] sm:$0xff]  }
 0x450   : > { %v1222_v16 = vpack.c.bf16 %v1221_v12, %v1220_v11 }
 0x452   : > { %9240 = vmatmul.mubr.msk.bf16.vlgmr.msra.gmra.mxu1 %vm1199_vm2, %v1222_v16 }
 0x453   : > { %8742 = vmatpush3.bf16.msra.mxu1 %v9438_v13  ;;  %1448 = vmatprep.mubr.bf16.mxu1 %v10449_v31 }
 0x454   : > { %8743 = vmatprep.subr.bf16.mxu1 %v9439_v17 }
 0x457   : > { %8744 = vmatpush3.bf16.msra.mxu1 %v9440_v18 }
 0x458   : > { %8745 = vmatprep.subr.bf16.mxu1 %v9441_v19  ;;  %v7437_v19 = vld [vmem:[%s12381_s6 + $0x1] ss:$0 sm:$0xff] }
 0x45b   : > { %8746 = vmatpush3.bf16.msra.mxu1 %v9442_v22 }
 0x45c   : > { %8747 = vmatprep.subr.bf16.mxu1 %v9443_v23 }
 0x45f   : > { %8748 = vmatpush3.bf16.msra.mxu1 %v9444_v24 }
 0x460   : > { %8749 = vmatprep.subr.bf16.mxu1 %v9445_v25 }
 0x463   : > { %8750 = vmatpush3.bf16.msra.mxu1 %v9446_v26 }
 0x464   : > { %8751 = vmatprep.subr.bf16.mxu1 %v9447_v27 }
 0x467   : > { %8752 = vmatpush3.bf16.msra.mxu1 %v9448_v28 }
 0x468   : > { %8753 = vmatprep.subr.bf16.mxu1 %v9449_v29 }
 0x46b   : > { %8754 = vmatpush3.bf16.msra.mxu1 %v9450_v14 }
 0x46c   : > { %8755 = vmatprep.subr.bf16.mxu1 %v9451_v15  ;;  %v7537_v15 = vld [vmem:[%s12383_s8 + $0x1] ss:$0 sm:$0xff] }
 0x46f   : > { %8756 = vmatpush3.bf16.msra.mxu1 %v9452_v20 }
 0x470   : > { %8785 = vmatprep.subr.bf16.mxu1 %v9453_v21 }
 0x472   : > { %1449 = vmatmul.mubr.bf16.vlgmr.msra.gmra.mxu1 %v10447_v30 }
 0x473   : > { %8786 = vmatpush3.bf16.msra.mxu1 %v9454_v32  ;;  %1804 = vmatprep.mubr.bf16.mxu1 %v10449_v31 }
 0x474   : > { %8787 = vmatprep.subr.bf16.mxu1 %v9455_v33 }
 0x477   : > { %8788 = vmatpush3.bf16.msra.mxu1 %v9456_v34 }
 0x478   : > { %8789 = vmatprep.subr.bf16.mxu1 %v9457_v35 }
 0x47b   : > { %8790 = vmatpush3.bf16.msra.mxu1 %v9458_v36 }
 0x47c   : > { %8791 = vmatprep.subr.bf16.mxu1 %v9459_v37 }
 0x47f   : > { %8792 = vmatpush3.bf16.msra.mxu1 %v9460_v38 }
 0x480   : > { %8793 = vmatprep.subr.bf16.mxu1 %v9461_v39  ;;  %v7641_v39 = vld [vmem:[%s12382_s7 + $0x2] ss:$0 sm:$0xff] }
 0x483   : > { %8794 = vmatpush3.bf16.msra.mxu1 %v9462_v40 }
 0x484   : > { %8795 = vmatprep.subr.bf16.mxu1 %v9463_v41 }
 0x487   : > { %8796 = vmatpush3.bf16.msra.mxu1 %v9464_v42 }
 0x488   : > { %8797 = vmatprep.subr.bf16.mxu1 %v9465_v43 }
 0x48b   : > { %8798 = vmatpush3.bf16.msra.mxu1 %v9466_v44 }
 0x48c   : > { %8799 = vmatprep.subr.bf16.mxu1 %v9467_v45 }
 0x48f   : > { %8800 = vmatpush3.bf16.msra.mxu1 %v9468_v46 }
 0x490   : > { %8833 = vmatprep.subr.bf16.mxu1 %v9469_v47 }
 0x492   : > { %1805 = vmatmul.mubr.bf16.vlgmr.msra.gmra.mxu1 %v10447_v30 }
 0x493   : > { %8834 = vmatpush3.bf16.msra.mxu1 %v9470_v48  ;;  %2292 = vmatprep.mubr.bf16.mxu1 %v10449_v31 }
 0x494   : > { %8835 = vmatprep.subr.bf16.mxu1 %v9471_v49 }
 0x497   : > { %8836 = vmatpush3.bf16.msra.mxu1 %v9472_v50 }
 0x498   : > { %8837 = vmatprep.subr.bf16.mxu1 %v9473_v51 }
 0x49b   : > { %8838 = vmatpush3.bf16.msra.mxu1 %v9474_v52 }
 0x49c   : > { %8839 = vmatprep.subr.bf16.mxu1 %v9475_v53 }
 0x49f   : > { %8840 = vmatpush3.bf16.msra.mxu1 %v9476_v54 }
 0x4a0   : > { %8841 = vmatprep.subr.bf16.mxu1 %v9477_v55 }
 0x4a3   : > { %8842 = vmatpush3.bf16.msra.mxu1 %v9478_v56 }
 0x4a4   : > { %8843 = vmatprep.subr.bf16.mxu1 %v9479_v57 }
 0x4a7   : > { %8844 = vmatpush3.bf16.msra.mxu1 %v9480_v59 }
 0x4a8   : > { %8845 = vmatprep.subr.bf16.mxu1 %v9481_v60 }
 0x4ab   : > { %8846 = vmatpush3.bf16.msra.mxu1 %v9482_v61 }
 0x4ac   : > { %8847 = vmatprep.subr.bf16.mxu1 %v9483_v62 }
 0x4af   : > { %8848 = vmatpush3.bf16.msra.mxu1 %v9484_v0  ;;  %v9485_v0 = vld [vmem:[%s12378_s3 + $0x178] sm:$0xff]  }
 0x4b0   : > { %9255 = vmatprep.subr.bf16.mxu1 %v10134_v58 }
 0x4b2   : > { %2293 = vmatmul.mubr.bf16.vlgmr.msra.gmra.mxu1 %v10447_v30 }
 0x4b3   : > { %9257 = vmatprep.mubr.msk.bf16.mxu1 %vm10135_vm0, %v10134_v58 }
 0x512   : > { %v1261_v7 = vpop.f32.mrf.mxu1 }
 0x513   : > { %v8652_v8 = vpack.c.bf16 %v1261_v7, %v1261_v7 }
 0x514   : > { %v9241_v9 = vpop.f32.mrf.mxu1 }
 0x515   : > { %1277 = vst.msk [vmem:[#allocation2] sm:$0xf] %vm1276_vm3, %v8652_v8 }
 0x516   : > { %v1264_v10 = vpop.f32.mrf.mxu1 }
 0x517   : > { %v8653_v11 = vpack.c.bf16 %v1264_v10, %v1264_v10 }
 0x518   : > { %v9242_v12 = vpop.f32.mrf.mxu1 }
 0x519   : > { %1278 = vst.msk [vmem:[#allocation2 + $0x8] sm:$0xf] %vm1276_vm3, %v8653_v11 }
 0x532   : > { %v8757_v13 = vpop.f32.mrf.mxu1 }
 0x534   : > { %v8758_v16 = vpop.f32.mrf.mxu1 }
 0x535   : > { %v8759_v18 = vadd.f32 %v8758_v16, %v8757_v13  ;;  %v9486_v13 = vld [vmem:[%s12378_s3 + $0x138] sm:$0xff]  }
 0x536   : > { %v8760_v17 = vpop.f32.mrf.mxu1 }
 0x537   : > { %v1451_v24 = vadd.f32 %v8759_v18, %v7437_v19  ;;  %v9488_v18 = vld [vmem:[%s12378_s3 + $0x130] sm:$0xff]  }
 0x538   : > { %v8761_v22 = vpop.f32.mrf.mxu1 }
 0x539   : > { %v8762_v23 = vadd.f32 %v8761_v22, %v8760_v17  ;;  %v9487_v17 = vld [vmem:[%s12378_s3 + $0x170] sm:$0xff]   ;;  %v9490_v22 = vld [vmem:[%s12378_s3 + $0x128] sm:$0xff]  }
 0x53b   : > { %v1454_v25 = vadd.f32 %v8762_v23, %v7437_v19  ;;  %v9489_v19 = vld [vmem:[%s12378_s3 + $0x168] sm:$0xff]   ;;  %v9491_v23 = vld [vmem:[%s12378_s3 + $0x160] sm:$0xff]  }
 0x53d   : > { %v1813_v26 = vpack.c.bf16 %v1454_v25, %v1451_v24  ;;  %v9492_v24 = vld [vmem:[%s12378_s3 + $0x120] sm:$0xff]   ;;  %v9493_v25 = vld [vmem:[%s12378_s3 + $0x158] sm:$0xff]  }
 0x53f   : > { %9246 = vmatmul.mubr.msk.bf16.vlgmr.msra.gmra.mxu0 %vm1151_vm1, %v1813_v26  ;;  %v9494_v26 = vld [vmem:[%s12378_s3 + $0x118] sm:$0xff]  }
 0x540   : > { %9251 = vmatprep.mubr.msk.bf16.mxu0 %vm10135_vm0, %v10134_v58 }
 0x552   : > { %v8801_v27 = vpop.f32.mrf.mxu1 }
 0x554   : > { %v8802_v28 = vpop.f32.mrf.mxu1 }
 0x555   : > { %v8803_v14 = vadd.f32 %v8802_v28, %v8801_v27  ;;  %v9495_v27 = vld [vmem:[%s12378_s3 + $0x150] sm:$0xff]  }
 0x556   : > { %v8804_v29 = vpop.f32.mrf.mxu1  ;;  %v9496_v28 = vld [vmem:[%s12378_s3 + $0x110] sm:$0xff]  }
 0x557   : > { %v1807_v32 = vadd.f32 %v8803_v14, %v7537_v15  ;;  %v9498_v14 = vld [vmem:[%s12378_s3 + $0x108] sm:$0xff]  }
 0x558   : > { %v8805_v20 = vpop.f32.mrf.mxu1 }
 0x559   : > { %v8806_v21 = vadd.f32 %v8805_v20, %v8804_v29  ;;  %v9497_v29 = vld [vmem:[%s12378_s3 + $0x148] sm:$0xff]   ;;  %v9500_v20 = vld [vmem:[%s12378_s3 + $0x100] sm:$0xff]  }
 0x55b   : > { %v1810_v33 = vadd.f32 %v8806_v21, %v7537_v15  ;;  %v9499_v15 = vld [vmem:[%s12378_s3 + $0x140] sm:$0xff]   ;;  %v9501_v21 = vld [vmem:[%s12380_s5 + $0x178] sm:$0xff]  }
 0x55d   : > { %v1885_v34 = vpack.c.bf16 %v1810_v33, %v1807_v32  ;;  %v9502_v32 = vld [vmem:[%s12380_s5 + $0x138] sm:$0xff]   ;;  %v9503_v33 = vld [vmem:[%s12380_s5 + $0x170] sm:$0xff]  }
 0x55f   : > { %9250 = vmatpush3.bf16.msra.mxu0 %v1885_v34  ;;  %v9504_v34 = vld [vmem:[%s12380_s5 + $0x130] sm:$0xff]  }
 0x560   : > { %8811 = vmatprep.subr.bf16.mxu0 %v9485_v0  ;;  %v9532_v0 = vld [vmem:[%s12379_s4 + $0x180] sm:$0xff]  }
 0x572   : > { %v8849_v35 = vpop.f32.mrf.mxu1 }
 0x574   : > { %v8850_v36 = vpop.f32.mrf.mxu1 }
 0x575   : > { %v8851_v38 = vadd.f32 %v8850_v36, %v8849_v35  ;;  %v9505_v35 = vld [vmem:[%s12380_s5 + $0x168] sm:$0xff]  }
 0x576   : > { %v8852_v37 = vpop.f32.mrf.mxu1  ;;  %v9506_v36 = vld [vmem:[%s12380_s5 + $0x128] sm:$0xff]  }
 0x577   : > { %v2295_v42 = vadd.f32 %v8851_v38, %v7641_v39  ;;  %v9508_v38 = vld [vmem:[%s12380_s5 + $0x120] sm:$0xff]  }
 0x578   : > { %v8853_v40 = vpop.f32.mrf.mxu1 }
 0x579   : > { %v8854_v41 = vadd.f32 %v8853_v40, %v8852_v37  ;;  %v9507_v37 = vld [vmem:[%s12380_s5 + $0x160] sm:$0xff]   ;;  %v9510_v40 = vld [vmem:[%s12380_s5 + $0x118] sm:$0xff]  }
 0x57b   : > { %v2298_v43 = vadd.f32 %v8854_v41, %v7641_v39  ;;  %v9509_v39 = vld [vmem:[%s12380_s5 + $0x158] sm:$0xff]   ;;  %v9511_v41 = vld [vmem:[%s12380_s5 + $0x150] sm:$0xff]  }
 0x57d   : > { %v2480_v44 = vpack.c.bf16 %v2298_v43, %v2295_v42  ;;  %v9512_v42 = vld [vmem:[%s12380_s5 + $0x110] sm:$0xff]   ;;  %v9513_v43 = vld [vmem:[%s12380_s5 + $0x148] sm:$0xff]  }
 0x57f   : > { %v2485_v45 = vsel %vm1151_vm1, %v2480_v44, 0  ;;  %v9514_v44 = vld [vmem:[%s12380_s5 + $0x108] sm:$0xff]  }
 0x580   : > { %9256 = vmatpush3.bf16.xpose.msra.mxu1 %v2485_v45  ;;  %v9515_v45 = vld [vmem:[%s12380_s5 + $0x140] sm:$0xff]  }
 0x581   : > { %9261 = vmatprep.subr.bf16.mxu1 %v10134_v58 }
 0x5ff   : > { %v1855_v46 = vpop.f32.mrf.mxu0 }
 0x600   : > { %v1862_v47 = vsel %vm1199_vm2, %v1855_v46, -inf }
 0x601   : > { %1863 = vmax.xlane.f32.xlu0 %v1862_v47  ;;  %v9247_v48 = vpop.f32.mrf.mxu0  ;;  %v9517_v47 = vld [vmem:[%s12379_s4 + $0x1f8] sm:$0xff]  }
 0x602   : > { %v9518_v48 = vld [vmem:[%s12379_s4 + $0x1b8] sm:$0xff]  }
 0x603   : > { %v1858_v49 = vpop.f32.mrf.mxu0 }
 0x604   : > { %v1865_v50 = vsel %vm1199_vm2, %v1858_v49, -inf }
 0x605   : > { %1866 = vmax.xlane.f32.xlu1 %v1865_v50  ;;  %v9248_v51 = vpop.f32.mrf.mxu0  ;;  %v9520_v50 = vld [vmem:[%s12379_s4 + $0x1b0] sm:$0xff]  }
 0x606   : > { %v9521_v51 = vld [vmem:[%s12379_s4 + $0x1e8] sm:$0xff]  }
 0x68a   : > { %v1864_v52 = vpop.xlane.xlu0 %1863 }
 0x68b   : > { %v1868_v53 = vsub.f32 %v1855_v46, %v1864_v52  ;;  %v9516_v46 = vld [vmem:[%s12380_s5 + $0x100] sm:$0xff]   ;;  %v9522_v52 = vld [vmem:[%s12379_s4 + $0x1a8] sm:$0xff]  }
 0x68d   : > { %v1870_v54 = vmul.f32 1.442695, %v1868_v53  ;;  %v9523_v53 = vld [vmem:[%s12379_s4 + $0x1e0] sm:$0xff]  }
 0x68e   : > { %v1867_v55 = vpop.xlane.xlu1 %1866 }
 0x68f   : > { %10012 = vpow2.f32 %v1870_v54  ;;  %v1869_v56 = vsub.f32 %v1858_v49, %v1867_v55  ;;  %v9519_v49 = vld [vmem:[%s12379_s4 + $0x1f0] sm:$0xff]   ;;  %v9524_v54 = vld [vmem:[%s12379_s4 + $0x1a0] sm:$0xff]   ;;  %v9525_v55 = vld [vmem:[%s12379_s4 + $0x1d8] sm:$0xff]  }
 0x691   : > { %v1872_v57 = vmul.f32 1.442695, %v1869_v56  ;;  %v9526_v56 = vld [vmem:[%s12379_s4 + $0x198] sm:$0xff]  }
 0x693   : > { %10014 = vpow2.f32 %v1872_v57  ;;  %v9527_v57 = vld [vmem:[%s12379_s4 + $0x1d0] sm:$0xff]  }
 0x69c   : > { %v10013_v59 = vpop.eup %10012 }
 0x69d   : > { %v1874_v60 = vsel %vm1199_vm2, %v10013_v59, 0.0 }
 0x69e   : > { %1875 = vadd.xlane.f32.xlu0 %v1874_v60  ;;  %v9529_v60 = vld [vmem:[%s12379_s4 + $0x1c8] sm:$0xff]  }
 0x6a0   : > { %v10015_v61 = vpop.eup %10014 }
 0x6a1   : > { %v1877_v62 = vsel %vm1199_vm2, %v10015_v61, 0.0 }
 0x6a2   : > { %1878 = vadd.xlane.f32.xlu1 %v1877_v62  ;;  %v9531_v62 = vld [vmem:[%s12379_s4 + $0x1c0] sm:$0xff]  }
 0x727   : > { %v1876_v7 = vpop.xlane.xlu0 %1875 }
 0x728   : > { %10016 = vrcp.f32 %v1876_v7 }
 0x72b   : > { %v1879_v8 = vpop.xlane.xlu1 %1878 }
 0x72c   : > { %10018 = vrcp.f32 %v1879_v8 }
 0x735   : > { %v10017_v9 = vpop.eup %10016 }
 0x736   : > { %v1882_v11 = vmul.f32 %v10017_v9, %v10013_v59  ;;  %v9528_v59 = vld [vmem:[%s12379_s4 + $0x190] sm:$0xff]  }
 0x739   : > { %v10019_v10 = vpop.eup %10018 }
 0x73a   : > { %v1883_v12 = vmul.f32 %v10019_v10, %v10015_v61  ;;  %v9530_v61 = vld [vmem:[%s12379_s4 + $0x188] sm:$0xff]  }
 0x73c   : > { %v1884_v16 = vpack.c.bf16 %v1883_v12, %v1882_v11 }
 0x73e   : > { %9252 = vmatmul.mubr.msk.bf16.vlgmr.msra.gmra.mxu0 %vm1199_vm2, %v1884_v16 }
 0x73f   : > { %8812 = vmatpush3.bf16.msra.mxu0 %v9486_v13  ;;  %2114 = vmatprep.mubr.bf16.mxu0 %v10449_v31 }
 0x740   : > { %8813 = vmatprep.subr.bf16.mxu0 %v9487_v17  ;;  %v7591_v17 = vld [vmem:[%s12381_s6 + $0x2] ss:$0 sm:$0xff] }
 0x743   : > { %8814 = vmatpush3.bf16.msra.mxu0 %v9488_v18 }
 0x744   : > { %8815 = vmatprep.subr.bf16.mxu0 %v9489_v19 }
 0x747   : > { %8816 = vmatpush3.bf16.msra.mxu0 %v9490_v22 }
 0x748   : > { %8817 = vmatprep.subr.bf16.mxu0 %v9491_v23 }
 0x74b   : > { %8818 = vmatpush3.bf16.msra.mxu0 %v9492_v24 }
 0x74c   : > { %8819 = vmatprep.subr.bf16.mxu0 %v9493_v25 }
 0x74f   : > { %8820 = vmatpush3.bf16.msra.mxu0 %v9494_v26 }
 0x750   : > { %8821 = vmatprep.subr.bf16.mxu0 %v9495_v27 }
 0x753   : > { %8822 = vmatpush3.bf16.msra.mxu0 %v9496_v28 }
 0x754   : > { %8823 = vmatprep.subr.bf16.mxu0 %v9497_v29  ;;  %v7691_v29 = vld [vmem:[%s12383_s8 + $0x2] ss:$0 sm:$0xff] }
 0x757   : > { %8824 = vmatpush3.bf16.msra.mxu0 %v9498_v14 }
 0x758   : > { %8825 = vmatprep.subr.bf16.mxu0 %v9499_v15 }
 0x75b   : > { %8826 = vmatpush3.bf16.msra.mxu0 %v9500_v20 }
 0x75c   : > { %8855 = vmatprep.subr.bf16.mxu0 %v9501_v21 }
 0x75e   : > { %2115 = vmatmul.mubr.bf16.vlgmr.msra.gmra.mxu0 %v10447_v30 }
 0x75f   : > { %8856 = vmatpush3.bf16.msra.mxu0 %v9502_v32  ;;  %2470 = vmatprep.mubr.bf16.mxu0 %v10449_v31 }
 0x760   : > { %8857 = vmatprep.subr.bf16.mxu0 %v9503_v33 }
 0x763   : > { %8858 = vmatpush3.bf16.msra.mxu0 %v9504_v34 }
 0x764   : > { %8859 = vmatprep.subr.bf16.mxu0 %v9505_v35 }
 0x767   : > { %8860 = vmatpush3.bf16.msra.mxu0 %v9506_v36 }
 0x768   : > { %8861 = vmatprep.subr.bf16.mxu0 %v9507_v37  ;;  %v7795_v37 = vld [vmem:[%s12382_s7 + $0x3] ss:$0 sm:$0xff] }
 0x76b   : > { %8862 = vmatpush3.bf16.msra.mxu0 %v9508_v38 }
 0x76c   : > { %8863 = vmatprep.subr.bf16.mxu0 %v9509_v39 }
 0x76f   : > { %8864 = vmatpush3.bf16.msra.mxu0 %v9510_v40 }
 0x770   : > { %8865 = vmatprep.subr.bf16.mxu0 %v9511_v41 }
 0x773   : > { %8866 = vmatpush3.bf16.msra.mxu0 %v9512_v42 }
 0x774   : > { %8867 = vmatprep.subr.bf16.mxu0 %v9513_v43 }
 0x777   : > { %8868 = vmatpush3.bf16.msra.mxu0 %v9514_v44 }
 0x778   : > { %8869 = vmatprep.subr.bf16.mxu0 %v9515_v45 }
 0x77b   : > { %8870 = vmatpush3.bf16.msra.mxu0 %v9516_v46 }
 0x77c   : > { %8903 = vmatprep.subr.bf16.mxu0 %v9517_v47 }
 0x77e   : > { %2471 = vmatmul.mubr.bf16.vlgmr.msra.gmra.mxu0 %v10447_v30 }
 0x77f   : > { %8904 = vmatpush3.bf16.msra.mxu0 %v9518_v48  ;;  %2958 = vmatprep.mubr.bf16.mxu0 %v10449_v31 }
 0x780   : > { %8905 = vmatprep.subr.bf16.mxu0 %v9519_v49 }
 0x783   : > { %8906 = vmatpush3.bf16.msra.mxu0 %v9520_v50 }
 0x784   : > { %8907 = vmatprep.subr.bf16.mxu0 %v9521_v51 }
 0x787   : > { %8908 = vmatpush3.bf16.msra.mxu0 %v9522_v52 }
 0x788   : > { %8909 = vmatprep.subr.bf16.mxu0 %v9523_v53 }
 0x78b   : > { %8910 = vmatpush3.bf16.msra.mxu0 %v9524_v54 }
 0x78c   : > { %8911 = vmatprep.subr.bf16.mxu0 %v9525_v55 }
 0x78f   : > { %8912 = vmatpush3.bf16.msra.mxu0 %v9526_v56 }
 0x790   : > { %8913 = vmatprep.subr.bf16.mxu0 %v9527_v57 }
 0x793   : > { %8914 = vmatpush3.bf16.msra.mxu0 %v9528_v59 }
 0x794   : > { %8915 = vmatprep.subr.bf16.mxu0 %v9529_v60 }
 0x797   : > { %8916 = vmatpush3.bf16.msra.mxu0 %v9530_v61  ;;  %v9533_v61 = vld [vmem:[%s12378_s3 + $0x1f8] sm:$0xff]  }
 0x798   : > { %8917 = vmatprep.subr.bf16.mxu0 %v9531_v62 }
 0x79b   : > { %8918 = vmatpush3.bf16.msra.mxu0 %v9532_v0 }
 0x79c   : > { %9267 = vmatprep.subr.bf16.mxu0 %v10134_v58 }
 0x79e   : > { %2959 = vmatmul.mubr.bf16.vlgmr.msra.gmra.mxu0 %v10447_v30 }
 0x79f   : > { %9269 = vmatprep.mubr.msk.bf16.mxu0 %vm10135_vm0, %v10134_v58 }
 0x7fe   : > { %v10900_v7 = vpop.f32.mrf.mxu0 }
 0x800   : > { %v9253_v8 = vpop.f32.mrf.mxu0 }
 0x802   : > { %v10902_v9 = vpop.f32.mrf.mxu0 }
 0x804   : > { %v9254_v10 = vpop.f32.mrf.mxu0 }
 0x81e   : > { %v8827_v11 = vpop.f32.mrf.mxu0 }
 0x820   : > { %v8828_v12 = vpop.f32.mrf.mxu0 }
 0x821   : > { %v8829_v16 = vadd.f32 %v8828_v12, %v8827_v11 }
 0x822   : > { %v8830_v13 = vpop.f32.mrf.mxu0 }
 0x823   : > { %v2117_v22 = vadd.f32 %v8829_v16, %v7591_v17 }
 0x824   : > { %v8831_v18 = vpop.f32.mrf.mxu0 }
 0x825   : > { %v8832_v19 = vadd.f32 %v8831_v18, %v8830_v13  ;;  %v9534_v13 = vld [vmem:[%s12378_s3 + $0x1b8] sm:$0xff]   ;;  %v9536_v18 = vld [vmem:[%s12378_s3 + $0x1b0] sm:$0xff]  }
 0x827   : > { %v2120_v23 = vadd.f32 %v8832_v19, %v7591_v17  ;;  %v9535_v17 = vld [vmem:[%s12378_s3 + $0x1f0] sm:$0xff]   ;;  %v9537_v19 = vld [vmem:[%s12378_s3 + $0x1e8] sm:$0xff]  }
 0x829   : > { %v2479_v24 = vpack.c.bf16 %v2120_v23, %v2117_v22  ;;  %v9538_v22 = vld [vmem:[%s12378_s3 + $0x1a8] sm:$0xff]   ;;  %v9539_v23 = vld [vmem:[%s12378_s3 + $0x1e0] sm:$0xff]  }
 0x82b   : > { %9258 = vmatmul.mubr.msk.bf16.vlgmr.msra.gmra.mxu1 %vm1151_vm1, %v2479_v24  ;;  %v9540_v24 = vld [vmem:[%s12378_s3 + $0x1a0] sm:$0xff]  }
 0x82c   : > { %9263 = vmatprep.mubr.msk.bf16.mxu1 %vm10135_vm0, %v10134_v58 }
 0x83e   : > { %v8871_v25 = vpop.f32.mrf.mxu0 }
 0x840   : > { %v8872_v26 = vpop.f32.mrf.mxu0 }
 0x841   : > { %v8873_v28 = vadd.f32 %v8872_v26, %v8871_v25  ;;  %v9541_v25 = vld [vmem:[%s12378_s3 + $0x1d8] sm:$0xff]  }
 0x842   : > { %v8874_v27 = vpop.f32.mrf.mxu0  ;;  %v9542_v26 = vld [vmem:[%s12378_s3 + $0x198] sm:$0xff]  }
 0x843   : > { %v2473_v20 = vadd.f32 %v8873_v28, %v7691_v29  ;;  %v9544_v28 = vld [vmem:[%s12378_s3 + $0x190] sm:$0xff]  }
 0x844   : > { %v8875_v14 = vpop.f32.mrf.mxu0 }
 0x845   : > { %v8876_v15 = vadd.f32 %v8875_v14, %v8874_v27  ;;  %v9543_v27 = vld [vmem:[%s12378_s3 + $0x1d0] sm:$0xff]   ;;  %v9546_v14 = vld [vmem:[%s12378_s3 + $0x188] sm:$0xff]  }
 0x847   : > { %v2476_v21 = vadd.f32 %v8876_v15, %v7691_v29  ;;  %v9545_v29 = vld [vmem:[%s12378_s3 + $0x1c8] sm:$0xff]   ;;  %v9547_v15 = vld [vmem:[%s12378_s3 + $0x1c0] sm:$0xff]  }
 0x849   : > { %v2551_v32 = vpack.c.bf16 %v2476_v21, %v2473_v20  ;;  %v9548_v20 = vld [vmem:[%s12378_s3 + $0x180] sm:$0xff]   ;;  %v9549_v21 = vld [vmem:[%s12380_s5 + $0x1f8] sm:$0xff]  }
 0x84b   : > { %9262 = vmatpush3.bf16.msra.mxu1 %v2551_v32  ;;  %v9550_v32 = vld [vmem:[%s12380_s5 + $0x1b8] sm:$0xff]  }
 0x84c   : > { %8881 = vmatprep.subr.bf16.mxu1 %v9533_v61  ;;  %v9578_v61 = vld [vmem:[%s12379_s4 + $0x208] sm:$0xff]  }
 0x85e   : > { %v8919_v33 = vpop.f32.mrf.mxu0 }
 0x860   : > { %v8920_v34 = vpop.f32.mrf.mxu0 }
 0x861   : > { %v8921_v36 = vadd.f32 %v8920_v34, %v8919_v33  ;;  %v9551_v33 = vld [vmem:[%s12380_s5 + $0x1f0] sm:$0xff]  }
 0x862   : > { %v8922_v35 = vpop.f32.mrf.mxu0  ;;  %v9552_v34 = vld [vmem:[%s12380_s5 + $0x1b0] sm:$0xff]  }
 0x863   : > { %v2961_v40 = vadd.f32 %v8921_v36, %v7795_v37  ;;  %v9554_v36 = vld [vmem:[%s12380_s5 + $0x1a8] sm:$0xff]  }
 0x864   : > { %v8923_v38 = vpop.f32.mrf.mxu0 }
 0x865   : > { %v8924_v39 = vadd.f32 %v8923_v38, %v8922_v35  ;;  %v9553_v35 = vld [vmem:[%s12380_s5 + $0x1e8] sm:$0xff]   ;;  %v9556_v38 = vld [vmem:[%s12380_s5 + $0x1a0] sm:$0xff]  }
 0x867   : > { %v2964_v41 = vadd.f32 %v8924_v39, %v7795_v37  ;;  %v9555_v37 = vld [vmem:[%s12380_s5 + $0x1e0] sm:$0xff]   ;;  %v9557_v39 = vld [vmem:[%s12380_s5 + $0x1d8] sm:$0xff]  }
 0x869   : > { %v3146_v42 = vpack.c.bf16 %v2964_v41, %v2961_v40  ;;  %v9558_v40 = vld [vmem:[%s12380_s5 + $0x198] sm:$0xff]   ;;  %v9559_v41 = vld [vmem:[%s12380_s5 + $0x1d0] sm:$0xff]  }
 0x86b   : > { %v3151_v43 = vsel %vm1151_vm1, %v3146_v42, 0  ;;  %v9560_v42 = vld [vmem:[%s12380_s5 + $0x190] sm:$0xff]  }
 0x86c   : > { %9268 = vmatpush3.bf16.xpose.msra.mxu0 %v3151_v43  ;;  %v9561_v43 = vld [vmem:[%s12380_s5 + $0x1c8] sm:$0xff]  }
 0x86d   : > { %9273 = vmatprep.subr.bf16.mxu0 %v10134_v58 }
 0x8eb   : > { %v2521_v44 = vpop.f32.mrf.mxu1 }
 0x8ec   : > { %v2528_v45 = vsel %vm1199_vm2, %v2521_v44, -inf }
 0x8ed   : > { %2529 = vmax.xlane.f32.xlu0 %v2528_v45  ;;  %v9259_v46 = vpop.f32.mrf.mxu1  ;;  %v9563_v45 = vld [vmem:[%s12380_s5 + $0x1c0] sm:$0xff]  }
 0x8ee   : > { %v9564_v46 = vld [vmem:[%s12380_s5 + $0x180] sm:$0xff]  }
 0x8ef   : > { %v2524_v47 = vpop.f32.mrf.mxu1 }
 0x8f0   : > { %v2531_v48 = vsel %vm1199_vm2, %v2524_v47, -inf }
 0x8f1   : > { %2532 = vmax.xlane.f32.xlu1 %v2531_v48  ;;  %v9260_v49 = vpop.f32.mrf.mxu1  ;;  %v9566_v48 = vld [vmem:[%s12379_s4 + $0x238] sm:$0xff]  }
 0x8f2   : > { %v9567_v49 = vld [vmem:[%s12379_s4 + $0x270] sm:$0xff]  }
 0x976   : > { %v2530_v50 = vpop.xlane.xlu0 %2529 }
 0x977   : > { %v2534_v51 = vsub.f32 %v2521_v44, %v2530_v50  ;;  %v9562_v44 = vld [vmem:[%s12380_s5 + $0x188] sm:$0xff]   ;;  %v9568_v50 = vld [vmem:[%s12379_s4 + $0x230] sm:$0xff]  }
 0x979   : > { %v2536_v52 = vmul.f32 1.442695, %v2534_v51  ;;  %v9569_v51 = vld [vmem:[%s12379_s4 + $0x268] sm:$0xff]  }
 0x97a   : > { %v2533_v53 = vpop.xlane.xlu1 %2532 }
 0x97b   : > { %10020 = vpow2.f32 %v2536_v52  ;;  %v2535_v54 = vsub.f32 %v2524_v47, %v2533_v53  ;;  %v9565_v47 = vld [vmem:[%s12379_s4 + $0x278] sm:$0xff]   ;;  %v9570_v52 = vld [vmem:[%s12379_s4 + $0x228] sm:$0xff]   ;;  %v9571_v53 = vld [vmem:[%s12379_s4 + $0x260] sm:$0xff]  }
 0x97d   : > { %v2538_v55 = vmul.f32 1.442695, %v2535_v54  ;;  %v9572_v54 = vld [vmem:[%s12379_s4 + $0x220] sm:$0xff]  }
 0x97f   : > { %10022 = vpow2.f32 %v2538_v55  ;;  %v9573_v55 = vld [vmem:[%s12379_s4 + $0x258] sm:$0xff]  }
 0x988   : > { %v10021_v56 = vpop.eup %10020 }
 0x989   : > { %v2540_v57 = vsel %vm1199_vm2, %v10021_v56, 0.0 }
 0x98a   : > { %2541 = vadd.xlane.f32.xlu0 %v2540_v57  ;;  %v9575_v57 = vld [vmem:[%s12379_s4 + $0x250] sm:$0xff]  }
 0x98c   : > { %v10023_v59 = vpop.eup %10022 }
 0x98d   : > { %v2543_v60 = vsel %vm1199_vm2, %v10023_v59, 0.0 }
 0x98e   : > { %2544 = vadd.xlane.f32.xlu1 %v2543_v60  ;;  %v9577_v60 = vld [vmem:[%s12379_s4 + $0x248] sm:$0xff]  }
 0xa13   : > { %v2542_v62 = vpop.xlane.xlu0 %2541 }
 0xa14   : > { %10024 = vrcp.f32 %v2542_v62  ;;  %v9579_v62 = vld [vmem:[%s12379_s4 + $0x240] sm:$0xff]  }
 0xa17   : > { %v2545_v0 = vpop.xlane.xlu1 %2544 }
 0xa18   : > { %10026 = vrcp.f32 %v2545_v0  ;;  %v9580_v0 = vld [vmem:[%s12379_s4 + $0x200] sm:$0xff]  }
 0xa21   : > { %v10025_v8 = vpop.eup %10024 }
 0xa22   : > { %v2548_v11 = vmul.f32 %v10025_v8, %v10021_v56  ;;  %v9574_v56 = vld [vmem:[%s12379_s4 + $0x218] sm:$0xff]  }
 0xa25   : > { %v10027_v10 = vpop.eup %10026 }
 0xa26   : > { %v2549_v12 = vmul.f32 %v10027_v10, %v10023_v59  ;;  %v9576_v59 = vld [vmem:[%s12379_s4 + $0x210] sm:$0xff]  }
 0xa28   : > { %v2550_v16 = vpack.c.bf16 %v2549_v12, %v2548_v11 }
 0xa2a   : > { %9264 = vmatmul.mubr.msk.bf16.vlgmr.msra.gmra.mxu1 %vm1199_vm2, %v2550_v16 }
 0xa2b   : > { %8882 = vmatpush3.bf16.msra.mxu1 %v9534_v13  ;;  %2780 = vmatprep.mubr.bf16.mxu1 %v10449_v31 }
 0xa2c   : > { %8883 = vmatprep.subr.bf16.mxu1 %v9535_v17 }
 0xa2f   : > { %8884 = vmatpush3.bf16.msra.mxu1 %v9536_v18 }
 0xa30   : > { %8885 = vmatprep.subr.bf16.mxu1 %v9537_v19  ;;  %v7745_v19 = vld [vmem:[%s12381_s6 + $0x3] ss:$0 sm:$0xff] }
 0xa33   : > { %8886 = vmatpush3.bf16.msra.mxu1 %v9538_v22 }
 0xa34   : > { %8887 = vmatprep.subr.bf16.mxu1 %v9539_v23 }
 0xa37   : > { %8888 = vmatpush3.bf16.msra.mxu1 %v9540_v24 }
 0xa38   : > { %8889 = vmatprep.subr.bf16.mxu1 %v9541_v25 }
 0xa3b   : > { %8890 = vmatpush3.bf16.msra.mxu1 %v9542_v26 }
 0xa3c   : > { %8891 = vmatprep.subr.bf16.mxu1 %v9543_v27 }
 0xa3f   : > { %8892 = vmatpush3.bf16.msra.mxu1 %v9544_v28 }
 0xa40   : > { %8893 = vmatprep.subr.bf16.mxu1 %v9545_v29 }
 0xa43   : > { %8894 = vmatpush3.bf16.msra.mxu1 %v9546_v14 }
 0xa44   : > { %8895 = vmatprep.subr.bf16.mxu1 %v9547_v15  ;;  %v7845_v15 = vld [vmem:[%s12383_s8 + $0x3] ss:$0 sm:$0xff] }
 0xa47   : > { %8896 = vmatpush3.bf16.msra.mxu1 %v9548_v20 }
 0xa48   : > { %8925 = vmatprep.subr.bf16.mxu1 %v9549_v21 }
 0xa4a   : > { %2781 = vmatmul.mubr.bf16.vlgmr.msra.gmra.mxu1 %v10447_v30 }
 0xa4b   : > { %8926 = vmatpush3.bf16.msra.mxu1 %v9550_v32  ;;  %3136 = vmatprep.mubr.bf16.mxu1 %v10449_v31 }
 0xa4c   : > { %8927 = vmatprep.subr.bf16.mxu1 %v9551_v33 }
 0xa4f   : > { %8928 = vmatpush3.bf16.msra.mxu1 %v9552_v34 }
 0xa50   : > { %8929 = vmatprep.subr.bf16.mxu1 %v9553_v35 }
 0xa53   : > { %8930 = vmatpush3.bf16.msra.mxu1 %v9554_v36 }
 0xa54   : > { %8931 = vmatprep.subr.bf16.mxu1 %v9555_v37 }
 0xa57   : > { %8932 = vmatpush3.bf16.msra.mxu1 %v9556_v38 }
 0xa58   : > { %8933 = vmatprep.subr.bf16.mxu1 %v9557_v39  ;;  %v7949_v39 = vld [vmem:[%s12382_s7 + $0x4] ss:$0 sm:$0xff] }
 0xa5b   : > { %8934 = vmatpush3.bf16.msra.mxu1 %v9558_v40 }
 0xa5c   : > { %8935 = vmatprep.subr.bf16.mxu1 %v9559_v41 }
 0xa5f   : > { %8936 = vmatpush3.bf16.msra.mxu1 %v9560_v42 }
 0xa60   : > { %8937 = vmatprep.subr.bf16.mxu1 %v9561_v43 }
 0xa63   : > { %8938 = vmatpush3.bf16.msra.mxu1 %v9562_v44 }
 0xa64   : > { %8939 = vmatprep.subr.bf16.mxu1 %v9563_v45 }
 0xa67   : > { %8940 = vmatpush3.bf16.msra.mxu1 %v9564_v46 }
 0xa68   : > { %8973 = vmatprep.subr.bf16.mxu1 %v9565_v47 }
 0xa6a   : > { %3137 = vmatmul.mubr.bf16.vlgmr.msra.gmra.mxu1 %v10447_v30 }
 0xa6b   : > { %8974 = vmatpush3.bf16.msra.mxu1 %v9566_v48  ;;  %3624 = vmatprep.mubr.bf16.mxu1 %v10449_v31 }
 0xa6c   : > { %8975 = vmatprep.subr.bf16.mxu1 %v9567_v49 }
 0xa6f   : > { %8976 = vmatpush3.bf16.msra.mxu1 %v9568_v50 }
 0xa70   : > { %8977 = vmatprep.subr.bf16.mxu1 %v9569_v51 }
 0xa73   : > { %8978 = vmatpush3.bf16.msra.mxu1 %v9570_v52 }
 0xa74   : > { %8979 = vmatprep.subr.bf16.mxu1 %v9571_v53 }
 0xa77   : > { %8980 = vmatpush3.bf16.msra.mxu1 %v9572_v54 }
 0xa78   : > { %8981 = vmatprep.subr.bf16.mxu1 %v9573_v55 }
 0xa7b   : > { %8982 = vmatpush3.bf16.msra.mxu1 %v9574_v56 }
 0xa7c   : > { %8983 = vmatprep.subr.bf16.mxu1 %v9575_v57 }
 0xa7f   : > { %8984 = vmatpush3.bf16.msra.mxu1 %v9576_v59 }
 0xa80   : > { %8985 = vmatprep.subr.bf16.mxu1 %v9577_v60 }
 0xa83   : > { %8986 = vmatpush3.bf16.msra.mxu1 %v9578_v61 }
 0xa84   : > { %8987 = vmatprep.subr.bf16.mxu1 %v9579_v62 }
 0xa87   : > { %8988 = vmatpush3.bf16.msra.mxu1 %v9580_v0  ;;  %v9581_v0 = vld [vmem:[%s12378_s3 + $0x278] sm:$0xff]  }
 0xa88   : > { %9279 = vmatprep.subr.bf16.mxu1 %v10134_v58 }
 0xa8a   : > { %3625 = vmatmul.mubr.bf16.vlgmr.msra.gmra.mxu1 %v10447_v30 }
 0xa8b   : > { %9281 = vmatprep.mubr.msk.bf16.mxu1 %vm10135_vm0, %v10134_v58 }
 0xaea   : > { %v11076_v8 = vpop.f32.mrf.mxu1 }
 0xaec   : > { %v9265_v10 = vpop.f32.mrf.mxu1 }
 0xaee   : > { %v11078_v11 = vpop.f32.mrf.mxu1 }
 0xaf0   : > { %v9266_v12 = vpop.f32.mrf.mxu1 }
 0xb0a   : > { %v8897_v13 = vpop.f32.mrf.mxu1 }
 0xb0c   : > { %v8898_v16 = vpop.f32.mrf.mxu1 }
 0xb0d   : > { %v8899_v18 = vadd.f32 %v8898_v16, %v8897_v13 }
 0xb0e   : > { %v8900_v17 = vpop.f32.mrf.mxu1 }
 0xb0f   : > { %v2783_v24 = vadd.f32 %v8899_v18, %v7745_v19 }
 0xb10   : > { %v8901_v22 = vpop.f32.mrf.mxu1 }
 0xb11   : > { %v8902_v23 = vadd.f32 %v8901_v22, %v8900_v17 }
 0xb13   : > { %v2786_v25 = vadd.f32 %v8902_v23, %v7745_v19  ;;  %v9582_v19 = vld [vmem:[%s12378_s3 + $0x238] sm:$0xff]   ;;  %v9583_v23 = vld [vmem:[%s12378_s3 + $0x270] sm:$0xff]  }
 0xb15   : > { %v3145_v26 = vpack.c.bf16 %v2786_v25, %v2783_v24  ;;  %v9584_v24 = vld [vmem:[%s12378_s3 + $0x230] sm:$0xff]   ;;  %v9585_v25 = vld [vmem:[%s12378_s3 + $0x268] sm:$0xff]  }
 0xb17   : > { %9270 = vmatmul.mubr.msk.bf16.vlgmr.msra.gmra.mxu0 %vm1151_vm1, %v3145_v26  ;;  %v9586_v26 = vld [vmem:[%s12378_s3 + $0x228] sm:$0xff]  }
 0xb18   : > { %9275 = vmatprep.mubr.msk.bf16.mxu0 %vm10135_vm0, %v10134_v58 }
 0xb2a   : > { %v8941_v27 = vpop.f32.mrf.mxu1 }
 0xb2c   : > { %v8942_v28 = vpop.f32.mrf.mxu1 }
 0xb2d   : > { %v8943_v14 = vadd.f32 %v8942_v28, %v8941_v27  ;;  %v9587_v27 = vld [vmem:[%s12378_s3 + $0x260] sm:$0xff]  }
 0xb2e   : > { %v8944_v29 = vpop.f32.mrf.mxu1  ;;  %v9588_v28 = vld [vmem:[%s12378_s3 + $0x220] sm:$0xff]  }
 0xb2f   : > { %v3139_v32 = vadd.f32 %v8943_v14, %v7845_v15  ;;  %v9590_v14 = vld [vmem:[%s12378_s3 + $0x218] sm:$0xff]  }
 0xb30   : > { %v8945_v20 = vpop.f32.mrf.mxu1 }
 0xb31   : > { %v8946_v21 = vadd.f32 %v8945_v20, %v8944_v29  ;;  %v9589_v29 = vld [vmem:[%s12378_s3 + $0x258] sm:$0xff]   ;;  %v9592_v20 = vld [vmem:[%s12378_s3 + $0x210] sm:$0xff]  }
 0xb33   : > { %v3142_v33 = vadd.f32 %v8946_v21, %v7845_v15  ;;  %v9591_v15 = vld [vmem:[%s12378_s3 + $0x250] sm:$0xff]   ;;  %v9593_v21 = vld [vmem:[%s12378_s3 + $0x248] sm:$0xff]  }
 0xb35   : > { %v3217_v34 = vpack.c.bf16 %v3142_v33, %v3139_v32  ;;  %v9594_v32 = vld [vmem:[%s12378_s3 + $0x208] sm:$0xff]   ;;  %v9595_v33 = vld [vmem:[%s12378_s3 + $0x240] sm:$0xff]  }
 0xb37   : > { %9274 = vmatpush3.bf16.msra.mxu0 %v3217_v34  ;;  %v9596_v34 = vld [vmem:[%s12378_s3 + $0x200] sm:$0xff]  }
 0xb38   : > { %8951 = vmatprep.subr.bf16.mxu0 %v9581_v0  ;;  %v9624_v0 = vld [vmem:[%s12379_s4 + $0x290] sm:$0xff]  }
 0xb4a   : > { %v8989_v35 = vpop.f32.mrf.mxu1 }
 0xb4c   : > { %v8990_v36 = vpop.f32.mrf.mxu1 }
 0xb4d   : > { %v8991_v38 = vadd.f32 %v8990_v36, %v8989_v35  ;;  %v9597_v35 = vld [vmem:[%s12380_s5 + $0x278] sm:$0xff]  }
 0xb4e   : > { %v8992_v37 = vpop.f32.mrf.mxu1  ;;  %v9598_v36 = vld [vmem:[%s12380_s5 + $0x238] sm:$0xff]  }
 0xb4f   : > { %v3627_v42 = vadd.f32 %v8991_v38, %v7949_v39  ;;  %v9600_v38 = vld [vmem:[%s12380_s5 + $0x230] sm:$0xff]  }
 0xb50   : > { %v8993_v40 = vpop.f32.mrf.mxu1 }
 0xb51   : > { %v8994_v41 = vadd.f32 %v8993_v40, %v8992_v37  ;;  %v9599_v37 = vld [vmem:[%s12380_s5 + $0x270] sm:$0xff]   ;;  %v9602_v40 = vld [vmem:[%s12380_s5 + $0x228] sm:$0xff]  }
 0xb53   : > { %v3630_v43 = vadd.f32 %v8994_v41, %v7949_v39  ;;  %v9601_v39 = vld [vmem:[%s12380_s5 + $0x268] sm:$0xff]   ;;  %v9603_v41 = vld [vmem:[%s12380_s5 + $0x260] sm:$0xff]  }
 0xb55   : > { %v3812_v44 = vpack.c.bf16 %v3630_v43, %v3627_v42  ;;  %v9604_v42 = vld [vmem:[%s12380_s5 + $0x220] sm:$0xff]   ;;  %v9605_v43 = vld [vmem:[%s12380_s5 + $0x258] sm:$0xff]  }
 0xb57   : > { %v3817_v45 = vsel %vm1151_vm1, %v3812_v44, 0  ;;  %v9606_v44 = vld [vmem:[%s12380_s5 + $0x218] sm:$0xff]  }
 0xb58   : > { %9280 = vmatpush3.bf16.xpose.msra.mxu1 %v3817_v45  ;;  %v9607_v45 = vld [vmem:[%s12380_s5 + $0x250] sm:$0xff]  }
 0xb59   : > { %9285 = vmatprep.subr.bf16.mxu1 %v10134_v58 }
 0xbd7   : > { %v3187_v46 = vpop.f32.mrf.mxu0 }
 0xbd8   : > { %v3194_v47 = vsel %vm1199_vm2, %v3187_v46, -inf }
 0xbd9   : > { %3195 = vmax.xlane.f32.xlu0 %v3194_v47  ;;  %v9271_v48 = vpop.f32.mrf.mxu0  ;;  %v9609_v47 = vld [vmem:[%s12380_s5 + $0x248] sm:$0xff]  }
 0xbda   : > { %v9610_v48 = vld [vmem:[%s12380_s5 + $0x208] sm:$0xff]  }
 0xbdb   : > { %v3190_v49 = vpop.f32.mrf.mxu0 }
 0xbdc   : > { %v3197_v50 = vsel %vm1199_vm2, %v3190_v49, -inf }
 0xbdd   : > { %3198 = vmax.xlane.f32.xlu1 %v3197_v50  ;;  %v9272_v51 = vpop.f32.mrf.mxu0  ;;  %v9612_v50 = vld [vmem:[%s12380_s5 + $0x200] sm:$0xff]  }
 0xbde   : > { %v9613_v51 = vld [vmem:[%s12379_s4 + $0x2f8] sm:$0xff]  }
 0xc62   : > { %v3196_v52 = vpop.xlane.xlu0 %3195 }
 0xc63   : > { %v3200_v53 = vsub.f32 %v3187_v46, %v3196_v52  ;;  %v9608_v46 = vld [vmem:[%s12380_s5 + $0x210] sm:$0xff]   ;;  %v9614_v52 = vld [vmem:[%s12379_s4 + $0x2b8] sm:$0xff]  }
 0xc65   : > { %v3202_v54 = vmul.f32 1.442695, %v3200_v53  ;;  %v9615_v53 = vld [vmem:[%s12379_s4 + $0x2f0] sm:$0xff]  }
 0xc66   : > { %v3199_v55 = vpop.xlane.xlu1 %3198 }
 0xc67   : > { %10028 = vpow2.f32 %v3202_v54  ;;  %v3201_v56 = vsub.f32 %v3190_v49, %v3199_v55  ;;  %v9611_v49 = vld [vmem:[%s12380_s5 + $0x240] sm:$0xff]   ;;  %v9616_v54 = vld [vmem:[%s12379_s4 + $0x2b0] sm:$0xff]   ;;  %v9617_v55 = vld [vmem:[%s12379_s4 + $0x2e8] sm:$0xff]  }
 0xc69   : > { %v3204_v57 = vmul.f32 1.442695, %v3201_v56  ;;  %v9618_v56 = vld [vmem:[%s12379_s4 + $0x2a8] sm:$0xff]  }
 0xc6b   : > { %10030 = vpow2.f32 %v3204_v57  ;;  %v9619_v57 = vld [vmem:[%s12379_s4 + $0x2e0] sm:$0xff]  }
 0xc74   : > { %v10029_v59 = vpop.eup %10028 }
 0xc75   : > { %v3206_v60 = vsel %vm1199_vm2, %v10029_v59, 0.0 }
 0xc76   : > { %3207 = vadd.xlane.f32.xlu0 %v3206_v60  ;;  %v9621_v60 = vld [vmem:[%s12379_s4 + $0x2d8] sm:$0xff]  }
 0xc78   : > { %v10031_v61 = vpop.eup %10030 }
 0xc79   : > { %v3209_v62 = vsel %vm1199_vm2, %v10031_v61, 0.0 }
 0xc7a   : > { %3210 = vadd.xlane.f32.xlu1 %v3209_v62  ;;  %v9623_v62 = vld [vmem:[%s12379_s4 + $0x2d0] sm:$0xff]  }
 0xcff   : > { %v3208_v10 = vpop.xlane.xlu0 %3207 }
 0xd00   : > { %10032 = vrcp.f32 %v3208_v10  ;;  %v9625_v10 = vld [vmem:[%s12379_s4 + $0x2c8] sm:$0xff]  }
 0xd03   : > { %v3211_v12 = vpop.xlane.xlu1 %3210 }
 0xd04   : > { %10034 = vrcp.f32 %v3211_v12  ;;  %v9626_v12 = vld [vmem:[%s12379_s4 + $0x288] sm:$0xff]  }
 0xd0d   : > { %v10033_v13 = vpop.eup %10032 }
 0xd0e   : > { %v3214_v17 = vmul.f32 %v10033_v13, %v10029_v59  ;;  %v9620_v59 = vld [vmem:[%s12379_s4 + $0x2a0] sm:$0xff]  }
 0xd0f   : > { %v9627_v13 = vld [vmem:[%s12379_s4 + $0x2c0] sm:$0xff]  }
 0xd11   : > { %v10035_v16 = vpop.eup %10034 }
 0xd12   : > { %v3215_v18 = vmul.f32 %v10035_v16, %v10031_v61  ;;  %v9622_v61 = vld [vmem:[%s12379_s4 + $0x298] sm:$0xff]   ;;  %v9628_v16 = vld [vmem:[%s12379_s4 + $0x280] sm:$0xff]  }
 0xd14   : > { %v3216_v22 = vpack.c.bf16 %v3215_v18, %v3214_v17 }
 0xd16   : > { %9276 = vmatmul.mubr.msk.bf16.vlgmr.msra.gmra.mxu0 %vm1199_vm2, %v3216_v22 }
 0xd17   : > { %8952 = vmatpush3.bf16.msra.mxu0 %v9582_v19  ;;  %3446 = vmatprep.mubr.bf16.mxu0 %v10449_v31 }
 0xd18   : > { %8953 = vmatprep.subr.bf16.mxu0 %v9583_v23 }
 0xd1b   : > { %8954 = vmatpush3.bf16.msra.mxu0 %v9584_v24 }
 0xd1c   : > { %8955 = vmatprep.subr.bf16.mxu0 %v9585_v25 }
 0xd1f   : > { %8956 = vmatpush3.bf16.msra.mxu0 %v9586_v26 }
 0xd20   : > { %8957 = vmatprep.subr.bf16.mxu0 %v9587_v27  ;;  %v7899_v27 = vld [vmem:[%s12381_s6 + $0x4] ss:$0 sm:$0xff] }
 0xd23   : > { %8958 = vmatpush3.bf16.msra.mxu0 %v9588_v28 }
 0xd24   : > { %8959 = vmatprep.subr.bf16.mxu0 %v9589_v29 }
 0xd27   : > { %8960 = vmatpush3.bf16.msra.mxu0 %v9590_v14 }
 0xd28   : > { %8961 = vmatprep.subr.bf16.mxu0 %v9591_v15 }
 0xd2b   : > { %8962 = vmatpush3.bf16.msra.mxu0 %v9592_v20 }
 0xd2c   : > { %8963 = vmatprep.subr.bf16.mxu0 %v9593_v21 }
 0xd2f   : > { %8964 = vmatpush3.bf16.msra.mxu0 %v9594_v32 }
 0xd30   : > { %8965 = vmatprep.subr.bf16.mxu0 %v9595_v33 }
 0xd33   : > { %8966 = vmatpush3.bf16.msra.mxu0 %v9596_v34 }
 0xd34   : > { %8995 = vmatprep.subr.bf16.mxu0 %v9597_v35  ;;  %v7999_v35 = vld [vmem:[%s12383_s8 + $0x4] ss:$0 sm:$0xff] }
 0xd36   : > { %3447 = vmatmul.mubr.bf16.vlgmr.msra.gmra.mxu0 %v10447_v30 }
 0xd37   : > { %8996 = vmatpush3.bf16.msra.mxu0 %v9598_v36  ;;  %3802 = vmatprep.mubr.bf16.mxu0 %v10449_v31 }
 0xd38   : > { %8997 = vmatprep.subr.bf16.mxu0 %v9599_v37 }
 0xd3b   : > { %8998 = vmatpush3.bf16.msra.mxu0 %v9600_v38 }
 0xd3c   : > { %8999 = vmatprep.subr.bf16.mxu0 %v9601_v39 }
 0xd3f   : > { %9000 = vmatpush3.bf16.msra.mxu0 %v9602_v40 }
 0xd40   : > { %9001 = vmatprep.subr.bf16.mxu0 %v9603_v41 }
 0xd43   : > { %9002 = vmatpush3.bf16.msra.mxu0 %v9604_v42 }
 0xd44   : > { %9003 = vmatprep.subr.bf16.mxu0 %v9605_v43 }
 0xd47   : > { %9004 = vmatpush3.bf16.msra.mxu0 %v9606_v44 }
 0xd48   : > { %9005 = vmatprep.subr.bf16.mxu0 %v9607_v45  ;;  %v8103_v45 = vld [vmem:[%s12382_s7 + $0x5] ss:$0 sm:$0xff] }
 0xd4b   : > { %9006 = vmatpush3.bf16.msra.mxu0 %v9608_v46 }
 0xd4c   : > { %9007 = vmatprep.subr.bf16.mxu0 %v9609_v47 }
 0xd4f   : > { %9008 = vmatpush3.bf16.msra.mxu0 %v9610_v48 }
 0xd50   : > { %9009 = vmatprep.subr.bf16.mxu0 %v9611_v49 }
 0xd53   : > { %9010 = vmatpush3.bf16.msra.mxu0 %v9612_v50 }
 0xd54   : > { %9043 = vmatprep.subr.bf16.mxu0 %v9613_v51 }
 0xd56   : > { %3803 = vmatmul.mubr.bf16.vlgmr.msra.gmra.mxu0 %v10447_v30 }
 0xd57   : > { %9044 = vmatpush3.bf16.msra.mxu0 %v9614_v52  ;;  %4285 = vmatprep.mubr.bf16.mxu0 %v10449_v31 }
 0xd58   : > { %9045 = vmatprep.subr.bf16.mxu0 %v9615_v53 }
 0xd5b   : > { %9046 = vmatpush3.bf16.msra.mxu0 %v9616_v54 }
 0xd5c   : > { %9047 = vmatprep.subr.bf16.mxu0 %v9617_v55 }
 0xd5f   : > { %9048 = vmatpush3.bf16.msra.mxu0 %v9618_v56 }
 0xd60   : > { %9049 = vmatprep.subr.bf16.mxu0 %v9619_v57 }
 0xd63   : > { %9050 = vmatpush3.bf16.msra.mxu0 %v9620_v59 }
 0xd64   : > { %9051 = vmatprep.subr.bf16.mxu0 %v9621_v60 }
 0xd67   : > { %9052 = vmatpush3.bf16.msra.mxu0 %v9622_v61 }
 0xd68   : > { %9053 = vmatprep.subr.bf16.mxu0 %v9623_v62 }
 0xd6b   : > { %9054 = vmatpush3.bf16.msra.mxu0 %v9624_v0 }
 0xd6c   : > { %9055 = vmatprep.subr.bf16.mxu0 %v9625_v10 }
 0xd6f   : > { %9056 = vmatpush3.bf16.msra.mxu0 %v9626_v12 }
 0xd70   : > { %9057 = vmatprep.subr.bf16.mxu0 %v9627_v13 }
 0xd73   : > { %9058 = vmatpush3.bf16.msra.mxu0 %v9628_v16 }
 0xd74   : > { %9291 = vmatprep.subr.bf16.mxu0 %v10134_v58 }
 0xd76   : > { %4286 = vmatmul.mubr.bf16.vlgmr.msra.gmra.mxu0 %v10447_v30 }
 0xd77   : > { %9293 = vmatprep.mubr.msk.bf16.mxu0 %vm10135_vm0, %v10134_v58 }
 0xdd6   : > { %v11252_v17 = vpop.f32.mrf.mxu0 }
 0xdd8   : > { %v9277_v18 = vpop.f32.mrf.mxu0 }
 0xdda   : > { %v11254_v19 = vpop.f32.mrf.mxu0 }
 0xddc   : > { %v9278_v22 = vpop.f32.mrf.mxu0 }
 0xddd   : > { %v9629_v22 = vld [vmem:[%s12378_s3 + $0x2f8] sm:$0xff]  }
 0xdf6   : > { %v8967_v23 = vpop.f32.mrf.mxu0 }
 0xdf8   : > { %v8968_v24 = vpop.f32.mrf.mxu0 }
 0xdf9   : > { %v8969_v26 = vadd.f32 %v8968_v24, %v8967_v23 }
 0xdfa   : > { %v8970_v25 = vpop.f32.mrf.mxu0 }
 0xdfb   : > { %v3449_v14 = vadd.f32 %v8969_v26, %v7899_v27 }
 0xdfc   : > { %v8971_v28 = vpop.f32.mrf.mxu0 }
 0xdfd   : > { %v8972_v29 = vadd.f32 %v8971_v28, %v8970_v25 }
 0xdff   : > { %v3452_v15 = vadd.f32 %v8972_v29, %v7899_v27  ;;  %v9630_v29 = vld [vmem:[%s12378_s3 + $0x2b8] sm:$0xff]  }
 0xe01   : > { %v3811_v20 = vpack.c.bf16 %v3452_v15, %v3449_v14  ;;  %v9631_v15 = vld [vmem:[%s12378_s3 + $0x2f0] sm:$0xff]  }
 0xe03   : > { %9282 = vmatmul.mubr.msk.bf16.vlgmr.msra.gmra.mxu1 %vm1151_vm1, %v3811_v20  ;;  %v9632_v20 = vld [vmem:[%s12378_s3 + $0x2b0] sm:$0xff]  }
 0xe04   : > { %9287 = vmatprep.mubr.msk.bf16.mxu1 %vm10135_vm0, %v10134_v58 }
 0xe16   : > { %v9011_v21 = vpop.f32.mrf.mxu0 }
 0xe18   : > { %v9012_v32 = vpop.f32.mrf.mxu0 }
 0xe19   : > { %v9013_v34 = vadd.f32 %v9012_v32, %v9011_v21  ;;  %v9633_v21 = vld [vmem:[%s12378_s3 + $0x2e8] sm:$0xff]  }
 0xe1a   : > { %v9014_v33 = vpop.f32.mrf.mxu0  ;;  %v9634_v32 = vld [vmem:[%s12378_s3 + $0x2a8] sm:$0xff]  }
 0xe1b   : > { %v3805_v38 = vadd.f32 %v9013_v34, %v7999_v35  ;;  %v9636_v34 = vld [vmem:[%s12378_s3 + $0x2a0] sm:$0xff]  }
 0xe1c   : > { %v9015_v36 = vpop.f32.mrf.mxu0 }
 0xe1d   : > { %v9016_v37 = vadd.f32 %v9015_v36, %v9014_v33  ;;  %v9635_v33 = vld [vmem:[%s12378_s3 + $0x2e0] sm:$0xff]   ;;  %v9638_v36 = vld [vmem:[%s12378_s3 + $0x298] sm:$0xff]  }
 0xe1f   : > { %v3808_v39 = vadd.f32 %v9016_v37, %v7999_v35  ;;  %v9637_v35 = vld [vmem:[%s12378_s3 + $0x2d8] sm:$0xff]   ;;  %v9639_v37 = vld [vmem:[%s12378_s3 + $0x2d0] sm:$0xff]  }
 0xe21   : > { %v3883_v40 = vpack.c.bf16 %v3808_v39, %v3805_v38  ;;  %v9640_v38 = vld [vmem:[%s12378_s3 + $0x290] sm:$0xff]   ;;  %v9641_v39 = vld [vmem:[%s12378_s3 + $0x2c8] sm:$0xff]  }
 0xe23   : > { %9286 = vmatpush3.bf16.msra.mxu1 %v3883_v40  ;;  %v9642_v40 = vld [vmem:[%s12378_s3 + $0x288] sm:$0xff]  }
 0xe24   : > { %9021 = vmatprep.subr.bf16.mxu1 %v9629_v22  ;;  %v9670_v22 = vld [vmem:[%s12379_s4 + $0x318] sm:$0xff]  }
 0xe36   : > { %v9059_v41 = vpop.f32.mrf.mxu0 }
 0xe38   : > { %v9060_v42 = vpop.f32.mrf.mxu0 }
 0xe39   : > { %v9061_v44 = vadd.f32 %v9060_v42, %v9059_v41  ;;  %v9643_v41 = vld [vmem:[%s12378_s3 + $0x2c0] sm:$0xff]  }
 0xe3a   : > { %v9062_v43 = vpop.f32.mrf.mxu0  ;;  %v9644_v42 = vld [vmem:[%s12378_s3 + $0x280] sm:$0xff]  }
 0xe3b   : > { %v4288_v48 = vadd.f32 %v9061_v44, %v8103_v45  ;;  %v9646_v44 = vld [vmem:[%s12380_s5 + $0x2b8] sm:$0xff]  }
 0xe3c   : > { %v9063_v46 = vpop.f32.mrf.mxu0 }
 0xe3d   : > { %v9064_v47 = vadd.f32 %v9063_v46, %v9062_v43  ;;  %v9645_v43 = vld [vmem:[%s12380_s5 + $0x2f8] sm:$0xff]   ;;  %v9648_v46 = vld [vmem:[%s12380_s5 + $0x2b0] sm:$0xff]  }
 0xe3f   : > { %v4291_v49 = vadd.f32 %v9064_v47, %v8103_v45  ;;  %v9647_v45 = vld [vmem:[%s12380_s5 + $0x2f0] sm:$0xff]   ;;  %v9649_v47 = vld [vmem:[%s12380_s5 + $0x2e8] sm:$0xff]  }
 0xe41   : > { %v4473_v50 = vpack.c.bf16 %v4291_v49, %v4288_v48  ;;  %v9650_v48 = vld [vmem:[%s12380_s5 + $0x2a8] sm:$0xff]   ;;  %v9651_v49 = vld [vmem:[%s12380_s5 + $0x2e0] sm:$0xff]  }
 0xe43   : > { %v4478_v51 = vsel %vm1151_vm1, %v4473_v50, 0  ;;  %v9652_v50 = vld [vmem:[%s12380_s5 + $0x2a0] sm:$0xff]  }
 0xe44   : > { %9292 = vmatpush3.bf16.xpose.msra.mxu0 %v4478_v51  ;;  %v9653_v51 = vld [vmem:[%s12380_s5 + $0x2d8] sm:$0xff]  }
 0xe45   : > { %9297 = vmatprep.subr.bf16.mxu0 %v10134_v58 }
 0xec3   : > { %v3853_v52 = vpop.f32.mrf.mxu1 }
 0xec4   : > { %v3860_v53 = vsel %vm1199_vm2, %v3853_v52, -inf }
 0xec5   : > { %3861 = vmax.xlane.f32.xlu0 %v3860_v53  ;;  %v9283_v54 = vpop.f32.mrf.mxu1  ;;  %v9655_v53 = vld [vmem:[%s12380_s5 + $0x2d0] sm:$0xff]  }
 0xec6   : > { %v9656_v54 = vld [vmem:[%s12380_s5 + $0x290] sm:$0xff]  }
 0xec7   : > { %v3856_v55 = vpop.f32.mrf.mxu1 }
 0xec8   : > { %v3863_v56 = vsel %vm1199_vm2, %v3856_v55, -inf }
 0xec9   : > { %3864 = vmax.xlane.f32.xlu1 %v3863_v56  ;;  %v9284_v57 = vpop.f32.mrf.mxu1  ;;  %v9658_v56 = vld [vmem:[%s12380_s5 + $0x288] sm:$0xff]  }
 0xeca   : > { %v9659_v57 = vld [vmem:[%s12380_s5 + $0x2c0] sm:$0xff]  }
 0xf4e   : > { %v3862_v59 = vpop.xlane.xlu0 %3861 }
 0xf4f   : > { %v3866_v60 = vsub.f32 %v3853_v52, %v3862_v59  ;;  %v9654_v52 = vld [vmem:[%s12380_s5 + $0x298] sm:$0xff]   ;;  %v9660_v59 = vld [vmem:[%s12380_s5 + $0x280] sm:$0xff]  }
 0xf51   : > { %v3868_v61 = vmul.f32 1.442695, %v3866_v60  ;;  %v9661_v60 = vld [vmem:[%s12379_s4 + $0x378] sm:$0xff]  }
 0xf52   : > { %v3865_v62 = vpop.xlane.xlu1 %3864 }
 0xf53   : > { %10036 = vpow2.f32 %v3868_v61  ;;  %v3867_v0 = vsub.f32 %v3856_v55, %v3865_v62  ;;  %v9657_v55 = vld [vmem:[%s12380_s5 + $0x2c8] sm:$0xff]   ;;  %v9662_v61 = vld [vmem:[%s12379_s4 + $0x338] sm:$0xff]   ;;  %v9663_v62 = vld [vmem:[%s12379_s4 + $0x370] sm:$0xff]  }
 0xf55   : > { %v3870_v10 = vmul.f32 1.442695, %v3867_v0  ;;  %v9664_v0 = vld [vmem:[%s12379_s4 + $0x330] sm:$0xff]  }
 0xf57   : > { %10038 = vpow2.f32 %v3870_v10  ;;  %v9665_v10 = vld [vmem:[%s12379_s4 + $0x368] sm:$0xff]  }
 0xf60   : > { %v10037_v12 = vpop.eup %10036 }
 0xf61   : > { %v3872_v13 = vsel %vm1199_vm2, %v10037_v12, 0.0 }
 0xf62   : > { %3873 = vadd.xlane.f32.xlu0 %v3872_v13  ;;  %v9667_v13 = vld [vmem:[%s12379_s4 + $0x360] sm:$0xff]  }
 0xf64   : > { %v10039_v16 = vpop.eup %10038 }
 0xf65   : > { %v3875_v18 = vsel %vm1199_vm2, %v10039_v16, 0.0 }
 0xf66   : > { %3876 = vadd.xlane.f32.xlu1 %v3875_v18  ;;  %v9669_v18 = vld [vmem:[%s12379_s4 + $0x358] sm:$0xff]  }
 0xfeb   : > { %v3874_v23 = vpop.xlane.xlu0 %3873 }
 0xfec   : > { %10040 = vrcp.f32 %v3874_v23  ;;  %v9671_v23 = vld [vmem:[%s12379_s4 + $0x350] sm:$0xff]  }
 0xfef   : > { %v3877_v24 = vpop.xlane.xlu1 %3876 }
 0xff0   : > { %10042 = vrcp.f32 %v3877_v24  ;;  %v9672_v24 = vld [vmem:[%s12379_s4 + $0x310] sm:$0xff]  }
 0xff9   : > { %v10041_v25 = vpop.eup %10040 }
 0xffa   : > { %v3880_v27 = vmul.f32 %v10041_v25, %v10037_v12  ;;  %v9666_v12 = vld [vmem:[%s12379_s4 + $0x328] sm:$0xff]  }
 0xffb   : > { %v9673_v25 = vld [vmem:[%s12379_s4 + $0x348] sm:$0xff]  }
 0xffd   : > { %v10043_v26 = vpop.eup %10042 }
 0xffe   : > { %v3881_v28 = vmul.f32 %v10043_v26, %v10039_v16  ;;  %v9668_v16 = vld [vmem:[%s12379_s4 + $0x320] sm:$0xff]   ;;  %v9674_v26 = vld [vmem:[%s12379_s4 + $0x308] sm:$0xff]  }
0x1000   : > { %v3882_v14 = vpack.c.bf16 %v3881_v28, %v3880_v27  ;;  %v9675_v27 = vld [vmem:[%s12379_s4 + $0x340] sm:$0xff]  }
0x1001   : > { %v9676_v28 = vld [vmem:[%s12379_s4 + $0x300] sm:$0xff]  }
0x1002   : > { %9288 = vmatmul.mubr.msk.bf16.vlgmr.msra.gmra.mxu1 %vm1199_vm2, %v3882_v14 }
0x1003   : > { %9022 = vmatpush3.bf16.msra.mxu1 %v9630_v29  ;;  %4107 = vmatprep.mubr.bf16.mxu1 %v10449_v31 }
0x1004   : > { %9023 = vmatprep.subr.bf16.mxu1 %v9631_v15 }
0x1007   : > { %9024 = vmatpush3.bf16.msra.mxu1 %v9632_v20 }
0x1008   : > { %9025 = vmatprep.subr.bf16.mxu1 %v9633_v21 }
0x100b   : > { %9026 = vmatpush3.bf16.msra.mxu1 %v9634_v32 }
0x100c   : > { %9027 = vmatprep.subr.bf16.mxu1 %v9635_v33 }
0x100f   : > { %9028 = vmatpush3.bf16.msra.mxu1 %v9636_v34 }
0x1010   : > { %9029 = vmatprep.subr.bf16.mxu1 %v9637_v35 }
0x1013   : > { %9030 = vmatpush3.bf16.msra.mxu1 %v9638_v36 }
0x1014   : > { %9031 = vmatprep.subr.bf16.mxu1 %v9639_v37  ;;  %v8053_v37 = vld [vmem:[%s12381_s6 + $0x5] ss:$0 sm:$0xff] }
0x1017   : > { %9032 = vmatpush3.bf16.msra.mxu1 %v9640_v38 }
0x1018   : > { %9033 = vmatprep.subr.bf16.mxu1 %v9641_v39 }
0x101b   : > { %9034 = vmatpush3.bf16.msra.mxu1 %v9642_v40 }
0x101c   : > { %9035 = vmatprep.subr.bf16.mxu1 %v9643_v41 }
0x101f   : > { %9036 = vmatpush3.bf16.msra.mxu1 %v9644_v42 }
0x1020   : > { %9065 = vmatprep.subr.bf16.mxu1 %v9645_v43 }
0x1022   : > { %4108 = vmatmul.mubr.bf16.vlgmr.msra.gmra.mxu1 %v10447_v30 }
0x1023   : > { %9066 = vmatpush3.bf16.msra.mxu1 %v9646_v44  ;;  %4463 = vmatprep.mubr.bf16.mxu1 %v10449_v31 }
0x1024   : > { %9067 = vmatprep.subr.bf16.mxu1 %v9647_v45 }
0x1027   : > { %9068 = vmatpush3.bf16.msra.mxu1 %v9648_v46 }
0x1028   : > { %9069 = vmatprep.subr.bf16.mxu1 %v9649_v47  ;;  %v8153_v47 = vld [vmem:[%s12383_s8 + $0x5] ss:$0 sm:$0xff] }
0x102b   : > { %9070 = vmatpush3.bf16.msra.mxu1 %v9650_v48 }
0x102c   : > { %9071 = vmatprep.subr.bf16.mxu1 %v9651_v49 }
0x102f   : > { %9072 = vmatpush3.bf16.msra.mxu1 %v9652_v50 }
0x1030   : > { %9073 = vmatprep.subr.bf16.mxu1 %v9653_v51 }
0x1033   : > { %9074 = vmatpush3.bf16.msra.mxu1 %v9654_v52 }
0x1034   : > { %9075 = vmatprep.subr.bf16.mxu1 %v9655_v53 }
0x1037   : > { %9076 = vmatpush3.bf16.msra.mxu1 %v9656_v54 }
0x1038   : > { %9077 = vmatprep.subr.bf16.mxu1 %v9657_v55 }
0x103b   : > { %9078 = vmatpush3.bf16.msra.mxu1 %v9658_v56 }
0x103c   : > { %9079 = vmatprep.subr.bf16.mxu1 %v9659_v57  ;;  %v8257_v57 = vld [vmem:[%s12382_s7 + $0x6] ss:$0 sm:$0xff] }
0x103f   : > { %9080 = vmatpush3.bf16.msra.mxu1 %v9660_v59 }
0x1040   : > { %9113 = vmatprep.subr.bf16.mxu1 %v9661_v60 }
0x1042   : > { %4464 = vmatmul.mubr.bf16.vlgmr.msra.gmra.mxu1 %v10447_v30 }
0x1043   : > { %9114 = vmatpush3.bf16.msra.mxu1 %v9662_v61  ;;  %4950 = vmatprep.mubr.bf16.mxu1 %v10449_v31 }
0x1044   : > { %9115 = vmatprep.subr.bf16.mxu1 %v9663_v62 }
0x1047   : > { %9116 = vmatpush3.bf16.msra.mxu1 %v9664_v0 }
0x1048   : > { %9117 = vmatprep.subr.bf16.mxu1 %v9665_v10 }
0x104b   : > { %9118 = vmatpush3.bf16.msra.mxu1 %v9666_v12 }
0x104c   : > { %9119 = vmatprep.subr.bf16.mxu1 %v9667_v13 }
0x104f   : > { %9120 = vmatpush3.bf16.msra.mxu1 %v9668_v16 }
0x1050   : > { %9121 = vmatprep.subr.bf16.mxu1 %v9669_v18 }
0x1053   : > { %9122 = vmatpush3.bf16.msra.mxu1 %v9670_v22 }
0x1054   : > { %9123 = vmatprep.subr.bf16.mxu1 %v9671_v23 }
0x1057   : > { %9124 = vmatpush3.bf16.msra.mxu1 %v9672_v24 }
0x1058   : > { %9125 = vmatprep.subr.bf16.mxu1 %v9673_v25 }
0x105b   : > { %9126 = vmatpush3.bf16.msra.mxu1 %v9674_v26 }
0x105c   : > { %9127 = vmatprep.subr.bf16.mxu1 %v9675_v27 }
0x105f   : > { %9128 = vmatpush3.bf16.msra.mxu1 %v9676_v28 }
0x1060   : > { %9303 = vmatprep.subr.bf16.mxu1 %v10134_v58 }
0x1062   : > { %4951 = vmatmul.mubr.bf16.vlgmr.msra.gmra.mxu1 %v10447_v30 }
0x1063   : > { %9305 = vmatprep.mubr.msk.bf16.mxu1 %vm10135_vm0, %v10134_v58 }
0x10c2   : > { %v3921_v29 = vpop.f32.mrf.mxu1 }
0x10c3   : > { %v8660_v14 = vpack.c.bf16 %v3921_v29, %v3921_v29 }
0x10c4   : > { %v9289_v15 = vpop.f32.mrf.mxu1 }
0x10c5   : > { %3936 = vst.msk [vmem:[#allocation2 + $0x4] sm:$0xf] %vm1276_vm3, %v8660_v14 }
0x10c6   : > { %v3924_v20 = vpop.f32.mrf.mxu1 }
0x10c7   : > { %v8661_v21 = vpack.c.bf16 %v3924_v20, %v3924_v20 }
0x10c8   : > { %v9290_v32 = vpop.f32.mrf.mxu1 }
0x10c9   : > { %3937 = vst.msk [vmem:[#allocation2 + $0xc] sm:$0xf] %vm1276_vm3, %v8661_v21  ;;  %v9677_v32 = vld [vmem:[%s12378_s3 + $0x378] sm:$0xff]  }
0x10e2   : > { %v9037_v33 = vpop.f32.mrf.mxu1 }
0x10e4   : > { %v9038_v34 = vpop.f32.mrf.mxu1 }
0x10e5   : > { %v9039_v36 = vadd.f32 %v9038_v34, %v9037_v33 }
0x10e6   : > { %v9040_v35 = vpop.f32.mrf.mxu1 }
0x10e7   : > { %v4110_v40 = vadd.f32 %v9039_v36, %v8053_v37 }
0x10e8   : > { %v9041_v38 = vpop.f32.mrf.mxu1 }
0x10e9   : > { %v9042_v39 = vadd.f32 %v9041_v38, %v9040_v35 }
0x10eb   : > { %v4113_v41 = vadd.f32 %v9042_v39, %v8053_v37  ;;  %v9678_v39 = vld [vmem:[%s12378_s3 + $0x338] sm:$0xff]  }
0x10ed   : > { %v4472_v42 = vpack.c.bf16 %v4113_v41, %v4110_v40  ;;  %v9679_v41 = vld [vmem:[%s12378_s3 + $0x370] sm:$0xff]  }
0x10ef   : > { %9294 = vmatmul.mubr.msk.bf16.vlgmr.msra.gmra.mxu0 %vm1151_vm1, %v4472_v42  ;;  %v9680_v42 = vld [vmem:[%s12378_s3 + $0x330] sm:$0xff]  }
0x10f0   : > { %9299 = vmatprep.mubr.msk.bf16.mxu0 %vm10135_vm0, %v10134_v58 }
0x1102   : > { %v9081_v43 = vpop.f32.mrf.mxu1 }
0x1104   : > { %v9082_v44 = vpop.f32.mrf.mxu1 }
0x1105   : > { %v9083_v46 = vadd.f32 %v9082_v44, %v9081_v43  ;;  %v9681_v43 = vld [vmem:[%s12378_s3 + $0x368] sm:$0xff]  }
0x1106   : > { %v9084_v45 = vpop.f32.mrf.mxu1  ;;  %v9682_v44 = vld [vmem:[%s12378_s3 + $0x328] sm:$0xff]  }
0x1107   : > { %v4466_v50 = vadd.f32 %v9083_v46, %v8153_v47  ;;  %v9684_v46 = vld [vmem:[%s12378_s3 + $0x320] sm:$0xff]  }
0x1108   : > { %v9085_v48 = vpop.f32.mrf.mxu1 }
0x1109   : > { %v9086_v49 = vadd.f32 %v9085_v48, %v9084_v45  ;;  %v9683_v45 = vld [vmem:[%s12378_s3 + $0x360] sm:$0xff]   ;;  %v9686_v48 = vld [vmem:[%s12378_s3 + $0x318] sm:$0xff]  }
0x110b   : > { %v4469_v51 = vadd.f32 %v9086_v49, %v8153_v47  ;;  %v9685_v47 = vld [vmem:[%s12378_s3 + $0x358] sm:$0xff]   ;;  %v9687_v49 = vld [vmem:[%s12378_s3 + $0x350] sm:$0xff]  }
0x110d   : > { %v4544_v52 = vpack.c.bf16 %v4469_v51, %v4466_v50  ;;  %v9688_v50 = vld [vmem:[%s12378_s3 + $0x310] sm:$0xff]   ;;  %v9689_v51 = vld [vmem:[%s12378_s3 + $0x348] sm:$0xff]  }
0x110f   : > { %9298 = vmatpush3.bf16.msra.mxu0 %v4544_v52  ;;  %v9690_v52 = vld [vmem:[%s12378_s3 + $0x308] sm:$0xff]  }
0x1110   : > { %9091 = vmatprep.subr.bf16.mxu0 %v9677_v32  ;;  %v9718_v32 = vld [vmem:[%s12379_s4 + $0x398] sm:$0xff]  }
0x1122   : > { %v9129_v53 = vpop.f32.mrf.mxu1 }
0x1124   : > { %v9130_v54 = vpop.f32.mrf.mxu1 }
0x1125   : > { %v9131_v56 = vadd.f32 %v9130_v54, %v9129_v53  ;;  %v9691_v53 = vld [vmem:[%s12378_s3 + $0x340] sm:$0xff]  }
0x1126   : > { %v9132_v55 = vpop.f32.mrf.mxu1  ;;  %v9692_v54 = vld [vmem:[%s12378_s3 + $0x300] sm:$0xff]  }
0x1127   : > { %v4953_v61 = vadd.f32 %v9131_v56, %v8257_v57  ;;  %v9694_v56 = vld [vmem:[%s12380_s5 + $0x338] sm:$0xff]  }
0x1128   : > { %v9133_v59 = vpop.f32.mrf.mxu1 }
0x1129   : > { %v9134_v60 = vadd.f32 %v9133_v59, %v9132_v55  ;;  %v9693_v55 = vld [vmem:[%s12380_s5 + $0x378] sm:$0xff]   ;;  %v9696_v59 = vld [vmem:[%s12380_s5 + $0x330] sm:$0xff]  }
0x112b   : > { %v4956_v62 = vadd.f32 %v9134_v60, %v8257_v57  ;;  %v9695_v57 = vld [vmem:[%s12380_s5 + $0x370] sm:$0xff]   ;;  %v9697_v60 = vld [vmem:[%s12380_s5 + $0x368] sm:$0xff]  }
0x112d   : > { %v5138_v0 = vpack.c.bf16 %v4956_v62, %v4953_v61  ;;  %v9698_v61 = vld [vmem:[%s12380_s5 + $0x328] sm:$0xff]   ;;  %v9699_v62 = vld [vmem:[%s12380_s5 + $0x360] sm:$0xff]  }
0x112f   : > { %v5143_v10 = vsel %vm1151_vm1, %v5138_v0, 0  ;;  %v9700_v0 = vld [vmem:[%s12380_s5 + $0x320] sm:$0xff]  }
0x1130   : > { %9304 = vmatpush3.bf16.xpose.msra.mxu1 %v5143_v10  ;;  %v9701_v10 = vld [vmem:[%s12380_s5 + $0x358] sm:$0xff]  }
0x1131   : > { %9309 = vmatprep.subr.bf16.mxu1 %v10134_v58 }
0x11af   : > { %v4514_v12 = vpop.f32.mrf.mxu0 }
0x11b0   : > { %v4521_v13 = vsel %vm1199_vm2, %v4514_v12, -inf }
0x11b1   : > { %4522 = vmax.xlane.f32.xlu0 %v4521_v13  ;;  %v9295_v16 = vpop.f32.mrf.mxu0  ;;  %v9703_v13 = vld [vmem:[%s12380_s5 + $0x350] sm:$0xff]  }
0x11b2   : > { %v9704_v16 = vld [vmem:[%s12380_s5 + $0x310] sm:$0xff]  }
0x11b3   : > { %v4517_v18 = vpop.f32.mrf.mxu0 }
0x11b4   : > { %v4524_v22 = vsel %vm1199_vm2, %v4517_v18, -inf }
0x11b5   : > { %4525 = vmax.xlane.f32.xlu1 %v4524_v22  ;;  %v9296_v23 = vpop.f32.mrf.mxu0  ;;  %v9706_v22 = vld [vmem:[%s12380_s5 + $0x308] sm:$0xff]  }
0x11b6   : > { %v9707_v23 = vld [vmem:[%s12380_s5 + $0x340] sm:$0xff]  }
0x123a   : > { %v4523_v24 = vpop.xlane.xlu0 %4522 }
0x123b   : > { %v4527_v25 = vsub.f32 %v4514_v12, %v4523_v24  ;;  %v9702_v12 = vld [vmem:[%s12380_s5 + $0x318] sm:$0xff]   ;;  %v9708_v24 = vld [vmem:[%s12380_s5 + $0x300] sm:$0xff]  }
0x123d   : > { %v4529_v26 = vmul.f32 1.442695, %v4527_v25  ;;  %v9709_v25 = vld [vmem:[%s12379_s4 + $0x3f8] sm:$0xff]  }
0x123e   : > { %v4526_v27 = vpop.xlane.xlu1 %4525 }
0x123f   : > { %10044 = vpow2.f32 %v4529_v26  ;;  %v4528_v28 = vsub.f32 %v4517_v18, %v4526_v27  ;;  %v9705_v18 = vld [vmem:[%s12380_s5 + $0x348] sm:$0xff]   ;;  %v9710_v26 = vld [vmem:[%s12379_s4 + $0x3b8] sm:$0xff]   ;;  %v9711_v27 = vld [vmem:[%s12379_s4 + $0x3f0] sm:$0xff]  }
0x1241   : > { %v4531_v29 = vmul.f32 1.442695, %v4528_v28  ;;  %v9712_v28 = vld [vmem:[%s12379_s4 + $0x3b0] sm:$0xff]  }
0x1243   : > { %10046 = vpow2.f32 %v4531_v29  ;;  %v9713_v29 = vld [vmem:[%s12379_s4 + $0x3e8] sm:$0xff]  }
0x124c   : > { %v10045_v14 = vpop.eup %10044 }
0x124d   : > { %v4533_v15 = vsel %vm1199_vm2, %v10045_v14, 0.0 }
0x124e   : > { %4534 = vadd.xlane.f32.xlu0 %v4533_v15  ;;  %v9715_v15 = vld [vmem:[%s12379_s4 + $0x3e0] sm:$0xff]  }
0x1250   : > { %v10047_v20 = vpop.eup %10046 }
0x1251   : > { %v4536_v21 = vsel %vm1199_vm2, %v10047_v20, 0.0 }
0x1252   : > { %4537 = vadd.xlane.f32.xlu1 %v4536_v21  ;;  %v9717_v21 = vld [vmem:[%s12379_s4 + $0x3d8] sm:$0xff]  }
0x12d7   : > { %v4535_v33 = vpop.xlane.xlu0 %4534 }
0x12d8   : > { %10048 = vrcp.f32 %v4535_v33  ;;  %v9719_v33 = vld [vmem:[%s12379_s4 + $0x3d0] sm:$0xff]  }
0x12db   : > { %v4538_v34 = vpop.xlane.xlu1 %4537 }
0x12dc   : > { %10050 = vrcp.f32 %v4538_v34  ;;  %v9720_v34 = vld [vmem:[%s12379_s4 + $0x390] sm:$0xff]  }
0x12e5   : > { %v10049_v35 = vpop.eup %10048 }
0x12e6   : > { %v4541_v37 = vmul.f32 %v10049_v35, %v10045_v14  ;;  %v9714_v14 = vld [vmem:[%s12379_s4 + $0x3a8] sm:$0xff]  }
0x12e7   : > { %v9721_v35 = vld [vmem:[%s12379_s4 + $0x3c8] sm:$0xff]  }
0x12e9   : > { %v10051_v36 = vpop.eup %10050 }
0x12ea   : > { %v4542_v38 = vmul.f32 %v10051_v36, %v10047_v20  ;;  %v9716_v20 = vld [vmem:[%s12379_s4 + $0x3a0] sm:$0xff]   ;;  %v9722_v36 = vld [vmem:[%s12379_s4 + $0x388] sm:$0xff]  }
0x12ec   : > { %v4543_v40 = vpack.c.bf16 %v4542_v38, %v4541_v37  ;;  %v9723_v37 = vld [vmem:[%s12379_s4 + $0x3c0] sm:$0xff]  }
0x12ed   : > { %v9724_v38 = vld [vmem:[%s12379_s4 + $0x380] sm:$0xff]  }
0x12ee   : > { %9300 = vmatmul.mubr.msk.bf16.vlgmr.msra.gmra.mxu0 %vm1199_vm2, %v4543_v40 }
0x12ef   : > { %9092 = vmatpush3.bf16.msra.mxu0 %v9678_v39  ;;  %4772 = vmatprep.mubr.bf16.mxu0 %v10449_v31 }
0x12f0   : > { %9093 = vmatprep.subr.bf16.mxu0 %v9679_v41 }
0x12f3   : > { %9094 = vmatpush3.bf16.msra.mxu0 %v9680_v42 }
0x12f4   : > { %9095 = vmatprep.subr.bf16.mxu0 %v9681_v43 }
0x12f7   : > { %9096 = vmatpush3.bf16.msra.mxu0 %v9682_v44 }
0x12f8   : > { %9097 = vmatprep.subr.bf16.mxu0 %v9683_v45 }
0x12fb   : > { %9098 = vmatpush3.bf16.msra.mxu0 %v9684_v46 }
0x12fc   : > { %9099 = vmatprep.subr.bf16.mxu0 %v9685_v47  ;;  %v8207_v47 = vld [vmem:[%s12381_s6 + $0x6] ss:$0 sm:$0xff] }
0x12ff   : > { %9100 = vmatpush3.bf16.msra.mxu0 %v9686_v48 }
0x1300   : > { %9101 = vmatprep.subr.bf16.mxu0 %v9687_v49 }
0x1303   : > { %9102 = vmatpush3.bf16.msra.mxu0 %v9688_v50 }
0x1304   : > { %9103 = vmatprep.subr.bf16.mxu0 %v9689_v51 }
0x1307   : > { %9104 = vmatpush3.bf16.msra.mxu0 %v9690_v52 }
0x1308   : > { %9105 = vmatprep.subr.bf16.mxu0 %v9691_v53 }
0x130b   : > { %9106 = vmatpush3.bf16.msra.mxu0 %v9692_v54 }
0x130c   : > { %9135 = vmatprep.subr.bf16.mxu0 %v9693_v55 }
0x130e   : > { %4773 = vmatmul.mubr.bf16.vlgmr.msra.gmra.mxu0 %v10447_v30 }
0x130f   : > { %9136 = vmatpush3.bf16.msra.mxu0 %v9694_v56  ;;  %5128 = vmatprep.mubr.bf16.mxu0 %v10449_v31 }
0x1310   : > { %9137 = vmatprep.subr.bf16.mxu0 %v9695_v57  ;;  %v8307_v57 = vld [vmem:[%s12383_s8 + $0x6] ss:$0 sm:$0xff] }
0x1313   : > { %9138 = vmatpush3.bf16.msra.mxu0 %v9696_v59 }
0x1314   : > { %9139 = vmatprep.subr.bf16.mxu0 %v9697_v60 }
0x1317   : > { %9140 = vmatpush3.bf16.msra.mxu0 %v9698_v61 }
0x1318   : > { %9141 = vmatprep.subr.bf16.mxu0 %v9699_v62 }
0x131b   : > { %9142 = vmatpush3.bf16.msra.mxu0 %v9700_v0 }
0x131c   : > { %9143 = vmatprep.subr.bf16.mxu0 %v9701_v10 }
0x131f   : > { %9144 = vmatpush3.bf16.msra.mxu0 %v9702_v12 }
0x1320   : > { %9145 = vmatprep.subr.bf16.mxu0 %v9703_v13 }
0x1323   : > { %9146 = vmatpush3.bf16.msra.mxu0 %v9704_v16 }
0x1324   : > { %9147 = vmatprep.subr.bf16.mxu0 %v9705_v18  ;;  %v8411_v18 = vld [vmem:[%s12382_s7 + $0x7] ss:$0 sm:$0xff] }
0x1327   : > { %9148 = vmatpush3.bf16.msra.mxu0 %v9706_v22 }
0x1328   : > { %9149 = vmatprep.subr.bf16.mxu0 %v9707_v23 }
0x132b   : > { %9150 = vmatpush3.bf16.msra.mxu0 %v9708_v24 }
0x132c   : > { %9183 = vmatprep.subr.bf16.mxu0 %v9709_v25 }
0x132e   : > { %5129 = vmatmul.mubr.bf16.vlgmr.msra.gmra.mxu0 %v10447_v30 }
0x132f   : > { %9184 = vmatpush3.bf16.msra.mxu0 %v9710_v26  ;;  %5615 = vmatprep.mubr.bf16.mxu0 %v10449_v31 }
0x1330   : > { %9185 = vmatprep.subr.bf16.mxu0 %v9711_v27 }
0x1333   : > { %9186 = vmatpush3.bf16.msra.mxu0 %v9712_v28 }
0x1334   : > { %9187 = vmatprep.subr.bf16.mxu0 %v9713_v29 }
0x1337   : > { %9188 = vmatpush3.bf16.msra.mxu0 %v9714_v14 }
0x1338   : > { %9189 = vmatprep.subr.bf16.mxu0 %v9715_v15 }
0x133b   : > { %9190 = vmatpush3.bf16.msra.mxu0 %v9716_v20 }
0x133c   : > { %9191 = vmatprep.subr.bf16.mxu0 %v9717_v21 }
0x133f   : > { %9192 = vmatpush3.bf16.msra.mxu0 %v9718_v32 }
0x1340   : > { %9193 = vmatprep.subr.bf16.mxu0 %v9719_v33 }
0x1343   : > { %9194 = vmatpush3.bf16.msra.mxu0 %v9720_v34 }
0x1344   : > { %9195 = vmatprep.subr.bf16.mxu0 %v9721_v35 }
0x1347   : > { %9196 = vmatpush3.bf16.msra.mxu0 %v9722_v36 }
0x1348   : > { %9197 = vmatprep.subr.bf16.mxu0 %v9723_v37 }
0x134b   : > { %9198 = vmatpush3.bf16.msra.mxu0 %v9724_v38 }
0x134c   : > { %9315 = vmatprep.subr.bf16.mxu0 %v10134_v58 }
0x134e   : > { %5616 = vmatmul.mubr.bf16.vlgmr.msra.gmra.mxu0 %v10447_v30 }
0x134f   : > { %9317 = vmatprep.mubr.msk.bf16.mxu0 %vm10135_vm0, %v10134_v58 }
0x13ae   : > { %v11602_v39 = vpop.f32.mrf.mxu0 }
0x13b0   : > { %v9301_v40 = vpop.f32.mrf.mxu0 }
0x13b2   : > { %v11604_v41 = vpop.f32.mrf.mxu0 }
0x13b4   : > { %v9302_v42 = vpop.f32.mrf.mxu0 }
0x13ce   : > { %v9107_v43 = vpop.f32.mrf.mxu0 }
0x13d0   : > { %v9108_v44 = vpop.f32.mrf.mxu0 }
0x13d1   : > { %v9109_v46 = vadd.f32 %v9108_v44, %v9107_v43  ;;  %v9725_v44 = vld [vmem:[%s12378_s3 + $0x3f8] sm:$0xff]  }
0x13d2   : > { %v9110_v45 = vpop.f32.mrf.mxu0 }
0x13d3   : > { %v4775_v50 = vadd.f32 %v9109_v46, %v8207_v47 }
0x13d4   : > { %v9111_v48 = vpop.f32.mrf.mxu0 }
0x13d5   : > { %v9112_v49 = vadd.f32 %v9111_v48, %v9110_v45 }
0x13d7   : > { %v4778_v51 = vadd.f32 %v9112_v49, %v8207_v47 }
0x13d9   : > { %v5137_v52 = vpack.c.bf16 %v4778_v51, %v4775_v50  ;;  %v9726_v51 = vld [vmem:[%s12378_s3 + $0x3b8] sm:$0xff]  }
0x13db   : > { %9306 = vmatmul.mubr.msk.bf16.vlgmr.msra.gmra.mxu1 %vm1151_vm1, %v5137_v52 }
0x13dc   : > { %9311 = vmatprep.mubr.msk.bf16.mxu1 %vm10135_vm0, %v10134_v58 }
0x13ee   : > { %v9151_v53 = vpop.f32.mrf.mxu0 }
0x13f0   : > { %v9152_v54 = vpop.f32.mrf.mxu0 }
0x13f1   : > { %v9153_v56 = vadd.f32 %v9152_v54, %v9151_v53  ;;  %v9727_v53 = vld [vmem:[%s12378_s3 + $0x3f0] sm:$0xff]  }
0x13f2   : > { %v9154_v55 = vpop.f32.mrf.mxu0  ;;  %v9728_v54 = vld [vmem:[%s12378_s3 + $0x3b0] sm:$0xff]  }
0x13f3   : > { %v5131_v61 = vadd.f32 %v9153_v56, %v8307_v57  ;;  %v9730_v56 = vld [vmem:[%s12378_s3 + $0x3a8] sm:$0xff]  }
0x13f4   : > { %v9155_v59 = vpop.f32.mrf.mxu0 }
0x13f5   : > { %v9156_v60 = vadd.f32 %v9155_v59, %v9154_v55  ;;  %v9729_v55 = vld [vmem:[%s12378_s3 + $0x3e8] sm:$0xff]   ;;  %v9732_v59 = vld [vmem:[%s12378_s3 + $0x3a0] sm:$0xff]  }
0x13f7   : > { %v5134_v62 = vadd.f32 %v9156_v60, %v8307_v57  ;;  %v9731_v57 = vld [vmem:[%s12378_s3 + $0x3e0] sm:$0xff]   ;;  %v9733_v60 = vld [vmem:[%s12378_s3 + $0x3d8] sm:$0xff]  }
0x13f9   : > { %v5209_v0 = vpack.c.bf16 %v5134_v62, %v5131_v61  ;;  %v9734_v61 = vld [vmem:[%s12378_s3 + $0x398] sm:$0xff]   ;;  %v9735_v62 = vld [vmem:[%s12378_s3 + $0x3d0] sm:$0xff]  }
0x13fb   : > { %9310 = vmatpush3.bf16.msra.mxu1 %v5209_v0  ;;  %v9736_v0 = vld [vmem:[%s12378_s3 + $0x390] sm:$0xff]  }
0x13fc   : > { %9161 = vmatprep.subr.bf16.mxu1 %v9725_v44  ;;  %v8361_v44 = vld [vmem:[%s12381_s6 + $0x7] ss:$0 sm:$0xff] }
0x140e   : > { %v9199_v10 = vpop.f32.mrf.mxu0 }
0x1410   : > { %v9200_v12 = vpop.f32.mrf.mxu0 }
0x1411   : > { %v9201_v16 = vadd.f32 %v9200_v12, %v9199_v10  ;;  %v9737_v10 = vld [vmem:[%s12378_s3 + $0x3c8] sm:$0xff]  }
0x1412   : > { %v9202_v13 = vpop.f32.mrf.mxu0  ;;  %v9738_v12 = vld [vmem:[%s12378_s3 + $0x388] sm:$0xff]  }
0x1413   : > { %v5618_v24 = vadd.f32 %v9201_v16, %v8411_v18  ;;  %v9740_v16 = vld [vmem:[%s12378_s3 + $0x380] sm:$0xff]  }
0x1414   : > { %v9203_v22 = vpop.f32.mrf.mxu0 }
0x1415   : > { %v9204_v23 = vadd.f32 %v9203_v22, %v9202_v13  ;;  %v9739_v13 = vld [vmem:[%s12378_s3 + $0x3c0] sm:$0xff]   ;;  %v9742_v22 = vld [vmem:[%s12380_s5 + $0x3b8] sm:$0xff]  }
0x1417   : > { %v5621_v25 = vadd.f32 %v9204_v23, %v8411_v18  ;;  %v9741_v18 = vld [vmem:[%s12380_s5 + $0x3f8] sm:$0xff]   ;;  %v9743_v23 = vld [vmem:[%s12380_s5 + $0x3f0] sm:$0xff]  }
0x1419   : > { %v5803_v26 = vpack.c.bf16 %v5621_v25, %v5618_v24  ;;  %v9744_v24 = vld [vmem:[%s12380_s5 + $0x3b0] sm:$0xff]   ;;  %v9745_v25 = vld [vmem:[%s12380_s5 + $0x3e8] sm:$0xff]  }
0x141b   : > { %v5808_v27 = vsel %vm1151_vm1, %v5803_v26, 0  ;;  %v9746_v26 = vld [vmem:[%s12380_s5 + $0x3a8] sm:$0xff]  }
0x141c   : > { %9316 = vmatpush3.bf16.xpose.msra.mxu0 %v5808_v27  ;;  %v9747_v27 = vld [vmem:[%s12380_s5 + $0x3e0] sm:$0xff]  }
0x141d   : > { %9321 = vmatprep.subr.bf16.mxu0 %v10134_v58 }
0x149b   : > { %v5179_v28 = vpop.f32.mrf.mxu1 }
0x149c   : > { %v5186_v29 = vsel %vm1199_vm2, %v5179_v28, -inf }
0x149d   : > { %5187 = vmax.xlane.f32.xlu0 %v5186_v29  ;;  %v9307_v14 = vpop.f32.mrf.mxu1  ;;  %v9750_v29 = vld [vmem:[%s12380_s5 + $0x398] sm:$0xff]  }
0x149e   : > { %v9751_v14 = vld [vmem:[%s12380_s5 + $0x3d0] sm:$0xff]  }
0x149f   : > { %v5182_v15 = vpop.f32.mrf.mxu1 }
0x14a0   : > { %v5189_v20 = vsel %vm1199_vm2, %v5182_v15, -inf }
0x14a1   : > { %5190 = vmax.xlane.f32.xlu1 %v5189_v20  ;;  %v9308_v21 = vpop.f32.mrf.mxu1  ;;  %v9753_v20 = vld [vmem:[%s12380_s5 + $0x3c8] sm:$0xff]  }
0x14a2   : > { %v9754_v21 = vld [vmem:[%s12380_s5 + $0x388] sm:$0xff]  }
0x1526   : > { %v5188_v32 = vpop.xlane.xlu0 %5187 }
0x1527   : > { %v5192_v33 = vsub.f32 %v5179_v28, %v5188_v32  ;;  %v9749_v28 = vld [vmem:[%s12380_s5 + $0x3d8] sm:$0xff]   ;;  %v9755_v32 = vld [vmem:[%s12380_s5 + $0x3c0] sm:$0xff]  }
0x1529   : > { %v5194_v34 = vmul.f32 1.442695, %v5192_v33  ;;  %v9756_v33 = vld [vmem:[%s12380_s5 + $0x380] sm:$0xff]  }
0x152a   : > { %v5191_v35 = vpop.xlane.xlu1 %5190 }
0x152b   : > { %10052 = vpow2.f32 %v5194_v34  ;;  %v5193_v36 = vsub.f32 %v5182_v15, %v5191_v35  ;;  %v9752_v15 = vld [vmem:[%s12380_s5 + $0x390] sm:$0xff]  }
0x152d   : > { %v5196_v37 = vmul.f32 1.442695, %v5193_v36 }
0x152f   : > { %10054 = vpow2.f32 %v5196_v37 }
0x1538   : > { %v10053_v38 = vpop.eup %10052 }
0x1539   : > { %v5198_v40 = vsel %vm1199_vm2, %v10053_v38, 0.0 }
0x153a   : > { %5199 = vadd.xlane.f32.xlu0 %v5198_v40 }
0x153c   : > { %v10055_v42 = vpop.eup %10054 }
0x153d   : > { %v5201_v43 = vsel %vm1199_vm2, %v10055_v42, 0.0 }
0x153e   : > { %5202 = vadd.xlane.f32.xlu1 %v5201_v43 }
0x15c3   : > { %v5200_v45 = vpop.xlane.xlu0 %5199 }
0x15c4   : > { %10056 = vrcp.f32 %v5200_v45 }
0x15c7   : > { %v5203_v46 = vpop.xlane.xlu1 %5202 }
0x15c8   : > { %10058 = vrcp.f32 %v5203_v46 }
0x15d1   : > { %v10057_v47 = vpop.eup %10056 }
0x15d2   : > { %v5206_v49 = vmul.f32 %v10057_v47, %v10053_v38 }
0x15d5   : > { %v10059_v48 = vpop.eup %10058 }
0x15d6   : > { %v5207_v50 = vmul.f32 %v10059_v48, %v10055_v42 }
0x15d8   : > { %v5208_v52 = vpack.c.bf16 %v5207_v50, %v5206_v49 }
0x15da   : > { %9312 = vmatmul.mubr.msk.bf16.vlgmr.msra.gmra.mxu1 %vm1199_vm2, %v5208_v52 }
0x15db   : > { %9162 = vmatpush3.bf16.msra.mxu1 %v9726_v51  ;;  %5437 = vmatprep.mubr.bf16.mxu1 %v10449_v31 }
0x15dc   : > { %9163 = vmatprep.subr.bf16.mxu1 %v9727_v53  ;;  %v8461_v53 = vld [vmem:[%s12383_s8 + $0x7] ss:$0 sm:$0xff] }
0x15df   : > { %9164 = vmatpush3.bf16.msra.mxu1 %v9728_v54 }
0x15e0   : > { %9165 = vmatprep.subr.bf16.mxu1 %v9729_v55 }
0x15e3   : > { %9166 = vmatpush3.bf16.msra.mxu1 %v9730_v56 }
0x15e4   : > { %9167 = vmatprep.subr.bf16.mxu1 %v9731_v57 }
0x15e7   : > { %9168 = vmatpush3.bf16.msra.mxu1 %v9732_v59 }
0x15e8   : > { %9169 = vmatprep.subr.bf16.mxu1 %v9733_v60 }
0x15eb   : > { %9170 = vmatpush3.bf16.msra.mxu1 %v9734_v61 }
0x15ec   : > { %9171 = vmatprep.subr.bf16.mxu1 %v9735_v62 }
0x15ef   : > { %9172 = vmatpush3.bf16.msra.mxu1 %v9736_v0 }
0x15f0   : > { %9173 = vmatprep.subr.bf16.mxu1 %v9737_v10 }
0x15f3   : > { %9174 = vmatpush3.bf16.msra.mxu1 %v9738_v12 }
0x15f4   : > { %9175 = vmatprep.subr.bf16.mxu1 %v9739_v13 }
0x15f7   : > { %9176 = vmatpush3.bf16.msra.mxu1 %v9740_v16 }
0x15f8   : > { %9205 = vmatprep.subr.bf16.mxu1 %v9741_v18 }
0x15fa   : > { %5438 = vmatmul.mubr.bf16.vlgmr.msra.gmra.mxu1 %v10447_v30 }
0x15fb   : > { %9206 = vmatpush3.bf16.msra.mxu1 %v9742_v22  ;;  %5793 = vmatprep.mubr.bf16.mxu1 %v10449_v31  ;;  %v9748_v31 = vld [vmem:[%s12380_s5 + $0x3a0] sm:$0xff]  }
0x15fc   : > { %9207 = vmatprep.subr.bf16.mxu1 %v9743_v23 }
0x15ff   : > { %9208 = vmatpush3.bf16.msra.mxu1 %v9744_v24 }
0x1600   : > { %9209 = vmatprep.subr.bf16.mxu1 %v9745_v25 }
0x1603   : > { %9210 = vmatpush3.bf16.msra.mxu1 %v9746_v26 }
0x1604   : > { %9211 = vmatprep.subr.bf16.mxu1 %v9747_v27 }
0x1607   : > { %9212 = vmatpush3.bf16.msra.mxu1 %v9748_v31  ;;  %v8655_v31 = vpack.c.bf16 %v10902_v9, %v10902_v9  ;;  %v8658_v9 = vpack.c.bf16 %v11252_v17, %v11252_v17 }
0x1608   : > { %9213 = vmatprep.subr.bf16.mxu1 %v9749_v28  ;;  %v8654_v28 = vpack.c.bf16 %v10900_v7, %v10900_v7  ;;  %v8657_v7 = vpack.c.bf16 %v11078_v11, %v11078_v11 }
0x160b   : > { %9214 = vmatpush3.bf16.msra.mxu1 %v9750_v29  ;;  %v8662_v29 = vpack.c.bf16 %v11602_v39, %v11602_v39  ;;  %v8659_v39 = vpack.c.bf16 %v11254_v19, %v11254_v19 }
0x160c   : > { %9215 = vmatprep.subr.bf16.mxu1 %v9751_v14  ;;  %v8656_v14 = vpack.c.bf16 %v11076_v8, %v11076_v8 }
0x160f   : > { %9216 = vmatpush3.bf16.msra.mxu1 %v9752_v15  ;;  %v8663_v15 = vpack.c.bf16 %v11604_v41, %v11604_v41 }
0x1610   : > { %9217 = vmatprep.subr.bf16.mxu1 %v9753_v20 }
0x1613   : > { %9218 = vmatpush3.bf16.msra.mxu1 %v9754_v21 }
0x1614   : > { %9219 = vmatprep.subr.bf16.mxu1 %v9755_v32 }
0x1617   : > { %9220 = vmatpush3.bf16.msra.mxu1 %v9756_v33 }
0x161a   : > { %5794 = vmatmul.mubr.bf16.vlgmr.msra.gmra.mxu1 %v10447_v30 }
0x169a   : > { %v5247_v34 = vpop.f32.mrf.mxu1 }
0x169b   : > { %v8664_v20 = vpack.c.bf16 %v5247_v34, %v5247_v34 }
0x169c   : > { %v9313_v35 = vpop.f32.mrf.mxu1 }
0x169e   : > { %v11725_v36 = vpop.f32.mrf.mxu1 }
0x169f   : > { %v8665_v8 = vpack.c.bf16 %v11725_v36, %v11725_v36 }
0x16a0   : > { %v9314_v37 = vpop.f32.mrf.mxu1 }
0x16ba   : > { %v9177_v38 = vpop.f32.mrf.mxu1 }
0x16bc   : > { %v9178_v40 = vpop.f32.mrf.mxu1 }
0x16bd   : > { %v9179_v43 = vadd.f32 %v9178_v40, %v9177_v38 }
0x16be   : > { %v9180_v42 = vpop.f32.mrf.mxu1 }
0x16bf   : > { %v5440_v47 = vadd.f32 %v9179_v43, %v8361_v44 }
0x16c0   : > { %v9181_v45 = vpop.f32.mrf.mxu1 }
0x16c1   : > { %v9182_v46 = vadd.f32 %v9181_v45, %v9180_v42 }
0x16c3   : > { %v5443_v48 = vadd.f32 %v9182_v46, %v8361_v44  ;;  %v9757_v46 = vld [vmem:[%s12384_s9 + $0x70] ss:$8 sps:$4 sm:$0xff]  }
0x16c5   : > { %v5802_v49 = vpack.c.bf16 %v5443_v48, %v5440_v47  ;;  %v9759_v47 = vld [vmem:[%s12384_s9 + $0x74] ss:$8 sps:$4 sm:$0xff]   ;;  %v9762_v48 = vld [vmem:[%s12384_s9 + $0x64] ss:$8 sps:$4 sm:$0xff]  }
0x16c7   : > { %9318 = vmatmul.mubr.msk.bf16.vlgmr.msra.gmra.mxu0 %vm1151_vm1, %v5802_v49  ;;  %v9760_v49 = vld [vmem:[%s12384_s9 + $0x60] ss:$8 sps:$4 sm:$0xff]  }
0x16c8   : > { %9323 = vmatprep.mubr.msk.bf16.mxu0 %vm10135_vm0, %v10134_v58 }
0x16da   : > { %v9221_v30 = vpop.f32.mrf.mxu1 }
0x16dc   : > { %v9222_v50 = vpop.f32.mrf.mxu1 }
0x16dd   : > { %v9223_v52 = vadd.f32 %v9222_v50, %v9221_v30  ;;  %v9765_v30 = vld [vmem:[%s12384_s9 + $0x54] ss:$8 sps:$4 sm:$0xff]   ;;  %v9763_v50 = vld [vmem:[%s12384_s9 + $0x50] ss:$8 sps:$4 sm:$0xff]  }
0x16de   : > { %v9224_v51 = vpop.f32.mrf.mxu1 }
0x16df   : > { %v5796_v56 = vadd.f32 %v9223_v52, %v8461_v53  ;;  %v9766_v52 = vld [vmem:[%s12384_s9 + $0x40] ss:$8 sps:$4 sm:$0xff]  }
0x16e0   : > { %v9225_v54 = vpop.f32.mrf.mxu1 }
0x16e1   : > { %v9226_v55 = vadd.f32 %v9225_v54, %v9224_v51  ;;  %v9768_v51 = vld [vmem:[%s12384_s9 + $0x44] ss:$8 sps:$4 sm:$0xff]   ;;  %v9769_v54 = vld [vmem:[%s12384_s9 + $0x30] ss:$8 sps:$4 sm:$0xff]  }
0x16e3   : > { %v5799_v57 = vadd.f32 %v9226_v55, %v8461_v53  ;;  %v9771_v53 = vld [vmem:[%s12384_s9 + $0x34] ss:$8 sps:$4 sm:$0xff]   ;;  %v9774_v55 = vld [vmem:[%s12384_s9 + $0x24] ss:$8 sps:$4 sm:$0xff]  }
0x16e5   : > { %v5874_v59 = vpack.c.bf16 %v5799_v57, %v5796_v56  ;;  %v9772_v56 = vld [vmem:[%s12384_s9 + $0x20] ss:$8 sps:$4 sm:$0xff]   ;;  %v9777_v57 = vld [vmem:[%s12384_s9 + $0x14] ss:$8 sps:$4 sm:$0xff]  }
0x16e7   : > { %9322 = vmatpush3.bf16.msra.mxu0 %v5874_v59  ;;  %v9775_v59 = vld [vmem:[%s12384_s9 + $0x10] ss:$8 sps:$4 sm:$0xff]  }
0x16e8   : > { %6149 = vmatprep.subr.bf16.mxu0 %v9759_v47  ;;  %v9810_v47 = vld [vmem:[%s12388_s13 + $0xe4] ss:$16 sps:$4 sm:$0xff]  }
0x16e9   : > { %6668 = vmatprep.subr.bf16.mxu1 %v9810_v47  ;;  %v9874_v47 = vld [vmem:[%s12388_s13 + $0x180] ss:$16 sps:$4 sm:$0xff]  }
0x1787   : > { %v5844_v60 = vpop.f32.mrf.mxu0 }
0x1788   : > { %v5851_v61 = vsel %vm1199_vm2, %v5844_v60, -inf }
0x1789   : > { %5852 = vmax.xlane.f32.xlu0 %v5851_v61  ;;  %v9319_v62 = vpop.f32.mrf.mxu0  ;;  %v9778_v61 = vld [vmem:[%s12384_s9] ss:$8 sps:$4 sm:$0xff]  }
0x178a   : > { %v9783_v62 = vld [vmem:[%s12384_s9 + $0xf4] ss:$8 sps:$4 sm:$0xff]  }
0x178b   : > { %v5847_v58 = vpop.f32.mrf.mxu0 }
0x178c   : > { %v5854_v0 = vsel %vm1199_vm2, %v5847_v58, -inf }
0x178d   : > { %5855 = vmax.xlane.f32.xlu1 %v5854_v0  ;;  %v9320_v10 = vpop.f32.mrf.mxu0  ;;  %v9786_v0 = vld [vmem:[%s12384_s9 + $0xe4] ss:$8 sps:$4 sm:$0xff]  }
0x178e   : > { %v9784_v10 = vld [vmem:[%s12384_s9 + $0xe0] ss:$8 sps:$4 sm:$0xff]  }
0x1812   : > { %v5853_v12 = vpop.xlane.xlu0 %5852 }
0x1813   : > { %v5857_v13 = vsub.f32 %v5844_v60, %v5853_v12  ;;  %v9780_v60 = vld [vmem:[%s12384_s9 + $0x4] ss:$8 sps:$4 sm:$0xff]   ;;  %v9789_v12 = vld [vmem:[%s12384_s9 + $0xd4] ss:$8 sps:$4 sm:$0xff]  }
0x1815   : > { %v5859_v16 = vmul.f32 1.442695, %v5857_v13  ;;  %v9787_v13 = vld [vmem:[%s12384_s9 + $0xd0] ss:$8 sps:$4 sm:$0xff]  }
0x1816   : > { %v5856_v18 = vpop.xlane.xlu1 %5855 }
0x1817   : > { %10060 = vpow2.f32 %v5859_v16  ;;  %v5858_v22 = vsub.f32 %v5847_v58, %v5856_v18  ;;  %v9781_v58 = vld [vmem:[%s12384_s9 + $0xf0] ss:$8 sps:$4 sm:$0xff]   ;;  %v9792_v16 = vld [vmem:[%s12384_s9 + $0xc4] ss:$8 sps:$4 sm:$0xff]   ;;  %v9790_v18 = vld [vmem:[%s12384_s9 + $0xc0] ss:$8 sps:$4 sm:$0xff]  }
0x1819   : > { %v5861_v23 = vmul.f32 1.442695, %v5858_v22  ;;  %v9795_v22 = vld [vmem:[%s12384_s9 + $0xb4] ss:$8 sps:$4 sm:$0xff]  }
0x181b   : > { %10062 = vpow2.f32 %v5861_v23  ;;  %v9793_v23 = vld [vmem:[%s12384_s9 + $0xb0] ss:$8 sps:$4 sm:$0xff]  }
0x1824   : > { %v10061_v24 = vpop.eup %10060 }
0x1825   : > { %v5863_v25 = vsel %vm1199_vm2, %v10061_v24, 0.0 }
0x1826   : > { %5864 = vadd.xlane.f32.xlu0 %v5863_v25  ;;  %v9798_v25 = vld [vmem:[%s12384_s9 + $0xa4] ss:$8 sps:$4 sm:$0xff]  }
0x1828   : > { %v10063_v26 = vpop.eup %10062 }
0x1829   : > { %v5866_v27 = vsel %vm1199_vm2, %v10063_v26, 0.0 }
0x182a   : > { %5867 = vadd.xlane.f32.xlu1 %v5866_v27  ;;  %v9801_v27 = vld [vmem:[%s12384_s9 + $0x94] ss:$8 sps:$4 sm:$0xff]  }
0x183b   : > { %1938 = vrot.lane.b32.xlu1 %v8655_v31, %s10136_s22  ;;  %v9804_v31 = vld [vmem:[%s12384_s9 + $0x84] ss:$8 sps:$4 sm:$0xff]  }
0x183c   : > { %1936 = vrot.lane.b32.xlu0 %v8654_v28, %s10136_s22  ;;  %v9802_v28 = vld [vmem:[%s12384_s9 + $0x80] ss:$8 sps:$4 sm:$0xff]  }
0x183f   : > { %4595 = vrot.lane.b32.xlu1 %v8662_v29, %s10136_s22 }
0x1840   : > { %2602 = vrot.lane.b32.xlu0 %v8656_v14, %s10137_s23 }
0x1843   : > { %4597 = vrot.lane.b32.xlu1 %v8663_v15, %s10136_s22  ;;  %s539_s22 = sand.u32 1, %s10124_s25  }
0x1844   : > { %5260 = vrot.lane.b32.xlu0 %v8664_v20, %s10137_s23  ;;  %s12335_s2 = scalar_lea.sflag [#allocation4], %s539_s22 }
0x1847   : > { %2604 = vrot.lane.b32.xlu1 %v8657_v7, %s10137_s23 }
0x1848   : > { %3268 = vrot.lane.b32.xlu0 %v8658_v9, %s12397_s29 }
0x184b   : > { %5262 = vrot.lane.b32.xlu1 %v8665_v8, %s10137_s23 }
0x184f   : > { %3270 = vrot.lane.b32.xlu1 %v8659_v39, %s12397_s29  ;;  %s7346_s29 = sshll.u32 %s539_s22, 4 }
0x1850   : > { %s541_s23 = scalar_lea.vmem [#allocation3], %s7346_s29  ;;  %s10078_s29 = scalar_lea.vmem %s10077_s21, 512 }
0x1851   : > { %s7280_s30 = sshll.u32 %s541_s23, 4  ;;  %s12328_s30 = int_to_ptr.vmem [resolvable:$true] %s7280_s30 }
0x1852   : > { %s10072_s28 = scalar_lea.vmem %s12328_s30, 256  ;;  %p10079_p0 = scmp.lt.s32.totalorder %s12328_s30, %s10077_s21 }
0x1853   : > { %p10073_p11 = scmp.ne.s32.totalorder %s12328_s30, %s10072_s28  ;;  %p10080_p1 = scmp.lt.s32.totalorder %s10078_s29, %s10072_s28 }
0x1855   : > { %p10074_p12 = pnand %p10073_p11, %p10270_p5  ;;  %p10081_p2 = por %p10080_p1, %p10079_p0 }
0x1857   : > { %p10075_p13 = pneg %p10074_p12 }
0x1859   : > { %p10082_p3 = pnand %p10081_p2, %p10075_p13 }
0x18af   : > { %v5865_v41 = vpop.xlane.xlu0 %5864 }
0x18b0   : > { %10064 = vrcp.f32 %v5865_v41 }
0x18b3   : > { %v1937_v11 = vpop.permute.xlu0 %1936  ;;  %v5868_v21 = vpop.xlane.xlu1 %5867 }
0x18b4   : > { %1943 = vst.msk [vmem:[#allocation2] sm:$0xf] %vm1942_vm4, %v1937_v11  ;;  %10066 = vrcp.f32 %v5868_v21  ;;  %v5967_v21 = vld [vmem:[%s12385_s10] sm:$0x3] }
0x18b7   : > { %v2603_v17 = vpop.permute.xlu0 %2602  ;;  %v1939_v32 = vpop.permute.xlu1 %1938 }
0x18b8   : > { %2609 = vst.msk [vmem:[#allocation2] sm:$0xf] %vm2608_vm5, %v2603_v17  ;;  %v5972_v17 = vrot.slane %v5967_v21, %v10425_v1 }
0x18b9   : > { %1944 = vst.msk [vmem:[#allocation2 + $0x8] sm:$0xf] %vm1942_vm4, %v1939_v32  ;;  %v5976_v32 = vrot.slane %v5967_v21, %v10428_v6 }
0x18bb   : > { %v5261_v33 = vpop.permute.xlu0 %5260  ;;  %v4596_v34 = vpop.permute.xlu1 %4595 }
0x18bc   : > { %4601 = vst.msk [vmem:[#allocation2 + $0x4] sm:$0xf] %vm1942_vm4, %v4596_v34 }
0x18bd   : > { %5266 = vst.msk [vmem:[#allocation2 + $0x4] sm:$0xf] %vm2608_vm5, %v5261_v33  ;;  %v10065_v19 = vpop.eup %10064 }
0x18be   : > { %v5871_v38 = vmul.f32 %v10065_v19, %v10061_v24  ;;  %v9796_v24 = vld [vmem:[%s12384_s9 + $0xa0] ss:$8 sps:$4 sm:$0xff]  }
0x18bf   : > { %v3269_v35 = vpop.permute.xlu0 %3268  ;;  %v4598_v36 = vpop.permute.xlu1 %4597 }
0x18c0   : > { %3275 = vst.msk [vmem:[#allocation2] sm:$0xf] %vm3274_vm6, %v3269_v35 }
0x18c1   : > { %4602 = vst.msk [vmem:[#allocation2 + $0xc] sm:$0xf] %vm1942_vm4, %v4598_v36  ;;  %v10067_v37 = vpop.eup %10066 }
0x18c2   : > { %v5872_v40 = vmul.f32 %v10067_v37, %v10063_v26  ;;  %v9799_v26 = vld [vmem:[%s12384_s9 + $0x90] ss:$8 sps:$4 sm:$0xff]  }
0x18c3   : > { %v2605_v42 = vpop.permute.xlu1 %2604 }
0x18c4   : > { %2610 = vst.msk [vmem:[#allocation2 + $0x8] sm:$0xf] %vm2608_vm5, %v2605_v42  ;;  %v5873_v43 = vpack.c.bf16 %v5872_v40, %v5871_v38 }
0x18c6   : > { %9324 = vmatmul.mubr.msk.bf16.vlgmr.msra.gmra.mxu0 %vm1199_vm2, %v5873_v43 }
0x18c7   : > { %v5263_v44 = vpop.permute.xlu1 %5262  ;;  %6150 = vmatpush1.bf16.msra.mxu0 %v9757_v46 }
0x18c8   : > { %5267 = vst.msk [vmem:[#allocation2 + $0xc] sm:$0xf] %vm2608_vm5, %v5263_v44  ;;  %6151 = vmatprep.subr.bf16.mxu0 %v9762_v48  ;;  %v9816_v48 = vld [vmem:[%s12388_s13 + $0xc4] ss:$16 sps:$4 sm:$0xff]  }
0x18cb   : > { %v3271_v45 = vpop.permute.xlu1 %3270  ;;  %6152 = vmatpush1.bf16.msra.mxu0 %v9760_v49  ;;  %v9819_v49 = vld [vmem:[%s12388_s13 + $0xcc] ss:$16 sps:$4 sm:$0xff]  }
0x18cc   : > { %3276 = vst.msk [vmem:[#allocation2 + $0x8] sm:$0xf] %vm3274_vm6, %v3271_v45  ;;  %6153 = vmatprep.subr.bf16.mxu0 %v9765_v30  ;;  %v9814_v30 = vld [vmem:[%s12388_s13 + $0xc0] ss:$16 sps:$4 sm:$0xff]  }
0x18cf   : > { %6154 = vmatpush1.bf16.msra.mxu0 %v9763_v50  ;;  %v9817_v50 = vld [vmem:[%s12388_s13 + $0xc8] ss:$16 sps:$4 sm:$0xff]  }
0x18d0   : > { %6155 = vmatprep.subr.bf16.mxu0 %v9768_v51  ;;  %v9822_v51 = vld [vmem:[%s12388_s13 + $0xa4] ss:$16 sps:$4 sm:$0xff]  }
0x18d3   : > { %6156 = vmatpush1.bf16.msra.mxu0 %v9766_v52  ;;  %v9805_v41 = vld [vmem:[#allocation2] ss:$8 sps:$4 sm:$0xff]   ;;  %v9825_v52 = vld [vmem:[%s12388_s13 + $0xac] ss:$16 sps:$4 sm:$0xff]  }
0x18d4   : > { %6157 = vmatprep.subr.bf16.mxu0 %v9771_v53  ;;  %v9820_v53 = vld [vmem:[%s12388_s13 + $0xa0] ss:$16 sps:$4 sm:$0xff]  }
0x18d7   : > { %6158 = vmatpush1.bf16.msra.mxu0 %v9769_v54  ;;  %v9823_v54 = vld [vmem:[%s12388_s13 + $0xa8] ss:$16 sps:$4 sm:$0xff]  }
0x18d8   : > { %6159 = vmatprep.subr.bf16.mxu0 %v9774_v55  ;;  %v9828_v55 = vld [vmem:[%s12388_s13 + $0x84] ss:$16 sps:$4 sm:$0xff]  }
0x18db   : > { %6160 = vmatpush1.bf16.msra.mxu0 %v9772_v56  ;;  %v9831_v56 = vld [vmem:[%s12388_s13 + $0x8c] ss:$16 sps:$4 sm:$0xff]  }
0x18dc   : > { %6161 = vmatprep.subr.bf16.mxu0 %v9777_v57  ;;  %v9826_v57 = vld [vmem:[%s12388_s13 + $0x80] ss:$16 sps:$4 sm:$0xff]  }
0x18df   : > { %6162 = vmatpush1.bf16.msra.mxu0 %v9775_v59  ;;  %v9829_v59 = vld [vmem:[%s12388_s13 + $0x88] ss:$16 sps:$4 sm:$0xff]  }
0x18e0   : > { %6163 = vmatprep.subr.bf16.mxu0 %v9780_v60  ;;  %v9834_v60 = vld [vmem:[%s12388_s13 + $0x64] ss:$16 sps:$4 sm:$0xff]  }
0x18e3   : > { %6164 = vmatpush1.bf16.msra.mxu0 %v9778_v61  ;;  %v9837_v61 = vld [vmem:[%s12388_s13 + $0x6c] ss:$16 sps:$4 sm:$0xff]  }
0x18e4   : > { %6165 = vmatprep.subr.bf16.mxu0 %v9783_v62  ;;  %v9832_v62 = vld [vmem:[%s12388_s13 + $0x60] ss:$16 sps:$4 sm:$0xff]  }
0x18e7   : > { %6166 = vmatpush2.bf16.msra.mxu0 %v9781_v58  ;;  %v9835_v58 = vld [vmem:[%s12388_s13 + $0x68] ss:$16 sps:$4 sm:$0xff]  }
0x18e8   : > { %6167 = vmatprep.subr.bf16.mxu0 %v9786_v0  ;;  %v9840_v0 = vld [vmem:[%s12388_s13 + $0x44] ss:$16 sps:$4 sm:$0xff]  }
0x18eb   : > { %6168 = vmatpush2.bf16.msra.mxu0 %v9784_v10  ;;  %v9843_v10 = vld [vmem:[%s12388_s13 + $0x4c] ss:$16 sps:$4 sm:$0xff]  }
0x18ec   : > { %6169 = vmatprep.subr.bf16.mxu0 %v9789_v12  ;;  %v9838_v12 = vld [vmem:[%s12388_s13 + $0x40] ss:$16 sps:$4 sm:$0xff]  }
0x18ef   : > { %6170 = vmatpush2.bf16.msra.mxu0 %v9787_v13  ;;  %v9841_v13 = vld [vmem:[%s12388_s13 + $0x48] ss:$16 sps:$4 sm:$0xff]  }
0x18f0   : > { %6171 = vmatprep.subr.bf16.mxu0 %v9792_v16  ;;  %v9846_v16 = vld [vmem:[%s12388_s13 + $0x24] ss:$16 sps:$4 sm:$0xff]  }
0x18f3   : > { %6172 = vmatpush2.bf16.msra.mxu0 %v9790_v18  ;;  %v9849_v18 = vld [vmem:[%s12388_s13 + $0x2c] ss:$16 sps:$4 sm:$0xff]  }
0x18f4   : > { %6173 = vmatprep.subr.bf16.mxu0 %v9795_v22  ;;  %v9844_v22 = vld [vmem:[%s12388_s13 + $0x20] ss:$16 sps:$4 sm:$0xff]  }
0x18f7   : > { %6174 = vmatpush2.bf16.msra.mxu0 %v9793_v23  ;;  %v9847_v23 = vld [vmem:[%s12388_s13 + $0x28] ss:$16 sps:$4 sm:$0xff]  }
0x18f8   : > { %6175 = vmatprep.subr.bf16.mxu0 %v9798_v25  ;;  %v9855_v25 = vld [vmem:[%s12388_s13 + $0xc] ss:$16 sps:$4 sm:$0xff]  }
0x18fb   : > { %6176 = vmatpush2.bf16.msra.mxu0 %v9796_v24  ;;  %v9852_v24 = vld [vmem:[%s12388_s13 + $0x4] ss:$16 sps:$4 sm:$0xff]  }
0x18fc   : > { %6177 = vmatprep.subr.bf16.mxu0 %v9801_v27  ;;  %v9853_v27 = vld [vmem:[%s12388_s13 + $0x8] ss:$16 sps:$4 sm:$0xff]  }
0x18ff   : > { %6178 = vmatpush2.bf16.msra.mxu0 %v9799_v26  ;;  %v9850_v26 = vld [vmem:[%s12388_s13] ss:$16 sps:$4 sm:$0xff]  }
0x1900   : > { %6179 = vmatprep.subr.bf16.mxu0 %v9804_v31  ;;  %v9858_v31 = vld [vmem:[%s12388_s13 + $0x1e4] ss:$16 sps:$4 sm:$0xff]  }
0x1903   : > { %6180 = vmatpush2.bf16.msra.mxu0 %v9802_v28  ;;  %v9861_v28 = vld [vmem:[%s12388_s13 + $0x1ec] ss:$16 sps:$4 sm:$0xff]  }
0x1986   : > { %v5912_v29 = vpop.f32.mrf.mxu0 }
0x1987   : > { %v8666_v14 = vpack.c.bf16 %v5912_v29, %v5912_v29  ;;  %v9856_v29 = vld [vmem:[%s12388_s13 + $0x1e0] ss:$16 sps:$4 sm:$0xff]  }
0x1988   : > { %v9325_v15 = vpop.f32.mrf.mxu0 }
0x1989   : > { %5925 = vrot.lane.b32.xlu0 %v8666_v14, %s12411_s26  ;;  %v9859_v14 = vld [vmem:[%s12388_s13 + $0x1e8] ss:$16 sps:$4 sm:$0xff]  }
0x198a   : > { %v5915_v20 = vpop.f32.mrf.mxu0 }
0x198b   : > { %v8667_v7 = vpack.c.bf16 %v5915_v20, %v5915_v20 }
0x198c   : > { %v9326_v9 = vpop.f32.mrf.mxu0 }
0x198d   : > { %5927 = vrot.lane.b32.xlu1 %v8667_v7, %s12411_s26  ;;  %s12333_s26 = scalar_lea.hbm %s12392_s17, %s8670_s18 }
0x19fb   : > { %v5926_v8 = vpop.permute.xlu0 %5925 }
0x19fc   : > { %5931 = vst.msk [vmem:[#allocation2 + $0x4] sm:$0xf] %vm3274_vm6, %v5926_v8 }
0x19ff   : > { %v5928_v39 = vpop.permute.xlu1 %5927 }
0x1a00   : > { %5932 = vst.msk [vmem:[#allocation2 + $0xc] sm:$0xf] %vm3274_vm6, %v5928_v39 }
0x1a07   : > { %v9807_v11 = vld [vmem:[#allocation2 + $0x4] ss:$8 sps:$4 sm:$0xff]  }
0x1a08   : > { %6181 = vmatprep.mubr.bf16.mxu0 %v9807_v11 }
0x1a09   : > { %6182 = vmatmul.mubr.bf16.vlgmr.msra.gmra.mxu0 %v9805_v41 }
0x1ac9   : > { %v6183_v33 = vpop.f32.mrf.mxu0 }
0x1aca   : > { %v6184_v34 = vadd.f32 %v6183_v33, %v5972_v17 }
0x1acb   : > { %v6185_v19 = vpop.f32.mrf.mxu0 }
0x1acc   : > { %v6186_v35 = vadd.f32 %v6185_v19, %v5976_v32  ;;  %v11877_v37 = vadd.f32 %v6184_v34, %v10285_v2 }
0x1acd   : > { %v6187_v36 = vpop.f32.mrf.mxu0 }
0x1ace   : > { %v11880_v38 = vadd.f32 %v6186_v35, %v10287_v3  ;;  %v6188_v40 = vadd.f32 %v6187_v36, %v5972_v17  ;;  %v9808_v3 = vld [vmem:[%s12388_s13 + $0xe0] ss:$16 sps:$4 sm:$0xff]   ;;  %v9864_v35 = vld [vmem:[%s12388_s13 + $0x1c4] ss:$16 sps:$4 sm:$0xff]   ;;  %v9867_v36 = vld [vmem:[%s12388_s13 + $0x1cc] ss:$16 sps:$4 sm:$0xff]  }
0x1acf   : > { %v6189_v42 = vpop.f32.mrf.mxu0  ;;  %6669 = vmatpush1.bf16.msra.mxu1 %v9808_v3  ;;  %v9871_v3 = vld [vmem:[%s12388_s13 + $0x1a8] ss:$16 sps:$4 sm:$0xff]  }
0x1ad0   : > { %v6190_v43 = vadd.f32 %v6189_v42, %v5976_v32  ;;  %v6198_v44 = vadd.f32 %v11880_v38, %v11877_v37  ;;  %v11885_v45 = vadd.f32 %v6188_v40, %v10289_v4  ;;  %v9811_v4 = vld [vmem:[%s12388_s13 + $0xe8] ss:$16 sps:$4 sm:$0xff]   ;;  %6670 = vmatprep.subr.bf16.mxu1 %v9816_v48  ;;  %v9862_v40 = vld [vmem:[%s12388_s13 + $0x1c0] ss:$16 sps:$4 sm:$0xff]   ;;  %v9879_v48 = vld [vmem:[%s12388_s13 + $0x18c] ss:$16 sps:$4 sm:$0xff]  }
0x1ad1   : > { %v9865_v42 = vld [vmem:[%s12388_s13 + $0x1c8] ss:$16 sps:$4 sm:$0xff]  }
0x1ad2   : > { %v11888_v46 = vadd.f32 %v6190_v43, %v10291_v5  ;;  %6199 = vadd.xlane.f32.xlu0 %v6198_v44  ;;  %v9813_v5 = vld [vmem:[%s12388_s13 + $0xec] ss:$16 sps:$4 sm:$0xff]   ;;  %v9870_v43 = vld [vmem:[%s12388_s13 + $0x1a4] ss:$16 sps:$4 sm:$0xff]  }
0x1ad3   : > { %6711 = vmatprep.subr.bf16.mxu0 %v9813_v5  ;;  %6671 = vmatpush1.bf16.msra.mxu1 %v9814_v30  ;;  %v9873_v44 = vld [vmem:[%s12388_s13 + $0x1ac] ss:$16 sps:$4 sm:$0xff]   ;;  %v9877_v5 = vld [vmem:[%s12388_s13 + $0x188] ss:$16 sps:$4 sm:$0xff]  }
0x1ad4   : > { %v6201_v2 = vadd.f32 %v11888_v46, %v11885_v45  ;;  %6712 = vmatpush1.bf16.msra.mxu0 %v9811_v4  ;;  %6672 = vmatprep.subr.bf16.mxu1 %v9822_v51  ;;  %v9876_v4 = vld [vmem:[%s12388_s13 + $0x184] ss:$16 sps:$4 sm:$0xff]   ;;  %v9885_v30 = vld [vmem:[%s12388_s13 + $0x16c] ss:$16 sps:$4 sm:$0xff]   ;;  %v9883_v51 = vld [vmem:[%s12388_s13 + $0x168] ss:$16 sps:$4 sm:$0xff]  }
0x1ad5   : > { %6713 = vmatprep.subr.bf16.mxu0 %v9819_v49  ;;  %v9882_v49 = vld [vmem:[%s12388_s13 + $0x164] ss:$16 sps:$4 sm:$0xff]  }
0x1ad6   : > { %6202 = vadd.xlane.f32.xlu1 %v6201_v2  ;;  %v9868_v2 = vld [vmem:[%s12388_s13 + $0x1a0] ss:$16 sps:$4 sm:$0xff]  }
0x1ad7   : > { %6673 = vmatpush1.bf16.msra.mxu1 %v9820_v53  ;;  %v9891_v53 = vld [vmem:[%s12388_s13 + $0x14c] ss:$16 sps:$4 sm:$0xff]  }
0x1ad8   : > { %6714 = vmatpush1.bf16.msra.mxu0 %v9817_v50  ;;  %6674 = vmatprep.subr.bf16.mxu1 %v9828_v55  ;;  %v9880_v50 = vld [vmem:[%s12388_s13 + $0x160] ss:$16 sps:$4 sm:$0xff]   ;;  %v9889_v55 = vld [vmem:[%s12388_s13 + $0x148] ss:$16 sps:$4 sm:$0xff]  }
0x1ad9   : > { %6715 = vmatprep.subr.bf16.mxu0 %v9825_v52  ;;  %v9888_v52 = vld [vmem:[%s12388_s13 + $0x144] ss:$16 sps:$4 sm:$0xff]  }
0x1adb   : > { %6675 = vmatpush1.bf16.msra.mxu1 %v9826_v57  ;;  %v9897_v57 = vld [vmem:[%s12388_s13 + $0x12c] ss:$16 sps:$4 sm:$0xff]  }
0x1adc   : > { %6716 = vmatpush1.bf16.msra.mxu0 %v9823_v54  ;;  %6676 = vmatprep.subr.bf16.mxu1 %v9834_v60  ;;  %v9886_v54 = vld [vmem:[%s12388_s13 + $0x140] ss:$16 sps:$4 sm:$0xff]   ;;  %v9895_v60 = vld [vmem:[%s12388_s13 + $0x128] ss:$16 sps:$4 sm:$0xff]  }
0x1add   : > { %6717 = vmatprep.subr.bf16.mxu0 %v9831_v56  ;;  %v9894_v56 = vld [vmem:[%s12388_s13 + $0x124] ss:$16 sps:$4 sm:$0xff]  }
0x1adf   : > { %6677 = vmatpush1.bf16.msra.mxu1 %v9832_v62  ;;  %v9903_v62 = vld [vmem:[%s12388_s13 + $0x10c] ss:$16 sps:$4 sm:$0xff]  }
0x1ae0   : > { %6718 = vmatpush1.bf16.msra.mxu0 %v9829_v59  ;;  %6678 = vmatprep.subr.bf16.mxu1 %v9840_v0  ;;  %v9892_v59 = vld [vmem:[%s12388_s13 + $0x120] ss:$16 sps:$4 sm:$0xff]   ;;  %v9901_v0 = vld [vmem:[%s12388_s13 + $0x108] ss:$16 sps:$4 sm:$0xff]  }
0x1ae1   : > { %6719 = vmatprep.subr.bf16.mxu0 %v9837_v61  ;;  %v9900_v61 = vld [vmem:[%s12388_s13 + $0x104] ss:$16 sps:$4 sm:$0xff]  }
0x1ae3   : > { %6679 = vmatpush1.bf16.msra.mxu1 %v9838_v12  ;;  %v9909_v12 = vld [vmem:[%s12390_s15 + $0x174] ss:$8 sps:$4 sm:$0xff]  }
0x1ae4   : > { %6720 = vmatpush1.bf16.msra.mxu0 %v9835_v58  ;;  %6680 = vmatprep.subr.bf16.mxu1 %v9846_v16  ;;  %v9898_v58 = vld [vmem:[%s12388_s13 + $0x100] ss:$16 sps:$4 sm:$0xff]  }
0x1ae5   : > { %6721 = vmatprep.subr.bf16.mxu0 %v9843_v10  ;;  %v9906_v10 = vld [vmem:[%s12390_s15 + $0x74] ss:$8 sps:$4 sm:$0xff]  }
0x1ae7   : > { %6681 = vmatpush1.bf16.msra.mxu1 %v9844_v22 }
0x1ae8   : > { %6722 = vmatpush1.bf16.msra.mxu0 %v9841_v13  ;;  %6682 = vmatprep.subr.bf16.mxu1 %v9852_v24 }
0x1ae9   : > { %6723 = vmatprep.subr.bf16.mxu0 %v9849_v18 }
0x1aeb   : > { %6683 = vmatpush1.bf16.msra.mxu1 %v9850_v26 }
0x1aec   : > { %6724 = vmatpush1.bf16.msra.mxu0 %v9847_v23  ;;  %6684 = vmatprep.subr.bf16.mxu1 %v9858_v31 }
0x1aed   : > { %6725 = vmatprep.subr.bf16.mxu0 %v9855_v25  ;;  %v6196_v25 = vld [vmem:[%s12386_s11] sm:$0x3] }
0x1aef   : > { %6685 = vmatpush2.bf16.msra.mxu1 %v9856_v29  ;;  %v6238_v29 = vrot.slane %v6196_v25, %v10428_v6 }
0x1af0   : > { %6726 = vmatpush1.bf16.msra.mxu0 %v9853_v27  ;;  %6686 = vmatprep.subr.bf16.mxu1 %v9864_v35  ;;  %v6197_v27 = vld [vmem:[%s12387_s12] sm:$0x3] }
0x1af1   : > { %6727 = vmatprep.subr.bf16.mxu0 %v9861_v28  ;;  %v6234_v28 = vrot.slane %v6196_v25, %v10425_v1  ;;  %v9963_v25 = vld [vmem:[%s12390_s15 + $0x1e4] ss:$8 sps:$4 sm:$0xff]  }
0x1af3   : > { %6687 = vmatpush2.bf16.msra.mxu1 %v9862_v40 }
0x1af4   : > { %6728 = vmatpush2.bf16.msra.mxu0 %v9859_v14  ;;  %6688 = vmatprep.subr.bf16.mxu1 %v9870_v43  ;;  %v9915_v43 = vld [vmem:[%s12390_s15 + $0x164] ss:$8 sps:$4 sm:$0xff]  }
0x1af5   : > { %6729 = vmatprep.subr.bf16.mxu0 %v9867_v36 }
0x1af7   : > { %6689 = vmatpush2.bf16.msra.mxu1 %v9868_v2  ;;  %v9913_v2 = vld [vmem:[%s12390_s15 + $0x160] ss:$8 sps:$4 sm:$0xff]  }
0x1af8   : > { %6730 = vmatpush2.bf16.msra.mxu0 %v9865_v42  ;;  %6690 = vmatprep.subr.bf16.mxu1 %v9876_v4  ;;  %v9916_v4 = vld [vmem:[%s12390_s15 + $0x50] ss:$8 sps:$4 sm:$0xff]  }
0x1af9   : > { %6731 = vmatprep.subr.bf16.mxu0 %v9873_v44  ;;  %v9910_v44 = vld [vmem:[%s12390_s15 + $0x60] ss:$8 sps:$4 sm:$0xff]  }
0x1afb   : > { %6691 = vmatpush2.bf16.msra.mxu1 %v9874_v47  ;;  %v9921_v47 = vld [vmem:[%s12390_s15 + $0x154] ss:$8 sps:$4 sm:$0xff]  }
0x1afc   : > { %6732 = vmatpush2.bf16.msra.mxu0 %v9871_v3  ;;  %6692 = vmatprep.subr.bf16.mxu1 %v9882_v49  ;;  %v9918_v3 = vld [vmem:[%s12390_s15 + $0x54] ss:$8 sps:$4 sm:$0xff]   ;;  %v9927_v49 = vld [vmem:[%s12390_s15 + $0x144] ss:$8 sps:$4 sm:$0xff]  }
0x1afd   : > { %6733 = vmatprep.subr.bf16.mxu0 %v9879_v48  ;;  %v9924_v48 = vld [vmem:[%s12390_s15 + $0x44] ss:$8 sps:$4 sm:$0xff]  }
0x1aff   : > { %6693 = vmatpush2.bf16.msra.mxu1 %v9880_v50  ;;  %v9925_v50 = vld [vmem:[%s12390_s15 + $0x140] ss:$8 sps:$4 sm:$0xff]  }
0x1b00   : > { %6734 = vmatpush2.bf16.msra.mxu0 %v9877_v5  ;;  %6694 = vmatprep.subr.bf16.mxu1 %v9888_v52  ;;  %v9919_v5 = vld [vmem:[%s12390_s15 + $0x150] ss:$8 sps:$4 sm:$0xff]   ;;  %v9933_v52 = vld [vmem:[%s12390_s15 + $0x134] ss:$8 sps:$4 sm:$0xff]  }
0x1b01   : > { %6735 = vmatprep.subr.bf16.mxu0 %v9885_v30  ;;  %v9922_v30 = vld [vmem:[%s12390_s15 + $0x40] ss:$8 sps:$4 sm:$0xff]  }
0x1b03   : > { %6695 = vmatpush2.bf16.msra.mxu1 %v9886_v54  ;;  %v9931_v54 = vld [vmem:[%s12390_s15 + $0x130] ss:$8 sps:$4 sm:$0xff]  }
0x1b04   : > { %6736 = vmatpush2.bf16.msra.mxu0 %v9883_v51  ;;  %6696 = vmatprep.subr.bf16.mxu1 %v9894_v56  ;;  %v9930_v51 = vld [vmem:[%s12390_s15 + $0x34] ss:$8 sps:$4 sm:$0xff]   ;;  %v9939_v56 = vld [vmem:[%s12390_s15 + $0x124] ss:$8 sps:$4 sm:$0xff]  }
0x1b05   : > { %6737 = vmatprep.subr.bf16.mxu0 %v9891_v53  ;;  %v9928_v53 = vld [vmem:[%s12390_s15 + $0x30] ss:$8 sps:$4 sm:$0xff]  }
0x1b07   : > { %6697 = vmatpush2.bf16.msra.mxu1 %v9892_v59  ;;  %v9937_v59 = vld [vmem:[%s12390_s15 + $0x120] ss:$8 sps:$4 sm:$0xff]  }
0x1b08   : > { %6738 = vmatpush2.bf16.msra.mxu0 %v9889_v55  ;;  %6698 = vmatprep.subr.bf16.mxu1 %v9900_v61  ;;  %v9936_v55 = vld [vmem:[%s12390_s15 + $0x24] ss:$8 sps:$4 sm:$0xff]   ;;  %v9945_v61 = vld [vmem:[%s12390_s15 + $0x114] ss:$8 sps:$4 sm:$0xff]  }
0x1b09   : > { %6739 = vmatprep.subr.bf16.mxu0 %v9897_v57  ;;  %v9934_v57 = vld [vmem:[%s12390_s15 + $0x20] ss:$8 sps:$4 sm:$0xff]  }
0x1b0b   : > { %6699 = vmatpush2.bf16.msra.mxu1 %v9898_v58  ;;  %v9943_v58 = vld [vmem:[%s12390_s15 + $0x110] ss:$8 sps:$4 sm:$0xff]  }
0x1b0c   : > { %6740 = vmatpush2.bf16.msra.mxu0 %v9895_v60  ;;  %7162 = vmatprep.subr.bf16.mxu1 %v9906_v10  ;;  %v9942_v60 = vld [vmem:[%s12390_s15 + $0x14] ss:$8 sps:$4 sm:$0xff]   ;;  %v9951_v10 = vld [vmem:[%s12390_s15 + $0x104] ss:$8 sps:$4 sm:$0xff]  }
0x1b0d   : > { %6741 = vmatprep.subr.bf16.mxu0 %v9903_v62  ;;  %v9940_v62 = vld [vmem:[%s12390_s15 + $0x10] ss:$8 sps:$4 sm:$0xff]  }
0x1b10   : > { %6742 = vmatpush2.bf16.msra.mxu0 %v9901_v0  ;;  %v9948_v0 = vld [vmem:[%s12390_s15 + $0x4] ss:$8 sps:$4 sm:$0xff]  }
0x1b11   : > { %7205 = vmatprep.subr.bf16.mxu0 %v9909_v12  ;;  %v9946_v12 = vld [vmem:[%s12390_s15] ss:$8 sps:$4 sm:$0xff]  }
0x1b5b   : > { %v6200_v15 = vpop.xlane.xlu0 %6199 }
0x1b5c   : > { %v6204_v20 = vmul.f32 0.00390625, %v6200_v15 }
0x1b5e   : > { %v12001_v7 = vsub.f32 %v11877_v37, %v6204_v20  ;;  %v12004_v9 = vsub.f32 %v11880_v38, %v6204_v20  ;;  %v6249_v20 = vrot.slane %v6197_v27, %v10425_v1 }
0x1b5f   : > { %v6203_v8 = vpop.xlane.xlu1 %6202 }
0x1b60   : > { %v6205_v39 = vmul.f32 0.00390625, %v6203_v8  ;;  %v6210_v41 = vmul.f32 %v12001_v7, %v12001_v7  ;;  %v6211_v11 = vmul.f32 %v12004_v9, %v12004_v9  ;;  %v6253_v8 = vrot.slane %v6197_v27, %v10428_v6  ;;  %v9961_v27 = vld [vmem:[%s12390_s15 + $0x1e0] ss:$8 sps:$4 sm:$0xff]  }
0x1b62   : > { %v12011_v21 = vsub.f32 %v11885_v45, %v6205_v39  ;;  %v12014_v17 = vsub.f32 %v11888_v46, %v6205_v39  ;;  %v6214_v32 = vadd.f32 %v6211_v11, %v6210_v41 }
0x1b64   : > { %6215 = vadd.xlane.f32.xlu0 %v6214_v32  ;;  %v6212_v33 = vmul.f32 %v12011_v21, %v12011_v21  ;;  %v6213_v34 = vmul.f32 %v12014_v17, %v12014_v17 }
0x1b66   : > { %v6217_v19 = vadd.f32 %v6213_v34, %v6212_v33 }
0x1b68   : > { %6218 = vadd.xlane.f32.xlu0 %v6217_v19 }
0x1bed   : > { %v6216_v13 = vpop.xlane.xlu0 %6215 }
0x1bee   : > { %v6220_v16 = vmul.f32 0.00390625, %v6216_v13  ;;  %v9949_v13 = vld [vmem:[%s12390_s15 + $0x100] ss:$8 sps:$4 sm:$0xff]  }
0x1bf0   : > { %v6222_v18 = vadd.f32 1e-05, %v6220_v16  ;;  %v9954_v16 = vld [vmem:[%s12390_s15 + $0xf4] ss:$8 sps:$4 sm:$0xff]  }
0x1bf1   : > { %v6219_v22 = vpop.xlane.xlu0 %6218 }
0x1bf2   : > { %10068 = vrsqrt.f32 %v6222_v18  ;;  %v6221_v23 = vmul.f32 0.00390625, %v6219_v22  ;;  %v9957_v18 = vld [vmem:[%s12390_s15 + $0x1f4] ss:$8 sps:$4 sm:$0xff]   ;;  %v9952_v22 = vld [vmem:[%s12390_s15 + $0xf0] ss:$8 sps:$4 sm:$0xff]  }
0x1bf4   : > { %v6223_v24 = vadd.f32 1e-05, %v6221_v23  ;;  %v9955_v23 = vld [vmem:[%s12390_s15 + $0x1f0] ss:$8 sps:$4 sm:$0xff]  }
0x1bf6   : > { %10070 = vrsqrt.f32 %v6223_v24  ;;  %v9960_v24 = vld [vmem:[%s12390_s15 + $0xe4] ss:$8 sps:$4 sm:$0xff]  }
0x1bff   : > { %v10069_v26 = vpop.eup %10068 }
0x1c00   : > { %v6227_v31 = vmul.f32 %v10069_v26, %v12004_v9  ;;  %v6226_v14 = vmul.f32 %v10069_v26, %v12001_v7  ;;  %v9904_v7 = vld [vmem:[%s12390_s15 + $0x70] ss:$8 sps:$4 sm:$0xff]   ;;  %v9958_v26 = vld [vmem:[%s12390_s15 + $0xe0] ss:$8 sps:$4 sm:$0xff]  }
0x1c02   : > { %v6242_v41 = vmul.f32 %v6238_v29, %v6227_v31  ;;  %v6241_v32 = vmul.f32 %v6234_v28, %v6226_v14  ;;  %v9966_v31 = vld [vmem:[%s12390_s15 + $0xd4] ss:$8 sps:$4 sm:$0xff]   ;;  %v9967_v14 = vld [vmem:[%s12390_s15 + $0x1d0] ss:$8 sps:$4 sm:$0xff]  }
0x1c03   : > { %v10071_v15 = vpop.eup %10070 }
0x1c04   : > { %v6229_v39 = vmul.f32 %v10071_v15, %v12014_v17  ;;  %v6228_v11 = vmul.f32 %v10071_v15, %v12011_v21  ;;  %v6257_v9 = vadd.f32 %v6253_v8, %v6242_v41  ;;  %v6256_v35 = vadd.f32 %v6249_v20, %v6241_v32  ;;  %v9907_v17 = vld [vmem:[%s12390_s15 + $0x170] ss:$8 sps:$4 sm:$0xff]   ;;  %v9912_v21 = vld [vmem:[%s12390_s15 + $0x64] ss:$8 sps:$4 sm:$0xff]   ;;  %v9978_v41 = vld [vmem:[%s12390_s15 + $0xb4] ss:$8 sps:$4 sm:$0xff]  }
0x1c05   : > { %v9972_v15 = vld [vmem:[%s12390_s15 + $0xc4] ss:$8 sps:$4 sm:$0xff]   ;;  %v9976_v32 = vld [vmem:[%s12390_s15 + $0xb0] ss:$8 sps:$4 sm:$0xff]  }
0x1c06   : > { %v6244_v33 = vmul.f32 %v6238_v29, %v6229_v39  ;;  %v6243_v34 = vmul.f32 %v6234_v28, %v6228_v11  ;;  %v9969_v28 = vld [vmem:[%s12390_s15 + $0x1d4] ss:$8 sps:$4 sm:$0xff]   ;;  %v9964_v29 = vld [vmem:[%s12390_s15 + $0xd0] ss:$8 sps:$4 sm:$0xff]   ;;  %v9973_v39 = vld [vmem:[%s12390_s15 + $0x1c0] ss:$8 sps:$4 sm:$0xff]  }
0x1c07   : > { %v9981_v11 = vld [vmem:[%s12390_s15 + $0x1b4] ss:$8 sps:$4 sm:$0xff]  }
0x1c08   : > { %v6259_v19 = vadd.f32 %v6253_v8, %v6244_v33  ;;  %v6258_v36 = vadd.f32 %v6249_v20, %v6243_v34  ;;  %v9975_v20 = vld [vmem:[%s12390_s15 + $0x1c4] ss:$8 sps:$4 sm:$0xff]   ;;  %v9970_v8 = vld [vmem:[%s12390_s15 + $0xc0] ss:$8 sps:$4 sm:$0xff]   ;;  %v9979_v33 = vld [vmem:[%s12390_s15 + $0x1b0] ss:$8 sps:$4 sm:$0xff]  }
0x1c09   : > { %v9984_v34 = vld [vmem:[%s12390_s15 + $0xa4] ss:$8 sps:$4 sm:$0xff]  }
0x1c0a   : > { %v6261_v40 = vpack.c.bf16 %v6259_v19, %v6257_v9  ;;  %v6260_v42 = vpack.c.bf16 %v6258_v36, %v6256_v35  ;;  %v9987_v9 = vld [vmem:[%s12390_s15 + $0x1a4] ss:$8 sps:$4 sm:$0xff]   ;;  %v9982_v19 = vld [vmem:[%s12390_s15 + $0xa0] ss:$8 sps:$4 sm:$0xff]   ;;  %v9990_v36 = vld [vmem:[%s12390_s15 + $0x94] ss:$8 sps:$4 sm:$0xff]  }
0x1c0b   : > { %v9985_v35 = vld [vmem:[%s12390_s15 + $0x1a0] ss:$8 sps:$4 sm:$0xff]  }
0x1c0c   : > { %6700 = vmatprep.mubr.bf16.mxu1 %v6261_v40  ;;  %6743 = vmatprep.mubr.bf16.mxu0 %v6261_v40  ;;  %v9993_v40 = vld [vmem:[%s12390_s15 + $0x194] ss:$8 sps:$4 sm:$0xff]  }
0x1c0d   : > { %6701 = vmatmul.mubr.bf16.vlgmr.msra.gmra.mxu1 %v6260_v42  ;;  %6744 = vmatmul.mubr.bf16.vlgmr.msra.gmra.mxu0 %v6260_v42  ;;  %v9988_v42 = vld [vmem:[%s12390_s15 + $0x90] ss:$8 sps:$4 sm:$0xff]  }
0x1c0e   : > { %7163 = vmatpush1.bf16.msra.mxu1 %v9904_v7  ;;  %7206 = vmatpush1.bf16.msra.mxu0 %v9907_v17  ;;  %v9991_v7 = vld [vmem:[%s12390_s15 + $0x190] ss:$8 sps:$4 sm:$0xff]   ;;  %v9996_v17 = vld [vmem:[%s12390_s15 + $0x84] ss:$8 sps:$4 sm:$0xff]  }
0x1c0f   : > { %7164 = vmatprep.subr.bf16.mxu1 %v9912_v21  ;;  %7207 = vmatprep.subr.bf16.mxu0 %v9915_v43  ;;  %v9999_v21 = vld [vmem:[%s12390_s15 + $0x184] ss:$8 sps:$4 sm:$0xff]   ;;  %v9994_v43 = vld [vmem:[%s12390_s15 + $0x80] ss:$8 sps:$4 sm:$0xff]  }
0x1c12   : > { %7165 = vmatpush1.bf16.msra.mxu1 %v9910_v44  ;;  %7208 = vmatpush1.bf16.msra.mxu0 %v9913_v2  ;;  %v9997_v44 = vld [vmem:[%s12390_s15 + $0x180] ss:$8 sps:$4 sm:$0xff]   ;;  %v6342_v2 = vsub.s32 3, %v10419_v63 }
0x1c13   : > { %7166 = vmatprep.subr.bf16.mxu1 %v9918_v3  ;;  %7209 = vmatprep.subr.bf16.mxu0 %v9921_v47  ;;  %v6338_v3 = vsub.s32 2, %v10419_v63  ;;  %v6326_v47 = vld [vmem:[%s12389_s14] sm:$0xf] }
0x1c16   : > { %7167 = vmatpush1.bf16.msra.mxu1 %v9916_v4  ;;  %7210 = vmatpush1.bf16.msra.mxu0 %v9919_v5 }
0x1c17   : > { %7168 = vmatprep.subr.bf16.mxu1 %v9924_v48  ;;  %7211 = vmatprep.subr.bf16.mxu0 %v9927_v49  ;;  %v6335_v48 = vrot.slane %v6326_v47, %v10428_v6  ;;  %v6343_v49 = vrot.slane %v6326_v47, %v6342_v2 }
0x1c1a   : > { %7169 = vmatpush1.bf16.msra.mxu1 %v9922_v30  ;;  %7212 = vmatpush1.bf16.msra.mxu0 %v9925_v50  ;;  %v6331_v30 = vrot.slane %v6326_v47, %v10425_v1  ;;  %v6339_v50 = vrot.slane %v6326_v47, %v6338_v3 }
0x1c1b   : > { %7170 = vmatprep.subr.bf16.mxu1 %v9930_v51  ;;  %7213 = vmatprep.subr.bf16.mxu0 %v9933_v52 }
0x1c1e   : > { %7171 = vmatpush1.bf16.msra.mxu1 %v9928_v53  ;;  %7214 = vmatpush1.bf16.msra.mxu0 %v9931_v54 }
0x1c1f   : > { %7172 = vmatprep.subr.bf16.mxu1 %v9936_v55  ;;  %7215 = vmatprep.subr.bf16.mxu0 %v9939_v56 }
0x1c22   : > { %7173 = vmatpush1.bf16.msra.mxu1 %v9934_v57  ;;  %7216 = vmatpush1.bf16.msra.mxu0 %v9937_v59 }
0x1c23   : > { %7174 = vmatprep.subr.bf16.mxu1 %v9942_v60  ;;  %7217 = vmatprep.subr.bf16.mxu0 %v9945_v61 }
0x1c26   : > { %7175 = vmatpush1.bf16.msra.mxu1 %v9940_v62  ;;  %7218 = vmatpush1.bf16.msra.mxu0 %v9943_v58 }
0x1c27   : > { %7176 = vmatprep.subr.bf16.mxu1 %v9948_v0  ;;  %7219 = vmatprep.subr.bf16.mxu0 %v9951_v10 }
0x1c2a   : > { %7177 = vmatpush1.bf16.msra.mxu1 %v9946_v12  ;;  %7220 = vmatpush1.bf16.msra.mxu0 %v9949_v13 }
0x1c2b   : > { %7178 = vmatprep.subr.bf16.mxu1 %v9954_v16  ;;  %7221 = vmatprep.subr.bf16.mxu0 %v9957_v18 }
0x1c2e   : > { %7179 = vmatpush2.bf16.msra.mxu1 %v9952_v22  ;;  %7222 = vmatpush2.bf16.msra.mxu0 %v9955_v23 }
0x1c2f   : > { %7180 = vmatprep.subr.bf16.mxu1 %v9960_v24  ;;  %7223 = vmatprep.subr.bf16.mxu0 %v9963_v25 }
0x1c32   : > { %7181 = vmatpush2.bf16.msra.mxu1 %v9958_v26  ;;  %7224 = vmatpush2.bf16.msra.mxu0 %v9961_v27 }
0x1c33   : > { %7182 = vmatprep.subr.bf16.mxu1 %v9966_v31  ;;  %7225 = vmatprep.subr.bf16.mxu0 %v9969_v28  ;;  %v6830_v28 = vld [vmem:[%s12391_s16] sm:$0x3] }
0x1c36   : > { %7183 = vmatpush2.bf16.msra.mxu1 %v9964_v29  ;;  %7226 = vmatpush2.bf16.msra.mxu0 %v9967_v14  ;;  %v6835_v29 = vrot.slane %v6830_v28, %v10425_v1  ;;  %v6839_v14 = vrot.slane %v6830_v28, %v10428_v6 }
0x1c37   : > { %7184 = vmatprep.subr.bf16.mxu1 %v9972_v15  ;;  %7227 = vmatprep.subr.bf16.mxu0 %v9975_v20 }
0x1c3a   : > { %7185 = vmatpush2.bf16.msra.mxu1 %v9970_v8  ;;  %7228 = vmatpush2.bf16.msra.mxu0 %v9973_v39 }
0x1c3b   : > { %7186 = vmatprep.subr.bf16.mxu1 %v9978_v41  ;;  %7229 = vmatprep.subr.bf16.mxu0 %v9981_v11 }
0x1c3e   : > { %7187 = vmatpush2.bf16.msra.mxu1 %v9976_v32  ;;  %7230 = vmatpush2.bf16.msra.mxu0 %v9979_v33 }
0x1c3f   : > { %7188 = vmatprep.subr.bf16.mxu1 %v9984_v34  ;;  %7231 = vmatprep.subr.bf16.mxu0 %v9987_v9 }
0x1c42   : > { %7189 = vmatpush2.bf16.msra.mxu1 %v9982_v19  ;;  %7232 = vmatpush2.bf16.msra.mxu0 %v9985_v35 }
0x1c43   : > { %7190 = vmatprep.subr.bf16.mxu1 %v9990_v36  ;;  %7233 = vmatprep.subr.bf16.mxu0 %v9993_v40 }
0x1c46   : > { %7191 = vmatpush2.bf16.msra.mxu1 %v9988_v42  ;;  %7234 = vmatpush2.bf16.msra.mxu0 %v9991_v7 }
0x1c47   : > { %7192 = vmatprep.subr.bf16.mxu1 %v9996_v17  ;;  %7235 = vmatprep.subr.bf16.mxu0 %v9999_v21 }
0x1c4a   : > { %7193 = vmatpush2.bf16.msra.mxu1 %v9994_v43  ;;  %7236 = vmatpush2.bf16.msra.mxu0 %v9997_v44 }
0x1ccd   : > { %v6702_v4 = vpop.f32.mrf.mxu1  ;;  %v6745_v5 = vpop.f32.mrf.mxu0 }
0x1cce   : > { %v6703_v59 = vadd.f32 %v6702_v4, %v6331_v30  ;;  %v6746_v60 = vadd.f32 %v6745_v5, %v6339_v50 }
0x1ccf   : > { %v6704_v51 = vpop.f32.mrf.mxu1  ;;  %v6747_v52 = vpop.f32.mrf.mxu0 }
0x1cd0   : > { %v6705_v55 = vadd.f32 %v6704_v51, %v6335_v48  ;;  %v6748_v56 = vadd.f32 %v6747_v52, %v6343_v49  ;;  %v6754_v23 = vmax.f32 %v6703_v59, 0.0  ;;  %v6756_v24 = vmax.f32 %v6746_v60, 0.0 }
0x1cd1   : > { %v6706_v53 = vpop.f32.mrf.mxu1  ;;  %v6749_v54 = vpop.f32.mrf.mxu0 }
0x1cd2   : > { %v6707_v57 = vadd.f32 %v6706_v53, %v6331_v30  ;;  %v6750_v63 = vadd.f32 %v6749_v54, %v6339_v50  ;;  %v6755_v13 = vmax.f32 %v6705_v55, 0.0  ;;  %v6757_v16 = vmax.f32 %v6748_v56, 0.0 }
0x1cd3   : > { %v6708_v61 = vpop.f32.mrf.mxu1  ;;  %v6751_v62 = vpop.f32.mrf.mxu0 }
0x1cd4   : > { %v6709_v58 = vadd.f32 %v6708_v61, %v6335_v48  ;;  %v6752_v0 = vadd.f32 %v6751_v62, %v6343_v49  ;;  %v6758_v10 = vmax.f32 %v6707_v57, 0.0  ;;  %v6760_v12 = vmax.f32 %v6750_v63, 0.0 }
0x1cd6   : > { %v6759_v18 = vmax.f32 %v6709_v58, 0.0  ;;  %v6761_v22 = vmax.f32 %v6752_v0, 0.0  ;;  %v6762_v27 = vpack.c.bf16 %v6758_v10, %v6754_v23  ;;  %v6764_v31 = vpack.c.bf16 %v6760_v12, %v6756_v24 }
0x1cd8   : > { %v6763_v25 = vpack.c.bf16 %v6759_v18, %v6755_v13  ;;  %v6765_v26 = vpack.c.bf16 %v6761_v22, %v6757_v16 }
0x1cda   : > { %7194 = vmatprep.mubr.bf16.mxu1 %v6763_v25  ;;  %7237 = vmatprep.mubr.bf16.mxu0 %v6765_v26 }
0x1cdb   : > { %7195 = vmatmul.mubr.bf16.vlgmr.msra.gmra.mxu1 %v6762_v27  ;;  %7238 = vmatmul.mubr.bf16.vlgmr.msra.gmra.mxu0 %v6764_v31 }
0x1d9b   : > { %v7196_v15 = vpop.f32.mrf.mxu1  ;;  %v7239_v20 = vpop.f32.mrf.mxu0 }
0x1d9c   : > { %v7197_v8 = vadd.f32 %v7196_v15, %v6835_v29 }
0x1d9d   : > { %v7198_v39 = vpop.f32.mrf.mxu1  ;;  %v7241_v41 = vpop.f32.mrf.mxu0 }
0x1d9e   : > { %v7240_v11 = vadd.f32 %v7239_v20, %v7197_v8  ;;  %v7199_v32 = vadd.f32 %v7198_v39, %v6839_v14 }
0x1d9f   : > { %v7200_v33 = vpop.f32.mrf.mxu1  ;;  %v7243_v34 = vpop.f32.mrf.mxu0 }
0x1da0   : > { %v7242_v9 = vadd.f32 %v7241_v41, %v7199_v32  ;;  %v7201_v19 = vadd.f32 %v7200_v33, %v6835_v29  ;;  %v7248_v36 = vadd.f32 %v7240_v11, %v11877_v37 }
0x1da1   : > { %v7202_v35 = vpop.f32.mrf.mxu1  ;;  %v7245_v42 = vpop.f32.mrf.mxu0 }
0x1da2   : > { %v7249_v1 = vadd.f32 %v7242_v9, %v11880_v38  ;;  %v7244_v6 = vadd.f32 %v7243_v34, %v7201_v19  ;;  %v7203_v40 = vadd.f32 %v7202_v35, %v6839_v14 }
0x1da4   : > { %v8668_v7 = vpack.c.bf16 %v7249_v1, %v7248_v36  ;;  %v7246_v17 = vadd.f32 %v7245_v42, %v7203_v40  ;;  %v7250_v21 = vadd.f32 %v7244_v6, %v11885_v45 }
0x1da6   : > { %7264 = vst [vmem:[%s541_s23] sm:$0xff] %v8668_v7  ;;  %v7251_v43 = vadd.f32 %v7246_v17, %v11888_v46 }
0x1da8   : > { %v8669_v37 = vpack.c.bf16 %v7251_v43, %v7250_v21 }
0x1daa   : > { %7265 = vst [vmem:[%s541_s23 + $0x8] sm:$0xff] %v8669_v37 }
0x1dab   : > { %10085 = shalt.err (!%p10082_p3)
}
0x1dac   : > { %s10086_s22 = scalar_lea.hbm %s12333_s26, 256  ;;  %s10090_s0 = scalar_lea.hbm %s12392_s17, 512 }
0x1dad   : > { %p10087_p4 = scmp.ne.s32.totalorder %s12333_s26, %s10086_s22  ;;  %p10091_p9 = scmp.lt.s32.totalorder %s12333_s26, %s12392_s17 }
0x1dae   : > { %p10092_p10 = scmp.lt.s32.totalorder %s10090_s0, %s10086_s22 }
0x1daf   : > { %p10088_p7 = pnand %p10087_p4, %p10270_p5 }
0x1db0   : > { %p10093_p11 = por %p10092_p10, %p10091_p9 }
0x1db1   : > { %p10089_p8 = pneg %p10088_p7 }
0x1db3   : > { %p10094_p12 = pnand %p10093_p11, %p10089_p8 }
0x1db5   : > { %10097 = shalt.err (!%p10094_p12)
}
0x1db6   : > { %s10140_s28 = smov 128   ;;  %s10141_s21 = smov 8  }
0x1db7   : > { %9327 = dma.vmem_to_hbm [thread:$0]  (%p10270_p5), %s12328_s30, 256, %s12333_s26, %s12335_s2, %s10140_s28, %s10140_s28, %s10141_s21  }
0x1db8 PF: > { %p9333_p13 = scmp.ge.s32.totalorder %s10132_s27, 2  ;;  %s7295_s23 = sand.u32 1, %s10120_s24  }
0x1db9   : > { %s7296_s22 = scalar_lea.sflag [#allocation4], %s7295_s23 }
0x1dba   : > { %p9330_p0 = pnand %p9333_p13, %p10274_p6 }
0x1dbc   : > { %p9331_p1 = pneg %p9330_p0 }
0x1dbe   : > { %10115 = dma.done.wait (%p9331_p1), %s7296_s22, 256  }
0x1dbf   : > { %10117 = vsyncadd (%p9331_p1), %s7296_s22, 4294967040  ;;  %s12413_s27 = sld [smem:[#allocation7_spill]]  ;;  %s12416_s24 = smov %s10124_s25 }
0x1dc0   : > { %s12414_s18 = sld [smem:[#allocation6_spill]] }
0x1dc1   : > { %s12415_s26 = sld [smem:[#allocation8_spill]] }
0x1dc5   : > { %p27_p2 = scmp.ge.s32.totalorder %s12413_s27, 4  }
0x1dc6   : > { %s12417_s25 = smov %s12414_s18 }
0x1dc7   :  { %29 = sbr.rel (!%p27_p2) target bundleno = 7 (0x7), region = 165 }
0x1dcc   :  { %7301 = vsyncpa [#allocation4], 1 }
0x1dcd   :  { %7303 = vsyncpa [#allocation4 + $0x1], 1 }

</bundles_post_ra>
